<compile_context>
chip_gen: v7x
topology: tpu7x:2x2x1
jax: 0.10.0
libtpu: 0.0.40
codegen_flags: <defaults>
</compile_context>

<pallas_src>
import jax
import jax.numpy as jnp
import numpy as np
from jax.experimental import pallas as pl
from jax.experimental.pallas import tpu as pltpu

# Padded (lane-aligned) sizes.
HP = 128       # padded hidden size: every gate slice starts on a 128-lane tile
VP = 128       # padded vocab size (one-hot contraction dim)
EP = 128       # padded embedding dim
F1P = 512      # fc1 out 500 -> 512
F2P = 384      # fc2 out 300 -> 384
LANES = 128    # lane-dense output block width


# -------------------- Fused forward kernel --------------------
def fused_rnn_kernel(ids_ref, embed_ref, wx_ref, b_ref, wh_ref,
                     w1_ref, b1_ref, w2_ref, b2_ref, w3_ref, b3_ref,
                     out_ref):
    f32 = jnp.float32
    B = out_ref.shape[0]
    TB = ids_ref.shape[0]
    T = TB // B
    vp = embed_ref.shape[0]

    # ---- embedding gather as one-hot @ table (MXU; no dynamic slicing) ----
    ids = ids_ref[...]                                                     # (T*B, 1) int32, row = t*B + b
    onehot = (ids == jax.lax.broadcasted_iota(jnp.int32, (TB, vp), 1)).astype(f32)
    e = jnp.dot(onehot, embed_ref[...], preferred_element_type=f32)        # (T*B, EP)

    # ---- hoist non-recurrent x@Wx + b for all timesteps, BOTH directions ----
    gx = jnp.dot(e, wx_ref[...], preferred_element_type=f32) + b_ref[...]  # (T*B, 8*HP)

    # ---- fused bidirectional recurrence (one block-diag matmul per step) ----
    wh = wh_ref[...]                                                       # (2*HP, 8*HP), block-diagonal
    hcat = jnp.zeros((B, 2 * HP), f32)                                     # [h_fwd | h_bwd]
    c_f = jnp.zeros((B, HP), f32)
    c_b = jnp.zeros((B, HP), f32)
    hsum = jnp.zeros((B, 2 * HP), f32)

    def gates(g, c):
        i = jax.nn.sigmoid(g[:, 0:HP])            # gate slices are 128-lane aligned
        f = jax.nn.sigmoid(g[:, HP:2 * HP])
        gg = jnp.tanh(g[:, 2 * HP:3 * HP])
        o = jax.nn.sigmoid(g[:, 3 * HP:4 * HP])
        c2 = f * c + i * gg
        h2 = o * jnp.tanh(c2)
        return h2, c2

    for s in range(T):                            # T is small: static unroll
        tf = s                                    # forward direction timestep
        tb = T - 1 - s                            # backward direction timestep
        ghh = jnp.dot(hcat, wh, preferred_element_type=f32)                # (B, 8*HP)
        g_f = gx[tf * B:(tf + 1) * B, 0:4 * HP] + ghh[:, 0:4 * HP]
        g_b = gx[tb * B:(tb + 1) * B, 4 * HP:8 * HP] + ghh[:, 4 * HP:8 * HP]
        h_f, c_f = gates(g_f, c_f)
        h_b, c_b = gates(g_b, c_b)
        hcat = jnp.concatenate([h_f, h_b], axis=-1)
        hsum = hsum + hcat

    # mean over time of the bidirectional hidden states; exact because fc1 is
    # affine: fc1(r).mean(dim=1) == fc1(r.mean(dim=1)).
    r_mean = hsum * (1.0 / T)                                              # (B, 2*HP)

    h1 = jnp.dot(r_mean, w1_ref[...], preferred_element_type=f32) + b1_ref[...]   # (B, F1P)
    h2 = jnp.dot(h1, w2_ref[...], preferred_element_type=f32) + b2_ref[...]       # (B, F2P)
    # Final out-dim-1 projection: VPU multiply + lane reduce (no N=1 MXU matmul).
    y = jnp.sum(h2 * w3_ref[...], axis=-1, keepdims=True)                         # (B, 1)
    out_ref[...] = (jnp.broadcast_to(y, out_ref.shape) + b3_ref[...]).astype(out_ref.dtype)


def rnn_forward(pp, x_ids):
    """pp: padded params (see pad_params). x_ids: (B, T) int32. Returns (B,)."""
    B, T = x_ids.shape
    # time-major flattened ids: row t*B + b == x_ids[b, t]
    ids_tm = jnp.reshape(jnp.transpose(x_ids, (1, 0)), (T * B, 1)).astype(jnp.int32)
    vmem = pl.BlockSpec(memory_space=pltpu.MemorySpace.VMEM)
    out = pl.pallas_call(
        fused_rnn_kernel,
        out_shape=jax.ShapeDtypeStruct((B, LANES), jnp.float32),
        in_specs=[vmem] * 11,
        out_specs=vmem,
    )(ids_tm, pp["embed"], pp["wx"], pp["b"], pp["wh"],
      pp["w1"], pp["b1"], pp["w2"], pp["b2"], pp["w3"], pp["b3"])
    return out[:, 0]                      # == .squeeze()


# -------------------- one-time lane-aligned zero-padding of params --------------------
def pad_params(p, H, E, vocab):
    """Pad original params to lane-aligned shapes. Exact: padded rows/cols are zero,
    padded hidden lanes stay identically zero through the recurrence."""
    def pad_gates(w, rows_out):
        # w: (rows_in, 4*H) -> (rows_out, 4*HP); each gate block starts at a 128-lane tile
        rows_in = w.shape[0]
        out = jnp.zeros((rows_out, 4 * HP), jnp.float32)
        for g in range(4):
            out = out.at[:rows_in, g * HP:g * HP + H].set(w[:, g * H:(g + 1) * H])
        return out

    pp = {"embed": jnp.zeros((VP, EP), jnp.float32).at[:vocab, :E].set(p["embed"])}

    # Both directions' input weights side by side: (EP, 8*HP); bias likewise.
    pp["wx"] = jnp.concatenate([pad_gates(p["wx_f"], EP), pad_gates(p["wx_b"], EP)], axis=1)
    pp["b"] = jnp.concatenate([pad_gates(p["b_f"], 1), pad_gates(p["b_b"], 1)], axis=1)

    # Block-diagonal recurrent weights: [h_fwd | h_bwd] @ wh -> [gates_fwd | gates_bwd].
    wh = jnp.zeros((2 * HP, 8 * HP), jnp.float32)
    wh = wh.at[:HP, :4 * HP].set(pad_gates(p["wh_f"], HP))
    wh = wh.at[HP:, 4 * HP:].set(pad_gates(p["wh_b"], HP))
    pp["wh"] = wh

    n1 = p["w1"].shape[1]     # 500
    n2 = p["w2"].shape[1]     # 300
    # fc1: rows [0:H) take the forward-direction hidden, rows [HP:HP+H) the backward one.
    w1 = jnp.zeros((2 * HP, F1P), jnp.float32)
    w1 = w1.at[:H, :n1].set(p["w1"][:H])
    w1 = w1.at[HP:HP + H, :n1].set(p["w1"][H:2 * H])
    pp["w1"] = w1
    pp["b1"] = jnp.zeros((1, F1P), jnp.float32).at[:, :n1].set(p["b1"])
    pp["w2"] = jnp.zeros((F1P, F2P), jnp.float32).at[:n1, :n2].set(p["w2"])
    pp["b2"] = jnp.zeros((1, F2P), jnp.float32).at[:, :n2].set(p["b2"])
    pp["w3"] = jnp.zeros((1, F2P), jnp.float32).at[0, :n2].set(p["w3"][:, 0])
    pp["b3"] = jnp.full((1, LANES), p["b3"][0, 0], jnp.float32)   # scalar bias, lane-dense
    return pp


# -------------------- Pure-JAX reference (correctness check) --------------------
def rnn_forward_ref(params, x_ids):
    hi = jax.lax.Precision.HIGHEST
    e = params["embed"][x_ids]
    e_tbe = jnp.transpose(e, (1, 0, 2))
    H = params["wh_f"].shape[0]

    def run_dir(seq, wx, wh, b):
        def step(carry, x_t):
            h, c = carry
            g = jnp.dot(x_t, wx, precision=hi) + jnp.dot(h, wh, precision=hi) + b
            i = jax.nn.sigmoid(g[:, :H])
            f = jax.nn.sigmoid(g[:, H:2 * H])
            gg = jnp.tanh(g[:, 2 * H:3 * H])
            o = jax.nn.sigmoid(g[:, 3 * H:])
            c2 = f * c + i * gg
            h2 = o * jnp.tanh(c2)
            return (h2, c2), h2
        B = seq.shape[1]
        init = (jnp.zeros((B, H), jnp.float32), jnp.zeros((B, H), jnp.float32))
        _, hs = jax.lax.scan(step, init, seq)
        return hs

    r_fwd = run_dir(e_tbe, params["wx_f"], params["wh_f"], params["b_f"])
    r_bwd = run_dir(e_tbe[::-1], params["wx_b"], params["wh_b"], params["b_b"])[::-1]
    r = jnp.transpose(jnp.concatenate([r_fwd, r_bwd], -1), (1, 0, 2))  # (B, T, 2H)
    h1 = (jnp.dot(r, params["w1"], precision=hi) + params["b1"]).mean(axis=1)
    h2 = jnp.dot(h1, params["w2"], precision=hi) + params["b2"]
    y = jnp.dot(h2, params["w3"], precision=hi) + params["b3"]
    return jnp.squeeze(y, axis=-1)


if __name__ == "__main__":
    # Small config consistent with the module: vocab_size=50, embedding_dim=16,
    # hidden_size=32, num_layers=1 (dropout inactive), bidirectional=True.
    B, T = 2, 8
    VOCAB, E, H = 50, 16, 32

    key = jax.random.PRNGKey(0)
    keys = jax.random.split(key, 16)
    kH = 1.0 / np.sqrt(H)

    def u(k, shape, bound):
        return jax.random.uniform(k, shape, jnp.float32, -bound, bound)

    params = {
        "embed": jax.random.normal(keys[0], (VOCAB, E), jnp.float32),
        # LSTM weights stored pre-transposed: (in, 4H) and (H, 4H); bias = b_ih + b_hh.
        "wx_f": u(keys[1], (E, 4 * H), kH), "wh_f": u(keys[2], (H, 4 * H), kH),
        "b_f":  u(keys[3], (1, 4 * H), kH) + u(keys[4], (1, 4 * H), kH),
        "wx_b": u(keys[5], (E, 4 * H), kH), "wh_b": u(keys[6], (H, 4 * H), kH),
        "b_b":  u(keys[7], (1, 4 * H), kH) + u(keys[8], (1, 4 * H), kH),
        # Linear layers stored pre-transposed: (in, out).
        "w1": u(keys[9], (2 * H, 500), 1 / np.sqrt(2 * H)),
        "b1": u(keys[10], (1, 500), 1 / np.sqrt(2 * H)),
        "w2": u(keys[11], (500, 300), 1 / np.sqrt(500)),
        "b2": u(keys[12], (1, 300), 1 / np.sqrt(500)),
        "w3": u(keys[13], (300, 1), 1 / np.sqrt(300)),
        "b3": u(keys[14], (1, 1), 1 / np.sqrt(300)),
    }
    x_ids = jax.random.randint(keys[15], (B, T), 0, VOCAB, dtype=jnp.int32)

    padded = jax.tree.map(jax.block_until_ready, pad_params(params, H, E, VOCAB))  # one-time pad

    fwd = jax.jit(rnn_forward)
    out = jax.block_until_ready(fwd(padded, x_ids))
    ref = jax.block_until_ready(rnn_forward_ref(params, x_ids))
    assert out.shape == (B,), out.shape
    np.testing.assert_allclose(np.asarray(out), np.asarray(ref), rtol=1e-2, atol=1e-2)
    print("KERNEL_OK")
</pallas_src>

<mosaic_0001>
module attributes {stable_mosaic.version = 11 : i64} {
  func.func @fused_rnn_kernel(%arg0: memref<16x1xi32, #tpu.memory_space<vmem>>, %arg1: memref<128x128xf32, #tpu.memory_space<vmem>>, %arg2: memref<128x1024xf32, #tpu.memory_space<vmem>>, %arg3: memref<1x1024xf32, #tpu.memory_space<vmem>>, %arg4: memref<256x1024xf32, #tpu.memory_space<vmem>>, %arg5: memref<256x512xf32, #tpu.memory_space<vmem>>, %arg6: memref<1x512xf32, #tpu.memory_space<vmem>>, %arg7: memref<512x384xf32, #tpu.memory_space<vmem>>, %arg8: memref<1x384xf32, #tpu.memory_space<vmem>>, %arg9: memref<1x384xf32, #tpu.memory_space<vmem>>, %arg10: memref<1x128xf32, #tpu.memory_space<vmem>>, %arg11: memref<2x128xf32, #tpu.memory_space<vmem>>) attributes {dimension_semantics = [], scalar_prefetch = 0 : i64, scratch_operands = 0 : i64, tpu.core_type = #tpu.core_type<tc>} {
    %c0 = arith.constant 0 : index
    %c0_0 = arith.constant 0 : index
    %0 = vector.load %arg0[%c0, %c0_0] : memref<16x1xi32, #tpu.memory_space<vmem>>, vector<16x1xi32>
    %1 = tpu.iota {dimensions = array<i32: 1>} : vector<16x128xi32>
    %2 = vector.broadcast %0 : vector<16x1xi32> to vector<16x128xi32>
    %3 = arith.cmpi eq, %2, %1 : vector<16x128xi32>
    %4 = arith.extui %3 : vector<16x128xi1> to vector<16x128xi32>
    %5 = arith.sitofp %4 : vector<16x128xi32> to vector<16x128xf32>
    %c0_1 = arith.constant 0 : index
    %c0_2 = arith.constant 0 : index
    %6 = vector.load %arg1[%c0_1, %c0_2] : memref<128x128xf32, #tpu.memory_space<vmem>>, vector<128x128xf32>
    %cst = arith.constant dense<0.000000e+00> : vector<16x128xf32>
    %7 = tpu.matmul %5, %6, %cst {dimension_numbers = #tpu.dot_dimension_numbers<[1], [0], [0], [1], [0, 0, 1, 1], [], []>} : vector<16x128xf32>, vector<128x128xf32>, vector<16x128xf32> -> vector<16x128xf32>
    %c0_3 = arith.constant 0 : index
    %c0_4 = arith.constant 0 : index
    %8 = vector.load %arg2[%c0_3, %c0_4] : memref<128x1024xf32, #tpu.memory_space<vmem>>, vector<128x1024xf32>
    %cst_5 = arith.constant dense<0.000000e+00> : vector<16x1024xf32>
    %9 = tpu.matmul %7, %8, %cst_5 {dimension_numbers = #tpu.dot_dimension_numbers<[1], [0], [0], [1], [0, 0, 1, 1], [], []>} : vector<16x128xf32>, vector<128x1024xf32>, vector<16x1024xf32> -> vector<16x1024xf32>
    %c0_6 = arith.constant 0 : index
    %c0_7 = arith.constant 0 : index
    %10 = vector.load %arg3[%c0_6, %c0_7] : memref<1x1024xf32, #tpu.memory_space<vmem>>, vector<1x1024xf32>
    %11 = vector.broadcast %10 : vector<1x1024xf32> to vector<16x1024xf32>
    %12 = arith.addf %9, %11 : vector<16x1024xf32>
    %c0_8 = arith.constant 0 : index
    %c0_9 = arith.constant 0 : index
    %13 = vector.load %arg4[%c0_8, %c0_9] : memref<256x1024xf32, #tpu.memory_space<vmem>>, vector<256x1024xf32>
    %cst_10 = arith.constant 0.000000e+00 : f32
    %14 = vector.broadcast %cst_10 : f32 to vector<2x256xf32>
    %cst_11 = arith.constant 0.000000e+00 : f32
    %15 = vector.broadcast %cst_11 : f32 to vector<2x128xf32>
    %cst_12 = arith.constant 0.000000e+00 : f32
    %16 = vector.broadcast %cst_12 : f32 to vector<2x128xf32>
    %cst_13 = arith.constant 0.000000e+00 : f32
    %17 = vector.broadcast %cst_13 : f32 to vector<2x256xf32>
    %cst_14 = arith.constant dense<0.000000e+00> : vector<2x1024xf32>
    %18 = tpu.matmul %14, %13, %cst_14 {dimension_numbers = #tpu.dot_dimension_numbers<[1], [0], [0], [1], [0, 0, 1, 1], [], []>} : vector<2x256xf32>, vector<256x1024xf32>, vector<2x1024xf32> -> vector<2x1024xf32>
    %19 = vector.extract_strided_slice %12 {offsets = [0, 0], sizes = [2, 512], strides = [1, 1]} : vector<16x1024xf32> to vector<2x512xf32>
    %20 = vector.extract_strided_slice %18 {offsets = [0, 0], sizes = [2, 512], strides = [1, 1]} : vector<2x1024xf32> to vector<2x512xf32>
    %21 = arith.addf %19, %20 : vector<2x512xf32>
    %22 = vector.extract_strided_slice %12 {offsets = [14, 512], sizes = [2, 512], strides = [1, 1]} : vector<16x1024xf32> to vector<2x512xf32>
    %23 = vector.extract_strided_slice %18 {offsets = [0, 512], sizes = [2, 512], strides = [1, 1]} : vector<2x1024xf32> to vector<2x512xf32>
    %24 = arith.addf %22, %23 : vector<2x512xf32>
    %25 = vector.extract_strided_slice %21 {offsets = [0, 0], sizes = [2, 128], strides = [1, 1]} : vector<2x512xf32> to vector<2x128xf32>
    %26 = arith.negf %25 : vector<2x128xf32>
    %27 = math.exp %26 : vector<2x128xf32>
    %cst_15 = arith.constant 1.000000e+00 : f32
    %28 = vector.broadcast %cst_15 : f32 to vector<2x128xf32>
    %29 = arith.addf %28, %27 : vector<2x128xf32>
    %30 = arith.divf %28, %29 : vector<2x128xf32>
    %31 = vector.extract_strided_slice %21 {offsets = [0, 128], sizes = [2, 128], strides = [1, 1]} : vector<2x512xf32> to vector<2x128xf32>
    %32 = arith.negf %31 : vector<2x128xf32>
    %33 = math.exp %32 : vector<2x128xf32>
    %cst_16 = arith.constant 1.000000e+00 : f32
    %34 = vector.broadcast %cst_16 : f32 to vector<2x128xf32>
    %35 = arith.addf %34, %33 : vector<2x128xf32>
    %36 = arith.divf %34, %35 : vector<2x128xf32>
    %37 = vector.extract_strided_slice %21 {offsets = [0, 256], sizes = [2, 128], strides = [1, 1]} : vector<2x512xf32> to vector<2x128xf32>
    %38 = math.tanh %37 : vector<2x128xf32>
    %39 = vector.extract_strided_slice %21 {offsets = [0, 384], sizes = [2, 128], strides = [1, 1]} : vector<2x512xf32> to vector<2x128xf32>
    %40 = arith.negf %39 : vector<2x128xf32>
    %41 = math.exp %40 : vector<2x128xf32>
    %cst_17 = arith.constant 1.000000e+00 : f32
    %42 = vector.broadcast %cst_17 : f32 to vector<2x128xf32>
    %43 = arith.addf %42, %41 : vector<2x128xf32>
    %44 = arith.divf %42, %43 : vector<2x128xf32>
    %45 = arith.mulf %36, %15 : vector<2x128xf32>
    %46 = arith.mulf %30, %38 : vector<2x128xf32>
    %47 = arith.addf %45, %46 : vector<2x128xf32>
    %48 = math.tanh %47 : vector<2x128xf32>
    %49 = arith.mulf %44, %48 : vector<2x128xf32>
    %50 = vector.extract_strided_slice %24 {offsets = [0, 0], sizes = [2, 128], strides = [1, 1]} : vector<2x512xf32> to vector<2x128xf32>
    %51 = arith.negf %50 : vector<2x128xf32>
    %52 = math.exp %51 : vector<2x128xf32>
    %cst_18 = arith.constant 1.000000e+00 : f32
    %53 = vector.broadcast %cst_18 : f32 to vector<2x128xf32>
    %54 = arith.addf %53, %52 : vector<2x128xf32>
    %55 = arith.divf %53, %54 : vector<2x128xf32>
    %56 = vector.extract_strided_slice %24 {offsets = [0, 128], sizes = [2, 128], strides = [1, 1]} : vector<2x512xf32> to vector<2x128xf32>
    %57 = arith.negf %56 : vector<2x128xf32>
    %58 = math.exp %57 : vector<2x128xf32>
    %cst_19 = arith.constant 1.000000e+00 : f32
    %59 = vector.broadcast %cst_19 : f32 to vector<2x128xf32>
    %60 = arith.addf %59, %58 : vector<2x128xf32>
    %61 = arith.divf %59, %60 : vector<2x128xf32>
    %62 = vector.extract_strided_slice %24 {offsets = [0, 256], sizes = [2, 128], strides = [1, 1]} : vector<2x512xf32> to vector<2x128xf32>
    %63 = math.tanh %62 : vector<2x128xf32>
    %64 = vector.extract_strided_slice %24 {offsets = [0, 384], sizes = [2, 128], strides = [1, 1]} : vector<2x512xf32> to vector<2x128xf32>
    %65 = arith.negf %64 : vector<2x128xf32>
    %66 = math.exp %65 : vector<2x128xf32>
    %cst_20 = arith.constant 1.000000e+00 : f32
    %67 = vector.broadcast %cst_20 : f32 to vector<2x128xf32>
    %68 = arith.addf %67, %66 : vector<2x128xf32>
    %69 = arith.divf %67, %68 : vector<2x128xf32>
    %70 = arith.mulf %61, %16 : vector<2x128xf32>
    %71 = arith.mulf %55, %63 : vector<2x128xf32>
    %72 = arith.addf %70, %71 : vector<2x128xf32>
    %73 = math.tanh %72 : vector<2x128xf32>
    %74 = arith.mulf %69, %73 : vector<2x128xf32>
    %75 = tpu.concatenate %49, %74 in 1 : vector<2x128xf32>, vector<2x128xf32> -> vector<2x256xf32>
    %76 = arith.addf %17, %75 : vector<2x256xf32>
    %cst_21 = arith.constant dense<0.000000e+00> : vector<2x1024xf32>
    %77 = tpu.matmul %75, %13, %cst_21 {dimension_numbers = #tpu.dot_dimension_numbers<[1], [0], [0], [1], [0, 0, 1, 1], [], []>} : vector<2x256xf32>, vector<256x1024xf32>, vector<2x1024xf32> -> vector<2x1024xf32>
    %78 = vector.extract_strided_slice %12 {offsets = [2, 0], sizes = [2, 512], strides = [1, 1]} : vector<16x1024xf32> to vector<2x512xf32>
    %79 = vector.extract_strided_slice %77 {offsets = [0, 0], sizes = [2, 512], strides = [1, 1]} : vector<2x1024xf32> to vector<2x512xf32>
    %80 = arith.addf %78, %79 : vector<2x512xf32>
    %81 = vector.extract_strided_slice %12 {offsets = [12, 512], sizes = [2, 512], strides = [1, 1]} : vector<16x1024xf32> to vector<2x512xf32>
    %82 = vector.extract_strided_slice %77 {offsets = [0, 512], sizes = [2, 512], strides = [1, 1]} : vector<2x1024xf32> to vector<2x512xf32>
    %83 = arith.addf %81, %82 : vector<2x512xf32>
    %84 = vector.extract_strided_slice %80 {offsets = [0, 0], sizes = [2, 128], strides = [1, 1]} : vector<2x512xf32> to vector<2x128xf32>
    %85 = arith.negf %84 : vector<2x128xf32>
    %86 = math.exp %85 : vector<2x128xf32>
    %cst_22 = arith.constant 1.000000e+00 : f32
    %87 = vector.broadcast %cst_22 : f32 to vector<2x128xf32>
    %88 = arith.addf %87, %86 : vector<2x128xf32>
    %89 = arith.divf %87, %88 : vector<2x128xf32>
    %90 = vector.extract_strided_slice %80 {offsets = [0, 128], sizes = [2, 128], strides = [1, 1]} : vector<2x512xf32> to vector<2x128xf32>
    %91 = arith.negf %90 : vector<2x128xf32>
    %92 = math.exp %91 : vector<2x128xf32>
    %cst_23 = arith.constant 1.000000e+00 : f32
    %93 = vector.broadcast %cst_23 : f32 to vector<2x128xf32>
    %94 = arith.addf %93, %92 : vector<2x128xf32>
    %95 = arith.divf %93, %94 : vector<2x128xf32>
    %96 = vector.extract_strided_slice %80 {offsets = [0, 256], sizes = [2, 128], strides = [1, 1]} : vector<2x512xf32> to vector<2x128xf32>
    %97 = math.tanh %96 : vector<2x128xf32>
    %98 = vector.extract_strided_slice %80 {offsets = [0, 384], sizes = [2, 128], strides = [1, 1]} : vector<2x512xf32> to vector<2x128xf32>
    %99 = arith.negf %98 : vector<2x128xf32>
    %100 = math.exp %99 : vector<2x128xf32>
    %cst_24 = arith.constant 1.000000e+00 : f32
    %101 = vector.broadcast %cst_24 : f32 to vector<2x128xf32>
    %102 = arith.addf %101, %100 : vector<2x128xf32>
    %103 = arith.divf %101, %102 : vector<2x128xf32>
    %104 = arith.mulf %95, %47 : vector<2x128xf32>
    %105 = arith.mulf %89, %97 : vector<2x128xf32>
    %106 = arith.addf %104, %105 : vector<2x128xf32>
    %107 = math.tanh %106 : vector<2x128xf32>
    %108 = arith.mulf %103, %107 : vector<2x128xf32>
    %109 = vector.extract_strided_slice %83 {offsets = [0, 0], sizes = [2, 128], strides = [1, 1]} : vector<2x512xf32> to vector<2x128xf32>
    %110 = arith.negf %109 : vector<2x128xf32>
    %111 = math.exp %110 : vector<2x128xf32>
    %cst_25 = arith.constant 1.000000e+00 : f32
    %112 = vector.broadcast %cst_25 : f32 to vector<2x128xf32>
    %113 = arith.addf %112, %111 : vector<2x128xf32>
    %114 = arith.divf %112, %113 : vector<2x128xf32>
    %115 = vector.extract_strided_slice %83 {offsets = [0, 128], sizes = [2, 128], strides = [1, 1]} : vector<2x512xf32> to vector<2x128xf32>
    %116 = arith.negf %115 : vector<2x128xf32>
    %117 = math.exp %116 : vector<2x128xf32>
    %cst_26 = arith.constant 1.000000e+00 : f32
    %118 = vector.broadcast %cst_26 : f32 to vector<2x128xf32>
    %119 = arith.addf %118, %117 : vector<2x128xf32>
    %120 = arith.divf %118, %119 : vector<2x128xf32>
    %121 = vector.extract_strided_slice %83 {offsets = [0, 256], sizes = [2, 128], strides = [1, 1]} : vector<2x512xf32> to vector<2x128xf32>
    %122 = math.tanh %121 : vector<2x128xf32>
    %123 = vector.extract_strided_slice %83 {offsets = [0, 384], sizes = [2, 128], strides = [1, 1]} : vector<2x512xf32> to vector<2x128xf32>
    %124 = arith.negf %123 : vector<2x128xf32>
    %125 = math.exp %124 : vector<2x128xf32>
    %cst_27 = arith.constant 1.000000e+00 : f32
    %126 = vector.broadcast %cst_27 : f32 to vector<2x128xf32>
    %127 = arith.addf %126, %125 : vector<2x128xf32>
    %128 = arith.divf %126, %127 : vector<2x128xf32>
    %129 = arith.mulf %120, %72 : vector<2x128xf32>
    %130 = arith.mulf %114, %122 : vector<2x128xf32>
    %131 = arith.addf %129, %130 : vector<2x128xf32>
    %132 = math.tanh %131 : vector<2x128xf32>
    %133 = arith.mulf %128, %132 : vector<2x128xf32>
    %134 = tpu.concatenate %108, %133 in 1 : vector<2x128xf32>, vector<2x128xf32> -> vector<2x256xf32>
    %135 = arith.addf %76, %134 : vector<2x256xf32>
    %cst_28 = arith.constant dense<0.000000e+00> : vector<2x1024xf32>
    %136 = tpu.matmul %134, %13, %cst_28 {dimension_numbers = #tpu.dot_dimension_numbers<[1], [0], [0], [1], [0, 0, 1, 1], [], []>} : vector<2x256xf32>, vector<256x1024xf32>, vector<2x1024xf32> -> vector<2x1024xf32>
    %137 = vector.extract_strided_slice %12 {offsets = [4, 0], sizes = [2, 512], strides = [1, 1]} : vector<16x1024xf32> to vector<2x512xf32>
    %138 = vector.extract_strided_slice %136 {offsets = [0, 0], sizes = [2, 512], strides = [1, 1]} : vector<2x1024xf32> to vector<2x512xf32>
    %139 = arith.addf %137, %138 : vector<2x512xf32>
    %140 = vector.extract_strided_slice %12 {offsets = [10, 512], sizes = [2, 512], strides = [1, 1]} : vector<16x1024xf32> to vector<2x512xf32>
    %141 = vector.extract_strided_slice %136 {offsets = [0, 512], sizes = [2, 512], strides = [1, 1]} : vector<2x1024xf32> to vector<2x512xf32>
    %142 = arith.addf %140, %141 : vector<2x512xf32>
    %143 = vector.extract_strided_slice %139 {offsets = [0, 0], sizes = [2, 128], strides = [1, 1]} : vector<2x512xf32> to vector<2x128xf32>
    %144 = arith.negf %143 : vector<2x128xf32>
    %145 = math.exp %144 : vector<2x128xf32>
    %cst_29 = arith.constant 1.000000e+00 : f32
    %146 = vector.broadcast %cst_29 : f32 to vector<2x128xf32>
    %147 = arith.addf %146, %145 : vector<2x128xf32>
    %148 = arith.divf %146, %147 : vector<2x128xf32>
    %149 = vector.extract_strided_slice %139 {offsets = [0, 128], sizes = [2, 128], strides = [1, 1]} : vector<2x512xf32> to vector<2x128xf32>
    %150 = arith.negf %149 : vector<2x128xf32>
    %151 = math.exp %150 : vector<2x128xf32>
    %cst_30 = arith.constant 1.000000e+00 : f32
    %152 = vector.broadcast %cst_30 : f32 to vector<2x128xf32>
    %153 = arith.addf %152, %151 : vector<2x128xf32>
    %154 = arith.divf %152, %153 : vector<2x128xf32>
    %155 = vector.extract_strided_slice %139 {offsets = [0, 256], sizes = [2, 128], strides = [1, 1]} : vector<2x512xf32> to vector<2x128xf32>
    %156 = math.tanh %155 : vector<2x128xf32>
    %157 = vector.extract_strided_slice %139 {offsets = [0, 384], sizes = [2, 128], strides = [1, 1]} : vector<2x512xf32> to vector<2x128xf32>
    %158 = arith.negf %157 : vector<2x128xf32>
    %159 = math.exp %158 : vector<2x128xf32>
    %cst_31 = arith.constant 1.000000e+00 : f32
    %160 = vector.broadcast %cst_31 : f32 to vector<2x128xf32>
    %161 = arith.addf %160, %159 : vector<2x128xf32>
    %162 = arith.divf %160, %161 : vector<2x128xf32>
    %163 = arith.mulf %154, %106 : vector<2x128xf32>
    %164 = arith.mulf %148, %156 : vector<2x128xf32>
    %165 = arith.addf %163, %164 : vector<2x128xf32>
    %166 = math.tanh %165 : vector<2x128xf32>
    %167 = arith.mulf %162, %166 : vector<2x128xf32>
    %168 = vector.extract_strided_slice %142 {offsets = [0, 0], sizes = [2, 128], strides = [1, 1]} : vector<2x512xf32> to vector<2x128xf32>
    %169 = arith.negf %168 : vector<2x128xf32>
    %170 = math.exp %169 : vector<2x128xf32>
    %cst_32 = arith.constant 1.000000e+00 : f32
    %171 = vector.broadcast %cst_32 : f32 to vector<2x128xf32>
    %172 = arith.addf %171, %170 : vector<2x128xf32>
    %173 = arith.divf %171, %172 : vector<2x128xf32>
    %174 = vector.extract_strided_slice %142 {offsets = [0, 128], sizes = [2, 128], strides = [1, 1]} : vector<2x512xf32> to vector<2x128xf32>
    %175 = arith.negf %174 : vector<2x128xf32>
    %176 = math.exp %175 : vector<2x128xf32>
    %cst_33 = arith.constant 1.000000e+00 : f32
    %177 = vector.broadcast %cst_33 : f32 to vector<2x128xf32>
    %178 = arith.addf %177, %176 : vector<2x128xf32>
    %179 = arith.divf %177, %178 : vector<2x128xf32>
    %180 = vector.extract_strided_slice %142 {offsets = [0, 256], sizes = [2, 128], strides = [1, 1]} : vector<2x512xf32> to vector<2x128xf32>
    %181 = math.tanh %180 : vector<2x128xf32>
    %182 = vector.extract_strided_slice %142 {offsets = [0, 384], sizes = [2, 128], strides = [1, 1]} : vector<2x512xf32> to vector<2x128xf32>
    %183 = arith.negf %182 : vector<2x128xf32>
    %184 = math.exp %183 : vector<2x128xf32>
    %cst_34 = arith.constant 1.000000e+00 : f32
    %185 = vector.broadcast %cst_34 : f32 to vector<2x128xf32>
    %186 = arith.addf %185, %184 : vector<2x128xf32>
    %187 = arith.divf %185, %186 : vector<2x128xf32>
    %188 = arith.mulf %179, %131 : vector<2x128xf32>
    %189 = arith.mulf %173, %181 : vector<2x128xf32>
    %190 = arith.addf %188, %189 : vector<2x128xf32>
    %191 = math.tanh %190 : vector<2x128xf32>
    %192 = arith.mulf %187, %191 : vector<2x128xf32>
    %193 = tpu.concatenate %167, %192 in 1 : vector<2x128xf32>, vector<2x128xf32> -> vector<2x256xf32>
    %194 = arith.addf %135, %193 : vector<2x256xf32>
    %cst_35 = arith.constant dense<0.000000e+00> : vector<2x1024xf32>
    %195 = tpu.matmul %193, %13, %cst_35 {dimension_numbers = #tpu.dot_dimension_numbers<[1], [0], [0], [1], [0, 0, 1, 1], [], []>} : vector<2x256xf32>, vector<256x1024xf32>, vector<2x1024xf32> -> vector<2x1024xf32>
    %196 = vector.extract_strided_slice %12 {offsets = [6, 0], sizes = [2, 512], strides = [1, 1]} : vector<16x1024xf32> to vector<2x512xf32>
    %197 = vector.extract_strided_slice %195 {offsets = [0, 0], sizes = [2, 512], strides = [1, 1]} : vector<2x1024xf32> to vector<2x512xf32>
    %198 = arith.addf %196, %197 : vector<2x512xf32>
    %199 = vector.extract_strided_slice %12 {offsets = [8, 512], sizes = [2, 512], strides = [1, 1]} : vector<16x1024xf32> to vector<2x512xf32>
    %200 = vector.extract_strided_slice %195 {offsets = [0, 512], sizes = [2, 512], strides = [1, 1]} : vector<2x1024xf32> to vector<2x512xf32>
    %201 = arith.addf %199, %200 : vector<2x512xf32>
    %202 = vector.extract_strided_slice %198 {offsets = [0, 0], sizes = [2, 128], strides = [1, 1]} : vector<2x512xf32> to vector<2x128xf32>
    %203 = arith.negf %202 : vector<2x128xf32>
    %204 = math.exp %203 : vector<2x128xf32>
    %cst_36 = arith.constant 1.000000e+00 : f32
    %205 = vector.broadcast %cst_36 : f32 to vector<2x128xf32>
    %206 = arith.addf %205, %204 : vector<2x128xf32>
    %207 = arith.divf %205, %206 : vector<2x128xf32>
    %208 = vector.extract_strided_slice %198 {offsets = [0, 128], sizes = [2, 128], strides = [1, 1]} : vector<2x512xf32> to vector<2x128xf32>
    %209 = arith.negf %208 : vector<2x128xf32>
    %210 = math.exp %209 : vector<2x128xf32>
    %cst_37 = arith.constant 1.000000e+00 : f32
    %211 = vector.broadcast %cst_37 : f32 to vector<2x128xf32>
    %212 = arith.addf %211, %210 : vector<2x128xf32>
    %213 = arith.divf %211, %212 : vector<2x128xf32>
    %214 = vector.extract_strided_slice %198 {offsets = [0, 256], sizes = [2, 128], strides = [1, 1]} : vector<2x512xf32> to vector<2x128xf32>
    %215 = math.tanh %214 : vector<2x128xf32>
    %216 = vector.extract_strided_slice %198 {offsets = [0, 384], sizes = [2, 128], strides = [1, 1]} : vector<2x512xf32> to vector<2x128xf32>
    %217 = arith.negf %216 : vector<2x128xf32>
    %218 = math.exp %217 : vector<2x128xf32>
    %cst_38 = arith.constant 1.000000e+00 : f32
    %219 = vector.broadcast %cst_38 : f32 to vector<2x128xf32>
    %220 = arith.addf %219, %218 : vector<2x128xf32>
    %221 = arith.divf %219, %220 : vector<2x128xf32>
    %222 = arith.mulf %213, %165 : vector<2x128xf32>
    %223 = arith.mulf %207, %215 : vector<2x128xf32>
    %224 = arith.addf %222, %223 : vector<2x128xf32>
    %225 = math.tanh %224 : vector<2x128xf32>
    %226 = arith.mulf %221, %225 : vector<2x128xf32>
    %227 = vector.extract_strided_slice %201 {offsets = [0, 0], sizes = [2, 128], strides = [1, 1]} : vector<2x512xf32> to vector<2x128xf32>
    %228 = arith.negf %227 : vector<2x128xf32>
    %229 = math.exp %228 : vector<2x128xf32>
    %cst_39 = arith.constant 1.000000e+00 : f32
    %230 = vector.broadcast %cst_39 : f32 to vector<2x128xf32>
    %231 = arith.addf %230, %229 : vector<2x128xf32>
    %232 = arith.divf %230, %231 : vector<2x128xf32>
    %233 = vector.extract_strided_slice %201 {offsets = [0, 128], sizes = [2, 128], strides = [1, 1]} : vector<2x512xf32> to vector<2x128xf32>
    %234 = arith.negf %233 : vector<2x128xf32>
    %235 = math.exp %234 : vector<2x128xf32>
    %cst_40 = arith.constant 1.000000e+00 : f32
    %236 = vector.broadcast %cst_40 : f32 to vector<2x128xf32>
    %237 = arith.addf %236, %235 : vector<2x128xf32>
    %238 = arith.divf %236, %237 : vector<2x128xf32>
    %239 = vector.extract_strided_slice %201 {offsets = [0, 256], sizes = [2, 128], strides = [1, 1]} : vector<2x512xf32> to vector<2x128xf32>
    %240 = math.tanh %239 : vector<2x128xf32>
    %241 = vector.extract_strided_slice %201 {offsets = [0, 384], sizes = [2, 128], strides = [1, 1]} : vector<2x512xf32> to vector<2x128xf32>
    %242 = arith.negf %241 : vector<2x128xf32>
    %243 = math.exp %242 : vector<2x128xf32>
    %cst_41 = arith.constant 1.000000e+00 : f32
    %244 = vector.broadcast %cst_41 : f32 to vector<2x128xf32>
    %245 = arith.addf %244, %243 : vector<2x128xf32>
    %246 = arith.divf %244, %245 : vector<2x128xf32>
    %247 = arith.mulf %238, %190 : vector<2x128xf32>
    %248 = arith.mulf %232, %240 : vector<2x128xf32>
    %249 = arith.addf %247, %248 : vector<2x128xf32>
    %250 = math.tanh %249 : vector<2x128xf32>
    %251 = arith.mulf %246, %250 : vector<2x128xf32>
    %252 = tpu.concatenate %226, %251 in 1 : vector<2x128xf32>, vector<2x128xf32> -> vector<2x256xf32>
    %253 = arith.addf %194, %252 : vector<2x256xf32>
    %cst_42 = arith.constant dense<0.000000e+00> : vector<2x1024xf32>
    %254 = tpu.matmul %252, %13, %cst_42 {dimension_numbers = #tpu.dot_dimension_numbers<[1], [0], [0], [1], [0, 0, 1, 1], [], []>} : vector<2x256xf32>, vector<256x1024xf32>, vector<2x1024xf32> -> vector<2x1024xf32>
    %255 = vector.extract_strided_slice %12 {offsets = [8, 0], sizes = [2, 512], strides = [1, 1]} : vector<16x1024xf32> to vector<2x512xf32>
    %256 = vector.extract_strided_slice %254 {offsets = [0, 0], sizes = [2, 512], strides = [1, 1]} : vector<2x1024xf32> to vector<2x512xf32>
    %257 = arith.addf %255, %256 : vector<2x512xf32>
    %258 = vector.extract_strided_slice %12 {offsets = [6, 512], sizes = [2, 512], strides = [1, 1]} : vector<16x1024xf32> to vector<2x512xf32>
    %259 = vector.extract_strided_slice %254 {offsets = [0, 512], sizes = [2, 512], strides = [1, 1]} : vector<2x1024xf32> to vector<2x512xf32>
    %260 = arith.addf %258, %259 : vector<2x512xf32>
    %261 = vector.extract_strided_slice %257 {offsets = [0, 0], sizes = [2, 128], strides = [1, 1]} : vector<2x512xf32> to vector<2x128xf32>
    %262 = arith.negf %261 : vector<2x128xf32>
    %263 = math.exp %262 : vector<2x128xf32>
    %cst_43 = arith.constant 1.000000e+00 : f32
    %264 = vector.broadcast %cst_43 : f32 to vector<2x128xf32>
    %265 = arith.addf %264, %263 : vector<2x128xf32>
    %266 = arith.divf %264, %265 : vector<2x128xf32>
    %267 = vector.extract_strided_slice %257 {offsets = [0, 128], sizes = [2, 128], strides = [1, 1]} : vector<2x512xf32> to vector<2x128xf32>
    %268 = arith.negf %267 : vector<2x128xf32>
    %269 = math.exp %268 : vector<2x128xf32>
    %cst_44 = arith.constant 1.000000e+00 : f32
    %270 = vector.broadcast %cst_44 : f32 to vector<2x128xf32>
    %271 = arith.addf %270, %269 : vector<2x128xf32>
    %272 = arith.divf %270, %271 : vector<2x128xf32>
    %273 = vector.extract_strided_slice %257 {offsets = [0, 256], sizes = [2, 128], strides = [1, 1]} : vector<2x512xf32> to vector<2x128xf32>
    %274 = math.tanh %273 : vector<2x128xf32>
    %275 = vector.extract_strided_slice %257 {offsets = [0, 384], sizes = [2, 128], strides = [1, 1]} : vector<2x512xf32> to vector<2x128xf32>
    %276 = arith.negf %275 : vector<2x128xf32>
    %277 = math.exp %276 : vector<2x128xf32>
    %cst_45 = arith.constant 1.000000e+00 : f32
    %278 = vector.broadcast %cst_45 : f32 to vector<2x128xf32>
    %279 = arith.addf %278, %277 : vector<2x128xf32>
    %280 = arith.divf %278, %279 : vector<2x128xf32>
    %281 = arith.mulf %272, %224 : vector<2x128xf32>
    %282 = arith.mulf %266, %274 : vector<2x128xf32>
    %283 = arith.addf %281, %282 : vector<2x128xf32>
    %284 = math.tanh %283 : vector<2x128xf32>
    %285 = arith.mulf %280, %284 : vector<2x128xf32>
    %286 = vector.extract_strided_slice %260 {offsets = [0, 0], sizes = [2, 128], strides = [1, 1]} : vector<2x512xf32> to vector<2x128xf32>
    %287 = arith.negf %286 : vector<2x128xf32>
    %288 = math.exp %287 : vector<2x128xf32>
    %cst_46 = arith.constant 1.000000e+00 : f32
    %289 = vector.broadcast %cst_46 : f32 to vector<2x128xf32>
    %290 = arith.addf %289, %288 : vector<2x128xf32>
    %291 = arith.divf %289, %290 : vector<2x128xf32>
    %292 = vector.extract_strided_slice %260 {offsets = [0, 128], sizes = [2, 128], strides = [1, 1]} : vector<2x512xf32> to vector<2x128xf32>
    %293 = arith.negf %292 : vector<2x128xf32>
    %294 = math.exp %293 : vector<2x128xf32>
    %cst_47 = arith.constant 1.000000e+00 : f32
    %295 = vector.broadcast %cst_47 : f32 to vector<2x128xf32>
    %296 = arith.addf %295, %294 : vector<2x128xf32>
    %297 = arith.divf %295, %296 : vector<2x128xf32>
    %298 = vector.extract_strided_slice %260 {offsets = [0, 256], sizes = [2, 128], strides = [1, 1]} : vector<2x512xf32> to vector<2x128xf32>
    %299 = math.tanh %298 : vector<2x128xf32>
    %300 = vector.extract_strided_slice %260 {offsets = [0, 384], sizes = [2, 128], strides = [1, 1]} : vector<2x512xf32> to vector<2x128xf32>
    %301 = arith.negf %300 : vector<2x128xf32>
    %302 = math.exp %301 : vector<2x128xf32>
    %cst_48 = arith.constant 1.000000e+00 : f32
    %303 = vector.broadcast %cst_48 : f32 to vector<2x128xf32>
    %304 = arith.addf %303, %302 : vector<2x128xf32>
    %305 = arith.divf %303, %304 : vector<2x128xf32>
    %306 = arith.mulf %297, %249 : vector<2x128xf32>
    %307 = arith.mulf %291, %299 : vector<2x128xf32>
    %308 = arith.addf %306, %307 : vector<2x128xf32>
    %309 = math.tanh %308 : vector<2x128xf32>
    %310 = arith.mulf %305, %309 : vector<2x128xf32>
    %311 = tpu.concatenate %285, %310 in 1 : vector<2x128xf32>, vector<2x128xf32> -> vector<2x256xf32>
    %312 = arith.addf %253, %311 : vector<2x256xf32>
    %cst_49 = arith.constant dense<0.000000e+00> : vector<2x1024xf32>
    %313 = tpu.matmul %311, %13, %cst_49 {dimension_numbers = #tpu.dot_dimension_numbers<[1], [0], [0], [1], [0, 0, 1, 1], [], []>} : vector<2x256xf32>, vector<256x1024xf32>, vector<2x1024xf32> -> vector<2x1024xf32>
    %314 = vector.extract_strided_slice %12 {offsets = [10, 0], sizes = [2, 512], strides = [1, 1]} : vector<16x1024xf32> to vector<2x512xf32>
    %315 = vector.extract_strided_slice %313 {offsets = [0, 0], sizes = [2, 512], strides = [1, 1]} : vector<2x1024xf32> to vector<2x512xf32>
    %316 = arith.addf %314, %315 : vector<2x512xf32>
    %317 = vector.extract_strided_slice %12 {offsets = [4, 512], sizes = [2, 512], strides = [1, 1]} : vector<16x1024xf32> to vector<2x512xf32>
    %318 = vector.extract_strided_slice %313 {offsets = [0, 512], sizes = [2, 512], strides = [1, 1]} : vector<2x1024xf32> to vector<2x512xf32>
    %319 = arith.addf %317, %318 : vector<2x512xf32>
    %320 = vector.extract_strided_slice %316 {offsets = [0, 0], sizes = [2, 128], strides = [1, 1]} : vector<2x512xf32> to vector<2x128xf32>
    %321 = arith.negf %320 : vector<2x128xf32>
    %322 = math.exp %321 : vector<2x128xf32>
    %cst_50 = arith.constant 1.000000e+00 : f32
    %323 = vector.broadcast %cst_50 : f32 to vector<2x128xf32>
    %324 = arith.addf %323, %322 : vector<2x128xf32>
    %325 = arith.divf %323, %324 : vector<2x128xf32>
    %326 = vector.extract_strided_slice %316 {offsets = [0, 128], sizes = [2, 128], strides = [1, 1]} : vector<2x512xf32> to vector<2x128xf32>
    %327 = arith.negf %326 : vector<2x128xf32>
    %328 = math.exp %327 : vector<2x128xf32>
    %cst_51 = arith.constant 1.000000e+00 : f32
    %329 = vector.broadcast %cst_51 : f32 to vector<2x128xf32>
    %330 = arith.addf %329, %328 : vector<2x128xf32>
    %331 = arith.divf %329, %330 : vector<2x128xf32>
    %332 = vector.extract_strided_slice %316 {offsets = [0, 256], sizes = [2, 128], strides = [1, 1]} : vector<2x512xf32> to vector<2x128xf32>
    %333 = math.tanh %332 : vector<2x128xf32>
    %334 = vector.extract_strided_slice %316 {offsets = [0, 384], sizes = [2, 128], strides = [1, 1]} : vector<2x512xf32> to vector<2x128xf32>
    %335 = arith.negf %334 : vector<2x128xf32>
    %336 = math.exp %335 : vector<2x128xf32>
    %cst_52 = arith.constant 1.000000e+00 : f32
    %337 = vector.broadcast %cst_52 : f32 to vector<2x128xf32>
    %338 = arith.addf %337, %336 : vector<2x128xf32>
    %339 = arith.divf %337, %338 : vector<2x128xf32>
    %340 = arith.mulf %331, %283 : vector<2x128xf32>
    %341 = arith.mulf %325, %333 : vector<2x128xf32>
    %342 = arith.addf %340, %341 : vector<2x128xf32>
    %343 = math.tanh %342 : vector<2x128xf32>
    %344 = arith.mulf %339, %343 : vector<2x128xf32>
    %345 = vector.extract_strided_slice %319 {offsets = [0, 0], sizes = [2, 128], strides = [1, 1]} : vector<2x512xf32> to vector<2x128xf32>
    %346 = arith.negf %345 : vector<2x128xf32>
    %347 = math.exp %346 : vector<2x128xf32>
    %cst_53 = arith.constant 1.000000e+00 : f32
    %348 = vector.broadcast %cst_53 : f32 to vector<2x128xf32>
    %349 = arith.addf %348, %347 : vector<2x128xf32>
    %350 = arith.divf %348, %349 : vector<2x128xf32>
    %351 = vector.extract_strided_slice %319 {offsets = [0, 128], sizes = [2, 128], strides = [1, 1]} : vector<2x512xf32> to vector<2x128xf32>
    %352 = arith.negf %351 : vector<2x128xf32>
    %353 = math.exp %352 : vector<2x128xf32>
    %cst_54 = arith.constant 1.000000e+00 : f32
    %354 = vector.broadcast %cst_54 : f32 to vector<2x128xf32>
    %355 = arith.addf %354, %353 : vector<2x128xf32>
    %356 = arith.divf %354, %355 : vector<2x128xf32>
    %357 = vector.extract_strided_slice %319 {offsets = [0, 256], sizes = [2, 128], strides = [1, 1]} : vector<2x512xf32> to vector<2x128xf32>
    %358 = math.tanh %357 : vector<2x128xf32>
    %359 = vector.extract_strided_slice %319 {offsets = [0, 384], sizes = [2, 128], strides = [1, 1]} : vector<2x512xf32> to vector<2x128xf32>
    %360 = arith.negf %359 : vector<2x128xf32>
    %361 = math.exp %360 : vector<2x128xf32>
    %cst_55 = arith.constant 1.000000e+00 : f32
    %362 = vector.broadcast %cst_55 : f32 to vector<2x128xf32>
    %363 = arith.addf %362, %361 : vector<2x128xf32>
    %364 = arith.divf %362, %363 : vector<2x128xf32>
    %365 = arith.mulf %356, %308 : vector<2x128xf32>
    %366 = arith.mulf %350, %358 : vector<2x128xf32>
    %367 = arith.addf %365, %366 : vector<2x128xf32>
    %368 = math.tanh %367 : vector<2x128xf32>
    %369 = arith.mulf %364, %368 : vector<2x128xf32>
    %370 = tpu.concatenate %344, %369 in 1 : vector<2x128xf32>, vector<2x128xf32> -> vector<2x256xf32>
    %371 = arith.addf %312, %370 : vector<2x256xf32>
    %cst_56 = arith.constant dense<0.000000e+00> : vector<2x1024xf32>
    %372 = tpu.matmul %370, %13, %cst_56 {dimension_numbers = #tpu.dot_dimension_numbers<[1], [0], [0], [1], [0, 0, 1, 1], [], []>} : vector<2x256xf32>, vector<256x1024xf32>, vector<2x1024xf32> -> vector<2x1024xf32>
    %373 = vector.extract_strided_slice %12 {offsets = [12, 0], sizes = [2, 512], strides = [1, 1]} : vector<16x1024xf32> to vector<2x512xf32>
    %374 = vector.extract_strided_slice %372 {offsets = [0, 0], sizes = [2, 512], strides = [1, 1]} : vector<2x1024xf32> to vector<2x512xf32>
    %375 = arith.addf %373, %374 : vector<2x512xf32>
    %376 = vector.extract_strided_slice %12 {offsets = [2, 512], sizes = [2, 512], strides = [1, 1]} : vector<16x1024xf32> to vector<2x512xf32>
    %377 = vector.extract_strided_slice %372 {offsets = [0, 512], sizes = [2, 512], strides = [1, 1]} : vector<2x1024xf32> to vector<2x512xf32>
    %378 = arith.addf %376, %377 : vector<2x512xf32>
    %379 = vector.extract_strided_slice %375 {offsets = [0, 0], sizes = [2, 128], strides = [1, 1]} : vector<2x512xf32> to vector<2x128xf32>
    %380 = arith.negf %379 : vector<2x128xf32>
    %381 = math.exp %380 : vector<2x128xf32>
    %cst_57 = arith.constant 1.000000e+00 : f32
    %382 = vector.broadcast %cst_57 : f32 to vector<2x128xf32>
    %383 = arith.addf %382, %381 : vector<2x128xf32>
    %384 = arith.divf %382, %383 : vector<2x128xf32>
    %385 = vector.extract_strided_slice %375 {offsets = [0, 128], sizes = [2, 128], strides = [1, 1]} : vector<2x512xf32> to vector<2x128xf32>
    %386 = arith.negf %385 : vector<2x128xf32>
    %387 = math.exp %386 : vector<2x128xf32>
    %cst_58 = arith.constant 1.000000e+00 : f32
    %388 = vector.broadcast %cst_58 : f32 to vector<2x128xf32>
    %389 = arith.addf %388, %387 : vector<2x128xf32>
    %390 = arith.divf %388, %389 : vector<2x128xf32>
    %391 = vector.extract_strided_slice %375 {offsets = [0, 256], sizes = [2, 128], strides = [1, 1]} : vector<2x512xf32> to vector<2x128xf32>
    %392 = math.tanh %391 : vector<2x128xf32>
    %393 = vector.extract_strided_slice %375 {offsets = [0, 384], sizes = [2, 128], strides = [1, 1]} : vector<2x512xf32> to vector<2x128xf32>
    %394 = arith.negf %393 : vector<2x128xf32>
    %395 = math.exp %394 : vector<2x128xf32>
    %cst_59 = arith.constant 1.000000e+00 : f32
    %396 = vector.broadcast %cst_59 : f32 to vector<2x128xf32>
    %397 = arith.addf %396, %395 : vector<2x128xf32>
    %398 = arith.divf %396, %397 : vector<2x128xf32>
    %399 = arith.mulf %390, %342 : vector<2x128xf32>
    %400 = arith.mulf %384, %392 : vector<2x128xf32>
    %401 = arith.addf %399, %400 : vector<2x128xf32>
    %402 = math.tanh %401 : vector<2x128xf32>
    %403 = arith.mulf %398, %402 : vector<2x128xf32>
    %404 = vector.extract_strided_slice %378 {offsets = [0, 0], sizes = [2, 128], strides = [1, 1]} : vector<2x512xf32> to vector<2x128xf32>
    %405 = arith.negf %404 : vector<2x128xf32>
    %406 = math.exp %405 : vector<2x128xf32>
    %cst_60 = arith.constant 1.000000e+00 : f32
    %407 = vector.broadcast %cst_60 : f32 to vector<2x128xf32>
    %408 = arith.addf %407, %406 : vector<2x128xf32>
    %409 = arith.divf %407, %408 : vector<2x128xf32>
    %410 = vector.extract_strided_slice %378 {offsets = [0, 128], sizes = [2, 128], strides = [1, 1]} : vector<2x512xf32> to vector<2x128xf32>
    %411 = arith.negf %410 : vector<2x128xf32>
    %412 = math.exp %411 : vector<2x128xf32>
    %cst_61 = arith.constant 1.000000e+00 : f32
    %413 = vector.broadcast %cst_61 : f32 to vector<2x128xf32>
    %414 = arith.addf %413, %412 : vector<2x128xf32>
    %415 = arith.divf %413, %414 : vector<2x128xf32>
    %416 = vector.extract_strided_slice %378 {offsets = [0, 256], sizes = [2, 128], strides = [1, 1]} : vector<2x512xf32> to vector<2x128xf32>
    %417 = math.tanh %416 : vector<2x128xf32>
    %418 = vector.extract_strided_slice %378 {offsets = [0, 384], sizes = [2, 128], strides = [1, 1]} : vector<2x512xf32> to vector<2x128xf32>
    %419 = arith.negf %418 : vector<2x128xf32>
    %420 = math.exp %419 : vector<2x128xf32>
    %cst_62 = arith.constant 1.000000e+00 : f32
    %421 = vector.broadcast %cst_62 : f32 to vector<2x128xf32>
    %422 = arith.addf %421, %420 : vector<2x128xf32>
    %423 = arith.divf %421, %422 : vector<2x128xf32>
    %424 = arith.mulf %415, %367 : vector<2x128xf32>
    %425 = arith.mulf %409, %417 : vector<2x128xf32>
    %426 = arith.addf %424, %425 : vector<2x128xf32>
    %427 = math.tanh %426 : vector<2x128xf32>
    %428 = arith.mulf %423, %427 : vector<2x128xf32>
    %429 = tpu.concatenate %403, %428 in 1 : vector<2x128xf32>, vector<2x128xf32> -> vector<2x256xf32>
    %430 = arith.addf %371, %429 : vector<2x256xf32>
    %cst_63 = arith.constant dense<0.000000e+00> : vector<2x1024xf32>
    %431 = tpu.matmul %429, %13, %cst_63 {dimension_numbers = #tpu.dot_dimension_numbers<[1], [0], [0], [1], [0, 0, 1, 1], [], []>} : vector<2x256xf32>, vector<256x1024xf32>, vector<2x1024xf32> -> vector<2x1024xf32>
    %432 = vector.extract_strided_slice %12 {offsets = [14, 0], sizes = [2, 512], strides = [1, 1]} : vector<16x1024xf32> to vector<2x512xf32>
    %433 = vector.extract_strided_slice %431 {offsets = [0, 0], sizes = [2, 512], strides = [1, 1]} : vector<2x1024xf32> to vector<2x512xf32>
    %434 = arith.addf %432, %433 : vector<2x512xf32>
    %435 = vector.extract_strided_slice %12 {offsets = [0, 512], sizes = [2, 512], strides = [1, 1]} : vector<16x1024xf32> to vector<2x512xf32>
    %436 = vector.extract_strided_slice %431 {offsets = [0, 512], sizes = [2, 512], strides = [1, 1]} : vector<2x1024xf32> to vector<2x512xf32>
    %437 = arith.addf %435, %436 : vector<2x512xf32>
    %438 = vector.extract_strided_slice %434 {offsets = [0, 0], sizes = [2, 128], strides = [1, 1]} : vector<2x512xf32> to vector<2x128xf32>
    %439 = arith.negf %438 : vector<2x128xf32>
    %440 = math.exp %439 : vector<2x128xf32>
    %cst_64 = arith.constant 1.000000e+00 : f32
    %441 = vector.broadcast %cst_64 : f32 to vector<2x128xf32>
    %442 = arith.addf %441, %440 : vector<2x128xf32>
    %443 = arith.divf %441, %442 : vector<2x128xf32>
    %444 = vector.extract_strided_slice %434 {offsets = [0, 128], sizes = [2, 128], strides = [1, 1]} : vector<2x512xf32> to vector<2x128xf32>
    %445 = arith.negf %444 : vector<2x128xf32>
    %446 = math.exp %445 : vector<2x128xf32>
    %cst_65 = arith.constant 1.000000e+00 : f32
    %447 = vector.broadcast %cst_65 : f32 to vector<2x128xf32>
    %448 = arith.addf %447, %446 : vector<2x128xf32>
    %449 = arith.divf %447, %448 : vector<2x128xf32>
    %450 = vector.extract_strided_slice %434 {offsets = [0, 256], sizes = [2, 128], strides = [1, 1]} : vector<2x512xf32> to vector<2x128xf32>
    %451 = math.tanh %450 : vector<2x128xf32>
    %452 = vector.extract_strided_slice %434 {offsets = [0, 384], sizes = [2, 128], strides = [1, 1]} : vector<2x512xf32> to vector<2x128xf32>
    %453 = arith.negf %452 : vector<2x128xf32>
    %454 = math.exp %453 : vector<2x128xf32>
    %cst_66 = arith.constant 1.000000e+00 : f32
    %455 = vector.broadcast %cst_66 : f32 to vector<2x128xf32>
    %456 = arith.addf %455, %454 : vector<2x128xf32>
    %457 = arith.divf %455, %456 : vector<2x128xf32>
    %458 = arith.mulf %449, %401 : vector<2x128xf32>
    %459 = arith.mulf %443, %451 : vector<2x128xf32>
    %460 = arith.addf %458, %459 : vector<2x128xf32>
    %461 = math.tanh %460 : vector<2x128xf32>
    %462 = arith.mulf %457, %461 : vector<2x128xf32>
    %463 = vector.extract_strided_slice %437 {offsets = [0, 0], sizes = [2, 128], strides = [1, 1]} : vector<2x512xf32> to vector<2x128xf32>
    %464 = arith.negf %463 : vector<2x128xf32>
    %465 = math.exp %464 : vector<2x128xf32>
    %cst_67 = arith.constant 1.000000e+00 : f32
    %466 = vector.broadcast %cst_67 : f32 to vector<2x128xf32>
    %467 = arith.addf %466, %465 : vector<2x128xf32>
    %468 = arith.divf %466, %467 : vector<2x128xf32>
    %469 = vector.extract_strided_slice %437 {offsets = [0, 128], sizes = [2, 128], strides = [1, 1]} : vector<2x512xf32> to vector<2x128xf32>
    %470 = arith.negf %469 : vector<2x128xf32>
    %471 = math.exp %470 : vector<2x128xf32>
    %cst_68 = arith.constant 1.000000e+00 : f32
    %472 = vector.broadcast %cst_68 : f32 to vector<2x128xf32>
    %473 = arith.addf %472, %471 : vector<2x128xf32>
    %474 = arith.divf %472, %473 : vector<2x128xf32>
    %475 = vector.extract_strided_slice %437 {offsets = [0, 256], sizes = [2, 128], strides = [1, 1]} : vector<2x512xf32> to vector<2x128xf32>
    %476 = math.tanh %475 : vector<2x128xf32>
    %477 = vector.extract_strided_slice %437 {offsets = [0, 384], sizes = [2, 128], strides = [1, 1]} : vector<2x512xf32> to vector<2x128xf32>
    %478 = arith.negf %477 : vector<2x128xf32>
    %479 = math.exp %478 : vector<2x128xf32>
    %cst_69 = arith.constant 1.000000e+00 : f32
    %480 = vector.broadcast %cst_69 : f32 to vector<2x128xf32>
    %481 = arith.addf %480, %479 : vector<2x128xf32>
    %482 = arith.divf %480, %481 : vector<2x128xf32>
    %483 = arith.mulf %474, %426 : vector<2x128xf32>
    %484 = arith.mulf %468, %476 : vector<2x128xf32>
    %485 = arith.addf %483, %484 : vector<2x128xf32>
    %486 = math.tanh %485 : vector<2x128xf32>
    %487 = arith.mulf %482, %486 : vector<2x128xf32>
    %488 = tpu.concatenate %462, %487 in 1 : vector<2x128xf32>, vector<2x128xf32> -> vector<2x256xf32>
    %489 = arith.addf %430, %488 : vector<2x256xf32>
    %cst_70 = arith.constant 1.250000e-01 : f32
    %490 = vector.broadcast %cst_70 : f32 to vector<2x256xf32>
    %491 = arith.mulf %489, %490 : vector<2x256xf32>
    %c0_71 = arith.constant 0 : index
    %c0_72 = arith.constant 0 : index
    %492 = vector.load %arg5[%c0_71, %c0_72] : memref<256x512xf32, #tpu.memory_space<vmem>>, vector<256x512xf32>
    %cst_73 = arith.constant dense<0.000000e+00> : vector<2x512xf32>
    %493 = tpu.matmul %491, %492, %cst_73 {dimension_numbers = #tpu.dot_dimension_numbers<[1], [0], [0], [1], [0, 0, 1, 1], [], []>} : vector<2x256xf32>, vector<256x512xf32>, vector<2x512xf32> -> vector<2x512xf32>
    %c0_74 = arith.constant 0 : index
    %c0_75 = arith.constant 0 : index
    %494 = vector.load %arg6[%c0_74, %c0_75] : memref<1x512xf32, #tpu.memory_space<vmem>>, vector<1x512xf32>
    %495 = vector.broadcast %494 : vector<1x512xf32> to vector<2x512xf32>
    %496 = arith.addf %493, %495 : vector<2x512xf32>
    %c0_76 = arith.constant 0 : index
    %c0_77 = arith.constant 0 : index
    %497 = vector.load %arg7[%c0_76, %c0_77] : memref<512x384xf32, #tpu.memory_space<vmem>>, vector<512x384xf32>
    %cst_78 = arith.constant dense<0.000000e+00> : vector<2x384xf32>
    %498 = tpu.matmul %496, %497, %cst_78 {dimension_numbers = #tpu.dot_dimension_numbers<[1], [0], [0], [1], [0, 0, 1, 1], [], []>} : vector<2x512xf32>, vector<512x384xf32>, vector<2x384xf32> -> vector<2x384xf32>
    %c0_79 = arith.constant 0 : index
    %c0_80 = arith.constant 0 : index
    %499 = vector.load %arg8[%c0_79, %c0_80] : memref<1x384xf32, #tpu.memory_space<vmem>>, vector<1x384xf32>
    %500 = vector.broadcast %499 : vector<1x384xf32> to vector<2x384xf32>
    %501 = arith.addf %498, %500 : vector<2x384xf32>
    %c0_81 = arith.constant 0 : index
    %c0_82 = arith.constant 0 : index
    %502 = vector.load %arg9[%c0_81, %c0_82] : memref<1x384xf32, #tpu.memory_space<vmem>>, vector<1x384xf32>
    %503 = vector.broadcast %502 : vector<1x384xf32> to vector<2x384xf32>
    %504 = arith.mulf %501, %503 : vector<2x384xf32>
    %cst_83 = arith.constant dense<0.000000e+00> : vector<2xf32>
    %505 = vector.multi_reduction <add>, %504, %cst_83 [1] : vector<2x384xf32> to vector<2xf32>
    %506 = vector.shape_cast %505 : vector<2xf32> to vector<2x1xf32>
    %507 = vector.shape_cast %506 : vector<2x1xf32> to vector<2x1xf32>
    %508 = vector.broadcast %507 : vector<2x1xf32> to vector<2x128xf32>
    %c0_84 = arith.constant 0 : index
    %c0_85 = arith.constant 0 : index
    %509 = vector.load %arg10[%c0_84, %c0_85] : memref<1x128xf32, #tpu.memory_space<vmem>>, vector<1x128xf32>
    %510 = vector.broadcast %509 : vector<1x128xf32> to vector<2x128xf32>
    %511 = arith.addf %508, %510 : vector<2x128xf32>
    %c0_86 = arith.constant 0 : index
    %c0_87 = arith.constant 0 : index
    %512 = vector.load %arg11[%c0_86, %c0_87] : memref<2x128xf32, #tpu.memory_space<vmem>>, vector<2x128xf32>
    tpu.vector_store %arg11[%c0_86, %c0_87], %511 {strides = array<i32>} : memref<2x128xf32, #tpu.memory_space<vmem>>, vector<2x128xf32>,
    return
  }
}

</mosaic_0001>

<bundles_post_ra>
// kernel: rnn_forward.1
= control target key start
LH: loop header
LB: loop body
LE: loop exit
PB: predicated region body
PF: predicated region fallthrough
CT: control target
= control target key end

     0   :  { %16 = vsyncpa [#allocation3], 0  ;;  %s9594_s0 = inlined_call_operand.vmem [shape: s32[16,1], index: 0, kind: input, shape index: {}]   ;;  %s9595_s1 = inlined_call_operand.hbm [shape: f32[128,128], index: 1, kind: input, shape index: {}]   ;;  %s9596_s2 = inlined_call_operand.hbm [shape: f32[128,1024], index: 2, kind: input, shape index: {}]   ;;  %s9597_s3 = inlined_call_operand.vmem [shape: f32[1,1024], index: 3, kind: input, shape index: {}]   ;;  %s9598_s4 = inlined_call_operand.hbm [shape: f32[256,1024], index: 4, kind: input, shape index: {}]   ;;  %s9599_s5 = inlined_call_operand.hbm [shape: f32[256,512], index: 5, kind: input, shape index: {}]   ;;  %s9600_s6 = inlined_call_operand.vmem [shape: f32[1,512], index: 6, kind: input, shape index: {}]   ;;  %s9601_s7 = inlined_call_operand.hbm [shape: f32[512,384], index: 7, kind: input, shape index: {}]   ;;  %s9602_s8 = inlined_call_operand.vmem [shape: f32[1,384], index: 8, kind: input, shape index: {}]   ;;  %s9603_s9 = inlined_call_operand.vmem [shape: f32[1,384], index: 9, kind: input, shape index: {}]   ;;  %s9604_s10 = inlined_call_operand.vmem [shape: f32[1,128], index: 10, kind: input, shape index: {}]   ;;  %s9605_s11 = inlined_call_operand.vmem [shape: f32[2,128], index: 11, kind: output, shape index: {}]  }
   0x1   :  { %17 = vsyncpa [#allocation5], 0 }
   0x2   :  { %18 = vsyncpa [#allocation8], 0  ;;  %s7844_s17 = smov [#allocation4]   ;;  %s7728_s21 = scalar_lea.hbm %s9596_s2, 16384 }
   0x3   :  { %s38_s18 = sshll.u32 %s7844_s17, 4  ;;  %p7729_p0 = scmp.ne.s32.totalorder %s9596_s2, %s7728_s21  ;;  %s39_s18 = int_to_ptr.vmem [resolvable:$true] %s38_s18 }
   0x4   :  { %p7732_p1 = scmp.lt.u32.totalorder %s7728_s21, %s9596_s2 }
   0x6   :  { %p7734_p2 = pnand %p7732_p1, %p7729_p0 }
   0x8   :  { %7737 = shalt.err (!%p7734_p2)
}
   0x9   :  { %s7738_s26 = scalar_lea.vmem %s39_s18, 16384  ;;  %p7743_p4 = scmp.lt.s32.totalorder %s39_s18, %s39_s18 }
   0xa   :  { %p7739_p3 = scmp.ne.s32.totalorder %s39_s18, %s7738_s26  ;;  %p7744_p5 = scmp.lt.s32.totalorder %s7738_s26, %s7738_s26 }
   0xc   :  { %p7745_p6 = por %p7744_p5, %p7743_p4 }
   0xe   :  { %p7746_p7 = pnand %p7745_p6, %p7739_p3 }
  0x10   :  { %7749 = shalt.err (!%p7746_p7)
}
  0x11   :  { %s7845_s27 = smov 1024   ;;  %s7846_s28 = smov 64  }
  0x12   :  { %44 = dma.hbm_to_vmem [thread:$0]  %s9596_s2, 16384, %s39_s18, [#allocation5], %s7845_s27, %s7845_s27, %s7846_s28  }
  0x13   :  { %s7847_s12 = smov [#allocation7]   ;;  %s7750_s16 = scalar_lea.hbm %s9599_s5, 16384 }
  0x14   :  { %s64_s13 = sshll.u32 %s7847_s12, 4  ;;  %p7751_p8 = scmp.ne.s32.totalorder %s9599_s5, %s7750_s16  ;;  %s65_s13 = int_to_ptr.vmem [resolvable:$true] %s64_s13 }
  0x15   :  { %p7754_p9 = scmp.lt.u32.totalorder %s7750_s16, %s9599_s5 }
  0x17   :  { %p7756_p10 = pnand %p7754_p9, %p7751_p8 }
  0x19   :  { %7759 = shalt.err (!%p7756_p10)
}
  0x1a   :  { %s7760_s22 = scalar_lea.vmem %s65_s13, 16384  ;;  %p7765_p12 = scmp.lt.s32.totalorder %s65_s13, %s65_s13 }
  0x1b   :  { %p7761_p11 = scmp.ne.s32.totalorder %s65_s13, %s7760_s22  ;;  %p7766_p13 = scmp.lt.s32.totalorder %s7760_s22, %s7760_s22 }
  0x1d   :  { %p7767_p0 = por %p7766_p13, %p7765_p12 }
  0x1f   :  { %p7768_p1 = pnand %p7767_p0, %p7761_p11 }
  0x21   :  { %7771 = shalt.err (!%p7768_p1)
}
  0x22   :  { %s7848_s2 = smov 512   ;;  %s7849_s18 = smov 32  }
  0x23   :  { %70 = dma.hbm_to_vmem [thread:$0]  %s9599_s5, 16384, %s65_s13, [#allocation8], %s7848_s2, %s7848_s2, %s7849_s18  }
  0x24   :  { %s7850_s25 = smov [#allocation2]   ;;  %s7772_s12 = scalar_lea.hbm %s9595_s1, 2048 }
  0x25   :  { %s26_s26 = sshll.u32 %s7850_s25, 4  ;;  %p7773_p2 = scmp.ne.s32.totalorder %s9595_s1, %s7772_s12  ;;  %s27_s26 = int_to_ptr.vmem [resolvable:$true] %s26_s26 }
  0x26   :  { %p7776_p3 = scmp.lt.u32.totalorder %s7772_s12, %s9595_s1 }
  0x28   :  { %p7778_p4 = pnand %p7776_p3, %p7773_p2 }
  0x2a   :  { %7781 = shalt.err (!%p7778_p4)
}
  0x2b   :  { %s7782_s19 = scalar_lea.vmem %s27_s26, 2048  ;;  %p7787_p6 = scmp.lt.s32.totalorder %s27_s26, %s27_s26 }
  0x2c   :  { %p7783_p5 = scmp.ne.s32.totalorder %s27_s26, %s7782_s19  ;;  %p7788_p7 = scmp.lt.s32.totalorder %s7782_s19, %s7782_s19 }
  0x2e   :  { %p7789_p8 = por %p7788_p7, %p7787_p6 }
  0x30   :  { %p7790_p9 = pnand %p7789_p8, %p7783_p5 }
  0x32   :  { %7793 = shalt.err (!%p7790_p9)
}
  0x33   :  { %s7851_s5 = smov 128   ;;  %s7852_s13 = smov 8  }
  0x34   :  { %32 = dma.hbm_to_vmem [thread:$0]  %s9595_s1, 2048, %s27_s26, [#allocation3], %s7851_s5, %s7851_s5, %s7852_s13  }
  0x35   :  { %s7853_s22 = smov [#allocation6]   ;;  %s7854_s18 = smov [#allocation9]  }
  0x36   :  { %s52_s2 = sshll.u32 %s7853_s22, 4  ;;  %s78_s23 = sshll.u32 %s7854_s18, 4  ;;  %s53_s2 = int_to_ptr.vmem [resolvable:$true] %s52_s2  ;;  %s79_s23 = int_to_ptr.vmem [resolvable:$true] %s78_s23 }
  0x37   :  { %s7794_s29 = scalar_lea.hbm %s9598_s4, 32768 }
  0x38   :  { %p7795_p10 = scmp.ne.s32.totalorder %s9598_s4, %s7794_s29  ;;  %p7798_p11 = scmp.lt.u32.totalorder %s7794_s29, %s9598_s4 }
  0x3a   :  { %p7800_p12 = pnand %p7798_p11, %p7795_p10 }
  0x3c   :  { %7803 = shalt.err (!%p7800_p12)
}
  0x3d   :  { %s7804_s1 = scalar_lea.vmem %s53_s2, 32768  ;;  %p7809_p0 = scmp.lt.s32.totalorder %s53_s2, %s53_s2 }
  0x3e   :  { %p7805_p13 = scmp.ne.s32.totalorder %s53_s2, %s7804_s1  ;;  %p7810_p1 = scmp.lt.s32.totalorder %s7804_s1, %s7804_s1 }
  0x40   :  { %p7811_p2 = por %p7810_p1, %p7809_p0 }
  0x42   :  { %p7812_p3 = pnand %p7811_p2, %p7805_p13 }
  0x44   :  { %7815 = shalt.err (!%p7812_p3)
}
  0x45   :  { %58 = dma.hbm_to_vmem [thread:$0]  %s9598_s4, 32768, %s53_s2, [#allocation5], %s7845_s27, %s7845_s27, %s7846_s28  }
  0x46   :  { %s7816_s5 = scalar_lea.hbm %s9601_s7, 24576 }
  0x47   :  { %p7817_p4 = scmp.ne.s32.totalorder %s9601_s7, %s7816_s5  ;;  %p7820_p5 = scmp.lt.u32.totalorder %s7816_s5, %s9601_s7 }
  0x49   :  { %p7822_p6 = pnand %p7820_p5, %p7817_p4 }
  0x4b   :  { %7825 = shalt.err (!%p7822_p6)
}
  0x4c   :  { %s7826_s18 = scalar_lea.vmem %s79_s23, 24576  ;;  %p7831_p8 = scmp.lt.s32.totalorder %s79_s23, %s79_s23 }
  0x4d   :  { %p7827_p7 = scmp.ne.s32.totalorder %s79_s23, %s7826_s18  ;;  %p7832_p9 = scmp.lt.s32.totalorder %s7826_s18, %s7826_s18 }
  0x4f   :  { %p7833_p10 = por %p7832_p9, %p7831_p8 }
  0x51   :  { %p7834_p11 = pnand %p7833_p10, %p7827_p7 }
  0x53   :  { %7837 = shalt.err (!%p7834_p11)
}
  0x54   :  { %s7855_s4 = smov 384   ;;  %s7856_s27 = smov 24  }
  0x55   :  { %84 = dma.hbm_to_vmem [thread:$0]  %s9601_s7, 24576, %s79_s23, [#allocation8], %s7855_s4, %s7855_s4, %s7856_s27  }
  0x56   :  { %7838 = dma.done.wait [#allocation3], 2048  }
  0x57   :  { %7839 = vsyncadd [#allocation3], 4294965248 }
  0x58   :  { %7840 = dma.done.wait [#allocation5], 49152  }
  0x59   :  { %7841 = vsyncadd [#allocation5], 4294918144 }
  0x5a   :  { %7842 = dma.done.wait [#allocation8], 40960  }
  0x5b   :  { %7843 = vsyncadd [#allocation8], 4294926336  ;;  %v7857_v0 = vmov 0   ;;  %v106_v1 = vld [vmem:[%s9594_s0] sm:$0xff]  ;;  %v123_v3 = vld [vmem:[#allocation2 + $0x8] sm:$0xff]  ;;  %vm4722_vm2 = vcmask 1041408  }
  0x5c   :  { %7471 = vset.pattern.permute.xlu0 %v7857_v0  ;;  %v122_v2 = vld [vmem:[#allocation2] sm:$0xff]  ;;  %v124_v4 = vld [vmem:[#allocation2 + $0x10] sm:$0xff]  ;;  %v125_v5 = vld [vmem:[#allocation2 + $0x18] sm:$0xff] }
  0x5d   :  { %111 = vperm.xlu0 %7471, %v106_v1   ;;  %v107_v6 = vld [vmem:[%s9594_s0 + $0x8] sm:$0xff]  ;;  %v4923_v7 = vpack.c.bf16 %v123_v3, %v122_v2  ;;  %v4927_v8 = vpack.c.bf16 %v125_v5, %v124_v4  ;;  %v126_v9 = vld [vmem:[#allocation2 + $0x20] sm:$0xff]  ;;  %v128_v12 = vld [vmem:[#allocation2 + $0x30] sm:$0xff] }
  0x5e   :  { %v127_v10 = vld [vmem:[#allocation2 + $0x28] sm:$0xff]  ;;  %v129_v15 = vld [vmem:[#allocation2 + $0x38] sm:$0xff]  ;;  %v213_v17 = vld [vmem:[#allocation4] sm:$0xff] }
  0x5f   :  { %4924 = vmatprep.subr.bf16.mxu0 %v4923_v7  ;;  %v4931_v11 = vpack.c.bf16 %v127_v10, %v126_v9  ;;  %v214_v13 = vld [vmem:[#allocation4 + $0x8] sm:$0xff]  ;;  %v221_v18 = vld [vmem:[#allocation4 + $0x40] sm:$0xff]  ;;  %v4935_v22 = vpack.c.bf16 %v129_v15, %v128_v12  ;;  %v132_v35 = vld [vmem:[#allocation2 + $0x50] sm:$0xff] }
  0x60   :  { %4926 = vmatpush3.bf16.msra.mxu0 %v4923_v7  ;;  %v222_v14 = vld [vmem:[#allocation4 + $0x48] sm:$0xff]  ;;  %v4957_v19 = vpack.c.bf16 %v221_v18, %v213_v17  ;;  %v130_v23 = vld [vmem:[#allocation2 + $0x40] sm:$0xff]  ;;  %v133_v37 = vld [vmem:[#allocation2 + $0x58] sm:$0xff] }
  0x61   :  { %114 = vperm.xlu0 %7471, %v107_v6   ;;  %4928 = vmatprep.subr.bf16.mxu0 %v4927_v8  ;;  %v4955_v16 = vpack.c.bf16 %v222_v14, %v214_v13  ;;  %v230_v20 = vld [vmem:[#allocation4 + $0x88] sm:$0xff]  ;;  %v229_v25 = vld [vmem:[#allocation4 + $0x80] sm:$0xff]  ;;  %v4943_v43 = vpack.c.bf16 %v133_v37, %v132_v35  ;;  %v136_v53 = vld [vmem:[#allocation2 + $0x70] sm:$0xff]  ;;  %v9606_v14 = vlaneseq }
  0x62   :  { %v238_v21 = vld [vmem:[#allocation4 + $0xc8] sm:$0xff]  ;;  %v237_v26 = vld [vmem:[#allocation4 + $0xc0] sm:$0xff]  ;;  %v137_v55 = vld [vmem:[#allocation2 + $0x78] sm:$0xff] }
  0x63   :  { %4956 = vmatprep.subr.bf16.mxu1 %v4955_v16  ;;  %v4959_v24 = vpack.c.bf16 %v238_v21, %v230_v20  ;;  %v131_v27 = vld [vmem:[#allocation2 + $0x48] sm:$0xff]  ;;  %v4961_v28 = vpack.c.bf16 %v237_v26, %v229_v25  ;;  %v245_v32 = vld [vmem:[#allocation4 + $0x100] sm:$0xff]  ;;  %v4951_v61 = vpack.c.bf16 %v137_v55, %v136_v53  ;;  %v216_v62 = vld [vmem:[#allocation4 + $0x18] sm:$0xff]  ;;  %v109_v15 = vand.u32 127, %v9606_v14 }
  0x64   :  { %4930 = vmatpush3.bf16.msra.mxu0 %v4927_v8  ;;  %4958 = vmatpush1.bf16.msra.mxu1 %v4957_v19  ;;  %v246_v29 = vld [vmem:[#allocation4 + $0x108] sm:$0xff]  ;;  %v253_v33 = vld [vmem:[#allocation4 + $0x140] sm:$0xff]  ;;  %v4939_v34 = vpack.c.bf16 %v131_v27, %v130_v23  ;;  %v224_v0 = vld [vmem:[#allocation4 + $0x58] sm:$0xff]  ;;  %v7858_v21 = vmov 1.0  }
  0x65   :  { %4932 = vmatprep.subr.bf16.mxu0 %v4931_v11  ;;  %v254_v30 = vld [vmem:[#allocation4 + $0x148] sm:$0xff]  ;;  %4960 = vmatprep.subr.bf16.mxu1 %v4959_v24  ;;  %v4965_v36 = vpack.c.bf16 %v253_v33, %v245_v32  ;;  %v261_v41 = vld [vmem:[#allocation4 + $0x180] sm:$0xff]  ;;  %v4987_v6 = vpack.c.bf16 %v224_v0, %v216_v62  ;;  %v215_v17 = vld [vmem:[#allocation4 + $0x10] sm:$0xff] }
  0x66   :  { %v4963_v31 = vpack.c.bf16 %v254_v30, %v246_v29  ;;  %v262_v38 = vld [vmem:[#allocation4 + $0x188] sm:$0xff]  ;;  %v269_v42 = vld [vmem:[#allocation4 + $0x1c0] sm:$0xff]  ;;  %v223_v18 = vld [vmem:[#allocation4 + $0x50] sm:$0xff] }
  0x67   :  { %v270_v39 = vld [vmem:[#allocation4 + $0x1c8] sm:$0xff]  ;;  %v134_v44 = vld [vmem:[#allocation2 + $0x60] sm:$0xff]  ;;  %v4969_v45 = vpack.c.bf16 %v269_v42, %v261_v41  ;;  %v232_v19 = vld [vmem:[#allocation4 + $0x98] sm:$0xff] }
  0x68   :  { %4934 = vmatpush3.bf16.msra.mxu0 %v4931_v11  ;;  %4962 = vmatpush1.bf16.msra.mxu1 %v4961_v28  ;;  %v4967_v40 = vpack.c.bf16 %v270_v39, %v262_v38  ;;  %v135_v46 = vld [vmem:[#allocation2 + $0x68] sm:$0xff]  ;;  %v277_v50 = vld [vmem:[#allocation4 + $0x200] sm:$0xff]  ;;  %v240_v20 = vld [vmem:[#allocation4 + $0xd8] sm:$0xff] }
  0x69   :  { %4936 = vmatprep.subr.bf16.mxu0 %v4935_v22  ;;  %4964 = vmatprep.subr.bf16.mxu1 %v4963_v31  ;;  %v278_v47 = vld [vmem:[#allocation4 + $0x208] sm:$0xff]  ;;  %v285_v51 = vld [vmem:[#allocation4 + $0x240] sm:$0xff]  ;;  %v4947_v52 = vpack.c.bf16 %v135_v46, %v134_v44  ;;  %v4991_v24 = vpack.c.bf16 %v240_v20, %v232_v19  ;;  %v231_v25 = vld [vmem:[#allocation4 + $0x90] sm:$0xff] }
  0x6a   :  { %v286_v48 = vld [vmem:[#allocation4 + $0x248] sm:$0xff]  ;;  %v4973_v54 = vpack.c.bf16 %v285_v51, %v277_v50  ;;  %v293_v59 = vld [vmem:[#allocation4 + $0x280] sm:$0xff]  ;;  %v239_v26 = vld [vmem:[#allocation4 + $0xd0] sm:$0xff] }
  0x6b   :  { %v4971_v49 = vpack.c.bf16 %v286_v48, %v278_v47  ;;  %v294_v56 = vld [vmem:[#allocation4 + $0x288] sm:$0xff]  ;;  %v301_v60 = vld [vmem:[#allocation4 + $0x2c0] sm:$0xff]  ;;  %v248_v27 = vld [vmem:[#allocation4 + $0x118] sm:$0xff]  ;;  %v4993_v29 = vpack.c.bf16 %v239_v26, %v231_v25 }
  0x6c   :  { %4938 = vmatpush3.bf16.msra.mxu0 %v4935_v22  ;;  %4966 = vmatpush1.bf16.msra.mxu1 %v4965_v36  ;;  %v302_v57 = vld [vmem:[#allocation4 + $0x2c8] sm:$0xff]  ;;  %v4977_v63 = vpack.c.bf16 %v301_v60, %v293_v59  ;;  %v309_v4 = vld [vmem:[#allocation4 + $0x300] sm:$0xff]  ;;  %v4989_v22 = vpack.c.bf16 %v223_v18, %v215_v17  ;;  %v256_v28 = vld [vmem:[#allocation4 + $0x158] sm:$0xff] }
  0x6d   :  { %4940 = vmatprep.subr.bf16.mxu0 %v4939_v34  ;;  %4968 = vmatprep.subr.bf16.mxu1 %v4967_v40  ;;  %v4975_v58 = vpack.c.bf16 %v302_v57, %v294_v56  ;;  %v310_v1 = vld [vmem:[#allocation4 + $0x308] sm:$0xff]  ;;  %v317_v5 = vld [vmem:[#allocation4 + $0x340] sm:$0xff]  ;;  %v4995_v30 = vpack.c.bf16 %v256_v28, %v248_v27  ;;  %v247_v31 = vld [vmem:[#allocation4 + $0x110] sm:$0xff] }
  0x6e   :  { %v318_v2 = vld [vmem:[#allocation4 + $0x348] sm:$0xff]  ;;  %v4981_v7 = vpack.c.bf16 %v317_v5, %v309_v4  ;;  %v325_v11 = vld [vmem:[#allocation4 + $0x380] sm:$0xff]  ;;  %v255_v32 = vld [vmem:[#allocation4 + $0x150] sm:$0xff] }
  0x6f   :  { %v4979_v3 = vpack.c.bf16 %v318_v2, %v310_v1  ;;  %v326_v8 = vld [vmem:[#allocation4 + $0x388] sm:$0xff]  ;;  %v333_v12 = vld [vmem:[#allocation4 + $0x3c0] sm:$0xff]  ;;  %v264_v33 = vld [vmem:[#allocation4 + $0x198] sm:$0xff]  ;;  %v4997_v35 = vpack.c.bf16 %v255_v32, %v247_v31 }
  0x70   :  { %4942 = vmatpush3.bf16.msra.mxu0 %v4939_v34  ;;  %4970 = vmatpush1.bf16.msra.mxu1 %v4969_v45  ;;  %v334_v9 = vld [vmem:[#allocation4 + $0x3c8] sm:$0xff]  ;;  %v4985_v13 = vpack.c.bf16 %v333_v12, %v325_v11  ;;  %v272_v34 = vld [vmem:[#allocation4 + $0x1d8] sm:$0xff]  ;;  %v263_v37 = vld [vmem:[#allocation4 + $0x190] sm:$0xff] }
  0x71   :  { %4944 = vmatprep.subr.bf16.mxu0 %v4943_v43  ;;  %4972 = vmatprep.subr.bf16.mxu1 %v4971_v49  ;;  %v4983_v10 = vpack.c.bf16 %v334_v9, %v326_v8  ;;  %v4999_v36 = vpack.c.bf16 %v272_v34, %v264_v33  ;;  %v271_v38 = vld [vmem:[#allocation4 + $0x1d0] sm:$0xff]  ;;  %v280_v39 = vld [vmem:[#allocation4 + $0x218] sm:$0xff]  ;;  %v218_v0 = vld [vmem:[#allocation4 + $0x28] sm:$0xff] }
  0x72   :  { %v288_v40 = vld [vmem:[#allocation4 + $0x258] sm:$0xff]  ;;  %v5001_v41 = vpack.c.bf16 %v271_v38, %v263_v37  ;;  %v287_v44 = vld [vmem:[#allocation4 + $0x250] sm:$0xff]  ;;  %v226_v1 = vld [vmem:[#allocation4 + $0x68] sm:$0xff] }
  0x73   :  { %v5003_v42 = vpack.c.bf16 %v288_v40, %v280_v39  ;;  %v296_v45 = vld [vmem:[#allocation4 + $0x298] sm:$0xff]  ;;  %v295_v49 = vld [vmem:[#allocation4 + $0x290] sm:$0xff]  ;;  %v225_v8 = vld [vmem:[#allocation4 + $0x60] sm:$0xff] }
  0x74   :  { %4946 = vmatpush3.bf16.msra.mxu0 %v4943_v43  ;;  %4974 = vmatpush1.bf16.msra.mxu1 %v4973_v54  ;;  %v279_v43 = vld [vmem:[#allocation4 + $0x210] sm:$0xff]  ;;  %v304_v46 = vld [vmem:[#allocation4 + $0x2d8] sm:$0xff]  ;;  %v234_v11 = vld [vmem:[#allocation4 + $0xa8] sm:$0xff] }
  0x75   :  { %4948 = vmatprep.subr.bf16.mxu0 %v4947_v52  ;;  %4976 = vmatprep.subr.bf16.mxu1 %v4975_v58  ;;  %v5005_v47 = vpack.c.bf16 %v287_v44, %v279_v43  ;;  %v5007_v48 = vpack.c.bf16 %v304_v46, %v296_v45  ;;  %v303_v50 = vld [vmem:[#allocation4 + $0x2d0] sm:$0xff]  ;;  %v312_v51 = vld [vmem:[#allocation4 + $0x318] sm:$0xff]  ;;  %v242_v12 = vld [vmem:[#allocation4 + $0xe8] sm:$0xff] }
  0x76   :  { %v5009_v53 = vpack.c.bf16 %v303_v50, %v295_v49  ;;  %v311_v55 = vld [vmem:[#allocation4 + $0x310] sm:$0xff]  ;;  %v328_v57 = vld [vmem:[#allocation4 + $0x398] sm:$0xff]  ;;  %v233_v18 = vld [vmem:[#allocation4 + $0xa0] sm:$0xff]  ;;  %v5023_v25 = vpack.c.bf16 %v242_v12, %v234_v11 }
  0x77   :  { %v319_v56 = vld [vmem:[#allocation4 + $0x350] sm:$0xff]  ;;  %v336_v58 = vld [vmem:[#allocation4 + $0x3d8] sm:$0xff]  ;;  %v241_v19 = vld [vmem:[#allocation4 + $0xe0] sm:$0xff] }
  0x78   :  { %4950 = vmatpush3.bf16.msra.mxu0 %v4947_v52  ;;  %4978 = vmatpush1.bf16.msra.mxu1 %v4977_v63  ;;  %v320_v52 = vld [vmem:[#allocation4 + $0x358] sm:$0xff]  ;;  %v5013_v59 = vpack.c.bf16 %v319_v56, %v311_v55  ;;  %v5015_v60 = vpack.c.bf16 %v336_v58, %v328_v57  ;;  %v335_v62 = vld [vmem:[#allocation4 + $0x3d0] sm:$0xff]  ;;  %v258_v27 = vld [vmem:[#allocation4 + $0x168] sm:$0xff] }
  0x79   :  { %4952 = vmatprep.subr.bf16.mxu0 %v4951_v61  ;;  %4980 = vmatprep.subr.bf16.mxu1 %v4979_v3  ;;  %v5011_v54 = vpack.c.bf16 %v320_v52, %v312_v51  ;;  %v220_v2 = vld [vmem:[#allocation4 + $0x38] sm:$0xff]  ;;  %v5019_v3 = vpack.c.bf16 %v226_v1, %v218_v0  ;;  %v219_v9 = vld [vmem:[#allocation4 + $0x30] sm:$0xff]  ;;  %v249_v32 = vld [vmem:[#allocation4 + $0x120] sm:$0xff] }
  0x7a   :  { %v228_v4 = vld [vmem:[#allocation4 + $0x78] sm:$0xff]  ;;  %v257_v33 = vld [vmem:[#allocation4 + $0x160] sm:$0xff]  ;;  %v259_v37 = vld [vmem:[#allocation4 + $0x170] sm:$0xff] }
  0x7b   :  { %v5051_v5 = vpack.c.bf16 %v228_v4, %v220_v2  ;;  %v252_v28 = vld [vmem:[#allocation4 + $0x138] sm:$0xff]  ;;  %v266_v38 = vld [vmem:[#allocation4 + $0x1a8] sm:$0xff]  ;;  %v265_v44 = vld [vmem:[#allocation4 + $0x1a0] sm:$0xff] }
  0x7c   :  { %4954 = vmatpush3.bf16.msra.mxu0 %v4951_v61  ;;  %4982 = vmatpush1.bf16.msra.mxu1 %v4981_v7  ;;  %v327_v61 = vld [vmem:[#allocation4 + $0x390] sm:$0xff]  ;;  %v217_v7 = vld [vmem:[#allocation4 + $0x20] sm:$0xff]  ;;  %v274_v39 = vld [vmem:[#allocation4 + $0x1e8] sm:$0xff] }
  0x7d   :  { %4988 = vmatprep.subr.bf16.mxu0 %v4987_v6  ;;  %4984 = vmatprep.subr.bf16.mxu1 %v4983_v10  ;;  %v5017_v63 = vpack.c.bf16 %v335_v62, %v327_v61  ;;  %v9607_v6 = vmov 0.0   ;;  %v227_v10 = vld [vmem:[#allocation4 + $0x70] sm:$0xff]  ;;  %v268_v40 = vld [vmem:[#allocation4 + $0x1b8] sm:$0xff]  ;;  %v273_v45 = vld [vmem:[#allocation4 + $0x1e0] sm:$0xff]  ;;  %v5031_v46 = vpack.c.bf16 %v274_v39, %v266_v38 }
  0x7e   :  { %447 = vmatprep.mubr.f32.mxu1 %v9607_v6  ;;  %v5053_v17 = vpack.c.bf16 %v227_v10, %v219_v9  ;;  %v275_v49 = vld [vmem:[#allocation4 + $0x1f0] sm:$0xff]  ;;  %v282_v50 = vld [vmem:[#allocation4 + $0x228] sm:$0xff]  ;;  %v284_v52 = vld [vmem:[#allocation4 + $0x238] sm:$0xff] }
  0x7f   :  { %v290_v51 = vld [vmem:[#allocation4 + $0x268] sm:$0xff]  ;;  %v281_v56 = vld [vmem:[#allocation4 + $0x220] sm:$0xff]  ;;  %v291_v61 = vld [vmem:[#allocation4 + $0x270] sm:$0xff] }
  0x80   :  { %4986 = vmatpush1.bf16.msra.mxu1 %v4985_v13  ;;  %v236_v13 = vld [vmem:[#allocation4 + $0xb8] sm:$0xff]  ;;  %v289_v57 = vld [vmem:[#allocation4 + $0x260] sm:$0xff]  ;;  %v5035_v58 = vpack.c.bf16 %v290_v51, %v282_v50  ;;  %v298_v62 = vld [vmem:[#allocation4 + $0x2a8] sm:$0xff] }
  0x81   :  { %5020 = vmatprep.subr.bf16.mxu1 %v5019_v3  ;;  %v300_v0 = vld [vmem:[#allocation4 + $0x2b8] sm:$0xff]  ;;  %v5037_v2 = vpack.c.bf16 %v289_v57, %v281_v56  ;;  %v297_v4 = vld [vmem:[#allocation4 + $0x2a0] sm:$0xff]  ;;  %v299_v9 = vld [vmem:[#allocation4 + $0x2b0] sm:$0xff] }
  0x82   :  { %v308_v1 = vld [vmem:[#allocation4 + $0x2f8] sm:$0xff]  ;;  %v307_v10 = vld [vmem:[#allocation4 + $0x2f0] sm:$0xff]  ;;  %v314_v11 = vld [vmem:[#allocation4 + $0x328] sm:$0xff] }
  0x83   :  { %v322_v12 = vld [vmem:[#allocation4 + $0x368] sm:$0xff]  ;;  %v707_v56 = vld [vmem:[#allocation6 + $0x80] sm:$0xff] }
  0x84   :  { %v692_v38 = vld [vmem:[#allocation6 + $0x8] sm:$0xff]  ;;  %v715_v57 = vld [vmem:[#allocation6 + $0xc0] sm:$0xff] }
  0x85   :  { %v700_v39 = vld [vmem:[#allocation6 + $0x48] sm:$0xff] }
  0x86   :  { %v708_v50 = vld [vmem:[#allocation6 + $0x88] sm:$0xff] }
  0x87   :  { %v716_v51 = vld [vmem:[#allocation6 + $0xc8] sm:$0xff] }
  0x88   :  { %v900_v14 = vld [vmem:[#allocation6 + $0x688] sm:$0xff] }
  0xdc   :  { %v112_v16 = vpop.permute.xlu0 %111 }
  0xdd   :  { %vm116_vm0 = vcmp.eq.s32.totalorder %v112_v16, %v109_v15  ;;  %v5021_v16 = vpack.c.bf16 %v225_v8, %v217_v7  ;;  %v5071_v8 = vpack.c.bf16 %v308_v1, %v300_v0  ;;  %v726_v0 = vld [vmem:[#allocation6 + $0x118] sm:$0xff] }
  0xde   :  { %4920 = vmatprep.mubr.msk.f32.mxu0 %vm116_vm0, %v7858_v21  ;;  %v734_v1 = vld [vmem:[#allocation6 + $0x158] sm:$0xff] }
  0xe0   :  { %v115_v23 = vpop.permute.xlu0 %114 }
  0xe1   :  { %vm117_vm1 = vcmp.eq.s32.totalorder %v115_v23, %v109_v15  ;;  %v244_v15 = vld [vmem:[#allocation4 + $0xf8] sm:$0xff]  ;;  %v250_v23 = vld [vmem:[#allocation4 + $0x128] sm:$0xff] }
  0xe2   :  { %4921 = vmatmul.mubr.msk.f32.vlgmr.msra.gmra.mrb[0].mxu0 %vm117_vm1, %v7858_v21  ;;  %v235_v21 = vld [vmem:[#allocation4 + $0xb0] sm:$0xff]  ;;  %v5055_v26 = vpack.c.bf16 %v244_v15, %v236_v13  ;;  %v5027_v34 = vpack.c.bf16 %v258_v27, %v250_v23  ;;  %v316_v13 = vld [vmem:[#allocation4 + $0x338] sm:$0xff]  ;;  %v338_v27 = vld [vmem:[#allocation4 + $0x3e8] sm:$0xff] }
  0xe3   :  { %4990 = vmatpush1.bf16.msra.mxu0 %v4989_v22  ;;  %524 = vmatprep.mubr.f32.mxu0 %v9607_v6  ;;  %v243_v22 = vld [vmem:[#allocation4 + $0xf0] sm:$0xff]  ;;  %v324_v15 = vld [vmem:[#allocation4 + $0x378] sm:$0xff] }
  0xe4   :  { %4992 = vmatprep.subr.bf16.mxu0 %v4991_v24  ;;  %v5057_v31 = vpack.c.bf16 %v243_v22, %v235_v21  ;;  %v5043_v21 = vpack.c.bf16 %v322_v12, %v314_v11  ;;  %v5075_v22 = vpack.c.bf16 %v324_v15, %v316_v13  ;;  %v315_v23 = vld [vmem:[#allocation4 + $0x330] sm:$0xff]  ;;  %v748_v11 = vld [vmem:[#allocation6 + $0x1c8] sm:$0xff]  ;;  %v742_v12 = vld [vmem:[#allocation6 + $0x198] sm:$0xff] }
  0xe5   :  { %v750_v13 = vld [vmem:[#allocation6 + $0x1d8] sm:$0xff] }
  0xe7   :  { %4994 = vmatpush1.bf16.msra.mxu0 %v4993_v29  ;;  %v260_v29 = vld [vmem:[#allocation4 + $0x178] sm:$0xff] }
  0xe8   :  { %4996 = vmatprep.subr.bf16.mxu0 %v4995_v30  ;;  %v5025_v30 = vpack.c.bf16 %v241_v19, %v233_v18  ;;  %v313_v18 = vld [vmem:[#allocation4 + $0x320] sm:$0xff] }
  0xe9   :  { %v321_v19 = vld [vmem:[#allocation4 + $0x360] sm:$0xff] }
  0xeb   :  { %4998 = vmatpush1.bf16.msra.mxu0 %v4997_v35  ;;  %v5059_v35 = vpack.c.bf16 %v260_v29, %v252_v28  ;;  %v332_v28 = vld [vmem:[#allocation4 + $0x3b8] sm:$0xff] }
  0xec   :  { %5000 = vmatprep.subr.bf16.mxu0 %v4999_v36  ;;  %v251_v36 = vld [vmem:[#allocation4 + $0x130] sm:$0xff]  ;;  %v340_v29 = vld [vmem:[#allocation4 + $0x3f8] sm:$0xff] }
  0xed   :  { %v5061_v43 = vpack.c.bf16 %v259_v37, %v251_v36  ;;  %v331_v36 = vld [vmem:[#allocation4 + $0x3b0] sm:$0xff] }
  0xee   :  { %v339_v37 = vld [vmem:[#allocation4 + $0x3f0] sm:$0xff] }
  0xef   :  { %5002 = vmatpush1.bf16.msra.mxu0 %v5001_v41  ;;  %v276_v41 = vld [vmem:[#allocation4 + $0x1f8] sm:$0xff] }
  0xf0   :  { %5004 = vmatprep.subr.bf16.mxu0 %v5003_v42  ;;  %v5029_v42 = vpack.c.bf16 %v257_v33, %v249_v32  ;;  %v329_v32 = vld [vmem:[#allocation4 + $0x3a0] sm:$0xff] }
  0xf1   :  { %v337_v33 = vld [vmem:[#allocation4 + $0x3e0] sm:$0xff] }
  0xf3   :  { %5006 = vmatpush1.bf16.msra.mxu0 %v5005_v47  ;;  %v5063_v47 = vpack.c.bf16 %v276_v41, %v268_v40  ;;  %v694_v40 = vld [vmem:[#allocation6 + $0x18] sm:$0xff] }
  0xf4   :  { %5008 = vmatprep.subr.bf16.mxu0 %v5007_v48  ;;  %v267_v48 = vld [vmem:[#allocation4 + $0x1b0] sm:$0xff]  ;;  %v702_v41 = vld [vmem:[#allocation6 + $0x58] sm:$0xff] }
  0xf5   :  { %v5065_v55 = vpack.c.bf16 %v275_v49, %v267_v48  ;;  %v693_v48 = vld [vmem:[#allocation6 + $0x10] sm:$0xff] }
  0xf6   :  { %v701_v49 = vld [vmem:[#allocation6 + $0x50] sm:$0xff] }
  0xf7   :  { %5010 = vmatpush1.bf16.msra.mxu0 %v5009_v53  ;;  %v292_v53 = vld [vmem:[#allocation4 + $0x278] sm:$0xff] }
  0xf8   :  { %5012 = vmatprep.subr.bf16.mxu0 %v5011_v54  ;;  %v5033_v54 = vpack.c.bf16 %v273_v45, %v265_v44  ;;  %v691_v44 = vld [vmem:[#allocation6] sm:$0xff]  ;;  %v8007_v45 = vpack.c.bf16 %v700_v39, %v692_v38  ;;  %v774_v38 = vld [vmem:[#allocation6 + $0x298] sm:$0xff] }
  0xf9   :  { %v782_v39 = vld [vmem:[#allocation6 + $0x2d8] sm:$0xff] }
  0xfa   :  { %9909 = vst [vmem:[#allocation13_spill] sm:$0xff] %v8007_v45 }
  0xfb   :  { %5014 = vmatpush1.bf16.msra.mxu0 %v5013_v59  ;;  %v5067_v59 = vpack.c.bf16 %v292_v53, %v284_v52  ;;  %v710_v52 = vld [vmem:[#allocation6 + $0x98] sm:$0xff] }
  0xfc   :  { %5016 = vmatprep.subr.bf16.mxu0 %v5015_v60  ;;  %v283_v60 = vld [vmem:[#allocation4 + $0x230] sm:$0xff]  ;;  %v718_v53 = vld [vmem:[#allocation6 + $0xd8] sm:$0xff] }
  0xfd   :  { %v5069_v3 = vpack.c.bf16 %v291_v61, %v283_v60  ;;  %v724_v60 = vld [vmem:[#allocation6 + $0x108] sm:$0xff]  ;;  %v8017_v61 = vpack.c.bf16 %v716_v51, %v708_v50 }
  0xfe   :  { %v788_v50 = vld [vmem:[#allocation6 + $0x308] sm:$0xff] }
  0xff   :  { %5018 = vmatpush1.bf16.msra.mxu0 %v5017_v63  ;;  %v306_v63 = vld [vmem:[#allocation4 + $0x2e8] sm:$0xff]  ;;  %9913 = vst [vmem:[#allocation17_spill] sm:$0xff] %v8017_v61 }
 0x100   :  { %5052 = vmatprep.subr.bf16.mxu0 %v5051_v5  ;;  %v305_v5 = vld [vmem:[#allocation4 + $0x2e0] sm:$0xff]  ;;  %v5039_v7 = vpack.c.bf16 %v306_v63, %v298_v62  ;;  %v8019_v62 = vpack.c.bf16 %v718_v53, %v710_v52  ;;  %v732_v63 = vld [vmem:[#allocation6 + $0x148] sm:$0xff]  ;;  %v790_v52 = vld [vmem:[#allocation6 + $0x318] sm:$0xff] }
 0x101   :  { %v796_v51 = vld [vmem:[#allocation6 + $0x348] sm:$0xff]  ;;  %v798_v53 = vld [vmem:[#allocation6 + $0x358] sm:$0xff] }
 0x102   :  { %9914 = vst [vmem:[#allocation18_spill] sm:$0xff] %v8019_v62 }
 0x1b5   :  { %v7995_v20 = vpop.f32.mrb[0].mxu0 }
 0x1b6   :  { %v7997_v24 = vpop.f32.mrb[1].mxu0 }
 0x1b7   :  { %448 = vmatmul.mubr.f32.vlgmr.msra.gmra.mrb[0].mxu1 %v7997_v24  ;;  %525 = vmatmul.mubr.f32.vlgmr.msra.gmra.mrb[2].mxu0 %v7997_v24 }
 0x1b8   :  { %5022 = vmatpush1.bf16.msra.mxu1 %v5021_v16  ;;  %5054 = vmatpush1.bf16.msra.mxu0 %v5053_v17  ;;  %v5041_v16 = vpack.c.bf16 %v305_v5, %v297_v4  ;;  %v5073_v17 = vpack.c.bf16 %v307_v10, %v299_v9  ;;  %v723_v4 = vld [vmem:[#allocation6 + $0x100] sm:$0xff]  ;;  %v725_v9 = vld [vmem:[#allocation6 + $0x110] sm:$0xff]  ;;  %v740_v10 = vld [vmem:[#allocation6 + $0x188] sm:$0xff] }
 0x1b9   :  { %453 = vmatprep.mubr.f32.mxu1 %v9607_v6  ;;  %530 = vmatprep.mubr.f32.mxu0 %v9607_v6  ;;  %v731_v5 = vld [vmem:[#allocation6 + $0x140] sm:$0xff] }
 0x1ba   :  { %5024 = vmatprep.subr.bf16.mxu1 %v5023_v25  ;;  %5056 = vmatprep.subr.bf16.mxu0 %v5055_v26  ;;  %v323_v25 = vld [vmem:[#allocation4 + $0x370] sm:$0xff]  ;;  %v330_v26 = vld [vmem:[#allocation4 + $0x3a8] sm:$0xff]  ;;  %v8041_v15 = vpack.c.bf16 %v731_v5, %v723_v4 }
 0x1bb   :  { %454 = vmatmul.mubr.f32.gmra.mrb[2].mxu1 %v7995_v20  ;;  %531 = vmatmul.mubr.f32.gmra.mrb[4].mxu0 %v7995_v20  ;;  %v804_v4 = vld [vmem:[#allocation6 + $0x388] sm:$0xff] }
 0x1bc   :  { %5026 = vmatpush1.bf16.msra.mxu1 %v5025_v30  ;;  %5058 = vmatpush1.bf16.msra.mxu0 %v5057_v31  ;;  %v5045_v30 = vpack.c.bf16 %v321_v19, %v313_v18  ;;  %v5077_v31 = vpack.c.bf16 %v323_v25, %v315_v23  ;;  %9919 = vst [vmem:[#allocation23_spill] sm:$0xff] %v8041_v15  ;;  %v747_v18 = vld [vmem:[#allocation6 + $0x1c0] sm:$0xff]  ;;  %v756_v23 = vld [vmem:[#allocation6 + $0x208] sm:$0xff] }
 0x1bd   :  { %5028 = vmatprep.subr.bf16.mxu1 %v5027_v34  ;;  %5060 = vmatprep.subr.bf16.mxu0 %v5059_v35  ;;  %v5047_v34 = vpack.c.bf16 %v338_v27, %v330_v26  ;;  %v5079_v35 = vpack.c.bf16 %v340_v29, %v332_v28  ;;  %v8047_v19 = vpack.c.bf16 %v748_v11, %v740_v10  ;;  %v764_v25 = vld [vmem:[#allocation6 + $0x248] sm:$0xff]  ;;  %v758_v26 = vld [vmem:[#allocation6 + $0x218] sm:$0xff] }
 0x1be   :  { %601 = vmatprep.mubr.f32.mxu1 %v9607_v6  ;;  %678 = vmatprep.mubr.f32.mxu0 %v9607_v6  ;;  %v766_v27 = vld [vmem:[#allocation6 + $0x258] sm:$0xff]  ;;  %v812_v5 = vld [vmem:[#allocation6 + $0x3c8] sm:$0xff] }
 0x1bf   :  { %9921 = vst [vmem:[#allocation25_spill] sm:$0xff] %v8047_v19 }
 0x1c0   :  { %5030 = vmatpush1.bf16.msra.mxu1 %v5029_v42  ;;  %5062 = vmatpush1.bf16.msra.mxu0 %v5061_v43  ;;  %v5049_v42 = vpack.c.bf16 %v337_v33, %v329_v32  ;;  %v5081_v43 = vpack.c.bf16 %v339_v37, %v331_v36  ;;  %v8061_v32 = vpack.c.bf16 %v764_v25, %v756_v23  ;;  %v772_v36 = vld [vmem:[#allocation6 + $0x288] sm:$0xff] }
 0x1c1   :  { %5032 = vmatprep.subr.bf16.mxu1 %v5031_v46  ;;  %5064 = vmatprep.subr.bf16.mxu0 %v5063_v47  ;;  %v8009_v46 = vpack.c.bf16 %v702_v41, %v694_v40  ;;  %v699_v47 = vld [vmem:[#allocation6 + $0x40] sm:$0xff]  ;;  %v8063_v33 = vpack.c.bf16 %v766_v27, %v758_v26  ;;  %v780_v37 = vld [vmem:[#allocation6 + $0x2c8] sm:$0xff]  ;;  %v822_v26 = vld [vmem:[#allocation6 + $0x418] sm:$0xff] }
 0x1c2   :  { %9925 = vst [vmem:[#allocation29_spill] sm:$0xff] %v8061_v32  ;;  %v820_v23 = vld [vmem:[#allocation6 + $0x408] sm:$0xff]  ;;  %v830_v27 = vld [vmem:[#allocation6 + $0x458] sm:$0xff] }
 0x1c3   :  { %9910 = vst [vmem:[#allocation14_spill] sm:$0xff] %v8009_v46  ;;  %9926 = vst [vmem:[#allocation30_spill] sm:$0xff] %v8063_v33  ;;  %v828_v25 = vld [vmem:[#allocation6 + $0x448] sm:$0xff] }
 0x1c4   :  { %5034 = vmatpush1.bf16.msra.mxu1 %v5033_v54  ;;  %5066 = vmatpush1.bf16.msra.mxu0 %v5065_v55  ;;  %v8011_v54 = vpack.c.bf16 %v699_v47, %v691_v44  ;;  %v8013_v55 = vpack.c.bf16 %v701_v49, %v693_v48  ;;  %v8073_v44 = vpack.c.bf16 %v780_v37, %v772_v36  ;;  %v773_v48 = vld [vmem:[#allocation6 + $0x290] sm:$0xff] }
 0x1c5   :  { %5036 = vmatprep.subr.bf16.mxu1 %v5035_v58  ;;  %5068 = vmatprep.subr.bf16.mxu0 %v5067_v59  ;;  %v709_v58 = vld [vmem:[#allocation6 + $0x90] sm:$0xff]  ;;  %v8075_v47 = vpack.c.bf16 %v782_v39, %v774_v38  ;;  %v8109_v36 = vpack.c.bf16 %v828_v25, %v820_v23  ;;  %v8111_v37 = vpack.c.bf16 %v830_v27, %v822_v26 }
 0x1c6   :  { %9911 = vst [vmem:[#allocation15_spill] sm:$0xff] %v8011_v54  ;;  %9912 = vst [vmem:[#allocation16_spill] sm:$0xff] %v8013_v55  ;;  %v717_v59 = vld [vmem:[#allocation6 + $0xd0] sm:$0xff] }
 0x1c7   :  { %9929 = vst [vmem:[#allocation33_spill] sm:$0xff] %v8073_v44  ;;  %9930 = vst [vmem:[#allocation34_spill] sm:$0xff] %v8075_v47  ;;  %v781_v49 = vld [vmem:[#allocation6 + $0x2d0] sm:$0xff] }
 0x1c8   :  { %5038 = vmatpush1.bf16.msra.mxu1 %v5037_v2  ;;  %5070 = vmatpush1.bf16.msra.mxu0 %v5069_v3  ;;  %v8025_v2 = vpack.c.bf16 %v715_v57, %v707_v56  ;;  %v8027_v3 = vpack.c.bf16 %v717_v59, %v709_v58  ;;  %v8081_v57 = vpack.c.bf16 %v781_v49, %v773_v48  ;;  %v787_v58 = vld [vmem:[#allocation6 + $0x300] sm:$0xff]  ;;  %v821_v38 = vld [vmem:[#allocation6 + $0x410] sm:$0xff]  ;;  %v838_v48 = vld [vmem:[#allocation6 + $0x498] sm:$0xff] }
 0x1c9   :  { %5040 = vmatprep.subr.bf16.mxu1 %v5039_v7  ;;  %5072 = vmatprep.subr.bf16.mxu0 %v5071_v8  ;;  %v8031_v7 = vpack.c.bf16 %v732_v63, %v724_v60  ;;  %v8033_v8 = vpack.c.bf16 %v734_v1, %v726_v0  ;;  %v795_v59 = vld [vmem:[#allocation6 + $0x340] sm:$0xff]  ;;  %v8085_v60 = vpack.c.bf16 %v796_v51, %v788_v50  ;;  %v789_v0 = vld [vmem:[#allocation6 + $0x310] sm:$0xff]  ;;  %v846_v49 = vld [vmem:[#allocation6 + $0x4d8] sm:$0xff] }
 0x1ca   :  { %9915 = vst [vmem:[#allocation19_spill] sm:$0xff] %v8025_v2  ;;  %9916 = vst [vmem:[#allocation20_spill] sm:$0xff] %v8027_v3  ;;  %v8087_v63 = vpack.c.bf16 %v798_v53, %v790_v52  ;;  %v797_v1 = vld [vmem:[#allocation6 + $0x350] sm:$0xff]  ;;  %v8091_v10 = vpack.c.bf16 %v795_v59, %v787_v58  ;;  %v835_v52 = vld [vmem:[#allocation6 + $0x480] sm:$0xff]  ;;  %v8123_v59 = vpack.c.bf16 %v846_v49, %v838_v48 }
 0x1cb   :  { %9917 = vst [vmem:[#allocation21_spill] sm:$0xff] %v8031_v7  ;;  %9918 = vst [vmem:[#allocation22_spill] sm:$0xff] %v8033_v8  ;;  %v8093_v11 = vpack.c.bf16 %v797_v1, %v789_v0  ;;  %v829_v39 = vld [vmem:[#allocation6 + $0x450] sm:$0xff]  ;;  %v843_v53 = vld [vmem:[#allocation6 + $0x4c0] sm:$0xff] }
 0x1cc   :  { %5042 = vmatpush1.bf16.msra.mxu1 %v5041_v16  ;;  %5074 = vmatpush1.bf16.msra.mxu0 %v5073_v17  ;;  %v739_v17 = vld [vmem:[#allocation6 + $0x180] sm:$0xff]  ;;  %9932 = vst [vmem:[#allocation36_spill] sm:$0xff] %v8081_v57  ;;  %9933 = vst [vmem:[#allocation37_spill] sm:$0xff] %v8085_v60  ;;  %v8117_v51 = vpack.c.bf16 %v829_v39, %v821_v38  ;;  %v837_v0 = vld [vmem:[#allocation6 + $0x490] sm:$0xff] }
 0x1cd   :  { %5044 = vmatprep.subr.bf16.mxu1 %v5043_v21  ;;  %5076 = vmatprep.subr.bf16.mxu0 %v5075_v22  ;;  %v8049_v21 = vpack.c.bf16 %v750_v13, %v742_v12  ;;  %v741_v22 = vld [vmem:[#allocation6 + $0x190] sm:$0xff]  ;;  %v8055_v28 = vpack.c.bf16 %v747_v18, %v739_v17  ;;  %9934 = vst [vmem:[#allocation38_spill] sm:$0xff] %v8087_v63  ;;  %9935 = vst [vmem:[#allocation39_spill] sm:$0xff] %v8091_v10  ;;  %v803_v12 = vld [vmem:[#allocation6 + $0x380] sm:$0xff] }
 0x1ce   :  { %9936 = vst [vmem:[#allocation40_spill] sm:$0xff] %v8093_v11  ;;  %v811_v13 = vld [vmem:[#allocation6 + $0x3c0] sm:$0xff]  ;;  %v8097_v17 = vpack.c.bf16 %v812_v5, %v804_v4  ;;  %9941 = vst [vmem:[#allocation45_spill] sm:$0xff] %v8109_v36  ;;  %v845_v1 = vld [vmem:[#allocation6 + $0x4d0] sm:$0xff] }
 0x1cf   :  { %9922 = vst [vmem:[#allocation26_spill] sm:$0xff] %v8049_v21  ;;  %9923 = vst [vmem:[#allocation27_spill] sm:$0xff] %v8055_v28  ;;  %v852_v4 = vld [vmem:[#allocation6 + $0x508] sm:$0xff]  ;;  %v853_v26 = vld [vmem:[#allocation6 + $0x510] sm:$0xff] }
 0x1d0   :  { %5046 = vmatpush1.bf16.msra.mxu1 %v5045_v30  ;;  %5078 = vmatpush1.bf16.msra.mxu0 %v5077_v31  ;;  %v755_v30 = vld [vmem:[#allocation6 + $0x200] sm:$0xff]  ;;  %9937 = vst [vmem:[#allocation41_spill] sm:$0xff] %v8097_v17  ;;  %9942 = vst [vmem:[#allocation46_spill] sm:$0xff] %v8111_v37  ;;  %v860_v5 = vld [vmem:[#allocation6 + $0x548] sm:$0xff] }
 0x1d1   :  { %5048 = vmatprep.subr.bf16.mxu1 %v5047_v34  ;;  %5080 = vmatprep.subr.bf16.mxu0 %v5079_v35  ;;  %v763_v31 = vld [vmem:[#allocation6 + $0x240] sm:$0xff]  ;;  %v757_v34 = vld [vmem:[#allocation6 + $0x210] sm:$0xff]  ;;  %9944 = vst [vmem:[#allocation48_spill] sm:$0xff] %v8117_v51  ;;  %9946 = vst [vmem:[#allocation50_spill] sm:$0xff] %v8123_v59  ;;  %v8133_v23 = vpack.c.bf16 %v860_v5, %v852_v4 }
 0x1d2   :  { %v765_v35 = vld [vmem:[#allocation6 + $0x250] sm:$0xff]  ;;  %v8067_v40 = vpack.c.bf16 %v763_v31, %v755_v30  ;;  %v8103_v30 = vpack.c.bf16 %v811_v13, %v803_v12  ;;  %v8127_v12 = vpack.c.bf16 %v843_v53, %v835_v52  ;;  %v8129_v13 = vpack.c.bf16 %v845_v1, %v837_v0  ;;  %v870_v38 = vld [vmem:[#allocation6 + $0x598] sm:$0xff]  ;;  %v867_v48 = vld [vmem:[#allocation6 + $0x580] sm:$0xff] }
 0x1d3   :  { %v8069_v41 = vpack.c.bf16 %v765_v35, %v757_v34  ;;  %v819_v34 = vld [vmem:[#allocation6 + $0x400] sm:$0xff]  ;;  %9949 = vst [vmem:[#allocation53_spill] sm:$0xff] %v8133_v23  ;;  %v861_v27 = vld [vmem:[#allocation6 + $0x550] sm:$0xff]  ;;  %v878_v39 = vld [vmem:[#allocation6 + $0x5d8] sm:$0xff] }
 0x1d4   :  { %5050 = vmatpush1.bf16.msra.mxu1 %v5049_v42  ;;  %5082 = vmatpush1.bf16.msra.mxu0 %v5081_v43  ;;  %9927 = vst [vmem:[#allocation31_spill] sm:$0xff] %v8067_v40  ;;  %v771_v42 = vld [vmem:[#allocation6 + $0x280] sm:$0xff]  ;;  %9939 = vst [vmem:[#allocation43_spill] sm:$0xff] %v8103_v30  ;;  %v8147_v53 = vpack.c.bf16 %v878_v39, %v870_v38  ;;  %v869_v0 = vld [vmem:[#allocation6 + $0x590] sm:$0xff] }
 0x1d5   :  { %5084 = vmatprep.subr.bf16.mxu1 %v8007_v45  ;;  %5148 = vmatprep.subr.bf16.mxu0 %v8009_v46  ;;  %9928 = vst [vmem:[#allocation32_spill] sm:$0xff] %v8069_v41  ;;  %v779_v43 = vld [vmem:[#allocation6 + $0x2c0] sm:$0xff]  ;;  %9947 = vst [vmem:[#allocation51_spill] sm:$0xff] %v8127_v12  ;;  %v877_v1 = vld [vmem:[#allocation6 + $0x5d0] sm:$0xff] }
 0x1d6   :  { %v8079_v56 = vpack.c.bf16 %v779_v43, %v771_v42  ;;  %v827_v35 = vld [vmem:[#allocation6 + $0x440] sm:$0xff]  ;;  %v836_v42 = vld [vmem:[#allocation6 + $0x488] sm:$0xff]  ;;  %9948 = vst [vmem:[#allocation52_spill] sm:$0xff] %v8129_v13  ;;  %9954 = vst [vmem:[#allocation58_spill] sm:$0xff] %v8147_v53 }
 0x1d7   :  { %602 = vmatmul.mubr.f32.vlgmr.msra.gmra.mrb[4].mxu1 %v7997_v24  ;;  %679 = vmatmul.mubr.f32.vlgmr.msra.gmra.mrb[6].mxu0 %v7997_v24  ;;  %v733_v24 = vld [vmem:[#allocation6 + $0x150] sm:$0xff]  ;;  %v844_v43 = vld [vmem:[#allocation6 + $0x4c8] sm:$0xff]  ;;  %v8115_v50 = vpack.c.bf16 %v827_v35, %v819_v34  ;;  %v875_v49 = vld [vmem:[#allocation6 + $0x5c0] sm:$0xff] }
 0x1d8   :  { %5086 = vmatpush1.bf16.msra.mxu1 %v8011_v54  ;;  %5150 = vmatpush1.bf16.msra.mxu0 %v8013_v55  ;;  %v8043_v16 = vpack.c.bf16 %v733_v24, %v725_v9  ;;  %9931 = vst [vmem:[#allocation35_spill] sm:$0xff] %v8079_v56  ;;  %v806_v9 = vld [vmem:[#allocation6 + $0x398] sm:$0xff]  ;;  %v8121_v58 = vpack.c.bf16 %v844_v43, %v836_v42  ;;  %v868_v34 = vld [vmem:[#allocation6 + $0x588] sm:$0xff]  ;;  %v885_v38 = vld [vmem:[#allocation6 + $0x610] sm:$0xff] }
 0x1d9   :  { %607 = vmatprep.mubr.f32.mxu1 %v9607_v6  ;;  %684 = vmatprep.mubr.f32.mxu0 %v9607_v6  ;;  %v814_v24 = vld [vmem:[#allocation6 + $0x3d8] sm:$0xff]  ;;  %9943 = vst [vmem:[#allocation47_spill] sm:$0xff] %v8115_v50  ;;  %v876_v35 = vld [vmem:[#allocation6 + $0x5c8] sm:$0xff]  ;;  %v8141_v43 = vpack.c.bf16 %v861_v27, %v853_v26  ;;  %v883_v26 = vld [vmem:[#allocation6 + $0x600] sm:$0xff] }
 0x1da   :  { %5088 = vmatprep.subr.bf16.mxu1 %v8017_v61  ;;  %5152 = vmatprep.subr.bf16.mxu0 %v8019_v62  ;;  %9920 = vst [vmem:[#allocation24_spill] sm:$0xff] %v8043_v16  ;;  %v8099_v18 = vpack.c.bf16 %v814_v24, %v806_v9  ;;  %9945 = vst [vmem:[#allocation49_spill] sm:$0xff] %v8121_v58  ;;  %v854_v9 = vld [vmem:[#allocation6 + $0x518] sm:$0xff]  ;;  %v8145_v52 = vpack.c.bf16 %v876_v35, %v868_v34  ;;  %v884_v4 = vld [vmem:[#allocation6 + $0x608] sm:$0xff] }
 0x1db   :  { %608 = vmatmul.mubr.f32.gmra.mrb[6].mxu1 %v7995_v20  ;;  %685 = vmatmul.mubr.f32.gmra.mrb[8].mxu0 %v7995_v20  ;;  %v749_v20 = vld [vmem:[#allocation6 + $0x1d0] sm:$0xff]  ;;  %v862_v24 = vld [vmem:[#allocation6 + $0x558] sm:$0xff]  ;;  %9952 = vst [vmem:[#allocation56_spill] sm:$0xff] %v8141_v43  ;;  %v892_v5 = vld [vmem:[#allocation6 + $0x648] sm:$0xff] }
 0x1dc   :  { %5090 = vmatpush1.bf16.msra.mxu1 %v8025_v2  ;;  %5154 = vmatpush1.bf16.msra.mxu0 %v8027_v3  ;;  %v8057_v29 = vpack.c.bf16 %v749_v20, %v741_v22  ;;  %9938 = vst [vmem:[#allocation42_spill] sm:$0xff] %v8099_v18  ;;  %v805_v22 = vld [vmem:[#allocation6 + $0x390] sm:$0xff]  ;;  %v8135_v25 = vpack.c.bf16 %v862_v24, %v854_v9  ;;  %9953 = vst [vmem:[#allocation57_spill] sm:$0xff] %v8145_v52  ;;  %v886_v9 = vld [vmem:[#allocation6 + $0x618] sm:$0xff] }
 0x1dd   :  { %5092 = vmatprep.subr.bf16.mxu1 %v8031_v7  ;;  %5156 = vmatprep.subr.bf16.mxu0 %v8033_v8  ;;  %v813_v20 = vld [vmem:[#allocation6 + $0x3d0] sm:$0xff]  ;;  %v894_v24 = vld [vmem:[#allocation6 + $0x658] sm:$0xff]  ;;  %v891_v27 = vld [vmem:[#allocation6 + $0x640] sm:$0xff]  ;;  %v8157_v34 = vpack.c.bf16 %v892_v5, %v884_v4 }
 0x1de   :  { %1011 = vmatprep.mubr.f32.mxu1 %v9607_v6  ;;  %1082 = vmatprep.mubr.f32.mxu0 %v9607_v6  ;;  %9924 = vst [vmem:[#allocation28_spill] sm:$0xff] %v8057_v29  ;;  %v8105_v31 = vpack.c.bf16 %v813_v20, %v805_v22  ;;  %v851_v22 = vld [vmem:[#allocation6 + $0x500] sm:$0xff]  ;;  %9950 = vst [vmem:[#allocation54_spill] sm:$0xff] %v8135_v25  ;;  %v8159_v35 = vpack.c.bf16 %v894_v24, %v886_v9  ;;  %v893_v39 = vld [vmem:[#allocation6 + $0x650] sm:$0xff] }
 0x1df   :  { %v859_v20 = vld [vmem:[#allocation6 + $0x540] sm:$0xff]  ;;  %9957 = vst [vmem:[#allocation61_spill] sm:$0xff] %v8157_v34  ;;  %v908_v6 = vld [vmem:[#allocation6 + $0x6c8] sm:$0xff]  ;;  %v901_v9 = vld [vmem:[#allocation6 + $0x690] sm:$0xff] }
 0x1e0   :  { %5094 = vmatpush1.bf16.msra.mxu1 %v8041_v15  ;;  %5158 = vmatpush1.bf16.msra.mxu0 %v8043_v16  ;;  %9940 = vst [vmem:[#allocation44_spill] sm:$0xff] %v8105_v31  ;;  %v8139_v42 = vpack.c.bf16 %v859_v20, %v851_v22  ;;  %v8151_v22 = vpack.c.bf16 %v875_v49, %v867_v48  ;;  %9958 = vst [vmem:[#allocation62_spill] sm:$0xff] %v8159_v35  ;;  %v909_v24 = vld [vmem:[#allocation6 + $0x6d0] sm:$0xff] }
 0x1e1   :  { %5096 = vmatprep.subr.bf16.mxu1 %v8047_v19  ;;  %5160 = vmatprep.subr.bf16.mxu0 %v8049_v21  ;;  %v8153_v20 = vpack.c.bf16 %v877_v1, %v869_v0  ;;  %v8163_v48 = vpack.c.bf16 %v891_v27, %v883_v26  ;;  %v8165_v49 = vpack.c.bf16 %v893_v39, %v885_v38  ;;  %v899_v0 = vld [vmem:[#allocation6 + $0x680] sm:$0xff] }
 0x1e2   :  { %9951 = vst [vmem:[#allocation55_spill] sm:$0xff] %v8139_v42  ;;  %9955 = vst [vmem:[#allocation59_spill] sm:$0xff] %v8151_v22  ;;  %v907_v1 = vld [vmem:[#allocation6 + $0x6c0] sm:$0xff]  ;;  %v8169_v4 = vpack.c.bf16 %v908_v6, %v900_v14  ;;  %v8177_v27 = vpack.c.bf16 %v909_v24, %v901_v9 }
 0x1e3   :  { %9956 = vst [vmem:[#allocation60_spill] sm:$0xff] %v8153_v20  ;;  %9959 = vst [vmem:[#allocation63_spill] sm:$0xff] %v8163_v48  ;;  %v8175_v26 = vpack.c.bf16 %v907_v1, %v899_v0  ;;  %v915_v38 = vld [vmem:[#allocation6 + $0x700] sm:$0xff] }
 0x1e4   :  { %5098 = vmatpush1.bf16.msra.mxu1 %v8055_v28  ;;  %5162 = vmatpush1.bf16.msra.mxu0 %v8057_v29  ;;  %9960 = vst [vmem:[#allocation64_spill] sm:$0xff] %v8165_v49  ;;  %9961 = vst [vmem:[#allocation65_spill] sm:$0xff] %v8169_v4  ;;  %v923_v39 = vld [vmem:[#allocation6 + $0x740] sm:$0xff] }
 0x1e5   :  { %5100 = vmatprep.subr.bf16.mxu1 %v8061_v32  ;;  %5164 = vmatprep.subr.bf16.mxu0 %v8063_v33  ;;  %9963 = vst [vmem:[#allocation67_spill] sm:$0xff] %v8175_v26  ;;  %9964 = vst [vmem:[#allocation68_spill] sm:$0xff] %v8177_v27  ;;  %v8187_v0 = vpack.c.bf16 %v923_v39, %v915_v38  ;;  %v931_v9 = vld [vmem:[#allocation6 + $0x780] sm:$0xff] }
 0x1e6   :  { %v939_v24 = vld [vmem:[#allocation6 + $0x7c0] sm:$0xff] }
 0x1e7   :  { %9967 = vst [vmem:[#allocation71_spill] sm:$0xff] %v8187_v0  ;;  %v8199_v38 = vpack.c.bf16 %v939_v24, %v931_v9 }
 0x1e8   :  { %5102 = vmatpush1.bf16.msra.mxu1 %v8067_v40  ;;  %5166 = vmatpush1.bf16.msra.mxu0 %v8069_v41 }
 0x1e9   :  { %5104 = vmatprep.subr.bf16.mxu1 %v8073_v44  ;;  %5168 = vmatprep.subr.bf16.mxu0 %v8075_v47  ;;  %9971 = vst [vmem:[#allocation75_spill] sm:$0xff] %v8199_v38 }
 0x1ec   :  { %5106 = vmatpush1.bf16.msra.mxu1 %v8079_v56  ;;  %5170 = vmatpush1.bf16.msra.mxu0 %v8081_v57 }
 0x1ed   :  { %5108 = vmatprep.subr.bf16.mxu1 %v8085_v60  ;;  %5172 = vmatprep.subr.bf16.mxu0 %v8087_v63 }
 0x1f0   :  { %5110 = vmatpush1.bf16.msra.mxu1 %v8091_v10  ;;  %5174 = vmatpush1.bf16.msra.mxu0 %v8093_v11 }
 0x1f1   :  { %5112 = vmatprep.subr.bf16.mxu1 %v8097_v17  ;;  %5176 = vmatprep.subr.bf16.mxu0 %v8099_v18 }
 0x1f4   :  { %5114 = vmatpush1.bf16.msra.mxu1 %v8103_v30  ;;  %5178 = vmatpush1.bf16.msra.mxu0 %v8105_v31 }
 0x1f5   :  { %5116 = vmatprep.subr.bf16.mxu1 %v8109_v36  ;;  %5180 = vmatprep.subr.bf16.mxu0 %v8111_v37 }
 0x1f8   :  { %5118 = vmatpush1.bf16.msra.mxu1 %v8115_v50  ;;  %5182 = vmatpush1.bf16.msra.mxu0 %v8117_v51 }
 0x1f9   :  { %5120 = vmatprep.subr.bf16.mxu1 %v8121_v58  ;;  %5184 = vmatprep.subr.bf16.mxu0 %v8123_v59 }
 0x1fc   :  { %5122 = vmatpush1.bf16.msra.mxu1 %v8127_v12  ;;  %5186 = vmatpush1.bf16.msra.mxu0 %v8129_v13 }
 0x1fd   :  { %5124 = vmatprep.subr.bf16.mxu1 %v8133_v23  ;;  %5188 = vmatprep.subr.bf16.mxu0 %v8135_v25  ;;  %v746_v25 = vld [vmem:[#allocation6 + $0x1b8] sm:$0xff] }
 0x200   :  { %5126 = vmatpush1.bf16.msra.mxu1 %v8139_v42  ;;  %5190 = vmatpush1.bf16.msra.mxu0 %v8141_v43  ;;  %v902_v42 = vld [vmem:[#allocation6 + $0x698] sm:$0xff] }
 0x201   :  { %5128 = vmatprep.subr.bf16.mxu1 %v8145_v52  ;;  %5192 = vmatprep.subr.bf16.mxu0 %v8147_v53  ;;  %v910_v43 = vld [vmem:[#allocation6 + $0x6d8] sm:$0xff]  ;;  %v916_v53 = vld [vmem:[#allocation6 + $0x708] sm:$0xff] }
 0x202   :  { %v8171_v5 = vpack.c.bf16 %v910_v43, %v902_v42  ;;  %v918_v52 = vld [vmem:[#allocation6 + $0x718] sm:$0xff]  ;;  %v917_v42 = vld [vmem:[#allocation6 + $0x710] sm:$0xff] }
 0x203   :  { %v925_v43 = vld [vmem:[#allocation6 + $0x750] sm:$0xff] }
 0x204   :  { %5130 = vmatpush1.bf16.msra.mxu1 %v8151_v22  ;;  %5194 = vmatpush1.bf16.msra.mxu0 %v8153_v20  ;;  %9962 = vst [vmem:[#allocation66_spill] sm:$0xff] %v8171_v5  ;;  %v924_v22 = vld [vmem:[#allocation6 + $0x748] sm:$0xff]  ;;  %v926_v20 = vld [vmem:[#allocation6 + $0x758] sm:$0xff]  ;;  %v8189_v1 = vpack.c.bf16 %v925_v43, %v917_v42  ;;  %v695_v42 = vld [vmem:[#allocation6 + $0x20] sm:$0xff] }
 0x205   :  { %5132 = vmatprep.subr.bf16.mxu1 %v8157_v34  ;;  %5196 = vmatprep.subr.bf16.mxu0 %v8159_v35  ;;  %v8181_v14 = vpack.c.bf16 %v924_v22, %v916_v53  ;;  %v8183_v6 = vpack.c.bf16 %v926_v20, %v918_v52  ;;  %v932_v35 = vld [vmem:[#allocation6 + $0x788] sm:$0xff]  ;;  %v934_v34 = vld [vmem:[#allocation6 + $0x798] sm:$0xff]  ;;  %v933_v22 = vld [vmem:[#allocation6 + $0x790] sm:$0xff] }
 0x206   :  { %9968 = vst [vmem:[#allocation72_spill] sm:$0xff] %v8189_v1  ;;  %v941_v20 = vld [vmem:[#allocation6 + $0x7d0] sm:$0xff]  ;;  %v703_v43 = vld [vmem:[#allocation6 + $0x60] sm:$0xff] }
 0x207   :  { %9965 = vst [vmem:[#allocation69_spill] sm:$0xff] %v8181_v14  ;;  %9966 = vst [vmem:[#allocation70_spill] sm:$0xff] %v8183_v6  ;;  %v8201_v39 = vpack.c.bf16 %v941_v20, %v933_v22  ;;  %v8211_v9 = vpack.c.bf16 %v703_v43, %v695_v42  ;;  %v711_v22 = vld [vmem:[#allocation6 + $0xa0] sm:$0xff]  ;;  %v9979_v42 = vmov 0.0  }
 0x208   :  { %5134 = vmatpush1.bf16.msra.mxu1 %v8163_v48  ;;  %5198 = vmatpush1.bf16.msra.mxu0 %v8165_v49  ;;  %v940_v48 = vld [vmem:[#allocation6 + $0x7c8] sm:$0xff]  ;;  %v942_v49 = vld [vmem:[#allocation6 + $0x7d8] sm:$0xff]  ;;  %v719_v20 = vld [vmem:[#allocation6 + $0xe0] sm:$0xff] }
 0x209   :  { %5136 = vmatprep.subr.bf16.mxu1 %v8169_v4  ;;  %5200 = vmatprep.subr.bf16.mxu0 %v8171_v5  ;;  %v8193_v52 = vpack.c.bf16 %v940_v48, %v932_v35  ;;  %v8195_v53 = vpack.c.bf16 %v942_v49, %v934_v34  ;;  %v696_v5 = vld [vmem:[#allocation6 + $0x28] sm:$0xff]  ;;  %v698_v4 = vld [vmem:[#allocation6 + $0x38] sm:$0xff]  ;;  %9972 = vst [vmem:[#allocation76_spill] sm:$0xff] %v8201_v39  ;;  %v697_v48 = vld [vmem:[#allocation6 + $0x30] sm:$0xff] }
 0x20a   :  { %v705_v49 = vld [vmem:[#allocation6 + $0x70] sm:$0xff]  ;;  %9975 = vst [vmem:[#allocation79_spill] sm:$0xff] %v8211_v9  ;;  %v8225_v43 = vpack.c.bf16 %v719_v20, %v711_v22 }
 0x20b   :  { %9969 = vst [vmem:[#allocation73_spill] sm:$0xff] %v8193_v52  ;;  %9970 = vst [vmem:[#allocation74_spill] sm:$0xff] %v8195_v53  ;;  %v8213_v24 = vpack.c.bf16 %v705_v49, %v697_v48  ;;  %v729_v49 = vld [vmem:[#allocation6 + $0x130] sm:$0xff] }
 0x20c   :  { %5138 = vmatpush1.bf16.msra.mxu1 %v8175_v26  ;;  %5202 = vmatpush1.bf16.msra.mxu0 %v8177_v27  ;;  %v704_v26 = vld [vmem:[#allocation6 + $0x68] sm:$0xff]  ;;  %v706_v27 = vld [vmem:[#allocation6 + $0x78] sm:$0xff]  ;;  %9980 = vst [vmem:[#allocation83_spill] sm:$0xff] %v8225_v43 }
 0x20d   :  { %5140 = vmatprep.subr.bf16.mxu1 %v8181_v14  ;;  %5204 = vmatprep.subr.bf16.mxu0 %v8183_v6  ;;  %v8205_v34 = vpack.c.bf16 %v704_v26, %v696_v5  ;;  %v8207_v35 = vpack.c.bf16 %v706_v27, %v698_v4  ;;  %v712_v6 = vld [vmem:[#allocation6 + $0xa8] sm:$0xff]  ;;  %v714_v14 = vld [vmem:[#allocation6 + $0xb8] sm:$0xff]  ;;  %9976 = vst [vmem:[#allocation80_spill] sm:$0xff] %v8213_v24  ;;  %v713_v26 = vld [vmem:[#allocation6 + $0xb0] sm:$0xff] }
 0x20e   :  { %v721_v27 = vld [vmem:[#allocation6 + $0xf0] sm:$0xff] }
 0x20f   :  { %9973 = vst [vmem:[#allocation77_spill] sm:$0xff] %v8205_v34  ;;  %9974 = vst [vmem:[#allocation78_spill] sm:$0xff] %v8207_v35 }
 0x210   :  { %5142 = vmatpush1.bf16.msra.mxu1 %v8187_v0  ;;  %5206 = vmatpush1.bf16.msra.mxu0 %v8189_v1  ;;  %v720_v0 = vld [vmem:[#allocation6 + $0xe8] sm:$0xff]  ;;  %v722_v1 = vld [vmem:[#allocation6 + $0xf8] sm:$0xff] }
 0x211   :  { %5144 = vmatprep.subr.bf16.mxu1 %v8193_v52  ;;  %5208 = vmatprep.subr.bf16.mxu0 %v8195_v53  ;;  %v8217_v4 = vpack.c.bf16 %v720_v0, %v712_v6  ;;  %v8219_v5 = vpack.c.bf16 %v722_v1, %v714_v14  ;;  %v728_v53 = vld [vmem:[#allocation6 + $0x128] sm:$0xff]  ;;  %v730_v52 = vld [vmem:[#allocation6 + $0x138] sm:$0xff]  ;;  %v8227_v6 = vpack.c.bf16 %v721_v27, %v713_v26  ;;  %v727_v14 = vld [vmem:[#allocation6 + $0x120] sm:$0xff] }
 0x212   :  { %v735_v0 = vld [vmem:[#allocation6 + $0x160] sm:$0xff]  ;;  %v745_v26 = vld [vmem:[#allocation6 + $0x1b0] sm:$0xff] }
 0x213   :  { %9977 = vst [vmem:[#allocation81_spill] sm:$0xff] %v8217_v4  ;;  %9978 = vst [vmem:[#allocation82_spill] sm:$0xff] %v8219_v5  ;;  %v8239_v22 = vpack.c.bf16 %v735_v0, %v727_v14  ;;  %v753_v27 = vld [vmem:[#allocation6 + $0x1f0] sm:$0xff]  ;;  %v759_v0 = vld [vmem:[#allocation6 + $0x220] sm:$0xff] }
 0x214   :  { %5146 = vmatpush1.bf16.msra.mxu1 %v8199_v38  ;;  %5210 = vmatpush1.bf16.msra.mxu0 %v8201_v39  ;;  %v736_v38 = vld [vmem:[#allocation6 + $0x168] sm:$0xff]  ;;  %v738_v39 = vld [vmem:[#allocation6 + $0x178] sm:$0xff]  ;;  %9981 = vst [vmem:[#allocation84_spill] sm:$0xff] %v8227_v6  ;;  %v8253_v14 = vpack.c.bf16 %v753_v27, %v745_v26  ;;  %v775_v26 = vld [vmem:[#allocation6 + $0x2a0] sm:$0xff] }
 0x215   :  { %5212 = vmatprep.subr.bf16.mxu1 %v8205_v34  ;;  %5276 = vmatprep.subr.bf16.mxu0 %v8207_v35  ;;  %v8231_v1 = vpack.c.bf16 %v736_v38, %v728_v53  ;;  %v8233_v48 = vpack.c.bf16 %v738_v39, %v730_v52  ;;  %v737_v35 = vld [vmem:[#allocation6 + $0x170] sm:$0xff]  ;;  %v744_v34 = vld [vmem:[#allocation6 + $0x1a8] sm:$0xff]  ;;  %9984 = vst [vmem:[#allocation87_spill] sm:$0xff] %v8239_v22  ;;  %v743_v52 = vld [vmem:[#allocation6 + $0x1a0] sm:$0xff] }
 0x216   :  { %v8241_v53 = vpack.c.bf16 %v737_v35, %v729_v49  ;;  %v751_v38 = vld [vmem:[#allocation6 + $0x1e0] sm:$0xff]  ;;  %9989 = vst [vmem:[#allocation92_spill] sm:$0xff] %v8253_v14 }
 0x217   :  { %1012 = vmatmul.mubr.f32.vlgmr.msra.gmra.mrb[8].mxu1 %v9979_v42  ;;  %1083 = vmatmul.mubr.f32.vlgmr.msra.gmra.mrb[10].mxu0 %v9979_v42  ;;  %9982 = vst [vmem:[#allocation85_spill] sm:$0xff] %v8231_v1  ;;  %9983 = vst [vmem:[#allocation86_spill] sm:$0xff] %v8233_v48  ;;  %v8251_v35 = vpack.c.bf16 %v751_v38, %v743_v52  ;;  %v767_v49 = vld [vmem:[#allocation6 + $0x260] sm:$0xff] }
 0x218   :  { %5214 = vmatpush1.bf16.msra.mxu1 %v8211_v9  ;;  %5278 = vmatpush1.bf16.msra.mxu0 %v8213_v24  ;;  %v752_v9 = vld [vmem:[#allocation6 + $0x1e8] sm:$0xff]  ;;  %v754_v24 = vld [vmem:[#allocation6 + $0x1f8] sm:$0xff]  ;;  %9985 = vst [vmem:[#allocation88_spill] sm:$0xff] %v8241_v53  ;;  %v8263_v52 = vpack.c.bf16 %v767_v49, %v759_v0  ;;  %v783_v27 = vld [vmem:[#allocation6 + $0x2e0] sm:$0xff] }
 0x219   :  { %5216 = vmatprep.subr.bf16.mxu1 %v8217_v4  ;;  %5280 = vmatprep.subr.bf16.mxu0 %v8219_v5  ;;  %v8245_v39 = vpack.c.bf16 %v752_v9, %v744_v34  ;;  %v8247_v20 = vpack.c.bf16 %v754_v24, %v746_v25  ;;  %v760_v5 = vld [vmem:[#allocation6 + $0x228] sm:$0xff]  ;;  %v762_v4 = vld [vmem:[#allocation6 + $0x238] sm:$0xff]  ;;  %9988 = vst [vmem:[#allocation91_spill] sm:$0xff] %v8251_v35  ;;  %v761_v9 = vld [vmem:[#allocation6 + $0x230] sm:$0xff] }
 0x21a   :  { %1153 = vmatprep.mubr.f32.mxu1 %v9979_v42  ;;  %1224 = vmatprep.mubr.f32.mxu0 %v9979_v42  ;;  %v769_v24 = vld [vmem:[#allocation6 + $0x270] sm:$0xff]  ;;  %9992 = vst [vmem:[#allocation95_spill] sm:$0xff] %v8263_v52  ;;  %v8275_v0 = vpack.c.bf16 %v783_v27, %v775_v26 }
 0x21b   :  { %9986 = vst [vmem:[#allocation89_spill] sm:$0xff] %v8245_v39  ;;  %9987 = vst [vmem:[#allocation90_spill] sm:$0xff] %v8247_v20  ;;  %v8265_v38 = vpack.c.bf16 %v769_v24, %v761_v9  ;;  %v791_v9 = vld [vmem:[#allocation6 + $0x320] sm:$0xff] }
 0x21c   :  { %5218 = vmatpush1.bf16.msra.mxu1 %v8225_v43  ;;  %5282 = vmatpush1.bf16.msra.mxu0 %v8227_v6  ;;  %v768_v43 = vld [vmem:[#allocation6 + $0x268] sm:$0xff]  ;;  %v770_v6 = vld [vmem:[#allocation6 + $0x278] sm:$0xff]  ;;  %9996 = vst [vmem:[#allocation99_spill] sm:$0xff] %v8275_v0  ;;  %v799_v24 = vld [vmem:[#allocation6 + $0x360] sm:$0xff] }
 0x21d   :  { %5220 = vmatprep.subr.bf16.mxu1 %v8231_v1  ;;  %5284 = vmatprep.subr.bf16.mxu0 %v8233_v48  ;;  %v8257_v25 = vpack.c.bf16 %v768_v43, %v760_v5  ;;  %v8259_v34 = vpack.c.bf16 %v770_v6, %v762_v4  ;;  %v776_v48 = vld [vmem:[#allocation6 + $0x2a8] sm:$0xff]  ;;  %v778_v1 = vld [vmem:[#allocation6 + $0x2b8] sm:$0xff]  ;;  %9993 = vst [vmem:[#allocation96_spill] sm:$0xff] %v8265_v38  ;;  %v777_v43 = vld [vmem:[#allocation6 + $0x2b0] sm:$0xff] }
 0x21e   :  { %v785_v6 = vld [vmem:[#allocation6 + $0x2f0] sm:$0xff]  ;;  %v8287_v26 = vpack.c.bf16 %v799_v24, %v791_v9 }
 0x21f   :  { %9990 = vst [vmem:[#allocation93_spill] sm:$0xff] %v8257_v25  ;;  %9991 = vst [vmem:[#allocation94_spill] sm:$0xff] %v8259_v34  ;;  %v8277_v49 = vpack.c.bf16 %v785_v6, %v777_v43  ;;  %v807_v43 = vld [vmem:[#allocation6 + $0x3a0] sm:$0xff] }
 0x220   :  { %5222 = vmatpush1.bf16.msra.mxu1 %v8239_v22  ;;  %5286 = vmatpush1.bf16.msra.mxu0 %v8241_v53  ;;  %v784_v22 = vld [vmem:[#allocation6 + $0x2e8] sm:$0xff]  ;;  %v786_v53 = vld [vmem:[#allocation6 + $0x2f8] sm:$0xff]  ;;  %10000 = vst [vmem:[#allocation103_spill] sm:$0xff] %v8287_v26  ;;  %v815_v6 = vld [vmem:[#allocation6 + $0x3e0] sm:$0xff] }
 0x221   :  { %5224 = vmatprep.subr.bf16.mxu1 %v8245_v39  ;;  %5288 = vmatprep.subr.bf16.mxu0 %v8247_v20  ;;  %v8269_v4 = vpack.c.bf16 %v784_v22, %v776_v48  ;;  %v8271_v5 = vpack.c.bf16 %v786_v53, %v778_v1  ;;  %v792_v20 = vld [vmem:[#allocation6 + $0x328] sm:$0xff]  ;;  %v794_v39 = vld [vmem:[#allocation6 + $0x338] sm:$0xff]  ;;  %9997 = vst [vmem:[#allocation100_spill] sm:$0xff] %v8277_v49  ;;  %v793_v22 = vld [vmem:[#allocation6 + $0x330] sm:$0xff] }
 0x222   :  { %v801_v53 = vld [vmem:[#allocation6 + $0x370] sm:$0xff]  ;;  %v8299_v9 = vpack.c.bf16 %v815_v6, %v807_v43 }
 0x223   :  { %9994 = vst [vmem:[#allocation97_spill] sm:$0xff] %v8269_v4  ;;  %9995 = vst [vmem:[#allocation98_spill] sm:$0xff] %v8271_v5  ;;  %v8289_v27 = vpack.c.bf16 %v801_v53, %v793_v22  ;;  %v823_v22 = vld [vmem:[#allocation6 + $0x420] sm:$0xff] }
 0x224   :  { %5226 = vmatpush1.bf16.msra.mxu1 %v8251_v35  ;;  %5290 = vmatpush1.bf16.msra.mxu0 %v8253_v14  ;;  %v800_v35 = vld [vmem:[#allocation6 + $0x368] sm:$0xff]  ;;  %v802_v14 = vld [vmem:[#allocation6 + $0x378] sm:$0xff]  ;;  %10004 = vst [vmem:[#allocation107_spill] sm:$0xff] %v8299_v9  ;;  %v831_v53 = vld [vmem:[#allocation6 + $0x460] sm:$0xff] }
 0x225   :  { %5228 = vmatprep.subr.bf16.mxu1 %v8257_v25  ;;  %5292 = vmatprep.subr.bf16.mxu0 %v8259_v34  ;;  %v8281_v1 = vpack.c.bf16 %v800_v35, %v792_v20  ;;  %v8283_v48 = vpack.c.bf16 %v802_v14, %v794_v39  ;;  %v808_v34 = vld [vmem:[#allocation6 + $0x3a8] sm:$0xff]  ;;  %v810_v25 = vld [vmem:[#allocation6 + $0x3b8] sm:$0xff]  ;;  %10001 = vst [vmem:[#allocation104_spill] sm:$0xff] %v8289_v27  ;;  %v809_v35 = vld [vmem:[#allocation6 + $0x3b0] sm:$0xff] }
 0x226   :  { %v817_v14 = vld [vmem:[#allocation6 + $0x3f0] sm:$0xff]  ;;  %v8311_v43 = vpack.c.bf16 %v831_v53, %v823_v22 }
 0x227   :  { %9998 = vst [vmem:[#allocation101_spill] sm:$0xff] %v8281_v1  ;;  %9999 = vst [vmem:[#allocation102_spill] sm:$0xff] %v8283_v48  ;;  %v8301_v24 = vpack.c.bf16 %v817_v14, %v809_v35  ;;  %v839_v35 = vld [vmem:[#allocation6 + $0x4a0] sm:$0xff] }
 0x228   :  { %5230 = vmatpush1.bf16.msra.mxu1 %v8263_v52  ;;  %5294 = vmatpush1.bf16.msra.mxu0 %v8265_v38  ;;  %v816_v52 = vld [vmem:[#allocation6 + $0x3e8] sm:$0xff]  ;;  %v818_v38 = vld [vmem:[#allocation6 + $0x3f8] sm:$0xff]  ;;  %10008 = vst [vmem:[#allocation111_spill] sm:$0xff] %v8311_v43  ;;  %v847_v14 = vld [vmem:[#allocation6 + $0x4e0] sm:$0xff] }
 0x229   :  { %5232 = vmatprep.subr.bf16.mxu1 %v8269_v4  ;;  %5296 = vmatprep.subr.bf16.mxu0 %v8271_v5  ;;  %v8293_v39 = vpack.c.bf16 %v816_v52, %v808_v34  ;;  %v8295_v20 = vpack.c.bf16 %v818_v38, %v810_v25  ;;  %v824_v5 = vld [vmem:[#allocation6 + $0x428] sm:$0xff]  ;;  %v826_v4 = vld [vmem:[#allocation6 + $0x438] sm:$0xff]  ;;  %10005 = vst [vmem:[#allocation108_spill] sm:$0xff] %v8301_v24  ;;  %v825_v52 = vld [vmem:[#allocation6 + $0x430] sm:$0xff] }
 0x22a   :  { %v833_v38 = vld [vmem:[#allocation6 + $0x470] sm:$0xff]  ;;  %v8323_v22 = vpack.c.bf16 %v847_v14, %v839_v35 }
 0x22b   :  { %10002 = vst [vmem:[#allocation105_spill] sm:$0xff] %v8293_v39  ;;  %10003 = vst [vmem:[#allocation106_spill] sm:$0xff] %v8295_v20  ;;  %v8313_v6 = vpack.c.bf16 %v833_v38, %v825_v52  ;;  %v855_v52 = vld [vmem:[#allocation6 + $0x520] sm:$0xff] }
 0x22c   :  { %5234 = vmatpush1.bf16.msra.mxu1 %v8275_v0  ;;  %5298 = vmatpush1.bf16.msra.mxu0 %v8277_v49  ;;  %v832_v0 = vld [vmem:[#allocation6 + $0x468] sm:$0xff]  ;;  %v834_v49 = vld [vmem:[#allocation6 + $0x478] sm:$0xff]  ;;  %10012 = vst [vmem:[#allocation115_spill] sm:$0xff] %v8323_v22  ;;  %v863_v38 = vld [vmem:[#allocation6 + $0x560] sm:$0xff] }
 0x22d   :  { %5236 = vmatprep.subr.bf16.mxu1 %v8281_v1  ;;  %5300 = vmatprep.subr.bf16.mxu0 %v8283_v48  ;;  %v8305_v25 = vpack.c.bf16 %v832_v0, %v824_v5  ;;  %v8307_v34 = vpack.c.bf16 %v834_v49, %v826_v4  ;;  %v840_v48 = vld [vmem:[#allocation6 + $0x4a8] sm:$0xff]  ;;  %v842_v1 = vld [vmem:[#allocation6 + $0x4b8] sm:$0xff]  ;;  %10009 = vst [vmem:[#allocation112_spill] sm:$0xff] %v8313_v6  ;;  %v841_v0 = vld [vmem:[#allocation6 + $0x4b0] sm:$0xff] }
 0x22e   :  { %v849_v49 = vld [vmem:[#allocation6 + $0x4f0] sm:$0xff]  ;;  %v8335_v35 = vpack.c.bf16 %v863_v38, %v855_v52 }
 0x22f   :  { %10006 = vst [vmem:[#allocation109_spill] sm:$0xff] %v8305_v25  ;;  %10007 = vst [vmem:[#allocation110_spill] sm:$0xff] %v8307_v34  ;;  %v8325_v53 = vpack.c.bf16 %v849_v49, %v841_v0  ;;  %v871_v0 = vld [vmem:[#allocation6 + $0x5a0] sm:$0xff] }
 0x230   :  { %5238 = vmatpush1.bf16.msra.mxu1 %v8287_v26  ;;  %5302 = vmatpush1.bf16.msra.mxu0 %v8289_v27  ;;  %v848_v26 = vld [vmem:[#allocation6 + $0x4e8] sm:$0xff]  ;;  %v850_v27 = vld [vmem:[#allocation6 + $0x4f8] sm:$0xff]  ;;  %10016 = vst [vmem:[#allocation119_spill] sm:$0xff] %v8335_v35  ;;  %v879_v49 = vld [vmem:[#allocation6 + $0x5e0] sm:$0xff] }
 0x231   :  { %5240 = vmatprep.subr.bf16.mxu1 %v8293_v39  ;;  %5304 = vmatprep.subr.bf16.mxu0 %v8295_v20  ;;  %v8317_v4 = vpack.c.bf16 %v848_v26, %v840_v48  ;;  %v8319_v5 = vpack.c.bf16 %v850_v27, %v842_v1  ;;  %v856_v20 = vld [vmem:[#allocation6 + $0x528] sm:$0xff]  ;;  %v858_v39 = vld [vmem:[#allocation6 + $0x538] sm:$0xff]  ;;  %10013 = vst [vmem:[#allocation116_spill] sm:$0xff] %v8325_v53  ;;  %v857_v26 = vld [vmem:[#allocation6 + $0x530] sm:$0xff] }
 0x232   :  { %v865_v27 = vld [vmem:[#allocation6 + $0x570] sm:$0xff]  ;;  %v8347_v52 = vpack.c.bf16 %v879_v49, %v871_v0 }
 0x233   :  { %10010 = vst [vmem:[#allocation113_spill] sm:$0xff] %v8317_v4  ;;  %10011 = vst [vmem:[#allocation114_spill] sm:$0xff] %v8319_v5  ;;  %v8337_v14 = vpack.c.bf16 %v865_v27, %v857_v26  ;;  %v887_v26 = vld [vmem:[#allocation6 + $0x620] sm:$0xff] }
 0x234   :  { %5242 = vmatpush1.bf16.msra.mxu1 %v8299_v9  ;;  %5306 = vmatpush1.bf16.msra.mxu0 %v8301_v24  ;;  %v864_v9 = vld [vmem:[#allocation6 + $0x568] sm:$0xff]  ;;  %v866_v24 = vld [vmem:[#allocation6 + $0x578] sm:$0xff]  ;;  %10020 = vst [vmem:[#allocation123_spill] sm:$0xff] %v8347_v52  ;;  %v895_v27 = vld [vmem:[#allocation6 + $0x660] sm:$0xff] }
 0x235   :  { %5244 = vmatprep.subr.bf16.mxu1 %v8305_v25  ;;  %5308 = vmatprep.subr.bf16.mxu0 %v8307_v34  ;;  %v8329_v1 = vpack.c.bf16 %v864_v9, %v856_v20  ;;  %v8331_v48 = vpack.c.bf16 %v866_v24, %v858_v39  ;;  %v872_v34 = vld [vmem:[#allocation6 + $0x5a8] sm:$0xff]  ;;  %v874_v25 = vld [vmem:[#allocation6 + $0x5b8] sm:$0xff]  ;;  %10017 = vst [vmem:[#allocation120_spill] sm:$0xff] %v8337_v14  ;;  %v873_v9 = vld [vmem:[#allocation6 + $0x5b0] sm:$0xff] }
 0x236   :  { %v881_v24 = vld [vmem:[#allocation6 + $0x5f0] sm:$0xff]  ;;  %v8359_v0 = vpack.c.bf16 %v895_v27, %v887_v26 }
 0x237   :  { %10014 = vst [vmem:[#allocation117_spill] sm:$0xff] %v8329_v1  ;;  %10015 = vst [vmem:[#allocation118_spill] sm:$0xff] %v8331_v48  ;;  %v8349_v38 = vpack.c.bf16 %v881_v24, %v873_v9  ;;  %v903_v9 = vld [vmem:[#allocation6 + $0x6a0] sm:$0xff] }
 0x238   :  { %5246 = vmatpush1.bf16.msra.mxu1 %v8311_v43  ;;  %5310 = vmatpush1.bf16.msra.mxu0 %v8313_v6  ;;  %v880_v43 = vld [vmem:[#allocation6 + $0x5e8] sm:$0xff]  ;;  %v882_v6 = vld [vmem:[#allocation6 + $0x5f8] sm:$0xff]  ;;  %10024 = vst [vmem:[#allocation127_spill] sm:$0xff] %v8359_v0  ;;  %v911_v24 = vld [vmem:[#allocation6 + $0x6e0] sm:$0xff] }
 0x239   :  { %5248 = vmatprep.subr.bf16.mxu1 %v8317_v4  ;;  %5312 = vmatprep.subr.bf16.mxu0 %v8319_v5  ;;  %v8341_v39 = vpack.c.bf16 %v880_v43, %v872_v34  ;;  %v8343_v20 = vpack.c.bf16 %v882_v6, %v874_v25  ;;  %v888_v5 = vld [vmem:[#allocation6 + $0x628] sm:$0xff]  ;;  %v890_v4 = vld [vmem:[#allocation6 + $0x638] sm:$0xff]  ;;  %10021 = vst [vmem:[#allocation124_spill] sm:$0xff] %v8349_v38  ;;  %v889_v43 = vld [vmem:[#allocation6 + $0x630] sm:$0xff] }
 0x23a   :  { %v897_v6 = vld [vmem:[#allocation6 + $0x670] sm:$0xff]  ;;  %v8371_v26 = vpack.c.bf16 %v911_v24, %v903_v9 }
 0x23b   :  { %10018 = vst [vmem:[#allocation121_spill] sm:$0xff] %v8341_v39  ;;  %10019 = vst [vmem:[#allocation122_spill] sm:$0xff] %v8343_v20  ;;  %v8361_v49 = vpack.c.bf16 %v897_v6, %v889_v43  ;;  %v919_v43 = vld [vmem:[#allocation6 + $0x720] sm:$0xff] }
 0x23c   :  { %5250 = vmatpush1.bf16.msra.mxu1 %v8323_v22  ;;  %5314 = vmatpush1.bf16.msra.mxu0 %v8325_v53  ;;  %v896_v22 = vld [vmem:[#allocation6 + $0x668] sm:$0xff]  ;;  %v898_v53 = vld [vmem:[#allocation6 + $0x678] sm:$0xff]  ;;  %10028 = vst [vmem:[#allocation131_spill] sm:$0xff] %v8371_v26  ;;  %v927_v6 = vld [vmem:[#allocation6 + $0x760] sm:$0xff] }
 0x23d   :  { %5252 = vmatprep.subr.bf16.mxu1 %v8329_v1  ;;  %5316 = vmatprep.subr.bf16.mxu0 %v8331_v48  ;;  %v8353_v25 = vpack.c.bf16 %v896_v22, %v888_v5  ;;  %v8355_v34 = vpack.c.bf16 %v898_v53, %v890_v4  ;;  %v904_v48 = vld [vmem:[#allocation6 + $0x6a8] sm:$0xff]  ;;  %v906_v1 = vld [vmem:[#allocation6 + $0x6b8] sm:$0xff]  ;;  %10025 = vst [vmem:[#allocation128_spill] sm:$0xff] %v8361_v49  ;;  %v905_v22 = vld [vmem:[#allocation6 + $0x6b0] sm:$0xff] }
 0x23e   :  { %v913_v53 = vld [vmem:[#allocation6 + $0x6f0] sm:$0xff]  ;;  %v8383_v9 = vpack.c.bf16 %v927_v6, %v919_v43 }
 0x23f   :  { %10022 = vst [vmem:[#allocation125_spill] sm:$0xff] %v8353_v25  ;;  %10023 = vst [vmem:[#allocation126_spill] sm:$0xff] %v8355_v34  ;;  %v8373_v27 = vpack.c.bf16 %v913_v53, %v905_v22  ;;  %v935_v22 = vld [vmem:[#allocation6 + $0x7a0] sm:$0xff]  ;;  %v945_v53 = vld [vmem:[#allocation6 + $0x7f0] sm:$0xff] }
 0x240   :  { %5254 = vmatpush1.bf16.msra.mxu1 %v8335_v35  ;;  %5318 = vmatpush1.bf16.msra.mxu0 %v8337_v14  ;;  %v912_v35 = vld [vmem:[#allocation6 + $0x6e8] sm:$0xff]  ;;  %v914_v14 = vld [vmem:[#allocation6 + $0x6f8] sm:$0xff]  ;;  %10032 = vst [vmem:[#allocation135_spill] sm:$0xff] %v8383_v9 }
 0x241   :  { %5256 = vmatprep.subr.bf16.mxu1 %v8341_v39  ;;  %5320 = vmatprep.subr.bf16.mxu0 %v8343_v20  ;;  %v8365_v4 = vpack.c.bf16 %v912_v35, %v904_v48  ;;  %v8367_v5 = vpack.c.bf16 %v914_v14, %v906_v1  ;;  %v920_v20 = vld [vmem:[#allocation6 + $0x728] sm:$0xff]  ;;  %v922_v39 = vld [vmem:[#allocation6 + $0x738] sm:$0xff]  ;;  %10029 = vst [vmem:[#allocation132_spill] sm:$0xff] %v8373_v27  ;;  %v921_v35 = vld [vmem:[#allocation6 + $0x730] sm:$0xff] }
 0x242   :  { %v929_v14 = vld [vmem:[#allocation6 + $0x770] sm:$0xff] }
 0x243   :  { %10026 = vst [vmem:[#allocation129_spill] sm:$0xff] %v8365_v4  ;;  %10027 = vst [vmem:[#allocation130_spill] sm:$0xff] %v8367_v5  ;;  %v8385_v24 = vpack.c.bf16 %v929_v14, %v921_v35  ;;  %v10043_v35 = vld [vmem:[#allocation59_spill] sm:$0xff]  ;;  %v10044_v14 = vld [vmem:[#allocation60_spill] sm:$0xff] }
 0x244   :  { %5258 = vmatpush1.bf16.msra.mxu1 %v8347_v52  ;;  %5322 = vmatpush1.bf16.msra.mxu0 %v8349_v38  ;;  %v928_v52 = vld [vmem:[#allocation6 + $0x768] sm:$0xff]  ;;  %v930_v38 = vld [vmem:[#allocation6 + $0x778] sm:$0xff] }
 0x245   :  { %5260 = vmatprep.subr.bf16.mxu1 %v8353_v25  ;;  %5324 = vmatprep.subr.bf16.mxu0 %v8355_v34  ;;  %v8377_v1 = vpack.c.bf16 %v928_v52, %v920_v20  ;;  %v8379_v48 = vpack.c.bf16 %v930_v38, %v922_v39  ;;  %v936_v34 = vld [vmem:[#allocation6 + $0x7a8] sm:$0xff]  ;;  %v938_v25 = vld [vmem:[#allocation6 + $0x7b8] sm:$0xff]  ;;  %10033 = vst [vmem:[#allocation136_spill] sm:$0xff] %v8385_v24  ;;  %v943_v52 = vld [vmem:[#allocation6 + $0x7e0] sm:$0xff] }
 0x246   :  { %v937_v38 = vld [vmem:[#allocation6 + $0x7b0] sm:$0xff]  ;;  %v8395_v43 = vpack.c.bf16 %v943_v52, %v935_v22  ;;  %v10045_v22 = vlaneseq }
 0x247   :  { %10030 = vst [vmem:[#allocation133_spill] sm:$0xff] %v8377_v1  ;;  %10031 = vst [vmem:[#allocation134_spill] sm:$0xff] %v8379_v48  ;;  %v8397_v6 = vpack.c.bf16 %v945_v53, %v937_v38  ;;  %v10047_v38 = vld [vmem:[#allocation61_spill] sm:$0xff]  ;;  %v10048_v53 = vld [vmem:[#allocation62_spill] sm:$0xff] }
 0x248   :  { %5262 = vmatpush1.bf16.msra.mxu1 %v8359_v0  ;;  %5326 = vmatpush1.bf16.msra.mxu0 %v8361_v49  ;;  %v944_v0 = vld [vmem:[#allocation6 + $0x7e8] sm:$0xff]  ;;  %v946_v49 = vld [vmem:[#allocation6 + $0x7f8] sm:$0xff]  ;;  %10036 = vst [vmem:[#allocation139_spill] sm:$0xff] %v8395_v43  ;;  %v8454_v52 = vshrl.u32 %v10045_v22, 7  ;;  %v341_v22 = vld [vmem:[%s9597_s3] sm:$0xff] }
 0x249   :  { %5264 = vmatprep.subr.bf16.mxu1 %v8365_v4  ;;  %5328 = vmatprep.subr.bf16.mxu0 %v8367_v5  ;;  %v8389_v39 = vpack.c.bf16 %v944_v0, %v936_v34  ;;  %v8391_v20 = vpack.c.bf16 %v946_v49, %v938_v25  ;;  %10037 = vst [vmem:[#allocation140_spill] sm:$0xff] %v8397_v6  ;;  %v10039_v25 = vld [vmem:[#allocation55_spill] sm:$0xff]  ;;  %v10040_v34 = vld [vmem:[#allocation56_spill] sm:$0xff]  ;;  %v10041_v0 = vld [vmem:[#allocation57_spill] sm:$0xff] }
 0x24a   :  { %v10042_v49 = vld [vmem:[#allocation58_spill] sm:$0xff]  ;;  %10046 = vst [vmem:[#allocation141_spill] sm:$0xff] %v8454_v52 }
 0x24b   :  { %10034 = vst [vmem:[#allocation137_spill] sm:$0xff] %v8389_v39  ;;  %10035 = vst [vmem:[#allocation138_spill] sm:$0xff] %v8391_v20 }
 0x24c   :  { %5266 = vmatpush1.bf16.msra.mxu1 %v8371_v26  ;;  %5330 = vmatpush1.bf16.msra.mxu0 %v8373_v27 }
 0x24d   :  { %5268 = vmatprep.subr.bf16.mxu1 %v8377_v1  ;;  %5332 = vmatprep.subr.bf16.mxu0 %v8379_v48 }
 0x250   :  { %5270 = vmatpush1.bf16.msra.mxu1 %v8383_v9  ;;  %5334 = vmatpush1.bf16.msra.mxu0 %v8385_v24 }
 0x251   :  { %5272 = vmatprep.subr.bf16.mxu1 %v8389_v39  ;;  %5336 = vmatprep.subr.bf16.mxu0 %v8391_v20 }
 0x254   :  { %5274 = vmatpush1.bf16.msra.mxu1 %v8395_v43  ;;  %5338 = vmatpush1.bf16.msra.mxu0 %v8397_v6 }
 0x255   :  { %5340 = vmatprep.subr.bf16.mxu1 %v8007_v45  ;;  %5404 = vmatprep.subr.bf16.mxu0 %v8009_v46 }
 0x257   :  { %1154 = vmatmul.mubr.f32.vlgmr.msra.gmra.mrb[10].mxu1 %v9979_v42  ;;  %1225 = vmatmul.mubr.f32.vlgmr.msra.gmra.mrb[12].mxu0 %v9979_v42  ;;  %v10038_v42 = vld [vmem:[#allocation54_spill] sm:$0xff] }
 0x258   :  { %5342 = vmatpush1.bf16.msra.mxu1 %v8011_v54  ;;  %5406 = vmatpush1.bf16.msra.mxu0 %v8013_v55 }
 0x259   :  { %5344 = vmatprep.subr.bf16.mxu1 %v8017_v61  ;;  %5408 = vmatprep.subr.bf16.mxu0 %v8019_v62 }
 0x25c   :  { %5346 = vmatpush1.bf16.msra.mxu1 %v8025_v2  ;;  %5410 = vmatpush1.bf16.msra.mxu0 %v8027_v3 }
 0x25d   :  { %5348 = vmatprep.subr.bf16.mxu1 %v8031_v7  ;;  %5412 = vmatprep.subr.bf16.mxu0 %v8033_v8 }
 0x260   :  { %5350 = vmatpush1.bf16.msra.mxu1 %v8041_v15  ;;  %5414 = vmatpush1.bf16.msra.mxu0 %v8043_v16 }
 0x261   :  { %5352 = vmatprep.subr.bf16.mxu1 %v8047_v19  ;;  %5416 = vmatprep.subr.bf16.mxu0 %v8049_v21 }
 0x264   :  { %5354 = vmatpush1.bf16.msra.mxu1 %v8055_v28  ;;  %5418 = vmatpush1.bf16.msra.mxu0 %v8057_v29 }
 0x265   :  { %5356 = vmatprep.subr.bf16.mxu1 %v8061_v32  ;;  %5420 = vmatprep.subr.bf16.mxu0 %v8063_v33 }
 0x268   :  { %5358 = vmatpush1.bf16.msra.mxu1 %v8067_v40  ;;  %5422 = vmatpush1.bf16.msra.mxu0 %v8069_v41 }
 0x269   :  { %5360 = vmatprep.subr.bf16.mxu1 %v8073_v44  ;;  %5424 = vmatprep.subr.bf16.mxu0 %v8075_v47 }
 0x26c   :  { %5362 = vmatpush1.bf16.msra.mxu1 %v8079_v56  ;;  %5426 = vmatpush1.bf16.msra.mxu0 %v8081_v57 }
 0x26d   :  { %5364 = vmatprep.subr.bf16.mxu1 %v8085_v60  ;;  %5428 = vmatprep.subr.bf16.mxu0 %v8087_v63 }
 0x270   :  { %5366 = vmatpush1.bf16.msra.mxu1 %v8091_v10  ;;  %5430 = vmatpush1.bf16.msra.mxu0 %v8093_v11 }
 0x271   :  { %5368 = vmatprep.subr.bf16.mxu1 %v8097_v17  ;;  %5432 = vmatprep.subr.bf16.mxu0 %v8099_v18  ;;  %v10067_v18 = vld [vmem:[#allocation74_spill] sm:$0xff] }
 0x274   :  { %5370 = vmatpush1.bf16.msra.mxu1 %v8103_v30  ;;  %5434 = vmatpush1.bf16.msra.mxu0 %v8105_v31 }
 0x275   :  { %5372 = vmatprep.subr.bf16.mxu1 %v8109_v36  ;;  %5436 = vmatprep.subr.bf16.mxu0 %v8111_v37 }
 0x278   :  { %5374 = vmatpush1.bf16.msra.mxu1 %v8115_v50  ;;  %5438 = vmatpush1.bf16.msra.mxu0 %v8117_v51 }
 0x279   :  { %5376 = vmatprep.subr.bf16.mxu1 %v8121_v58  ;;  %5440 = vmatprep.subr.bf16.mxu0 %v8123_v59  ;;  %v10058_v59 = vld [vmem:[#allocation69_spill] sm:$0xff]  ;;  %v10059_v58 = vld [vmem:[#allocation70_spill] sm:$0xff] }
 0x27c   :  { %5378 = vmatpush1.bf16.msra.mxu1 %v8127_v12  ;;  %5442 = vmatpush1.bf16.msra.mxu0 %v8129_v13  ;;  %v10056_v13 = vld [vmem:[#allocation67_spill] sm:$0xff]  ;;  %v10057_v12 = vld [vmem:[#allocation68_spill] sm:$0xff] }
 0x27d   :  { %5380 = vmatprep.subr.bf16.mxu1 %v8133_v23  ;;  %5444 = vmatprep.subr.bf16.mxu0 %v10038_v42  ;;  %v10049_v42 = vld [vmem:[#allocation63_spill] sm:$0xff] }
 0x280   :  { %5382 = vmatpush1.bf16.msra.mxu1 %v10039_v25  ;;  %5446 = vmatpush1.bf16.msra.mxu0 %v10040_v34  ;;  %v10050_v25 = vld [vmem:[#allocation64_spill] sm:$0xff]  ;;  %v8461_v34 = vsub.s32 0, %v8454_v52 }
 0x281   :  { %5384 = vmatprep.subr.bf16.mxu1 %v10041_v0  ;;  %5448 = vmatprep.subr.bf16.mxu0 %v10042_v49  ;;  %v8464_v49 = vsub.s32 2, %v8454_v52 }
 0x282   :  { %10051 = vst [vmem:[#allocation142_spill] sm:$0xff] %v8461_v34 }
 0x283   :  { %10052 = vst [vmem:[#allocation143_spill] sm:$0xff] %v8464_v49 }
 0x284   :  { %5386 = vmatpush1.bf16.msra.mxu1 %v10043_v35  ;;  %5450 = vmatpush1.bf16.msra.mxu0 %v10044_v14  ;;  %v10053_v35 = vld [vmem:[#allocation65_spill] sm:$0xff]  ;;  %v10054_v14 = vld [vmem:[#allocation66_spill] sm:$0xff] }
 0x285   :  { %5388 = vmatprep.subr.bf16.mxu1 %v10047_v38  ;;  %5452 = vmatprep.subr.bf16.mxu0 %v10048_v53 }
 0x288   :  { %5390 = vmatpush1.bf16.msra.mxu1 %v10049_v42  ;;  %5454 = vmatpush1.bf16.msra.mxu0 %v10050_v25  ;;  %v8474_v42 = vsub.s32 1, %v8454_v52  ;;  %v9789_v25 = vsub.s32 3, %v8454_v52 }
 0x289   :  { %5392 = vmatprep.subr.bf16.mxu1 %v10053_v35  ;;  %5456 = vmatprep.subr.bf16.mxu0 %v10054_v14  ;;  %v346_v14 = vrot.slane %v341_v22, %v8461_v34  ;;  %v354_v35 = vrot.slane %v341_v22, %v8464_v49 }
 0x28a   :  { %v449_v38 = vpop.f32.mrb[0].mxu1  ;;  %v8471_v53 = vpop.f32.mrb[2].mxu0  ;;  %10055 = vst [vmem:[#allocation144_spill] sm:$0xff] %v8474_v42  ;;  %v350_v51 = vrot.slane %v341_v22, %v8474_v42  ;;  %v358_v50 = vrot.slane %v341_v22, %v9789_v25  ;;  %v10066_v42 = vld [vmem:[#allocation73_spill] sm:$0xff]  ;;  %v10068_v25 = vld [vmem:[#allocation75_spill] sm:$0xff] }
 0x28b   :  { %v451_v0 = vpop.f32.mrb[1].mxu1  ;;  %v528_v23 = vpop.f32.mrb[3].mxu0 }
 0x28c   :  { %5394 = vmatpush1.bf16.msra.mxu1 %v10056_v13  ;;  %5458 = vmatpush1.bf16.msra.mxu0 %v10057_v12 }
 0x28d   :  { %5396 = vmatprep.subr.bf16.mxu1 %v10058_v59  ;;  %5460 = vmatprep.subr.bf16.mxu0 %v10059_v58  ;;  %v10064_v59 = vld [vmem:[#allocation71_spill] sm:$0xff]  ;;  %v10065_v58 = vld [vmem:[#allocation72_spill] sm:$0xff] }
 0x28e   :  { %v455_v37 = vpop.f32.mrb[2].mxu1  ;;  %v532_v36 = vpop.f32.mrb[4].mxu0 }
 0x28f   :  { %v8486_v31 = vadd.f32 %v455_v37, %v346_v14  ;;  %v8488_v13 = vadd.f32 %v532_v36, %v354_v35  ;;  %v457_v12 = vpop.f32.mrb[3].mxu1  ;;  %v534_v30 = vpop.f32.mrb[5].mxu0  ;;  %v10069_v37 = vld [vmem:[#allocation76_spill] sm:$0xff]  ;;  %v10070_v36 = vld [vmem:[#allocation77_spill] sm:$0xff] }
 0x290   :  { %v8490_v34 = vadd.f32 %v457_v12, %v350_v51  ;;  %v8492_v49 = vadd.f32 %v534_v30, %v358_v50  ;;  %5398 = vmatpush1.bf16.msra.mxu1 %v10064_v59  ;;  %5462 = vmatpush1.bf16.msra.mxu0 %v10065_v58  ;;  %v361_v12 = vsub.s32 4, %v8454_v52  ;;  %v369_v30 = vsub.s32 6, %v8454_v52 }
 0x291   :  { %10060 = vst [vmem:[#allocation145_spill] sm:$0xff] %v8486_v31  ;;  %10061 = vst [vmem:[#allocation146_spill] sm:$0xff] %v8488_v13  ;;  %5400 = vmatprep.subr.bf16.mxu1 %v10066_v42  ;;  %5464 = vmatprep.subr.bf16.mxu0 %v10067_v18  ;;  %v10071_v13 = vld [vmem:[#allocation78_spill] sm:$0xff] }
 0x292   :  { %10062 = vst [vmem:[#allocation147_spill] sm:$0xff] %v8490_v34  ;;  %10063 = vst [vmem:[#allocation148_spill] sm:$0xff] %v8492_v49  ;;  %v365_v49 = vsub.s32 5, %v8454_v52  ;;  %v373_v34 = vsub.s32 7, %v8454_v52  ;;  %v362_v31 = vrot.slane %v341_v22, %v361_v12  ;;  %v370_v42 = vrot.slane %v341_v22, %v369_v30 }
 0x293   :  { %v8524_v30 = vadd.f32 %v451_v0, %v350_v51 }
 0x294   :  { %5402 = vmatpush1.bf16.msra.mxu1 %v10068_v25  ;;  %5466 = vmatpush1.bf16.msra.mxu0 %v10069_v37  ;;  %v366_v58 = vrot.slane %v341_v22, %v365_v49  ;;  %v374_v18 = vrot.slane %v341_v22, %v373_v34 }
 0x295   :  { %5468 = vmatprep.subr.bf16.mxu1 %v10070_v36  ;;  %5532 = vmatprep.subr.bf16.mxu0 %v10071_v13 }
 0x2aa   :  { %v603_v59 = vpop.f32.mrb[4].mxu1  ;;  %v680_v25 = vpop.f32.mrb[6].mxu0 }
 0x2ab   :  { %v8506_v17 = vadd.f32 %v603_v59, %v362_v31  ;;  %v8508_v37 = vadd.f32 %v680_v25, %v370_v42  ;;  %v605_v36 = vpop.f32.mrb[5].mxu1  ;;  %v682_v13 = vpop.f32.mrb[7].mxu0  ;;  %v8522_v25 = vadd.f32 %v449_v38, %v346_v14 }
 0x2ac   :  { %v8510_v11 = vadd.f32 %v605_v36, %v366_v58  ;;  %v8512_v10 = vadd.f32 %v682_v13, %v374_v18 }
 0x2ad   :  { %10072 = vst [vmem:[#allocation149_spill] sm:$0xff] %v8506_v17  ;;  %10073 = vst [vmem:[#allocation150_spill] sm:$0xff] %v8508_v37  ;;  %v10095_v17 = vld [vmem:[#allocation95_spill] sm:$0xff] }
 0x2ae   :  { %10074 = vst [vmem:[#allocation151_spill] sm:$0xff] %v8510_v11  ;;  %10075 = vst [vmem:[#allocation152_spill] sm:$0xff] %v8512_v10  ;;  %v609_v63 = vpop.f32.mrb[6].mxu1  ;;  %v686_v60 = vpop.f32.mrb[8].mxu0  ;;  %v10094_v11 = vld [vmem:[#allocation94_spill] sm:$0xff] }
 0x2af   :  { %v8514_v57 = vadd.f32 %v609_v63, %v362_v31  ;;  %v8516_v12 = vadd.f32 %v686_v60, %v370_v42  ;;  %v611_v49 = vpop.f32.mrb[7].mxu1  ;;  %v688_v34 = vpop.f32.mrb[9].mxu0  ;;  %v8528_v42 = vadd.f32 %v528_v23, %v358_v50 }
 0x2b0   :  { %v8518_v22 = vadd.f32 %v611_v49, %v366_v58  ;;  %v8520_v59 = vadd.f32 %v688_v34, %v374_v18  ;;  %v8532_v58 = vadd.f32 %v8471_v53, %v354_v35 }
 0x2b2   :  { %10076 = vst [vmem:[#allocation153_spill] sm:$0xff] %v8532_v58 }
 0x2ea   :  { %v1013_v36 = vpop.f32.mrb[8].mxu1  ;;  %v1084_v52 = vpop.f32.mrb[10].mxu0 }
 0x2eb   :  { %v1231_v13 = vadd.f32 %v1013_v36, %v8522_v25  ;;  %v1015_v37 = vpop.f32.mrb[9].mxu1  ;;  %v1086_v10 = vpop.f32.mrb[11].mxu0  ;;  %v1233_v0 = vadd.f32 %v1084_v52, %v8532_v58 }
 0x2ec   :  { %v1232_v63 = vadd.f32 %v1015_v37, %v8524_v30  ;;  %v1234_v18 = vadd.f32 %v1086_v10, %v8528_v42 }
 0x2ed   :  { %v4750_v60 = vmul.f32 -1.442695, %v1231_v13 }
 0x2ee   :  { %v4751_v31 = vmul.f32 -1.442695, %v1232_v63  ;;  %v4752_v51 = vmul.f32 -1.442695, %v1234_v18 }
 0x2ef   :  { %7472 = vpow2.f32 %v4750_v60 }
 0x2f0   :  { %7474 = vpow2.f32 %v4751_v31 }
 0x2f1   :  { %7476 = vpow2.f32 %v4752_v51 }
 0x2f2   :  { %7478 = vtanh.f32 %v1233_v0 }
 0x2f9   :  { %v7473_v14 = vpop.eup %7472 }
 0x2fa   :  { %v7475_v38 = vpop.eup %7474  ;;  %v1254_v49 = vadd.f32 1.0, %v7473_v14 }
 0x2fb   :  { %v1260_v37 = vadd.f32 1.0, %v7475_v38  ;;  %v7477_v34 = vpop.eup %7476 }
 0x2fc   :  { %7480 = vrcp.f32 %v1254_v49  ;;  %v7479_v50 = vpop.eup %7478  ;;  %v1267_v10 = vadd.f32 1.0, %v7477_v34 }
 0x2fd   :  { %7482 = vrcp.f32 %v1260_v37 }
 0x2fe   :  { %7484 = vrcp.f32 %v1267_v10 }
 0x306   :  { %v7481_v23 = vpop.eup %7480 }
 0x307   :  { %v7483_v36 = vpop.eup %7482  ;;  %v1271_v13 = vmul.f32 %v7481_v23, %v7479_v50 }
 0x308   :  { %v1270_v63 = vmul.f32 0.0, %v7483_v36  ;;  %v7485_v52 = vpop.eup %7484 }
 0x30a   :  { %v8535_v35 = vadd.f32 %v1271_v13, %v1270_v63 }
 0x30c   :  { %7486 = vtanh.f32 %v8535_v35 }
 0x316   :  { %v7487_v53 = vpop.eup %7486 }
 0x317   :  { %v8538_v60 = vmul.f32 %v7487_v53, %v7485_v52 }
 0x319   :  { %10077 = vst [vmem:[#allocation154_spill] sm:$0xff] %v8538_v60 }
 0x32a   :  { %v1155_v31 = vpop.f32.mrb[10].mxu1  ;;  %v1226_v18 = vpop.f32.mrb[12].mxu0 }
 0x32b   :  { %v1239_v51 = vrot.slane %v1155_v31, 2  ;;  %v1157_v0 = vpop.f32.mrb[11].mxu1  ;;  %v1228_v14 = vpop.f32.mrb[13].mxu0  ;;  %v1241_v13 = vrot.slane %v1226_v18, 2 }
 0x32c   :  { %v1240_v38 = vrot.slane %v1157_v0, 2  ;;  %v1242_v23 = vrot.slane %v1228_v14, 2 }
 0x32d   :  { %v1247_v49 = vadd.f32 %v1239_v51, %v8514_v57  ;;  %v1249_v63 = vadd.f32 %v1241_v13, %v8516_v12 }
 0x32e   :  { %v1248_v37 = vadd.f32 %v1240_v38, %v8518_v22  ;;  %v1250_v36 = vadd.f32 %v1242_v23, %v8520_v59 }
 0x32f   :  { %v4753_v34 = vmul.f32 -1.442695, %v1247_v49 }
 0x330   :  { %v4754_v50 = vmul.f32 -1.442695, %v1248_v37  ;;  %v4755_v10 = vmul.f32 -1.442695, %v1250_v36 }
 0x331   :  { %7488 = vpow2.f32 %v4753_v34 }
 0x332   :  { %7490 = vpow2.f32 %v4754_v50 }
 0x333   :  { %7492 = vpow2.f32 %v4755_v10 }
 0x334   :  { %7494 = vtanh.f32 %v1249_v63  ;;  %v10079_v63 = vld [vmem:[#allocation79_spill] sm:$0xff] }
 0x33b   :  { %v7489_v52 = vpop.eup %7488 }
 0x33c   :  { %v7491_v53 = vpop.eup %7490  ;;  %v1278_v31 = vadd.f32 1.0, %v7489_v52  ;;  %v10080_v52 = vld [vmem:[#allocation80_spill] sm:$0xff] }
 0x33d   :  { %v1284_v0 = vadd.f32 1.0, %v7491_v53  ;;  %v7493_v51 = vpop.eup %7492  ;;  %v10081_v53 = vld [vmem:[#allocation81_spill] sm:$0xff] }
 0x33e   :  { %7496 = vrcp.f32 %v1278_v31  ;;  %v7495_v38 = vpop.eup %7494  ;;  %v1291_v34 = vadd.f32 1.0, %v7493_v51  ;;  %v10082_v31 = vld [vmem:[#allocation82_spill] sm:$0xff]  ;;  %v10084_v51 = vld [vmem:[#allocation84_spill] sm:$0xff] }
 0x33f   :  { %7498 = vrcp.f32 %v1284_v0  ;;  %v10083_v0 = vld [vmem:[#allocation83_spill] sm:$0xff] }
 0x340   :  { %7500 = vrcp.f32 %v1291_v34  ;;  %v10089_v34 = vld [vmem:[#allocation89_spill] sm:$0xff] }
 0x348   :  { %v7497_v49 = vpop.eup %7496 }
 0x349   :  { %v7499_v14 = vpop.eup %7498  ;;  %v1295_v37 = vmul.f32 %v7497_v49, %v7495_v38  ;;  %v10085_v38 = vld [vmem:[#allocation85_spill] sm:$0xff]  ;;  %v10086_v49 = vld [vmem:[#allocation86_spill] sm:$0xff] }
 0x34a   :  { %v1294_v50 = vmul.f32 0.0, %v7499_v14  ;;  %v7501_v18 = vpop.eup %7500  ;;  %v10087_v14 = vld [vmem:[#allocation87_spill] sm:$0xff] }
 0x34c   :  { %v8544_v23 = vadd.f32 %v1295_v37, %v1294_v50  ;;  %v10088_v37 = vld [vmem:[#allocation88_spill] sm:$0xff]  ;;  %v10090_v50 = vld [vmem:[#allocation90_spill] sm:$0xff] }
 0x34e   :  { %7502 = vtanh.f32 %v8544_v23 }
 0x358   :  { %v7503_v36 = vpop.eup %7502 }
 0x359   :  { %v1298_v13 = vmul.f32 %v7503_v36, %v7501_v18  ;;  %v10091_v18 = vld [vmem:[#allocation91_spill] sm:$0xff]  ;;  %v10092_v36 = vld [vmem:[#allocation92_spill] sm:$0xff] }
 0x35b   :  { %v8547_v10 = vrot.slane %v1298_v13, 6  ;;  %v10093_v13 = vld [vmem:[#allocation93_spill] sm:$0xff] }
 0x35d   :  { %10078 = vst [vmem:[#allocation155_spill] sm:$0xff] %v8547_v10  ;;  %1368 = vmatprep.mubr.f32.mxu1 %v8547_v10  ;;  %1439 = vmatprep.mubr.f32.mxu0 %v8547_v10 }
 0x35e   :  { %1369 = vmatmul.mubr.f32.vlgmr.msra.gmra.mrb[12].mxu1 %v8538_v60  ;;  %1440 = vmatmul.mubr.f32.vlgmr.msra.gmra.mrb[14].mxu0 %v8538_v60 }
 0x35f   :  { %5470 = vmatpush1.bf16.msra.mxu1 %v10079_v63  ;;  %5534 = vmatpush1.bf16.msra.mxu0 %v10080_v52 }
 0x360   :  { %1510 = vmatprep.mubr.f32.mxu1 %v8547_v10  ;;  %1581 = vmatprep.mubr.f32.mxu0 %v8547_v10  ;;  %v10096_v10 = vld [vmem:[#allocation96_spill] sm:$0xff] }
 0x361   :  { %5472 = vmatprep.subr.bf16.mxu1 %v10081_v53  ;;  %5536 = vmatprep.subr.bf16.mxu0 %v10082_v31 }
 0x363   :  { %5474 = vmatpush1.bf16.msra.mxu1 %v10083_v0  ;;  %5538 = vmatpush1.bf16.msra.mxu0 %v10084_v51 }
 0x364   :  { %5476 = vmatprep.subr.bf16.mxu1 %v10085_v38  ;;  %5540 = vmatprep.subr.bf16.mxu0 %v10086_v49  ;;  %v10097_v49 = vld [vmem:[#allocation97_spill] sm:$0xff] }
 0x367   :  { %5478 = vmatpush1.bf16.msra.mxu1 %v10087_v14  ;;  %5542 = vmatpush1.bf16.msra.mxu0 %v10088_v37  ;;  %v10098_v14 = vld [vmem:[#allocation98_spill] sm:$0xff]  ;;  %v10099_v37 = vld [vmem:[#allocation99_spill] sm:$0xff] }
 0x368   :  { %5480 = vmatprep.subr.bf16.mxu1 %v10089_v34  ;;  %5544 = vmatprep.subr.bf16.mxu0 %v10090_v50  ;;  %v10100_v34 = vld [vmem:[#allocation100_spill] sm:$0xff]  ;;  %v10101_v50 = vld [vmem:[#allocation101_spill] sm:$0xff] }
 0x36b   :  { %5482 = vmatpush1.bf16.msra.mxu1 %v10091_v18  ;;  %5546 = vmatpush1.bf16.msra.mxu0 %v10092_v36  ;;  %v10102_v18 = vld [vmem:[#allocation102_spill] sm:$0xff]  ;;  %v10103_v36 = vld [vmem:[#allocation103_spill] sm:$0xff] }
 0x36c   :  { %5484 = vmatprep.subr.bf16.mxu1 %v10093_v13  ;;  %5548 = vmatprep.subr.bf16.mxu0 %v10094_v11  ;;  %v10104_v13 = vld [vmem:[#allocation104_spill] sm:$0xff]  ;;  %v10105_v11 = vld [vmem:[#allocation105_spill] sm:$0xff] }
 0x36f   :  { %5486 = vmatpush1.bf16.msra.mxu1 %v10095_v17  ;;  %5550 = vmatpush1.bf16.msra.mxu0 %v10096_v10  ;;  %v10106_v17 = vld [vmem:[#allocation106_spill] sm:$0xff]  ;;  %v10107_v10 = vld [vmem:[#allocation107_spill] sm:$0xff] }
 0x370   :  { %5488 = vmatprep.subr.bf16.mxu1 %v10097_v49  ;;  %5552 = vmatprep.subr.bf16.mxu0 %v10098_v14  ;;  %v10108_v49 = vld [vmem:[#allocation108_spill] sm:$0xff]  ;;  %v10109_v14 = vld [vmem:[#allocation109_spill] sm:$0xff] }
 0x373   :  { %5490 = vmatpush1.bf16.msra.mxu1 %v10099_v37  ;;  %5554 = vmatpush1.bf16.msra.mxu0 %v10100_v34  ;;  %v10110_v37 = vld [vmem:[#allocation110_spill] sm:$0xff]  ;;  %v10111_v34 = vld [vmem:[#allocation111_spill] sm:$0xff] }
 0x374   :  { %5492 = vmatprep.subr.bf16.mxu1 %v10101_v50  ;;  %5556 = vmatprep.subr.bf16.mxu0 %v10102_v18  ;;  %v10112_v50 = vld [vmem:[#allocation112_spill] sm:$0xff]  ;;  %v10113_v18 = vld [vmem:[#allocation113_spill] sm:$0xff] }
 0x377   :  { %5494 = vmatpush1.bf16.msra.mxu1 %v10103_v36  ;;  %5558 = vmatpush1.bf16.msra.mxu0 %v10104_v13  ;;  %v10114_v36 = vld [vmem:[#allocation114_spill] sm:$0xff]  ;;  %v10115_v13 = vld [vmem:[#allocation115_spill] sm:$0xff] }
 0x378   :  { %5496 = vmatprep.subr.bf16.mxu1 %v10105_v11  ;;  %5560 = vmatprep.subr.bf16.mxu0 %v10106_v17  ;;  %v10116_v11 = vld [vmem:[#allocation116_spill] sm:$0xff]  ;;  %v10117_v17 = vld [vmem:[#allocation117_spill] sm:$0xff] }
 0x37b   :  { %5498 = vmatpush1.bf16.msra.mxu1 %v10107_v10  ;;  %5562 = vmatpush1.bf16.msra.mxu0 %v10108_v49  ;;  %v10118_v10 = vld [vmem:[#allocation118_spill] sm:$0xff]  ;;  %v10119_v49 = vld [vmem:[#allocation119_spill] sm:$0xff] }
 0x37c   :  { %5500 = vmatprep.subr.bf16.mxu1 %v10109_v14  ;;  %5564 = vmatprep.subr.bf16.mxu0 %v10110_v37  ;;  %v10120_v14 = vld [vmem:[#allocation120_spill] sm:$0xff]  ;;  %v10121_v37 = vld [vmem:[#allocation121_spill] sm:$0xff] }
 0x37f   :  { %5502 = vmatpush1.bf16.msra.mxu1 %v10111_v34  ;;  %5566 = vmatpush1.bf16.msra.mxu0 %v10112_v50  ;;  %v10122_v34 = vld [vmem:[#allocation122_spill] sm:$0xff]  ;;  %v10123_v50 = vld [vmem:[#allocation123_spill] sm:$0xff] }
 0x380   :  { %5504 = vmatprep.subr.bf16.mxu1 %v10113_v18  ;;  %5568 = vmatprep.subr.bf16.mxu0 %v10114_v36  ;;  %v10124_v18 = vld [vmem:[#allocation124_spill] sm:$0xff]  ;;  %v10125_v36 = vld [vmem:[#allocation125_spill] sm:$0xff] }
 0x383   :  { %5506 = vmatpush1.bf16.msra.mxu1 %v10115_v13  ;;  %5570 = vmatpush1.bf16.msra.mxu0 %v10116_v11  ;;  %v10126_v13 = vld [vmem:[#allocation126_spill] sm:$0xff]  ;;  %v10127_v11 = vld [vmem:[#allocation127_spill] sm:$0xff] }
 0x384   :  { %5508 = vmatprep.subr.bf16.mxu1 %v10117_v17  ;;  %5572 = vmatprep.subr.bf16.mxu0 %v10118_v10  ;;  %v10128_v17 = vld [vmem:[#allocation128_spill] sm:$0xff] }
 0x387   :  { %5510 = vmatpush1.bf16.msra.mxu1 %v10119_v49  ;;  %5574 = vmatpush1.bf16.msra.mxu0 %v10120_v14 }
 0x388   :  { %5512 = vmatprep.subr.bf16.mxu1 %v10121_v37  ;;  %5576 = vmatprep.subr.bf16.mxu0 %v10122_v34 }
 0x38b   :  { %5514 = vmatpush1.bf16.msra.mxu1 %v10123_v50  ;;  %5578 = vmatpush1.bf16.msra.mxu0 %v10124_v18 }
 0x38c   :  { %5516 = vmatprep.subr.bf16.mxu1 %v10125_v36  ;;  %5580 = vmatprep.subr.bf16.mxu0 %v10126_v13 }
 0x38f   :  { %5518 = vmatpush1.bf16.msra.mxu1 %v10127_v11  ;;  %5582 = vmatpush1.bf16.msra.mxu0 %v10128_v17 }
 0x390   :  { %5520 = vmatprep.subr.bf16.mxu1 %v8365_v4  ;;  %5584 = vmatprep.subr.bf16.mxu0 %v8367_v5 }
 0x393   :  { %5522 = vmatpush1.bf16.msra.mxu1 %v8371_v26  ;;  %5586 = vmatpush1.bf16.msra.mxu0 %v8373_v27 }
 0x394   :  { %5524 = vmatprep.subr.bf16.mxu1 %v8377_v1  ;;  %5588 = vmatprep.subr.bf16.mxu0 %v8379_v48 }
 0x397   :  { %5526 = vmatpush1.bf16.msra.mxu1 %v8383_v9  ;;  %5590 = vmatpush1.bf16.msra.mxu0 %v8385_v24 }
 0x398   :  { %5528 = vmatprep.subr.bf16.mxu1 %v8389_v39  ;;  %5592 = vmatprep.subr.bf16.mxu0 %v8391_v20 }
 0x39b   :  { %5530 = vmatpush1.bf16.msra.mxu1 %v8395_v43  ;;  %5594 = vmatpush1.bf16.msra.mxu0 %v8397_v6 }
 0x39c   :  { %5596 = vmatprep.subr.bf16.mxu1 %v8007_v45  ;;  %5660 = vmatprep.subr.bf16.mxu0 %v8009_v46 }
 0x39e   :  { %1511 = vmatmul.mubr.f32.vlgmr.msra.gmra.mrb[14].mxu1 %v8538_v60  ;;  %1582 = vmatmul.mubr.f32.vlgmr.msra.gmra.mrb[16].mxu0 %v8538_v60  ;;  %v10129_v60 = vld [vmem:[#allocation36_spill] sm:$0xff] }
 0x39f   :  { %5598 = vmatpush1.bf16.msra.mxu1 %v8011_v54  ;;  %5662 = vmatpush1.bf16.msra.mxu0 %v8013_v55 }
 0x3a0   :  { %5600 = vmatprep.subr.bf16.mxu1 %v8017_v61  ;;  %5664 = vmatprep.subr.bf16.mxu0 %v8019_v62 }
 0x3a3   :  { %5602 = vmatpush1.bf16.msra.mxu1 %v8025_v2  ;;  %5666 = vmatpush1.bf16.msra.mxu0 %v8027_v3 }
 0x3a4   :  { %5604 = vmatprep.subr.bf16.mxu1 %v8031_v7  ;;  %5668 = vmatprep.subr.bf16.mxu0 %v8033_v8 }
 0x3a7   :  { %5606 = vmatpush1.bf16.msra.mxu1 %v8041_v15  ;;  %5670 = vmatpush1.bf16.msra.mxu0 %v8043_v16 }
 0x3a8   :  { %5608 = vmatprep.subr.bf16.mxu1 %v8047_v19  ;;  %5672 = vmatprep.subr.bf16.mxu0 %v8049_v21  ;;  %v10130_v21 = vld [vmem:[#allocation37_spill] sm:$0xff] }
 0x3ab   :  { %5610 = vmatpush1.bf16.msra.mxu1 %v8055_v28  ;;  %5674 = vmatpush1.bf16.msra.mxu0 %v8057_v29  ;;  %v10131_v28 = vld [vmem:[#allocation38_spill] sm:$0xff]  ;;  %v10132_v29 = vld [vmem:[#allocation39_spill] sm:$0xff] }
 0x3ac   :  { %5612 = vmatprep.subr.bf16.mxu1 %v8061_v32  ;;  %5676 = vmatprep.subr.bf16.mxu0 %v8063_v33  ;;  %v10133_v32 = vld [vmem:[#allocation40_spill] sm:$0xff]  ;;  %v10134_v33 = vld [vmem:[#allocation41_spill] sm:$0xff] }
 0x3af   :  { %5614 = vmatpush1.bf16.msra.mxu1 %v8067_v40  ;;  %5678 = vmatpush1.bf16.msra.mxu0 %v8069_v41  ;;  %v10135_v40 = vld [vmem:[#allocation42_spill] sm:$0xff]  ;;  %v10136_v41 = vld [vmem:[#allocation43_spill] sm:$0xff] }
 0x3b0   :  { %5616 = vmatprep.subr.bf16.mxu1 %v8073_v44  ;;  %5680 = vmatprep.subr.bf16.mxu0 %v8075_v47  ;;  %v10137_v44 = vld [vmem:[#allocation44_spill] sm:$0xff]  ;;  %v10138_v47 = vld [vmem:[#allocation45_spill] sm:$0xff] }
 0x3b3   :  { %5618 = vmatpush1.bf16.msra.mxu1 %v8079_v56  ;;  %5682 = vmatpush1.bf16.msra.mxu0 %v10129_v60  ;;  %v10139_v56 = vld [vmem:[#allocation46_spill] sm:$0xff]  ;;  %v10140_v60 = vld [vmem:[#allocation47_spill] sm:$0xff] }
 0x3b4   :  { %5620 = vmatprep.subr.bf16.mxu1 %v10130_v21  ;;  %5684 = vmatprep.subr.bf16.mxu0 %v10131_v28  ;;  %v10141_v21 = vld [vmem:[#allocation48_spill] sm:$0xff]  ;;  %v10142_v28 = vld [vmem:[#allocation49_spill] sm:$0xff] }
 0x3b7   :  { %5622 = vmatpush1.bf16.msra.mxu1 %v10132_v29  ;;  %5686 = vmatpush1.bf16.msra.mxu0 %v10133_v32  ;;  %v10143_v29 = vld [vmem:[#allocation50_spill] sm:$0xff]  ;;  %v10144_v32 = vld [vmem:[#allocation51_spill] sm:$0xff] }
 0x3b8   :  { %5624 = vmatprep.subr.bf16.mxu1 %v10134_v33  ;;  %5688 = vmatprep.subr.bf16.mxu0 %v10135_v40  ;;  %v10145_v33 = vld [vmem:[#allocation52_spill] sm:$0xff]  ;;  %v10146_v40 = vld [vmem:[#allocation53_spill] sm:$0xff] }
 0x3bb   :  { %5626 = vmatpush1.bf16.msra.mxu1 %v10136_v41  ;;  %5690 = vmatpush1.bf16.msra.mxu0 %v10137_v44  ;;  %v10147_v41 = vld [vmem:[#allocation54_spill] sm:$0xff]  ;;  %v10148_v44 = vld [vmem:[#allocation55_spill] sm:$0xff] }
 0x3bc   :  { %5628 = vmatprep.subr.bf16.mxu1 %v10138_v47  ;;  %5692 = vmatprep.subr.bf16.mxu0 %v10139_v56  ;;  %v10149_v47 = vld [vmem:[#allocation56_spill] sm:$0xff]  ;;  %v10150_v56 = vld [vmem:[#allocation57_spill] sm:$0xff] }
 0x3bf   :  { %5630 = vmatpush1.bf16.msra.mxu1 %v10140_v60  ;;  %5694 = vmatpush1.bf16.msra.mxu0 %v10141_v21  ;;  %v10151_v60 = vld [vmem:[#allocation58_spill] sm:$0xff]  ;;  %v10152_v21 = vld [vmem:[#allocation59_spill] sm:$0xff] }
 0x3c0   :  { %5632 = vmatprep.subr.bf16.mxu1 %v10142_v28  ;;  %5696 = vmatprep.subr.bf16.mxu0 %v10143_v29  ;;  %v10153_v28 = vld [vmem:[#allocation60_spill] sm:$0xff]  ;;  %v10154_v29 = vld [vmem:[#allocation61_spill] sm:$0xff] }
 0x3c3   :  { %5634 = vmatpush1.bf16.msra.mxu1 %v10144_v32  ;;  %5698 = vmatpush1.bf16.msra.mxu0 %v10145_v33  ;;  %v10155_v32 = vld [vmem:[#allocation62_spill] sm:$0xff]  ;;  %v10156_v33 = vld [vmem:[#allocation63_spill] sm:$0xff] }
 0x3c4   :  { %5636 = vmatprep.subr.bf16.mxu1 %v10146_v40  ;;  %5700 = vmatprep.subr.bf16.mxu0 %v10147_v41  ;;  %v10157_v40 = vld [vmem:[#allocation64_spill] sm:$0xff]  ;;  %v10158_v41 = vld [vmem:[#allocation65_spill] sm:$0xff] }
 0x3c7   :  { %5638 = vmatpush1.bf16.msra.mxu1 %v10148_v44  ;;  %5702 = vmatpush1.bf16.msra.mxu0 %v10149_v47  ;;  %v10159_v44 = vld [vmem:[#allocation66_spill] sm:$0xff]  ;;  %v10160_v47 = vld [vmem:[#allocation67_spill] sm:$0xff] }
 0x3c8   :  { %5640 = vmatprep.subr.bf16.mxu1 %v10150_v56  ;;  %5704 = vmatprep.subr.bf16.mxu0 %v10151_v60  ;;  %v10161_v56 = vld [vmem:[#allocation68_spill] sm:$0xff]  ;;  %v10162_v60 = vld [vmem:[#allocation69_spill] sm:$0xff] }
 0x3cb   :  { %5642 = vmatpush1.bf16.msra.mxu1 %v10152_v21  ;;  %5706 = vmatpush1.bf16.msra.mxu0 %v10153_v28  ;;  %v10163_v21 = vld [vmem:[#allocation70_spill] sm:$0xff]  ;;  %v10164_v28 = vld [vmem:[#allocation71_spill] sm:$0xff] }
 0x3cc   :  { %5644 = vmatprep.subr.bf16.mxu1 %v10154_v29  ;;  %5708 = vmatprep.subr.bf16.mxu0 %v10155_v32  ;;  %v10165_v29 = vld [vmem:[#allocation72_spill] sm:$0xff]  ;;  %v10166_v32 = vld [vmem:[#allocation73_spill] sm:$0xff] }
 0x3cf   :  { %5646 = vmatpush1.bf16.msra.mxu1 %v10156_v33  ;;  %5710 = vmatpush1.bf16.msra.mxu0 %v10157_v40  ;;  %v10167_v33 = vld [vmem:[#allocation74_spill] sm:$0xff]  ;;  %v10168_v40 = vld [vmem:[#allocation75_spill] sm:$0xff] }
 0x3d0   :  { %5648 = vmatprep.subr.bf16.mxu1 %v10158_v41  ;;  %5712 = vmatprep.subr.bf16.mxu0 %v10159_v44  ;;  %v10169_v41 = vld [vmem:[#allocation76_spill] sm:$0xff]  ;;  %v10170_v44 = vld [vmem:[#allocation77_spill] sm:$0xff] }
 0x3d3   :  { %5650 = vmatpush1.bf16.msra.mxu1 %v10160_v47  ;;  %5714 = vmatpush1.bf16.msra.mxu0 %v10161_v56  ;;  %v10171_v47 = vld [vmem:[#allocation78_spill] sm:$0xff] }
 0x3d4   :  { %5652 = vmatprep.subr.bf16.mxu1 %v10162_v60  ;;  %5716 = vmatprep.subr.bf16.mxu0 %v10163_v21 }
 0x3d7   :  { %5654 = vmatpush1.bf16.msra.mxu1 %v10164_v28  ;;  %5718 = vmatpush1.bf16.msra.mxu0 %v10165_v29 }
 0x3d8   :  { %5656 = vmatprep.subr.bf16.mxu1 %v10166_v32  ;;  %5720 = vmatprep.subr.bf16.mxu0 %v10167_v33 }
 0x3db   :  { %5658 = vmatpush1.bf16.msra.mxu1 %v10168_v40  ;;  %5722 = vmatpush1.bf16.msra.mxu0 %v10169_v41 }
 0x3dc   :  { %5724 = vmatprep.subr.bf16.mxu1 %v10170_v44  ;;  %5788 = vmatprep.subr.bf16.mxu0 %v10171_v47 }
 0x431   :  { %v1370_v56 = vpop.f32.mrb[12].mxu1  ;;  %v1441_v60 = vpop.f32.mrb[14].mxu0 }
 0x432   :  { %v1592_v19 = vrot.slane %v1370_v56, 6  ;;  %v1372_v21 = vpop.f32.mrb[13].mxu1  ;;  %v1443_v16 = vpop.f32.mrb[15].mxu0  ;;  %v1594_v44 = vrot.slane %v1441_v60, 6 }
 0x433   :  { %v1593_v28 = vrot.slane %v1372_v21, 6  ;;  %v1595_v8 = vrot.slane %v1443_v16, 6 }
 0x434   :  { %v1600_v29 = vadd.f32 %v1592_v19, %v8522_v25  ;;  %v1602_v47 = vadd.f32 %v1594_v44, %v8532_v58 }
 0x435   :  { %v1601_v32 = vadd.f32 %v1593_v28, %v8524_v30  ;;  %v1603_v41 = vadd.f32 %v1595_v8, %v8528_v42 }
 0x436   :  { %v4756_v15 = vmul.f32 -1.442695, %v1600_v29 }
 0x437   :  { %v4757_v33 = vmul.f32 -1.442695, %v1601_v32  ;;  %v4758_v40 = vmul.f32 -1.442695, %v1603_v41 }
 0x438   :  { %7504 = vpow2.f32 %v4756_v15  ;;  %v1640_v15 = vrot.slane %v8535_v35, 6 }
 0x439   :  { %7506 = vpow2.f32 %v4757_v33 }
 0x43a   :  { %7508 = vpow2.f32 %v4758_v40 }
 0x43b   :  { %7510 = vtanh.f32 %v1602_v47 }
 0x442   :  { %v7505_v7 = vpop.eup %7504 }
 0x443   :  { %v7507_v56 = vpop.eup %7506  ;;  %v1623_v3 = vadd.f32 1.0, %v7505_v7 }
 0x444   :  { %v1629_v21 = vadd.f32 1.0, %v7507_v56  ;;  %v7509_v19 = vpop.eup %7508 }
 0x445   :  { %7512 = vrcp.f32 %v1623_v3  ;;  %v7511_v28 = vpop.eup %7510  ;;  %v1636_v8 = vadd.f32 1.0, %v7509_v19 }
 0x446   :  { %7514 = vrcp.f32 %v1629_v21 }
 0x447   :  { %7516 = vrcp.f32 %v1636_v8 }
 0x44f   :  { %v7513_v29 = vpop.eup %7512 }
 0x450   :  { %v7515_v16 = vpop.eup %7514  ;;  %v1643_v32 = vmul.f32 %v7513_v29, %v7511_v28 }
 0x451   :  { %v1642_v33 = vmul.f32 %v7515_v16, %v1640_v15  ;;  %v7517_v7 = vpop.eup %7516 }
 0x453   :  { %v8690_v41 = vadd.f32 %v1643_v32, %v1642_v33 }
 0x455   :  { %7518 = vtanh.f32 %v8690_v41 }
 0x45f   :  { %v7519_v40 = vpop.eup %7518 }
 0x460   :  { %v1646_v44 = vmul.f32 %v7519_v40, %v7517_v7 }
 0x471   :  { %v1512_v47 = vpop.f32.mrb[14].mxu1  ;;  %v1583_v3 = vpop.f32.mrb[16].mxu0 }
 0x472   :  { %v1608_v60 = vrot.slane %v1512_v47, 4  ;;  %v1514_v56 = vpop.f32.mrb[15].mxu1  ;;  %v1585_v21 = vpop.f32.mrb[17].mxu0  ;;  %v1610_v32 = vrot.slane %v1583_v3, 4 }
 0x473   :  { %v1609_v58 = vrot.slane %v1514_v56, 4  ;;  %v1611_v15 = vrot.slane %v1585_v21, 4  ;;  %v1667_v21 = vrot.slane %v8544_v23, 2  ;;  %v10173_v23 = vld [vmem:[#allocation86_spill] sm:$0xff] }
 0x474   :  { %v1616_v35 = vadd.f32 %v1608_v60, %v8514_v57  ;;  %v1618_v33 = vadd.f32 %v1610_v32, %v8516_v12 }
 0x475   :  { %v1617_v28 = vadd.f32 %v1609_v58, %v8518_v22  ;;  %v1619_v16 = vadd.f32 %v1611_v15, %v8520_v59 }
 0x476   :  { %v4759_v19 = vmul.f32 -1.442695, %v1616_v35 }
 0x477   :  { %v4760_v29 = vmul.f32 -1.442695, %v1617_v28  ;;  %v4761_v8 = vmul.f32 -1.442695, %v1619_v16 }
 0x478   :  { %7520 = vpow2.f32 %v4759_v19 }
 0x479   :  { %7522 = vpow2.f32 %v4760_v29 }
 0x47a   :  { %7524 = vpow2.f32 %v4761_v8 }
 0x47b   :  { %7526 = vtanh.f32 %v1618_v33 }
 0x482   :  { %v7521_v7 = vpop.eup %7520 }
 0x483   :  { %v7523_v40 = vpop.eup %7522  ;;  %v1650_v47 = vadd.f32 1.0, %v7521_v7 }
 0x484   :  { %v1656_v56 = vadd.f32 1.0, %v7523_v40  ;;  %v7525_v58 = vpop.eup %7524  ;;  %v8703_v40 = vrot.slane %v1646_v44, 2  ;;  %v10174_v44 = vld [vmem:[#allocation87_spill] sm:$0xff] }
 0x485   :  { %7528 = vrcp.f32 %v1650_v47  ;;  %v7527_v60 = vpop.eup %7526  ;;  %v1663_v29 = vadd.f32 1.0, %v7525_v58  ;;  %v10175_v47 = vld [vmem:[#allocation88_spill] sm:$0xff]  ;;  %v10177_v58 = vld [vmem:[#allocation90_spill] sm:$0xff] }
 0x486   :  { %7530 = vrcp.f32 %v1656_v56  ;;  %10172 = vst [vmem:[#allocation79_spill] sm:$0xff] %v8703_v40  ;;  %v10176_v56 = vld [vmem:[#allocation89_spill] sm:$0xff] }
 0x487   :  { %7532 = vrcp.f32 %v1663_v29  ;;  %v10183_v29 = vld [vmem:[#allocation96_spill] sm:$0xff] }
 0x48f   :  { %v7529_v35 = vpop.eup %7528 }
 0x490   :  { %v7531_v28 = vpop.eup %7530  ;;  %v1670_v19 = vmul.f32 %v7529_v35, %v7527_v60  ;;  %v10178_v60 = vld [vmem:[#allocation91_spill] sm:$0xff]  ;;  %v10179_v35 = vld [vmem:[#allocation92_spill] sm:$0xff] }
 0x491   :  { %v1669_v3 = vmul.f32 %v7531_v28, %v1667_v21  ;;  %v7533_v16 = vpop.eup %7532  ;;  %v10180_v21 = vld [vmem:[#allocation93_spill] sm:$0xff]  ;;  %v10181_v28 = vld [vmem:[#allocation94_spill] sm:$0xff] }
 0x493   :  { %v8698_v15 = vadd.f32 %v1670_v19, %v1669_v3  ;;  %v10182_v19 = vld [vmem:[#allocation95_spill] sm:$0xff]  ;;  %v10184_v3 = vld [vmem:[#allocation97_spill] sm:$0xff] }
 0x495   :  { %7534 = vtanh.f32 %v8698_v15 }
 0x49f   :  { %v7535_v32 = vpop.eup %7534 }
 0x4a0   :  { %v1673_v8 = vmul.f32 %v7535_v32, %v7533_v16  ;;  %v10185_v16 = vld [vmem:[#allocation98_spill] sm:$0xff]  ;;  %v10186_v32 = vld [vmem:[#allocation99_spill] sm:$0xff] }
 0x4a2   :  { %v1675_v33 = vrot.slane %v1673_v8, 2  ;;  %v10187_v8 = vld [vmem:[#allocation100_spill] sm:$0xff] }
 0x4a4   :  { %v8701_v7 = vrot.slane %v1675_v33, 2  ;;  %v10188_v33 = vld [vmem:[#allocation101_spill] sm:$0xff] }
 0x4a6   :  { %1747 = vmatprep.mubr.f32.mxu1 %v8701_v7  ;;  %1818 = vmatprep.mubr.f32.mxu0 %v8701_v7 }
 0x4a7   :  { %1748 = vmatmul.mubr.f32.vlgmr.msra.gmra.mrb[16].mxu1 %v8703_v40  ;;  %1819 = vmatmul.mubr.f32.vlgmr.msra.gmra.mrb[18].mxu0 %v8703_v40 }
 0x4a8   :  { %5726 = vmatpush1.bf16.msra.mxu1 %v10079_v63  ;;  %5790 = vmatpush1.bf16.msra.mxu0 %v10080_v52 }
 0x4a9   :  { %1889 = vmatprep.mubr.f32.mxu1 %v8701_v7  ;;  %1960 = vmatprep.mubr.f32.mxu0 %v8701_v7 }
 0x4aa   :  { %5728 = vmatprep.subr.bf16.mxu1 %v10081_v53  ;;  %5792 = vmatprep.subr.bf16.mxu0 %v10082_v31 }
 0x4ac   :  { %5730 = vmatpush1.bf16.msra.mxu1 %v10083_v0  ;;  %5794 = vmatpush1.bf16.msra.mxu0 %v10084_v51 }
 0x4ad   :  { %5732 = vmatprep.subr.bf16.mxu1 %v10085_v38  ;;  %5796 = vmatprep.subr.bf16.mxu0 %v10173_v23 }
 0x4b0   :  { %5734 = vmatpush1.bf16.msra.mxu1 %v10174_v44  ;;  %5798 = vmatpush1.bf16.msra.mxu0 %v10175_v47 }
 0x4b1   :  { %5736 = vmatprep.subr.bf16.mxu1 %v10176_v56  ;;  %5800 = vmatprep.subr.bf16.mxu0 %v10177_v58 }
 0x4b4   :  { %5738 = vmatpush1.bf16.msra.mxu1 %v10178_v60  ;;  %5802 = vmatpush1.bf16.msra.mxu0 %v10179_v35  ;;  %v10189_v60 = vld [vmem:[#allocation102_spill] sm:$0xff]  ;;  %v10190_v35 = vld [vmem:[#allocation103_spill] sm:$0xff] }
 0x4b5   :  { %5740 = vmatprep.subr.bf16.mxu1 %v10180_v21  ;;  %5804 = vmatprep.subr.bf16.mxu0 %v10181_v28  ;;  %v10191_v21 = vld [vmem:[#allocation104_spill] sm:$0xff]  ;;  %v10192_v28 = vld [vmem:[#allocation105_spill] sm:$0xff] }
 0x4b8   :  { %5742 = vmatpush1.bf16.msra.mxu1 %v10182_v19  ;;  %5806 = vmatpush1.bf16.msra.mxu0 %v10183_v29  ;;  %v10193_v19 = vld [vmem:[#allocation106_spill] sm:$0xff]  ;;  %v10194_v29 = vld [vmem:[#allocation107_spill] sm:$0xff] }
 0x4b9   :  { %5744 = vmatprep.subr.bf16.mxu1 %v10184_v3  ;;  %5808 = vmatprep.subr.bf16.mxu0 %v10185_v16  ;;  %v10195_v3 = vld [vmem:[#allocation108_spill] sm:$0xff]  ;;  %v10196_v16 = vld [vmem:[#allocation109_spill] sm:$0xff] }
 0x4bc   :  { %5746 = vmatpush1.bf16.msra.mxu1 %v10186_v32  ;;  %5810 = vmatpush1.bf16.msra.mxu0 %v10187_v8  ;;  %v10197_v32 = vld [vmem:[#allocation110_spill] sm:$0xff]  ;;  %v10198_v8 = vld [vmem:[#allocation111_spill] sm:$0xff] }
 0x4bd   :  { %5748 = vmatprep.subr.bf16.mxu1 %v10188_v33  ;;  %5812 = vmatprep.subr.bf16.mxu0 %v10189_v60  ;;  %v10199_v33 = vld [vmem:[#allocation112_spill] sm:$0xff]  ;;  %v10200_v60 = vld [vmem:[#allocation113_spill] sm:$0xff] }
 0x4c0   :  { %5750 = vmatpush1.bf16.msra.mxu1 %v10190_v35  ;;  %5814 = vmatpush1.bf16.msra.mxu0 %v10191_v21  ;;  %v10201_v35 = vld [vmem:[#allocation114_spill] sm:$0xff]  ;;  %v10202_v21 = vld [vmem:[#allocation115_spill] sm:$0xff] }
 0x4c1   :  { %5752 = vmatprep.subr.bf16.mxu1 %v10192_v28  ;;  %5816 = vmatprep.subr.bf16.mxu0 %v10193_v19  ;;  %v10203_v28 = vld [vmem:[#allocation116_spill] sm:$0xff]  ;;  %v10204_v19 = vld [vmem:[#allocation117_spill] sm:$0xff] }
 0x4c4   :  { %5754 = vmatpush1.bf16.msra.mxu1 %v10194_v29  ;;  %5818 = vmatpush1.bf16.msra.mxu0 %v10195_v3 }
 0x4c5   :  { %5756 = vmatprep.subr.bf16.mxu1 %v10196_v16  ;;  %5820 = vmatprep.subr.bf16.mxu0 %v10197_v32 }
 0x4c8   :  { %5758 = vmatpush1.bf16.msra.mxu1 %v10198_v8  ;;  %5822 = vmatpush1.bf16.msra.mxu0 %v10199_v33 }
 0x4c9   :  { %5760 = vmatprep.subr.bf16.mxu1 %v10200_v60  ;;  %5824 = vmatprep.subr.bf16.mxu0 %v10201_v35 }
 0x4cc   :  { %5762 = vmatpush1.bf16.msra.mxu1 %v10202_v21  ;;  %5826 = vmatpush1.bf16.msra.mxu0 %v10203_v28 }
 0x4cd   :  { %5764 = vmatprep.subr.bf16.mxu1 %v10204_v19  ;;  %5828 = vmatprep.subr.bf16.mxu0 %v10118_v10 }
 0x4d0   :  { %5766 = vmatpush1.bf16.msra.mxu1 %v10119_v49  ;;  %5830 = vmatpush1.bf16.msra.mxu0 %v10120_v14 }
 0x4d1   :  { %5768 = vmatprep.subr.bf16.mxu1 %v10121_v37  ;;  %5832 = vmatprep.subr.bf16.mxu0 %v10122_v34 }
 0x4d4   :  { %5770 = vmatpush1.bf16.msra.mxu1 %v10123_v50  ;;  %5834 = vmatpush1.bf16.msra.mxu0 %v10124_v18 }
 0x4d5   :  { %5772 = vmatprep.subr.bf16.mxu1 %v10125_v36  ;;  %5836 = vmatprep.subr.bf16.mxu0 %v10126_v13 }
 0x4d8   :  { %5774 = vmatpush1.bf16.msra.mxu1 %v10127_v11  ;;  %5838 = vmatpush1.bf16.msra.mxu0 %v10128_v17 }
 0x4d9   :  { %5776 = vmatprep.subr.bf16.mxu1 %v8365_v4  ;;  %5840 = vmatprep.subr.bf16.mxu0 %v8367_v5 }
 0x4dc   :  { %5778 = vmatpush1.bf16.msra.mxu1 %v8371_v26  ;;  %5842 = vmatpush1.bf16.msra.mxu0 %v8373_v27 }
 0x4dd   :  { %5780 = vmatprep.subr.bf16.mxu1 %v8377_v1  ;;  %5844 = vmatprep.subr.bf16.mxu0 %v8379_v48 }
 0x4e0   :  { %5782 = vmatpush1.bf16.msra.mxu1 %v8383_v9  ;;  %5846 = vmatpush1.bf16.msra.mxu0 %v8385_v24 }
 0x4e1   :  { %5784 = vmatprep.subr.bf16.mxu1 %v8389_v39  ;;  %5848 = vmatprep.subr.bf16.mxu0 %v8391_v20  ;;  %v10209_v20 = vld [vmem:[#allocation24_spill] sm:$0xff] }
 0x4e4   :  { %5786 = vmatpush1.bf16.msra.mxu1 %v8395_v43  ;;  %5850 = vmatpush1.bf16.msra.mxu0 %v8397_v6  ;;  %v10205_v43 = vld [vmem:[#allocation20_spill] sm:$0xff]  ;;  %v10206_v6 = vld [vmem:[#allocation21_spill] sm:$0xff] }
 0x4e5   :  { %5852 = vmatprep.subr.bf16.mxu1 %v8007_v45  ;;  %5916 = vmatprep.subr.bf16.mxu0 %v8009_v46  ;;  %v10207_v45 = vld [vmem:[#allocation22_spill] sm:$0xff]  ;;  %v10208_v46 = vld [vmem:[#allocation23_spill] sm:$0xff] }
 0x4e7   :  { %1890 = vmatmul.mubr.f32.vlgmr.msra.gmra.mrb[18].mxu1 %v8703_v40  ;;  %1961 = vmatmul.mubr.f32.vlgmr.msra.gmra.mrb[20].mxu0 %v8703_v40  ;;  %v10210_v40 = vld [vmem:[#allocation25_spill] sm:$0xff] }
 0x4e8   :  { %5854 = vmatpush1.bf16.msra.mxu1 %v8011_v54  ;;  %5918 = vmatpush1.bf16.msra.mxu0 %v8013_v55  ;;  %v10211_v54 = vld [vmem:[#allocation26_spill] sm:$0xff]  ;;  %v10212_v55 = vld [vmem:[#allocation27_spill] sm:$0xff] }
 0x4e9   :  { %5856 = vmatprep.subr.bf16.mxu1 %v8017_v61  ;;  %5920 = vmatprep.subr.bf16.mxu0 %v8019_v62  ;;  %v10213_v61 = vld [vmem:[#allocation28_spill] sm:$0xff]  ;;  %v10214_v62 = vld [vmem:[#allocation29_spill] sm:$0xff] }
 0x4ec   :  { %5858 = vmatpush1.bf16.msra.mxu1 %v8025_v2  ;;  %5922 = vmatpush1.bf16.msra.mxu0 %v10205_v43  ;;  %v10215_v2 = vld [vmem:[#allocation30_spill] sm:$0xff]  ;;  %v10216_v43 = vld [vmem:[#allocation31_spill] sm:$0xff] }
 0x4ed   :  { %5860 = vmatprep.subr.bf16.mxu1 %v10206_v6  ;;  %5924 = vmatprep.subr.bf16.mxu0 %v10207_v45  ;;  %v10217_v6 = vld [vmem:[#allocation32_spill] sm:$0xff]  ;;  %v10218_v45 = vld [vmem:[#allocation33_spill] sm:$0xff] }
 0x4f0   :  { %5862 = vmatpush1.bf16.msra.mxu1 %v10208_v46  ;;  %5926 = vmatpush1.bf16.msra.mxu0 %v10209_v20  ;;  %v10219_v46 = vld [vmem:[#allocation34_spill] sm:$0xff]  ;;  %v10220_v20 = vld [vmem:[#allocation35_spill] sm:$0xff] }
 0x4f1   :  { %5864 = vmatprep.subr.bf16.mxu1 %v10210_v40  ;;  %5928 = vmatprep.subr.bf16.mxu0 %v10211_v54  ;;  %v10221_v40 = vld [vmem:[#allocation36_spill] sm:$0xff]  ;;  %v10222_v54 = vld [vmem:[#allocation37_spill] sm:$0xff] }
 0x4f4   :  { %5866 = vmatpush1.bf16.msra.mxu1 %v10212_v55  ;;  %5930 = vmatpush1.bf16.msra.mxu0 %v10213_v61  ;;  %v10223_v55 = vld [vmem:[#allocation38_spill] sm:$0xff]  ;;  %v10224_v61 = vld [vmem:[#allocation39_spill] sm:$0xff] }
 0x4f5   :  { %5868 = vmatprep.subr.bf16.mxu1 %v10214_v62  ;;  %5932 = vmatprep.subr.bf16.mxu0 %v10215_v2  ;;  %v10225_v62 = vld [vmem:[#allocation40_spill] sm:$0xff]  ;;  %v10226_v2 = vld [vmem:[#allocation41_spill] sm:$0xff] }
 0x4f8   :  { %5870 = vmatpush1.bf16.msra.mxu1 %v10216_v43  ;;  %5934 = vmatpush1.bf16.msra.mxu0 %v10217_v6  ;;  %v10227_v43 = vld [vmem:[#allocation42_spill] sm:$0xff]  ;;  %v10228_v6 = vld [vmem:[#allocation43_spill] sm:$0xff] }
 0x4f9   :  { %5872 = vmatprep.subr.bf16.mxu1 %v10218_v45  ;;  %5936 = vmatprep.subr.bf16.mxu0 %v10219_v46  ;;  %v10229_v45 = vld [vmem:[#allocation44_spill] sm:$0xff]  ;;  %v10230_v46 = vld [vmem:[#allocation45_spill] sm:$0xff] }
 0x4fc   :  { %5874 = vmatpush1.bf16.msra.mxu1 %v10220_v20  ;;  %5938 = vmatpush1.bf16.msra.mxu0 %v10221_v40  ;;  %v10231_v20 = vld [vmem:[#allocation46_spill] sm:$0xff]  ;;  %v10232_v40 = vld [vmem:[#allocation47_spill] sm:$0xff] }
 0x4fd   :  { %5876 = vmatprep.subr.bf16.mxu1 %v10222_v54  ;;  %5940 = vmatprep.subr.bf16.mxu0 %v10223_v55  ;;  %v10233_v54 = vld [vmem:[#allocation48_spill] sm:$0xff]  ;;  %v10234_v55 = vld [vmem:[#allocation49_spill] sm:$0xff] }
 0x500   :  { %5878 = vmatpush1.bf16.msra.mxu1 %v10224_v61  ;;  %5942 = vmatpush1.bf16.msra.mxu0 %v10225_v62  ;;  %v10235_v61 = vld [vmem:[#allocation50_spill] sm:$0xff]  ;;  %v10236_v62 = vld [vmem:[#allocation51_spill] sm:$0xff] }
 0x501   :  { %5880 = vmatprep.subr.bf16.mxu1 %v10226_v2  ;;  %5944 = vmatprep.subr.bf16.mxu0 %v10227_v43  ;;  %v10237_v2 = vld [vmem:[#allocation52_spill] sm:$0xff]  ;;  %v10238_v43 = vld [vmem:[#allocation53_spill] sm:$0xff] }
 0x504   :  { %5882 = vmatpush1.bf16.msra.mxu1 %v10228_v6  ;;  %5946 = vmatpush1.bf16.msra.mxu0 %v10229_v45  ;;  %v10239_v6 = vld [vmem:[#allocation54_spill] sm:$0xff]  ;;  %v10240_v45 = vld [vmem:[#allocation55_spill] sm:$0xff] }
 0x505   :  { %5884 = vmatprep.subr.bf16.mxu1 %v10230_v46  ;;  %5948 = vmatprep.subr.bf16.mxu0 %v10231_v20  ;;  %v10241_v46 = vld [vmem:[#allocation56_spill] sm:$0xff]  ;;  %v10242_v20 = vld [vmem:[#allocation57_spill] sm:$0xff] }
 0x508   :  { %5886 = vmatpush1.bf16.msra.mxu1 %v10232_v40  ;;  %5950 = vmatpush1.bf16.msra.mxu0 %v10233_v54  ;;  %v10243_v40 = vld [vmem:[#allocation58_spill] sm:$0xff]  ;;  %v10244_v54 = vld [vmem:[#allocation59_spill] sm:$0xff] }
 0x509   :  { %5888 = vmatprep.subr.bf16.mxu1 %v10234_v55  ;;  %5952 = vmatprep.subr.bf16.mxu0 %v10235_v61  ;;  %v10245_v55 = vld [vmem:[#allocation60_spill] sm:$0xff]  ;;  %v10246_v61 = vld [vmem:[#allocation61_spill] sm:$0xff] }
 0x50c   :  { %5890 = vmatpush1.bf16.msra.mxu1 %v10236_v62  ;;  %5954 = vmatpush1.bf16.msra.mxu0 %v10237_v2  ;;  %v10247_v62 = vld [vmem:[#allocation62_spill] sm:$0xff]  ;;  %v10248_v2 = vld [vmem:[#allocation63_spill] sm:$0xff] }
 0x50d   :  { %5892 = vmatprep.subr.bf16.mxu1 %v10238_v43  ;;  %5956 = vmatprep.subr.bf16.mxu0 %v10239_v6  ;;  %v10249_v43 = vld [vmem:[#allocation64_spill] sm:$0xff]  ;;  %v10250_v6 = vld [vmem:[#allocation65_spill] sm:$0xff] }
 0x510   :  { %5894 = vmatpush1.bf16.msra.mxu1 %v10240_v45  ;;  %5958 = vmatpush1.bf16.msra.mxu0 %v10241_v46  ;;  %v10251_v45 = vld [vmem:[#allocation66_spill] sm:$0xff]  ;;  %v10252_v46 = vld [vmem:[#allocation67_spill] sm:$0xff] }
 0x511   :  { %5896 = vmatprep.subr.bf16.mxu1 %v10242_v20  ;;  %5960 = vmatprep.subr.bf16.mxu0 %v10243_v40  ;;  %v10253_v20 = vld [vmem:[#allocation68_spill] sm:$0xff]  ;;  %v10254_v40 = vld [vmem:[#allocation69_spill] sm:$0xff] }
 0x514   :  { %5898 = vmatpush1.bf16.msra.mxu1 %v10244_v54  ;;  %5962 = vmatpush1.bf16.msra.mxu0 %v10245_v55  ;;  %v10255_v54 = vld [vmem:[#allocation70_spill] sm:$0xff]  ;;  %v10256_v55 = vld [vmem:[#allocation71_spill] sm:$0xff] }
 0x515   :  { %5900 = vmatprep.subr.bf16.mxu1 %v10246_v61  ;;  %5964 = vmatprep.subr.bf16.mxu0 %v10247_v62  ;;  %v10257_v61 = vld [vmem:[#allocation72_spill] sm:$0xff]  ;;  %v10258_v62 = vld [vmem:[#allocation73_spill] sm:$0xff] }
 0x518   :  { %5902 = vmatpush1.bf16.msra.mxu1 %v10248_v2  ;;  %5966 = vmatpush1.bf16.msra.mxu0 %v10249_v43  ;;  %v10259_v2 = vld [vmem:[#allocation74_spill] sm:$0xff]  ;;  %v10260_v43 = vld [vmem:[#allocation75_spill] sm:$0xff] }
 0x519   :  { %5904 = vmatprep.subr.bf16.mxu1 %v10250_v6  ;;  %5968 = vmatprep.subr.bf16.mxu0 %v10251_v45  ;;  %v10261_v6 = vld [vmem:[#allocation76_spill] sm:$0xff]  ;;  %v10262_v45 = vld [vmem:[#allocation77_spill] sm:$0xff] }
 0x51c   :  { %5906 = vmatpush1.bf16.msra.mxu1 %v10252_v46  ;;  %5970 = vmatpush1.bf16.msra.mxu0 %v10253_v20  ;;  %v10263_v46 = vld [vmem:[#allocation78_spill] sm:$0xff] }
 0x51d   :  { %5908 = vmatprep.subr.bf16.mxu1 %v10254_v40  ;;  %5972 = vmatprep.subr.bf16.mxu0 %v10255_v54 }
 0x520   :  { %5910 = vmatpush1.bf16.msra.mxu1 %v10256_v55  ;;  %5974 = vmatpush1.bf16.msra.mxu0 %v10257_v61 }
 0x521   :  { %5912 = vmatprep.subr.bf16.mxu1 %v10258_v62  ;;  %5976 = vmatprep.subr.bf16.mxu0 %v10259_v2 }
 0x524   :  { %5914 = vmatpush1.bf16.msra.mxu1 %v10260_v43  ;;  %5978 = vmatpush1.bf16.msra.mxu0 %v10261_v6 }
 0x525   :  { %5980 = vmatprep.subr.bf16.mxu1 %v10262_v45  ;;  %6044 = vmatprep.subr.bf16.mxu0 %v10263_v46  ;;  %v10264_v46 = vld [vmem:[#allocation153_spill] sm:$0xff] }
 0x57a   :  { %v1749_v20 = vpop.f32.mrb[16].mxu1  ;;  %v1820_v40 = vpop.f32.mrb[18].mxu0 }
 0x57b   :  { %v1971_v39 = vrot.slane %v1749_v20, 4  ;;  %v1751_v54 = vpop.f32.mrb[17].mxu1  ;;  %v1822_v24 = vpop.f32.mrb[19].mxu0  ;;  %v1973_v45 = vrot.slane %v1820_v40, 4 }
 0x57c   :  { %v1972_v55 = vrot.slane %v1751_v54, 4  ;;  %v1974_v48 = vrot.slane %v1822_v24, 4 }
 0x57d   :  { %v1979_v61 = vadd.f32 %v1971_v39, %v8522_v25  ;;  %v1981_v1 = vadd.f32 %v1973_v45, %v10264_v46 }
 0x57e   :  { %v1980_v62 = vadd.f32 %v1972_v55, %v8524_v30  ;;  %v1982_v6 = vadd.f32 %v1974_v48, %v8528_v42 }
 0x57f   :  { %v4762_v9 = vmul.f32 -1.442695, %v1979_v61 }
 0x580   :  { %v4763_v2 = vmul.f32 -1.442695, %v1980_v62  ;;  %v4764_v43 = vmul.f32 -1.442695, %v1982_v6 }
 0x581   :  { %7536 = vpow2.f32 %v4762_v9  ;;  %v2019_v9 = vrot.slane %v8690_v41, 6 }
 0x582   :  { %7538 = vpow2.f32 %v4763_v2 }
 0x583   :  { %7540 = vpow2.f32 %v4764_v43 }
 0x584   :  { %7542 = vtanh.f32 %v1981_v1 }
 0x58b   :  { %v7537_v27 = vpop.eup %7536 }
 0x58c   :  { %v7539_v20 = vpop.eup %7538  ;;  %v2002_v26 = vadd.f32 1.0, %v7537_v27 }
 0x58d   :  { %v2008_v54 = vadd.f32 1.0, %v7539_v20  ;;  %v7541_v55 = vpop.eup %7540 }
 0x58e   :  { %7544 = vrcp.f32 %v2002_v26  ;;  %v7543_v61 = vpop.eup %7542  ;;  %v2015_v48 = vadd.f32 1.0, %v7541_v55 }
 0x58f   :  { %7546 = vrcp.f32 %v2008_v54 }
 0x590   :  { %7548 = vrcp.f32 %v2015_v48 }
 0x598   :  { %v7545_v62 = vpop.eup %7544 }
 0x599   :  { %v7547_v2 = vpop.eup %7546  ;;  %v2022_v24 = vmul.f32 %v7545_v62, %v7543_v61 }
 0x59a   :  { %v2021_v39 = vmul.f32 %v7547_v2, %v2019_v9  ;;  %v7549_v45 = vpop.eup %7548 }
 0x59c   :  { %v8846_v6 = vadd.f32 %v2022_v24, %v2021_v39 }
 0x59e   :  { %7550 = vtanh.f32 %v8846_v6 }
 0x5a8   :  { %v7551_v27 = vpop.eup %7550 }
 0x5a9   :  { %v2025_v1 = vmul.f32 %v7551_v27, %v7549_v45 }
 0x5ba   :  { %v1891_v43 = vpop.f32.mrb[18].mxu1  ;;  %v1962_v26 = vpop.f32.mrb[20].mxu0 }
 0x5bb   :  { %v1987_v40 = vrot.slane %v1891_v43, 6  ;;  %v1893_v20 = vpop.f32.mrb[19].mxu1  ;;  %v1964_v54 = vpop.f32.mrb[21].mxu0  ;;  %v1989_v24 = vrot.slane %v1962_v26, 6 }
 0x5bc   :  { %v1988_v46 = vrot.slane %v1893_v20, 6  ;;  %v1990_v9 = vrot.slane %v1964_v54, 6  ;;  %v2046_v54 = vrot.slane %v8698_v15, 2 }
 0x5bd   :  { %v1995_v41 = vadd.f32 %v1987_v40, %v8514_v57  ;;  %v1997_v39 = vadd.f32 %v1989_v24, %v8516_v12 }
 0x5be   :  { %v1996_v61 = vadd.f32 %v1988_v46, %v8518_v22  ;;  %v1998_v2 = vadd.f32 %v1990_v9, %v8520_v59 }
 0x5bf   :  { %v4765_v55 = vmul.f32 -1.442695, %v1995_v41 }
 0x5c0   :  { %v4766_v62 = vmul.f32 -1.442695, %v1996_v61  ;;  %v4767_v48 = vmul.f32 -1.442695, %v1998_v2 }
 0x5c1   :  { %7552 = vpow2.f32 %v4765_v55 }
 0x5c2   :  { %7554 = vpow2.f32 %v4766_v62 }
 0x5c3   :  { %7556 = vpow2.f32 %v4767_v48 }
 0x5c4   :  { %7558 = vtanh.f32 %v1997_v39 }
 0x5cb   :  { %v7553_v45 = vpop.eup %7552 }
 0x5cc   :  { %v7555_v27 = vpop.eup %7554  ;;  %v2029_v43 = vadd.f32 1.0, %v7553_v45 }
 0x5cd   :  { %v2035_v20 = vadd.f32 1.0, %v7555_v27  ;;  %v7557_v46 = vpop.eup %7556  ;;  %v10265_v27 = vld [vmem:[#allocation155_spill] sm:$0xff] }
 0x5ce   :  { %7560 = vrcp.f32 %v2029_v43  ;;  %v7559_v40 = vpop.eup %7558  ;;  %v2042_v62 = vadd.f32 1.0, %v7557_v46  ;;  %v1682_v43 = vadd.f32 %v8701_v7, %v10265_v27  ;;  %v10267_v7 = vld [vmem:[#allocation91_spill] sm:$0xff]  ;;  %v10269_v46 = vld [vmem:[#allocation93_spill] sm:$0xff]  ;;  %v10282_v27 = vld [vmem:[#allocation106_spill] sm:$0xff] }
 0x5cf   :  { %7562 = vrcp.f32 %v2035_v20  ;;  %v8859_v20 = vrot.slane %v2025_v1, 4  ;;  %v10268_v1 = vld [vmem:[#allocation92_spill] sm:$0xff] }
 0x5d0   :  { %7564 = vrcp.f32 %v2042_v62  ;;  %v10275_v62 = vld [vmem:[#allocation99_spill] sm:$0xff] }
 0x5d1   :  { %10266 = vst [vmem:[#allocation80_spill] sm:$0xff] %v8859_v20 }
 0x5d8   :  { %v7561_v41 = vpop.eup %7560 }
 0x5d9   :  { %v7563_v61 = vpop.eup %7562  ;;  %v2049_v55 = vmul.f32 %v7561_v41, %v7559_v40  ;;  %v10270_v40 = vld [vmem:[#allocation94_spill] sm:$0xff]  ;;  %v10271_v41 = vld [vmem:[#allocation95_spill] sm:$0xff] }
 0x5da   :  { %v2048_v26 = vmul.f32 %v7563_v61, %v2046_v54  ;;  %v7565_v2 = vpop.eup %7564  ;;  %v10272_v54 = vld [vmem:[#allocation96_spill] sm:$0xff]  ;;  %v10273_v61 = vld [vmem:[#allocation97_spill] sm:$0xff] }
 0x5dc   :  { %v8854_v9 = vadd.f32 %v2049_v55, %v2048_v26  ;;  %v10274_v55 = vld [vmem:[#allocation98_spill] sm:$0xff]  ;;  %v10276_v26 = vld [vmem:[#allocation100_spill] sm:$0xff] }
 0x5de   :  { %7566 = vtanh.f32 %v8854_v9 }
 0x5e8   :  { %v7567_v24 = vpop.eup %7566 }
 0x5e9   :  { %v2052_v48 = vmul.f32 %v7567_v24, %v7565_v2  ;;  %v10277_v2 = vld [vmem:[#allocation101_spill] sm:$0xff]  ;;  %v10278_v24 = vld [vmem:[#allocation102_spill] sm:$0xff] }
 0x5eb   :  { %v2054_v39 = vrot.slane %v2052_v48, 6  ;;  %v10279_v48 = vld [vmem:[#allocation103_spill] sm:$0xff] }
 0x5ed   :  { %v2057_v45 = vrot.slane %v2054_v39, 4  ;;  %v10280_v39 = vld [vmem:[#allocation104_spill] sm:$0xff] }
 0x5ef   :  { %2126 = vmatprep.mubr.f32.mxu1 %v2057_v45  ;;  %2197 = vmatprep.mubr.f32.mxu0 %v2057_v45  ;;  %v8861_v15 = vadd.f32 %v2057_v45, %v1682_v43  ;;  %v10283_v43 = vld [vmem:[#allocation131_spill] sm:$0xff] }
 0x5f0   :  { %2127 = vmatmul.mubr.f32.vlgmr.msra.gmra.mrb[20].mxu1 %v8859_v20  ;;  %2198 = vmatmul.mubr.f32.vlgmr.msra.gmra.mrb[22].mxu0 %v8859_v20 }
 0x5f1   :  { %5982 = vmatpush1.bf16.msra.mxu1 %v10079_v63  ;;  %6046 = vmatpush1.bf16.msra.mxu0 %v10080_v52 }
 0x5f2   :  { %2268 = vmatprep.mubr.f32.mxu1 %v2057_v45  ;;  %2339 = vmatprep.mubr.f32.mxu0 %v2057_v45  ;;  %v10281_v45 = vld [vmem:[#allocation105_spill] sm:$0xff] }
 0x5f3   :  { %5984 = vmatprep.subr.bf16.mxu1 %v10081_v53  ;;  %6048 = vmatprep.subr.bf16.mxu0 %v10082_v31 }
 0x5f5   :  { %5986 = vmatpush1.bf16.msra.mxu1 %v10083_v0  ;;  %6050 = vmatpush1.bf16.msra.mxu0 %v10084_v51 }
 0x5f6   :  { %5988 = vmatprep.subr.bf16.mxu1 %v10085_v38  ;;  %6052 = vmatprep.subr.bf16.mxu0 %v10173_v23 }
 0x5f9   :  { %5990 = vmatpush1.bf16.msra.mxu1 %v10174_v44  ;;  %6054 = vmatpush1.bf16.msra.mxu0 %v10175_v47 }
 0x5fa   :  { %5992 = vmatprep.subr.bf16.mxu1 %v10176_v56  ;;  %6056 = vmatprep.subr.bf16.mxu0 %v10177_v58 }
 0x5fd   :  { %5994 = vmatpush1.bf16.msra.mxu1 %v10267_v7  ;;  %6058 = vmatpush1.bf16.msra.mxu0 %v10268_v1 }
 0x5fe   :  { %5996 = vmatprep.subr.bf16.mxu1 %v10269_v46  ;;  %6060 = vmatprep.subr.bf16.mxu0 %v10270_v40 }
 0x601   :  { %5998 = vmatpush1.bf16.msra.mxu1 %v10271_v41  ;;  %6062 = vmatpush1.bf16.msra.mxu0 %v10272_v54 }
 0x602   :  { %6000 = vmatprep.subr.bf16.mxu1 %v10273_v61  ;;  %6064 = vmatprep.subr.bf16.mxu0 %v10274_v55 }
 0x605   :  { %6002 = vmatpush1.bf16.msra.mxu1 %v10275_v62  ;;  %6066 = vmatpush1.bf16.msra.mxu0 %v10276_v26 }
 0x606   :  { %6004 = vmatprep.subr.bf16.mxu1 %v10277_v2  ;;  %6068 = vmatprep.subr.bf16.mxu0 %v10278_v24 }
 0x609   :  { %6006 = vmatpush1.bf16.msra.mxu1 %v10279_v48  ;;  %6070 = vmatpush1.bf16.msra.mxu0 %v10280_v39 }
 0x60a   :  { %6008 = vmatprep.subr.bf16.mxu1 %v10281_v45  ;;  %6072 = vmatprep.subr.bf16.mxu0 %v10282_v27 }
 0x60d   :  { %6010 = vmatpush1.bf16.msra.mxu1 %v10194_v29  ;;  %6074 = vmatpush1.bf16.msra.mxu0 %v10195_v3 }
 0x60e   :  { %6012 = vmatprep.subr.bf16.mxu1 %v10196_v16  ;;  %6076 = vmatprep.subr.bf16.mxu0 %v10197_v32 }
 0x611   :  { %6014 = vmatpush1.bf16.msra.mxu1 %v10198_v8  ;;  %6078 = vmatpush1.bf16.msra.mxu0 %v10199_v33 }
 0x612   :  { %6016 = vmatprep.subr.bf16.mxu1 %v10200_v60  ;;  %6080 = vmatprep.subr.bf16.mxu0 %v10201_v35 }
 0x615   :  { %6018 = vmatpush1.bf16.msra.mxu1 %v10202_v21  ;;  %6082 = vmatpush1.bf16.msra.mxu0 %v10203_v28 }
 0x616   :  { %6020 = vmatprep.subr.bf16.mxu1 %v10204_v19  ;;  %6084 = vmatprep.subr.bf16.mxu0 %v10118_v10 }
 0x619   :  { %6022 = vmatpush1.bf16.msra.mxu1 %v10119_v49  ;;  %6086 = vmatpush1.bf16.msra.mxu0 %v10120_v14 }
 0x61a   :  { %6024 = vmatprep.subr.bf16.mxu1 %v10121_v37  ;;  %6088 = vmatprep.subr.bf16.mxu0 %v10122_v34  ;;  %v10284_v37 = vld [vmem:[#allocation132_spill] sm:$0xff]  ;;  %v10285_v34 = vld [vmem:[#allocation133_spill] sm:$0xff] }
 0x61d   :  { %6026 = vmatpush1.bf16.msra.mxu1 %v10123_v50  ;;  %6090 = vmatpush1.bf16.msra.mxu0 %v10124_v18  ;;  %v10286_v50 = vld [vmem:[#allocation134_spill] sm:$0xff]  ;;  %v10287_v18 = vld [vmem:[#allocation135_spill] sm:$0xff] }
 0x61e   :  { %6028 = vmatprep.subr.bf16.mxu1 %v10125_v36  ;;  %6092 = vmatprep.subr.bf16.mxu0 %v10126_v13  ;;  %v10288_v36 = vld [vmem:[#allocation136_spill] sm:$0xff]  ;;  %v10289_v13 = vld [vmem:[#allocation137_spill] sm:$0xff] }
 0x621   :  { %6030 = vmatpush1.bf16.msra.mxu1 %v10127_v11  ;;  %6094 = vmatpush1.bf16.msra.mxu0 %v10128_v17  ;;  %v10290_v11 = vld [vmem:[#allocation138_spill] sm:$0xff]  ;;  %v10291_v17 = vld [vmem:[#allocation139_spill] sm:$0xff] }
 0x622   :  { %6032 = vmatprep.subr.bf16.mxu1 %v8365_v4  ;;  %6096 = vmatprep.subr.bf16.mxu0 %v8367_v5  ;;  %v10292_v4 = vld [vmem:[#allocation140_spill] sm:$0xff]  ;;  %v10293_v5 = vld [vmem:[#allocation13_spill] sm:$0xff] }
 0x625   :  { %6034 = vmatpush1.bf16.msra.mxu1 %v10283_v43  ;;  %6098 = vmatpush1.bf16.msra.mxu0 %v10284_v37  ;;  %v10294_v43 = vld [vmem:[#allocation14_spill] sm:$0xff] }
 0x626   :  { %6036 = vmatprep.subr.bf16.mxu1 %v10285_v34  ;;  %6100 = vmatprep.subr.bf16.mxu0 %v10286_v50  ;;  %v10295_v50 = vld [vmem:[#allocation15_spill] sm:$0xff]  ;;  %v10304_v34 = vld [vmem:[#allocation24_spill] sm:$0xff] }
 0x629   :  { %6038 = vmatpush1.bf16.msra.mxu1 %v10287_v18  ;;  %6102 = vmatpush1.bf16.msra.mxu0 %v10288_v36  ;;  %v10296_v18 = vld [vmem:[#allocation16_spill] sm:$0xff]  ;;  %v10297_v36 = vld [vmem:[#allocation17_spill] sm:$0xff] }
 0x62a   :  { %6040 = vmatprep.subr.bf16.mxu1 %v10289_v13  ;;  %6104 = vmatprep.subr.bf16.mxu0 %v10290_v11  ;;  %v10298_v13 = vld [vmem:[#allocation18_spill] sm:$0xff]  ;;  %v10299_v11 = vld [vmem:[#allocation19_spill] sm:$0xff] }
 0x62d   :  { %6042 = vmatpush1.bf16.msra.mxu1 %v10291_v17  ;;  %6106 = vmatpush1.bf16.msra.mxu0 %v10292_v4  ;;  %v10300_v17 = vld [vmem:[#allocation20_spill] sm:$0xff]  ;;  %v10301_v4 = vld [vmem:[#allocation21_spill] sm:$0xff] }
 0x62e   :  { %6108 = vmatprep.subr.bf16.mxu1 %v10293_v5  ;;  %6172 = vmatprep.subr.bf16.mxu0 %v10294_v43  ;;  %v10302_v5 = vld [vmem:[#allocation22_spill] sm:$0xff]  ;;  %v10303_v43 = vld [vmem:[#allocation23_spill] sm:$0xff] }
 0x630   :  { %2269 = vmatmul.mubr.f32.vlgmr.msra.gmra.mrb[22].mxu1 %v8859_v20  ;;  %2340 = vmatmul.mubr.f32.vlgmr.msra.gmra.mrb[24].mxu0 %v8859_v20  ;;  %v10305_v20 = vld [vmem:[#allocation25_spill] sm:$0xff] }
 0x631   :  { %6110 = vmatpush1.bf16.msra.mxu1 %v10295_v50  ;;  %6174 = vmatpush1.bf16.msra.mxu0 %v10296_v18  ;;  %v10306_v50 = vld [vmem:[#allocation26_spill] sm:$0xff]  ;;  %v10307_v18 = vld [vmem:[#allocation27_spill] sm:$0xff] }
 0x632   :  { %6112 = vmatprep.subr.bf16.mxu1 %v10297_v36  ;;  %6176 = vmatprep.subr.bf16.mxu0 %v10298_v13  ;;  %v10308_v36 = vld [vmem:[#allocation28_spill] sm:$0xff]  ;;  %v10309_v13 = vld [vmem:[#allocation29_spill] sm:$0xff] }
 0x635   :  { %6114 = vmatpush1.bf16.msra.mxu1 %v10299_v11  ;;  %6178 = vmatpush1.bf16.msra.mxu0 %v10300_v17  ;;  %v10310_v11 = vld [vmem:[#allocation30_spill] sm:$0xff]  ;;  %v10311_v17 = vld [vmem:[#allocation31_spill] sm:$0xff] }
 0x636   :  { %6116 = vmatprep.subr.bf16.mxu1 %v10301_v4  ;;  %6180 = vmatprep.subr.bf16.mxu0 %v10302_v5  ;;  %v10312_v4 = vld [vmem:[#allocation32_spill] sm:$0xff]  ;;  %v10313_v5 = vld [vmem:[#allocation33_spill] sm:$0xff] }
 0x639   :  { %6118 = vmatpush1.bf16.msra.mxu1 %v10303_v43  ;;  %6182 = vmatpush1.bf16.msra.mxu0 %v10304_v34  ;;  %v10314_v43 = vld [vmem:[#allocation34_spill] sm:$0xff]  ;;  %v10315_v34 = vld [vmem:[#allocation35_spill] sm:$0xff] }
 0x63a   :  { %6120 = vmatprep.subr.bf16.mxu1 %v10305_v20  ;;  %6184 = vmatprep.subr.bf16.mxu0 %v10306_v50  ;;  %v10316_v20 = vld [vmem:[#allocation36_spill] sm:$0xff]  ;;  %v10317_v50 = vld [vmem:[#allocation37_spill] sm:$0xff] }
 0x63d   :  { %6122 = vmatpush1.bf16.msra.mxu1 %v10307_v18  ;;  %6186 = vmatpush1.bf16.msra.mxu0 %v10308_v36  ;;  %v10318_v18 = vld [vmem:[#allocation38_spill] sm:$0xff]  ;;  %v10319_v36 = vld [vmem:[#allocation39_spill] sm:$0xff] }
 0x63e   :  { %6124 = vmatprep.subr.bf16.mxu1 %v10309_v13  ;;  %6188 = vmatprep.subr.bf16.mxu0 %v10310_v11  ;;  %v10320_v13 = vld [vmem:[#allocation40_spill] sm:$0xff]  ;;  %v10321_v11 = vld [vmem:[#allocation41_spill] sm:$0xff] }
 0x641   :  { %6126 = vmatpush1.bf16.msra.mxu1 %v10311_v17  ;;  %6190 = vmatpush1.bf16.msra.mxu0 %v10312_v4  ;;  %v10322_v17 = vld [vmem:[#allocation42_spill] sm:$0xff]  ;;  %v10323_v4 = vld [vmem:[#allocation43_spill] sm:$0xff] }
 0x642   :  { %6128 = vmatprep.subr.bf16.mxu1 %v10313_v5  ;;  %6192 = vmatprep.subr.bf16.mxu0 %v10314_v43  ;;  %v10324_v5 = vld [vmem:[#allocation44_spill] sm:$0xff]  ;;  %v10325_v43 = vld [vmem:[#allocation45_spill] sm:$0xff] }
 0x645   :  { %6130 = vmatpush1.bf16.msra.mxu1 %v10315_v34  ;;  %6194 = vmatpush1.bf16.msra.mxu0 %v10316_v20  ;;  %v10326_v34 = vld [vmem:[#allocation46_spill] sm:$0xff]  ;;  %v10327_v20 = vld [vmem:[#allocation47_spill] sm:$0xff] }
 0x646   :  { %6132 = vmatprep.subr.bf16.mxu1 %v10317_v50  ;;  %6196 = vmatprep.subr.bf16.mxu0 %v10318_v18  ;;  %v10328_v50 = vld [vmem:[#allocation48_spill] sm:$0xff]  ;;  %v10329_v18 = vld [vmem:[#allocation49_spill] sm:$0xff] }
 0x649   :  { %6134 = vmatpush1.bf16.msra.mxu1 %v10319_v36  ;;  %6198 = vmatpush1.bf16.msra.mxu0 %v10320_v13  ;;  %v10330_v36 = vld [vmem:[#allocation50_spill] sm:$0xff]  ;;  %v10331_v13 = vld [vmem:[#allocation51_spill] sm:$0xff] }
 0x64a   :  { %6136 = vmatprep.subr.bf16.mxu1 %v10321_v11  ;;  %6200 = vmatprep.subr.bf16.mxu0 %v10322_v17  ;;  %v10332_v11 = vld [vmem:[#allocation52_spill] sm:$0xff]  ;;  %v10333_v17 = vld [vmem:[#allocation53_spill] sm:$0xff] }
 0x64d   :  { %6138 = vmatpush1.bf16.msra.mxu1 %v10323_v4  ;;  %6202 = vmatpush1.bf16.msra.mxu0 %v10324_v5  ;;  %v10334_v4 = vld [vmem:[#allocation54_spill] sm:$0xff]  ;;  %v10335_v5 = vld [vmem:[#allocation55_spill] sm:$0xff] }
 0x64e   :  { %6140 = vmatprep.subr.bf16.mxu1 %v10325_v43  ;;  %6204 = vmatprep.subr.bf16.mxu0 %v10326_v34  ;;  %v10336_v43 = vld [vmem:[#allocation56_spill] sm:$0xff]  ;;  %v10337_v34 = vld [vmem:[#allocation57_spill] sm:$0xff] }
 0x651   :  { %6142 = vmatpush1.bf16.msra.mxu1 %v10327_v20  ;;  %6206 = vmatpush1.bf16.msra.mxu0 %v10328_v50  ;;  %v10338_v20 = vld [vmem:[#allocation58_spill] sm:$0xff]  ;;  %v10339_v50 = vld [vmem:[#allocation59_spill] sm:$0xff] }
 0x652   :  { %6144 = vmatprep.subr.bf16.mxu1 %v10329_v18  ;;  %6208 = vmatprep.subr.bf16.mxu0 %v10330_v36  ;;  %v10340_v18 = vld [vmem:[#allocation60_spill] sm:$0xff]  ;;  %v10341_v36 = vld [vmem:[#allocation61_spill] sm:$0xff] }
 0x655   :  { %6146 = vmatpush1.bf16.msra.mxu1 %v10331_v13  ;;  %6210 = vmatpush1.bf16.msra.mxu0 %v10332_v11  ;;  %v10342_v13 = vld [vmem:[#allocation62_spill] sm:$0xff]  ;;  %v10343_v11 = vld [vmem:[#allocation63_spill] sm:$0xff] }
 0x656   :  { %6148 = vmatprep.subr.bf16.mxu1 %v10333_v17  ;;  %6212 = vmatprep.subr.bf16.mxu0 %v10334_v4  ;;  %v10344_v17 = vld [vmem:[#allocation64_spill] sm:$0xff]  ;;  %v10345_v4 = vld [vmem:[#allocation65_spill] sm:$0xff] }
 0x659   :  { %6150 = vmatpush1.bf16.msra.mxu1 %v10335_v5  ;;  %6214 = vmatpush1.bf16.msra.mxu0 %v10336_v43  ;;  %v10346_v5 = vld [vmem:[#allocation66_spill] sm:$0xff]  ;;  %v10347_v43 = vld [vmem:[#allocation67_spill] sm:$0xff] }
 0x65a   :  { %6152 = vmatprep.subr.bf16.mxu1 %v10337_v34  ;;  %6216 = vmatprep.subr.bf16.mxu0 %v10338_v20  ;;  %v10348_v34 = vld [vmem:[#allocation68_spill] sm:$0xff]  ;;  %v10349_v20 = vld [vmem:[#allocation69_spill] sm:$0xff] }
 0x65d   :  { %6154 = vmatpush1.bf16.msra.mxu1 %v10339_v50  ;;  %6218 = vmatpush1.bf16.msra.mxu0 %v10340_v18  ;;  %v10350_v50 = vld [vmem:[#allocation70_spill] sm:$0xff]  ;;  %v10351_v18 = vld [vmem:[#allocation71_spill] sm:$0xff] }
 0x65e   :  { %6156 = vmatprep.subr.bf16.mxu1 %v10341_v36  ;;  %6220 = vmatprep.subr.bf16.mxu0 %v10342_v13  ;;  %v10352_v36 = vld [vmem:[#allocation72_spill] sm:$0xff]  ;;  %v10353_v13 = vld [vmem:[#allocation73_spill] sm:$0xff] }
 0x661   :  { %6158 = vmatpush1.bf16.msra.mxu1 %v10343_v11  ;;  %6222 = vmatpush1.bf16.msra.mxu0 %v10344_v17  ;;  %v10354_v11 = vld [vmem:[#allocation74_spill] sm:$0xff]  ;;  %v10355_v17 = vld [vmem:[#allocation75_spill] sm:$0xff] }
 0x662   :  { %6160 = vmatprep.subr.bf16.mxu1 %v10345_v4  ;;  %6224 = vmatprep.subr.bf16.mxu0 %v10346_v5  ;;  %v10356_v4 = vld [vmem:[#allocation76_spill] sm:$0xff]  ;;  %v10357_v5 = vld [vmem:[#allocation77_spill] sm:$0xff] }
 0x665   :  { %6162 = vmatpush1.bf16.msra.mxu1 %v10347_v43  ;;  %6226 = vmatpush1.bf16.msra.mxu0 %v10348_v34  ;;  %v10358_v43 = vld [vmem:[#allocation78_spill] sm:$0xff] }
 0x666   :  { %6164 = vmatprep.subr.bf16.mxu1 %v10349_v20  ;;  %6228 = vmatprep.subr.bf16.mxu0 %v10350_v50 }
 0x669   :  { %6166 = vmatpush1.bf16.msra.mxu1 %v10351_v18  ;;  %6230 = vmatpush1.bf16.msra.mxu0 %v10352_v36 }
 0x66a   :  { %6168 = vmatprep.subr.bf16.mxu1 %v10353_v13  ;;  %6232 = vmatprep.subr.bf16.mxu0 %v10354_v11 }
 0x66d   :  { %6170 = vmatpush1.bf16.msra.mxu1 %v10355_v17  ;;  %6234 = vmatpush1.bf16.msra.mxu0 %v10356_v4 }
 0x66e   :  { %6236 = vmatprep.subr.bf16.mxu1 %v10357_v5  ;;  %6300 = vmatprep.subr.bf16.mxu0 %v10358_v43  ;;  %v10359_v43 = vld [vmem:[#allocation153_spill] sm:$0xff] }
 0x6c3   :  { %v2128_v34 = vpop.f32.mrb[20].mxu1  ;;  %v2199_v20 = vpop.f32.mrb[22].mxu0 }
 0x6c4   :  { %v2350_v37 = vrot.slane %v2128_v34, 2  ;;  %v2130_v50 = vpop.f32.mrb[21].mxu1  ;;  %v2201_v14 = vpop.f32.mrb[23].mxu0  ;;  %v2352_v5 = vrot.slane %v2199_v20, 2 }
 0x6c5   :  { %v2351_v18 = vrot.slane %v2130_v50, 2  ;;  %v2353_v10 = vrot.slane %v2201_v14, 2 }
 0x6c6   :  { %v2358_v36 = vadd.f32 %v2350_v37, %v8522_v25  ;;  %v2360_v19 = vadd.f32 %v2352_v5, %v10359_v43 }
 0x6c7   :  { %v2359_v13 = vadd.f32 %v2351_v18, %v8524_v30  ;;  %v2361_v4 = vadd.f32 %v2353_v10, %v8528_v42 }
 0x6c8   :  { %v4768_v49 = vmul.f32 -1.442695, %v2358_v36 }
 0x6c9   :  { %v4769_v11 = vmul.f32 -1.442695, %v2359_v13  ;;  %v4770_v17 = vmul.f32 -1.442695, %v2361_v4 }
 0x6ca   :  { %7568 = vpow2.f32 %v4768_v49  ;;  %v2386_v49 = vrot.slane %v8846_v6, 6 }
 0x6cb   :  { %7570 = vpow2.f32 %v4769_v11 }
 0x6cc   :  { %7572 = vpow2.f32 %v4770_v17 }
 0x6cd   :  { %7574 = vtanh.f32 %v2360_v19 }
 0x6d4   :  { %v7569_v28 = vpop.eup %7568 }
 0x6d5   :  { %v7571_v34 = vpop.eup %7570  ;;  %v2369_v21 = vadd.f32 1.0, %v7569_v28 }
 0x6d6   :  { %v2375_v50 = vadd.f32 1.0, %v7571_v34  ;;  %v7573_v25 = vpop.eup %7572 }
 0x6d7   :  { %7576 = vrcp.f32 %v2369_v21  ;;  %v7575_v30 = vpop.eup %7574  ;;  %v2382_v42 = vadd.f32 1.0, %v7573_v25 }
 0x6d8   :  { %7578 = vrcp.f32 %v2375_v50 }
 0x6d9   :  { %7580 = vrcp.f32 %v2382_v42  ;;  %v2413_v42 = vrot.slane %v8854_v9, 2 }
 0x6e1   :  { %v7577_v37 = vpop.eup %7576 }
 0x6e2   :  { %v7579_v11 = vpop.eup %7578  ;;  %v2389_v14 = vmul.f32 %v7577_v37, %v7575_v30 }
 0x6e3   :  { %v2388_v10 = vmul.f32 %v7579_v11, %v2386_v49  ;;  %v7581_v5 = vpop.eup %7580 }
 0x6e5   :  { %v9000_v4 = vadd.f32 %v2389_v14, %v2388_v10 }
 0x6e7   :  { %7582 = vtanh.f32 %v9000_v4 }
 0x6f1   :  { %v7583_v17 = vpop.eup %7582 }
 0x6f2   :  { %v2392_v18 = vmul.f32 %v7583_v17, %v7581_v5 }
 0x703   :  { %v2270_v36 = vpop.f32.mrb[22].mxu1  ;;  %v2341_v13 = vpop.f32.mrb[24].mxu0 }
 0x704   :  { %v2362_v21 = vadd.f32 %v2270_v36, %v8514_v57  ;;  %v2272_v28 = vpop.f32.mrb[23].mxu1  ;;  %v2343_v19 = vpop.f32.mrb[25].mxu0  ;;  %v2364_v25 = vadd.f32 %v2341_v13, %v8516_v12 }
 0x705   :  { %v2363_v6 = vadd.f32 %v2272_v28, %v8518_v22  ;;  %v2365_v34 = vadd.f32 %v2343_v19, %v8520_v59 }
 0x706   :  { %v4771_v20 = vmul.f32 -1.442695, %v2362_v21 }
 0x707   :  { %v4772_v43 = vmul.f32 -1.442695, %v2363_v6  ;;  %v4773_v50 = vmul.f32 -1.442695, %v2365_v34  ;;  %v9011_v6 = vrot.slane %v2392_v18, 6  ;;  %v10362_v18 = vld [vmem:[#allocation116_spill] sm:$0xff] }
 0x708   :  { %7584 = vpow2.f32 %v4771_v20  ;;  %v10363_v20 = vld [vmem:[#allocation117_spill] sm:$0xff]  ;;  %v10365_v34 = vld [vmem:[#allocation119_spill] sm:$0xff] }
 0x709   :  { %7586 = vpow2.f32 %v4772_v43  ;;  %10360 = vst [vmem:[#allocation81_spill] sm:$0xff] %v9011_v6  ;;  %v10364_v43 = vld [vmem:[#allocation118_spill] sm:$0xff] }
 0x70a   :  { %7588 = vpow2.f32 %v4773_v50  ;;  %v10366_v50 = vld [vmem:[#allocation120_spill] sm:$0xff] }
 0x70b   :  { %7590 = vtanh.f32 %v2364_v25  ;;  %v10367_v25 = vld [vmem:[#allocation121_spill] sm:$0xff] }
 0x712   :  { %v7585_v30 = vpop.eup %7584 }
 0x713   :  { %v7587_v37 = vpop.eup %7586  ;;  %v2396_v49 = vadd.f32 1.0, %v7585_v30  ;;  %v10368_v30 = vld [vmem:[#allocation122_spill] sm:$0xff] }
 0x714   :  { %v2402_v11 = vadd.f32 1.0, %v7587_v37  ;;  %v7589_v57 = vpop.eup %7588  ;;  %v10369_v37 = vld [vmem:[#allocation123_spill] sm:$0xff] }
 0x715   :  { %7592 = vrcp.f32 %v2396_v49  ;;  %v7591_v14 = vpop.eup %7590  ;;  %v2409_v17 = vadd.f32 1.0, %v7589_v57  ;;  %v10370_v49 = vld [vmem:[#allocation124_spill] sm:$0xff]  ;;  %v10372_v57 = vld [vmem:[#allocation126_spill] sm:$0xff] }
 0x716   :  { %7594 = vrcp.f32 %v2402_v11  ;;  %v10371_v11 = vld [vmem:[#allocation125_spill] sm:$0xff] }
 0x717   :  { %7596 = vrcp.f32 %v2409_v17  ;;  %v10378_v17 = vld [vmem:[#allocation132_spill] sm:$0xff] }
 0x71f   :  { %v7593_v22 = vpop.eup %7592 }
 0x720   :  { %v7595_v10 = vpop.eup %7594  ;;  %v2416_v5 = vmul.f32 %v7593_v22, %v7591_v14  ;;  %v10373_v14 = vld [vmem:[#allocation127_spill] sm:$0xff]  ;;  %v10374_v22 = vld [vmem:[#allocation128_spill] sm:$0xff] }
 0x721   :  { %v2415_v59 = vmul.f32 %v7595_v10, %v2413_v42  ;;  %v7597_v12 = vpop.eup %7596  ;;  %v10375_v42 = vld [vmem:[#allocation129_spill] sm:$0xff]  ;;  %v10376_v10 = vld [vmem:[#allocation130_spill] sm:$0xff] }
 0x723   :  { %v9008_v36 = vadd.f32 %v2416_v5, %v2415_v59  ;;  %v10377_v5 = vld [vmem:[#allocation131_spill] sm:$0xff]  ;;  %v10379_v59 = vld [vmem:[#allocation133_spill] sm:$0xff] }
 0x725   :  { %7598 = vtanh.f32 %v9008_v36 }
 0x72f   :  { %v7599_v13 = vpop.eup %7598 }
 0x730   :  { %v2419_v21 = vmul.f32 %v7599_v13, %v7597_v12  ;;  %v10380_v12 = vld [vmem:[#allocation134_spill] sm:$0xff]  ;;  %v10381_v13 = vld [vmem:[#allocation135_spill] sm:$0xff] }
 0x732   :  { %v2421_v28 = vrot.slane %v2419_v21, 2  ;;  %v10382_v21 = vld [vmem:[#allocation136_spill] sm:$0xff] }
 0x734   :  { %v2424_v19 = vrot.slane %v2421_v28, 6  ;;  %v10383_v28 = vld [vmem:[#allocation137_spill] sm:$0xff] }
 0x736   :  { %2493 = vmatprep.mubr.f32.mxu1 %v2424_v19  ;;  %2564 = vmatprep.mubr.f32.mxu0 %v2424_v19  ;;  %v9014_v9 = vadd.f32 %v2424_v19, %v8861_v15  ;;  %v10361_v15 = vld [vmem:[#allocation115_spill] sm:$0xff] }
 0x737   :  { %2494 = vmatmul.mubr.f32.vlgmr.msra.gmra.mrb[24].mxu1 %v9011_v6  ;;  %2565 = vmatmul.mubr.f32.vlgmr.msra.gmra.mrb[26].mxu0 %v9011_v6 }
 0x738   :  { %6238 = vmatpush1.bf16.msra.mxu1 %v10079_v63  ;;  %6302 = vmatpush1.bf16.msra.mxu0 %v10080_v52 }
 0x739   :  { %2635 = vmatprep.mubr.f32.mxu1 %v2424_v19  ;;  %2706 = vmatprep.mubr.f32.mxu0 %v2424_v19  ;;  %v10384_v19 = vld [vmem:[#allocation138_spill] sm:$0xff] }
 0x73a   :  { %6240 = vmatprep.subr.bf16.mxu1 %v10081_v53  ;;  %6304 = vmatprep.subr.bf16.mxu0 %v10082_v31 }
 0x73c   :  { %6242 = vmatpush1.bf16.msra.mxu1 %v10083_v0  ;;  %6306 = vmatpush1.bf16.msra.mxu0 %v10084_v51 }
 0x73d   :  { %6244 = vmatprep.subr.bf16.mxu1 %v10085_v38  ;;  %6308 = vmatprep.subr.bf16.mxu0 %v10173_v23 }
 0x740   :  { %6246 = vmatpush1.bf16.msra.mxu1 %v10174_v44  ;;  %6310 = vmatpush1.bf16.msra.mxu0 %v10175_v47 }
 0x741   :  { %6248 = vmatprep.subr.bf16.mxu1 %v10176_v56  ;;  %6312 = vmatprep.subr.bf16.mxu0 %v10177_v58 }
 0x744   :  { %6250 = vmatpush1.bf16.msra.mxu1 %v10267_v7  ;;  %6314 = vmatpush1.bf16.msra.mxu0 %v10268_v1 }
 0x745   :  { %6252 = vmatprep.subr.bf16.mxu1 %v10269_v46  ;;  %6316 = vmatprep.subr.bf16.mxu0 %v10270_v40 }
 0x748   :  { %6254 = vmatpush1.bf16.msra.mxu1 %v10271_v41  ;;  %6318 = vmatpush1.bf16.msra.mxu0 %v10272_v54 }
 0x749   :  { %6256 = vmatprep.subr.bf16.mxu1 %v10273_v61  ;;  %6320 = vmatprep.subr.bf16.mxu0 %v10274_v55 }
 0x74c   :  { %6258 = vmatpush1.bf16.msra.mxu1 %v10275_v62  ;;  %6322 = vmatpush1.bf16.msra.mxu0 %v10276_v26 }
 0x74d   :  { %6260 = vmatprep.subr.bf16.mxu1 %v10277_v2  ;;  %6324 = vmatprep.subr.bf16.mxu0 %v10278_v24 }
 0x750   :  { %6262 = vmatpush1.bf16.msra.mxu1 %v10279_v48  ;;  %6326 = vmatpush1.bf16.msra.mxu0 %v10280_v39 }
 0x751   :  { %6264 = vmatprep.subr.bf16.mxu1 %v10281_v45  ;;  %6328 = vmatprep.subr.bf16.mxu0 %v10282_v27 }
 0x754   :  { %6266 = vmatpush1.bf16.msra.mxu1 %v10194_v29  ;;  %6330 = vmatpush1.bf16.msra.mxu0 %v10195_v3 }
 0x755   :  { %6268 = vmatprep.subr.bf16.mxu1 %v10196_v16  ;;  %6332 = vmatprep.subr.bf16.mxu0 %v10197_v32 }
 0x758   :  { %6270 = vmatpush1.bf16.msra.mxu1 %v10198_v8  ;;  %6334 = vmatpush1.bf16.msra.mxu0 %v10199_v33 }
 0x759   :  { %6272 = vmatprep.subr.bf16.mxu1 %v10200_v60  ;;  %6336 = vmatprep.subr.bf16.mxu0 %v10201_v35 }
 0x75c   :  { %6274 = vmatpush1.bf16.msra.mxu1 %v10361_v15  ;;  %6338 = vmatpush1.bf16.msra.mxu0 %v10362_v18 }
 0x75d   :  { %6276 = vmatprep.subr.bf16.mxu1 %v10363_v20  ;;  %6340 = vmatprep.subr.bf16.mxu0 %v10364_v43 }
 0x760   :  { %6278 = vmatpush1.bf16.msra.mxu1 %v10365_v34  ;;  %6342 = vmatpush1.bf16.msra.mxu0 %v10366_v50 }
 0x761   :  { %6280 = vmatprep.subr.bf16.mxu1 %v10367_v25  ;;  %6344 = vmatprep.subr.bf16.mxu0 %v10368_v30 }
 0x764   :  { %6282 = vmatpush1.bf16.msra.mxu1 %v10369_v37  ;;  %6346 = vmatpush1.bf16.msra.mxu0 %v10370_v49 }
 0x765   :  { %6284 = vmatprep.subr.bf16.mxu1 %v10371_v11  ;;  %6348 = vmatprep.subr.bf16.mxu0 %v10372_v57  ;;  %v10454_v57 = vld [vmem:[#allocation147_spill] sm:$0xff] }
 0x768   :  { %6286 = vmatpush1.bf16.msra.mxu1 %v10373_v14  ;;  %6350 = vmatpush1.bf16.msra.mxu0 %v10374_v22  ;;  %v10385_v22 = vld [vmem:[#allocation139_spill] sm:$0xff] }
 0x769   :  { %6288 = vmatprep.subr.bf16.mxu1 %v10375_v42  ;;  %6352 = vmatprep.subr.bf16.mxu0 %v10376_v10  ;;  %v10386_v42 = vld [vmem:[#allocation140_spill] sm:$0xff]  ;;  %v10387_v10 = vld [vmem:[#allocation13_spill] sm:$0xff] }
 0x76c   :  { %6290 = vmatpush1.bf16.msra.mxu1 %v10377_v5  ;;  %6354 = vmatpush1.bf16.msra.mxu0 %v10378_v17  ;;  %v10388_v5 = vld [vmem:[#allocation14_spill] sm:$0xff]  ;;  %v10453_v17 = vld [vmem:[#allocation145_spill] sm:$0xff] }
 0x76d   :  { %6292 = vmatprep.subr.bf16.mxu1 %v10379_v59  ;;  %6356 = vmatprep.subr.bf16.mxu0 %v10380_v12  ;;  %v10389_v12 = vld [vmem:[#allocation15_spill] sm:$0xff]  ;;  %v10398_v59 = vld [vmem:[#allocation24_spill] sm:$0xff] }
 0x770   :  { %6294 = vmatpush1.bf16.msra.mxu1 %v10381_v13  ;;  %6358 = vmatpush1.bf16.msra.mxu0 %v10382_v21  ;;  %v10390_v13 = vld [vmem:[#allocation16_spill] sm:$0xff]  ;;  %v10391_v21 = vld [vmem:[#allocation17_spill] sm:$0xff] }
 0x771   :  { %6296 = vmatprep.subr.bf16.mxu1 %v10383_v28  ;;  %6360 = vmatprep.subr.bf16.mxu0 %v10384_v19  ;;  %v10392_v28 = vld [vmem:[#allocation18_spill] sm:$0xff]  ;;  %v10393_v19 = vld [vmem:[#allocation19_spill] sm:$0xff] }
 0x774   :  { %6298 = vmatpush1.bf16.msra.mxu1 %v10385_v22  ;;  %6362 = vmatpush1.bf16.msra.mxu0 %v10386_v42  ;;  %v10394_v22 = vld [vmem:[#allocation20_spill] sm:$0xff]  ;;  %v10395_v42 = vld [vmem:[#allocation21_spill] sm:$0xff] }
 0x775   :  { %6364 = vmatprep.subr.bf16.mxu1 %v10387_v10  ;;  %6428 = vmatprep.subr.bf16.mxu0 %v10388_v5  ;;  %v10396_v10 = vld [vmem:[#allocation22_spill] sm:$0xff]  ;;  %v10397_v5 = vld [vmem:[#allocation23_spill] sm:$0xff] }
 0x777   :  { %2636 = vmatmul.mubr.f32.vlgmr.msra.gmra.mrb[26].mxu1 %v9011_v6  ;;  %2707 = vmatmul.mubr.f32.vlgmr.msra.gmra.mrb[28].mxu0 %v9011_v6  ;;  %v10399_v6 = vld [vmem:[#allocation25_spill] sm:$0xff] }
 0x778   :  { %6366 = vmatpush1.bf16.msra.mxu1 %v10389_v12  ;;  %6430 = vmatpush1.bf16.msra.mxu0 %v10390_v13  ;;  %v10400_v12 = vld [vmem:[#allocation26_spill] sm:$0xff]  ;;  %v10401_v13 = vld [vmem:[#allocation27_spill] sm:$0xff] }
 0x779   :  { %6368 = vmatprep.subr.bf16.mxu1 %v10391_v21  ;;  %6432 = vmatprep.subr.bf16.mxu0 %v10392_v28  ;;  %v10402_v21 = vld [vmem:[#allocation28_spill] sm:$0xff]  ;;  %v10403_v28 = vld [vmem:[#allocation29_spill] sm:$0xff] }
 0x77c   :  { %6370 = vmatpush1.bf16.msra.mxu1 %v10393_v19  ;;  %6434 = vmatpush1.bf16.msra.mxu0 %v10394_v22  ;;  %v10404_v19 = vld [vmem:[#allocation30_spill] sm:$0xff]  ;;  %v10405_v22 = vld [vmem:[#allocation31_spill] sm:$0xff] }
 0x77d   :  { %6372 = vmatprep.subr.bf16.mxu1 %v10395_v42  ;;  %6436 = vmatprep.subr.bf16.mxu0 %v10396_v10  ;;  %v10406_v42 = vld [vmem:[#allocation32_spill] sm:$0xff]  ;;  %v10407_v10 = vld [vmem:[#allocation33_spill] sm:$0xff] }
 0x780   :  { %6374 = vmatpush1.bf16.msra.mxu1 %v10397_v5  ;;  %6438 = vmatpush1.bf16.msra.mxu0 %v10398_v59  ;;  %v10408_v5 = vld [vmem:[#allocation34_spill] sm:$0xff]  ;;  %v10409_v59 = vld [vmem:[#allocation35_spill] sm:$0xff] }
 0x781   :  { %6376 = vmatprep.subr.bf16.mxu1 %v10399_v6  ;;  %6440 = vmatprep.subr.bf16.mxu0 %v10400_v12  ;;  %v10410_v6 = vld [vmem:[#allocation36_spill] sm:$0xff]  ;;  %v10411_v12 = vld [vmem:[#allocation37_spill] sm:$0xff] }
 0x784   :  { %6378 = vmatpush1.bf16.msra.mxu1 %v10401_v13  ;;  %6442 = vmatpush1.bf16.msra.mxu0 %v10402_v21  ;;  %v10412_v13 = vld [vmem:[#allocation38_spill] sm:$0xff]  ;;  %v10413_v21 = vld [vmem:[#allocation39_spill] sm:$0xff] }
 0x785   :  { %6380 = vmatprep.subr.bf16.mxu1 %v10403_v28  ;;  %6444 = vmatprep.subr.bf16.mxu0 %v10404_v19  ;;  %v10414_v28 = vld [vmem:[#allocation40_spill] sm:$0xff]  ;;  %v10415_v19 = vld [vmem:[#allocation41_spill] sm:$0xff] }
 0x788   :  { %6382 = vmatpush1.bf16.msra.mxu1 %v10405_v22  ;;  %6446 = vmatpush1.bf16.msra.mxu0 %v10406_v42  ;;  %v10416_v22 = vld [vmem:[#allocation42_spill] sm:$0xff]  ;;  %v10417_v42 = vld [vmem:[#allocation43_spill] sm:$0xff] }
 0x789   :  { %6384 = vmatprep.subr.bf16.mxu1 %v10407_v10  ;;  %6448 = vmatprep.subr.bf16.mxu0 %v10408_v5  ;;  %v10418_v10 = vld [vmem:[#allocation44_spill] sm:$0xff]  ;;  %v10419_v5 = vld [vmem:[#allocation45_spill] sm:$0xff] }
 0x78c   :  { %6386 = vmatpush1.bf16.msra.mxu1 %v10409_v59  ;;  %6450 = vmatpush1.bf16.msra.mxu0 %v10410_v6  ;;  %v10420_v59 = vld [vmem:[#allocation46_spill] sm:$0xff]  ;;  %v10421_v6 = vld [vmem:[#allocation47_spill] sm:$0xff] }
 0x78d   :  { %6388 = vmatprep.subr.bf16.mxu1 %v10411_v12  ;;  %6452 = vmatprep.subr.bf16.mxu0 %v10412_v13  ;;  %v10422_v12 = vld [vmem:[#allocation48_spill] sm:$0xff]  ;;  %v10423_v13 = vld [vmem:[#allocation49_spill] sm:$0xff] }
 0x790   :  { %6390 = vmatpush1.bf16.msra.mxu1 %v10413_v21  ;;  %6454 = vmatpush1.bf16.msra.mxu0 %v10414_v28  ;;  %v10424_v21 = vld [vmem:[#allocation50_spill] sm:$0xff]  ;;  %v10425_v28 = vld [vmem:[#allocation51_spill] sm:$0xff] }
 0x791   :  { %6392 = vmatprep.subr.bf16.mxu1 %v10415_v19  ;;  %6456 = vmatprep.subr.bf16.mxu0 %v10416_v22  ;;  %v10426_v19 = vld [vmem:[#allocation52_spill] sm:$0xff]  ;;  %v10427_v22 = vld [vmem:[#allocation53_spill] sm:$0xff] }
 0x794   :  { %6394 = vmatpush1.bf16.msra.mxu1 %v10417_v42  ;;  %6458 = vmatpush1.bf16.msra.mxu0 %v10418_v10  ;;  %v10428_v42 = vld [vmem:[#allocation54_spill] sm:$0xff]  ;;  %v10429_v10 = vld [vmem:[#allocation55_spill] sm:$0xff] }
 0x795   :  { %6396 = vmatprep.subr.bf16.mxu1 %v10419_v5  ;;  %6460 = vmatprep.subr.bf16.mxu0 %v10420_v59  ;;  %v10430_v5 = vld [vmem:[#allocation56_spill] sm:$0xff]  ;;  %v10431_v59 = vld [vmem:[#allocation57_spill] sm:$0xff] }
 0x798   :  { %6398 = vmatpush1.bf16.msra.mxu1 %v10421_v6  ;;  %6462 = vmatpush1.bf16.msra.mxu0 %v10422_v12  ;;  %v10432_v6 = vld [vmem:[#allocation58_spill] sm:$0xff]  ;;  %v10433_v12 = vld [vmem:[#allocation59_spill] sm:$0xff] }
 0x799   :  { %6400 = vmatprep.subr.bf16.mxu1 %v10423_v13  ;;  %6464 = vmatprep.subr.bf16.mxu0 %v10424_v21  ;;  %v10434_v13 = vld [vmem:[#allocation60_spill] sm:$0xff]  ;;  %v10435_v21 = vld [vmem:[#allocation61_spill] sm:$0xff] }
 0x79c   :  { %6402 = vmatpush1.bf16.msra.mxu1 %v10425_v28  ;;  %6466 = vmatpush1.bf16.msra.mxu0 %v10426_v19  ;;  %v10436_v28 = vld [vmem:[#allocation62_spill] sm:$0xff]  ;;  %v10437_v19 = vld [vmem:[#allocation63_spill] sm:$0xff] }
 0x79d   :  { %6404 = vmatprep.subr.bf16.mxu1 %v10427_v22  ;;  %6468 = vmatprep.subr.bf16.mxu0 %v10428_v42  ;;  %v10438_v22 = vld [vmem:[#allocation64_spill] sm:$0xff]  ;;  %v10439_v42 = vld [vmem:[#allocation65_spill] sm:$0xff] }
 0x7a0   :  { %6406 = vmatpush1.bf16.msra.mxu1 %v10429_v10  ;;  %6470 = vmatpush1.bf16.msra.mxu0 %v10430_v5  ;;  %v10440_v10 = vld [vmem:[#allocation66_spill] sm:$0xff]  ;;  %v10441_v5 = vld [vmem:[#allocation67_spill] sm:$0xff] }
 0x7a1   :  { %6408 = vmatprep.subr.bf16.mxu1 %v10431_v59  ;;  %6472 = vmatprep.subr.bf16.mxu0 %v10432_v6  ;;  %v10442_v59 = vld [vmem:[#allocation68_spill] sm:$0xff]  ;;  %v10443_v6 = vld [vmem:[#allocation69_spill] sm:$0xff] }
 0x7a4   :  { %6410 = vmatpush1.bf16.msra.mxu1 %v10433_v12  ;;  %6474 = vmatpush1.bf16.msra.mxu0 %v10434_v13  ;;  %v10444_v12 = vld [vmem:[#allocation70_spill] sm:$0xff]  ;;  %v10445_v13 = vld [vmem:[#allocation71_spill] sm:$0xff] }
 0x7a5   :  { %6412 = vmatprep.subr.bf16.mxu1 %v10435_v21  ;;  %6476 = vmatprep.subr.bf16.mxu0 %v10436_v28  ;;  %v10446_v21 = vld [vmem:[#allocation72_spill] sm:$0xff]  ;;  %v10447_v28 = vld [vmem:[#allocation73_spill] sm:$0xff] }
 0x7a8   :  { %6414 = vmatpush1.bf16.msra.mxu1 %v10437_v19  ;;  %6478 = vmatpush1.bf16.msra.mxu0 %v10438_v22  ;;  %v10448_v19 = vld [vmem:[#allocation74_spill] sm:$0xff]  ;;  %v10449_v22 = vld [vmem:[#allocation75_spill] sm:$0xff] }
 0x7a9   :  { %6416 = vmatprep.subr.bf16.mxu1 %v10439_v42  ;;  %6480 = vmatprep.subr.bf16.mxu0 %v10440_v10  ;;  %v10450_v42 = vld [vmem:[#allocation76_spill] sm:$0xff]  ;;  %v10451_v10 = vld [vmem:[#allocation77_spill] sm:$0xff] }
 0x7ac   :  { %6418 = vmatpush1.bf16.msra.mxu1 %v10441_v5  ;;  %6482 = vmatpush1.bf16.msra.mxu0 %v10442_v59  ;;  %v10452_v5 = vld [vmem:[#allocation78_spill] sm:$0xff] }
 0x7ad   :  { %6420 = vmatprep.subr.bf16.mxu1 %v10443_v6  ;;  %6484 = vmatprep.subr.bf16.mxu0 %v10444_v12 }
 0x7b0   :  { %6422 = vmatpush1.bf16.msra.mxu1 %v10445_v13  ;;  %6486 = vmatpush1.bf16.msra.mxu0 %v10446_v21 }
 0x7b1   :  { %6424 = vmatprep.subr.bf16.mxu1 %v10447_v28  ;;  %6488 = vmatprep.subr.bf16.mxu0 %v10448_v19  ;;  %v10455_v19 = vld [vmem:[#allocation148_spill] sm:$0xff] }
 0x7b4   :  { %6426 = vmatpush1.bf16.msra.mxu1 %v10449_v22  ;;  %6490 = vmatpush1.bf16.msra.mxu0 %v10450_v42  ;;  %v10456_v42 = vld [vmem:[#allocation146_spill] sm:$0xff] }
 0x7b5   :  { %6492 = vmatprep.subr.bf16.mxu1 %v10451_v10  ;;  %6556 = vmatprep.subr.bf16.mxu0 %v10452_v5 }
 0x80a   :  { %v2495_v59 = vpop.f32.mrb[24].mxu1  ;;  %v2566_v6 = vpop.f32.mrb[26].mxu0 }
 0x80b   :  { %v2713_v12 = vadd.f32 %v2495_v59, %v10453_v17  ;;  %v2497_v14 = vpop.f32.mrb[25].mxu1  ;;  %v2568_v13 = vpop.f32.mrb[27].mxu0  ;;  %v2715_v37 = vadd.f32 %v2566_v6, %v10456_v42 }
 0x80c   :  { %v2714_v21 = vadd.f32 %v2497_v14, %v10454_v57  ;;  %v2716_v22 = vadd.f32 %v2568_v13, %v10455_v19 }
 0x80d   :  { %v4774_v11 = vmul.f32 -1.442695, %v2713_v12  ;;  %v2753_v12 = vrot.slane %v9000_v4, 6  ;;  %v10459_v4 = vld [vmem:[#allocation149_spill] sm:$0xff] }
 0x80e   :  { %v4775_v28 = vmul.f32 -1.442695, %v2714_v21  ;;  %v4776_v49 = vmul.f32 -1.442695, %v2716_v22 }
 0x80f   :  { %7600 = vpow2.f32 %v4774_v11 }
 0x810   :  { %7602 = vpow2.f32 %v4775_v28 }
 0x811   :  { %7604 = vpow2.f32 %v4776_v49 }
 0x812   :  { %7606 = vtanh.f32 %v2715_v37 }
 0x819   :  { %v7601_v10 = vpop.eup %7600 }
 0x81a   :  { %v7603_v30 = vpop.eup %7602  ;;  %v2736_v5 = vadd.f32 1.0, %v7601_v10 }
 0x81b   :  { %v2742_v25 = vadd.f32 1.0, %v7603_v30  ;;  %v7605_v59 = vpop.eup %7604 }
 0x81c   :  { %7608 = vrcp.f32 %v2736_v5  ;;  %v7607_v17 = vpop.eup %7606  ;;  %v2749_v28 = vadd.f32 1.0, %v7605_v59 }
 0x81d   :  { %7610 = vrcp.f32 %v2742_v25 }
 0x81e   :  { %7612 = vrcp.f32 %v2749_v28 }
 0x826   :  { %v7609_v14 = vpop.eup %7608 }
 0x827   :  { %v7611_v11 = vpop.eup %7610  ;;  %v2756_v21 = vmul.f32 %v7609_v14, %v7607_v17  ;;  %v10460_v17 = vld [vmem:[#allocation151_spill] sm:$0xff] }
 0x828   :  { %v2755_v13 = vmul.f32 %v7611_v11, %v2753_v12  ;;  %v7613_v6 = vpop.eup %7612 }
 0x82a   :  { %v9153_v22 = vadd.f32 %v2756_v21, %v2755_v13  ;;  %v10461_v21 = vld [vmem:[#allocation152_spill] sm:$0xff] }
 0x82c   :  { %10457 = vst [vmem:[#allocation82_spill] sm:$0xff] %v9153_v22  ;;  %7614 = vtanh.f32 %v9153_v22 }
 0x836   :  { %v7615_v49 = vpop.eup %7614 }
 0x837   :  { %v9156_v37 = vmul.f32 %v7615_v49, %v7613_v6  ;;  %v10462_v49 = vld [vmem:[#allocation150_spill] sm:$0xff] }
 0x839   :  { %10458 = vst [vmem:[#allocation83_spill] sm:$0xff] %v9156_v37 }
 0x84a   :  { %v2637_v30 = vpop.f32.mrb[26].mxu1  ;;  %v2708_v25 = vpop.f32.mrb[28].mxu0 }
 0x84b   :  { %v2721_v10 = vrot.slane %v2637_v30, 2  ;;  %v2639_v5 = vpop.f32.mrb[27].mxu1  ;;  %v2710_v42 = vpop.f32.mrb[29].mxu0  ;;  %v2723_v13 = vrot.slane %v2708_v25, 2 }
 0x84c   :  { %v2722_v19 = vrot.slane %v2639_v5, 2  ;;  %v2724_v11 = vrot.slane %v2710_v42, 2  ;;  %v2780_v42 = vrot.slane %v9008_v36, 2  ;;  %v10463_v36 = vld [vmem:[#allocation119_spill] sm:$0xff] }
 0x84d   :  { %v2729_v57 = vadd.f32 %v2721_v10, %v10459_v4  ;;  %v2731_v22 = vadd.f32 %v2723_v13, %v10462_v49 }
 0x84e   :  { %v2730_v59 = vadd.f32 %v2722_v19, %v10460_v17  ;;  %v2732_v28 = vadd.f32 %v2724_v11, %v10461_v21 }
 0x84f   :  { %v4777_v14 = vmul.f32 -1.442695, %v2729_v57 }
 0x850   :  { %v4778_v12 = vmul.f32 -1.442695, %v2730_v59  ;;  %v4779_v6 = vmul.f32 -1.442695, %v2732_v28 }
 0x851   :  { %7616 = vpow2.f32 %v4777_v14 }
 0x852   :  { %7618 = vpow2.f32 %v4778_v12 }
 0x853   :  { %7620 = vpow2.f32 %v4779_v6  ;;  %v10465_v6 = vld [vmem:[#allocation121_spill] sm:$0xff] }
 0x854   :  { %7622 = vtanh.f32 %v2731_v22 }
 0x85b   :  { %v7617_v50 = vpop.eup %7616 }
 0x85c   :  { %v7619_v30 = vpop.eup %7618  ;;  %v2763_v34 = vadd.f32 1.0, %v7617_v50 }
 0x85d   :  { %v2769_v5 = vadd.f32 1.0, %v7619_v30  ;;  %v7621_v19 = vpop.eup %7620  ;;  %v10466_v30 = vld [vmem:[#allocation122_spill] sm:$0xff] }
 0x85e   :  { %7624 = vrcp.f32 %v2763_v34  ;;  %v7623_v57 = vpop.eup %7622  ;;  %v2776_v12 = vadd.f32 1.0, %v7621_v19  ;;  %v10468_v19 = vld [vmem:[#allocation124_spill] sm:$0xff] }
 0x85f   :  { %7626 = vrcp.f32 %v2769_v5  ;;  %v10467_v5 = vld [vmem:[#allocation123_spill] sm:$0xff] }
 0x860   :  { %7628 = vrcp.f32 %v2776_v12  ;;  %v10474_v12 = vld [vmem:[#allocation130_spill] sm:$0xff] }
 0x868   :  { %v7625_v10 = vpop.eup %7624 }
 0x869   :  { %v7627_v59 = vpop.eup %7626  ;;  %v2783_v14 = vmul.f32 %v7625_v10, %v7623_v57  ;;  %v10469_v57 = vld [vmem:[#allocation125_spill] sm:$0xff]  ;;  %v10470_v10 = vld [vmem:[#allocation126_spill] sm:$0xff] }
 0x86a   :  { %v2782_v25 = vmul.f32 %v7627_v59, %v2780_v42  ;;  %v7629_v50 = vpop.eup %7628  ;;  %v10471_v42 = vld [vmem:[#allocation127_spill] sm:$0xff]  ;;  %v10472_v59 = vld [vmem:[#allocation128_spill] sm:$0xff] }
 0x86c   :  { %v9163_v11 = vadd.f32 %v2783_v14, %v2782_v25  ;;  %v10473_v14 = vld [vmem:[#allocation129_spill] sm:$0xff]  ;;  %v10475_v25 = vld [vmem:[#allocation131_spill] sm:$0xff] }
 0x86e   :  { %7630 = vtanh.f32 %v9163_v11 }
 0x878   :  { %v7631_v28 = vpop.eup %7630 }
 0x879   :  { %v2786_v22 = vmul.f32 %v7631_v28, %v7629_v50  ;;  %v10476_v50 = vld [vmem:[#allocation132_spill] sm:$0xff]  ;;  %v10477_v28 = vld [vmem:[#allocation133_spill] sm:$0xff] }
 0x87b   :  { %v2788_v13 = vrot.slane %v2786_v22, 6  ;;  %v10478_v22 = vld [vmem:[#allocation134_spill] sm:$0xff] }
 0x87d   :  { %2856 = vmatprep.mubr.f32.mxu1 %v2788_v13  ;;  %2927 = vmatprep.mubr.f32.mxu0 %v2788_v13  ;;  %v9167_v34 = vadd.f32 %v2788_v13, %v9014_v9  ;;  %v10464_v9 = vld [vmem:[#allocation120_spill] sm:$0xff] }
 0x87e   :  { %2857 = vmatmul.mubr.f32.vlgmr.msra.gmra.mrb[28].mxu1 %v9156_v37  ;;  %2928 = vmatmul.mubr.f32.vlgmr.msra.gmra.mrb[30].mxu0 %v9156_v37 }
 0x87f   :  { %6494 = vmatpush1.bf16.msra.mxu1 %v10079_v63  ;;  %6558 = vmatpush1.bf16.msra.mxu0 %v10080_v52 }
 0x880   :  { %2998 = vmatprep.mubr.f32.mxu1 %v2788_v13  ;;  %3069 = vmatprep.mubr.f32.mxu0 %v2788_v13  ;;  %v10479_v13 = vld [vmem:[#allocation135_spill] sm:$0xff] }
 0x881   :  { %6496 = vmatprep.subr.bf16.mxu1 %v10081_v53  ;;  %6560 = vmatprep.subr.bf16.mxu0 %v10082_v31 }
 0x883   :  { %6498 = vmatpush1.bf16.msra.mxu1 %v10083_v0  ;;  %6562 = vmatpush1.bf16.msra.mxu0 %v10084_v51 }
 0x884   :  { %6500 = vmatprep.subr.bf16.mxu1 %v10085_v38  ;;  %6564 = vmatprep.subr.bf16.mxu0 %v10173_v23 }
 0x887   :  { %6502 = vmatpush1.bf16.msra.mxu1 %v10174_v44  ;;  %6566 = vmatpush1.bf16.msra.mxu0 %v10175_v47 }
 0x888   :  { %6504 = vmatprep.subr.bf16.mxu1 %v10176_v56  ;;  %6568 = vmatprep.subr.bf16.mxu0 %v10177_v58 }
 0x88b   :  { %6506 = vmatpush1.bf16.msra.mxu1 %v10267_v7  ;;  %6570 = vmatpush1.bf16.msra.mxu0 %v10268_v1 }
 0x88c   :  { %6508 = vmatprep.subr.bf16.mxu1 %v10269_v46  ;;  %6572 = vmatprep.subr.bf16.mxu0 %v10270_v40 }
 0x88f   :  { %6510 = vmatpush1.bf16.msra.mxu1 %v10271_v41  ;;  %6574 = vmatpush1.bf16.msra.mxu0 %v10272_v54 }
 0x890   :  { %6512 = vmatprep.subr.bf16.mxu1 %v10273_v61  ;;  %6576 = vmatprep.subr.bf16.mxu0 %v10274_v55 }
 0x893   :  { %6514 = vmatpush1.bf16.msra.mxu1 %v10275_v62  ;;  %6578 = vmatpush1.bf16.msra.mxu0 %v10276_v26 }
 0x894   :  { %6516 = vmatprep.subr.bf16.mxu1 %v10277_v2  ;;  %6580 = vmatprep.subr.bf16.mxu0 %v10278_v24 }
 0x897   :  { %6518 = vmatpush1.bf16.msra.mxu1 %v10279_v48  ;;  %6582 = vmatpush1.bf16.msra.mxu0 %v10280_v39 }
 0x898   :  { %6520 = vmatprep.subr.bf16.mxu1 %v10281_v45  ;;  %6584 = vmatprep.subr.bf16.mxu0 %v10282_v27 }
 0x89b   :  { %6522 = vmatpush1.bf16.msra.mxu1 %v10194_v29  ;;  %6586 = vmatpush1.bf16.msra.mxu0 %v10195_v3 }
 0x89c   :  { %6524 = vmatprep.subr.bf16.mxu1 %v10196_v16  ;;  %6588 = vmatprep.subr.bf16.mxu0 %v10197_v32 }
 0x89f   :  { %6526 = vmatpush1.bf16.msra.mxu1 %v10198_v8  ;;  %6590 = vmatpush1.bf16.msra.mxu0 %v10199_v33 }
 0x8a0   :  { %6528 = vmatprep.subr.bf16.mxu1 %v10200_v60  ;;  %6592 = vmatprep.subr.bf16.mxu0 %v10201_v35 }
 0x8a3   :  { %6530 = vmatpush1.bf16.msra.mxu1 %v10361_v15  ;;  %6594 = vmatpush1.bf16.msra.mxu0 %v10362_v18 }
 0x8a4   :  { %6532 = vmatprep.subr.bf16.mxu1 %v10363_v20  ;;  %6596 = vmatprep.subr.bf16.mxu0 %v10364_v43 }
 0x8a7   :  { %6534 = vmatpush1.bf16.msra.mxu1 %v10463_v36  ;;  %6598 = vmatpush1.bf16.msra.mxu0 %v10464_v9 }
 0x8a8   :  { %6536 = vmatprep.subr.bf16.mxu1 %v10465_v6  ;;  %6600 = vmatprep.subr.bf16.mxu0 %v10466_v30  ;;  %v10552_v30 = vld [vmem:[#allocation147_spill] sm:$0xff] }
 0x8ab   :  { %6538 = vmatpush1.bf16.msra.mxu1 %v10467_v5  ;;  %6602 = vmatpush1.bf16.msra.mxu0 %v10468_v19  ;;  %v10551_v5 = vld [vmem:[#allocation145_spill] sm:$0xff] }
 0x8ac   :  { %6540 = vmatprep.subr.bf16.mxu1 %v10469_v57  ;;  %6604 = vmatprep.subr.bf16.mxu0 %v10470_v10  ;;  %v10480_v57 = vld [vmem:[#allocation136_spill] sm:$0xff]  ;;  %v10481_v10 = vld [vmem:[#allocation137_spill] sm:$0xff] }
 0x8af   :  { %6542 = vmatpush1.bf16.msra.mxu1 %v10471_v42  ;;  %6606 = vmatpush1.bf16.msra.mxu0 %v10472_v59  ;;  %v10482_v42 = vld [vmem:[#allocation138_spill] sm:$0xff]  ;;  %v10483_v59 = vld [vmem:[#allocation139_spill] sm:$0xff] }
 0x8b0   :  { %6544 = vmatprep.subr.bf16.mxu1 %v10473_v14  ;;  %6608 = vmatprep.subr.bf16.mxu0 %v10474_v12  ;;  %v10484_v14 = vld [vmem:[#allocation140_spill] sm:$0xff]  ;;  %v10485_v12 = vld [vmem:[#allocation13_spill] sm:$0xff] }
 0x8b3   :  { %6546 = vmatpush1.bf16.msra.mxu1 %v10475_v25  ;;  %6610 = vmatpush1.bf16.msra.mxu0 %v10476_v50  ;;  %v10486_v25 = vld [vmem:[#allocation14_spill] sm:$0xff] }
 0x8b4   :  { %6548 = vmatprep.subr.bf16.mxu1 %v10477_v28  ;;  %6612 = vmatprep.subr.bf16.mxu0 %v10478_v22  ;;  %v10487_v22 = vld [vmem:[#allocation15_spill] sm:$0xff]  ;;  %v10496_v28 = vld [vmem:[#allocation24_spill] sm:$0xff] }
 0x8b7   :  { %6550 = vmatpush1.bf16.msra.mxu1 %v10479_v13  ;;  %6614 = vmatpush1.bf16.msra.mxu0 %v10480_v57  ;;  %v10488_v13 = vld [vmem:[#allocation16_spill] sm:$0xff]  ;;  %v10489_v57 = vld [vmem:[#allocation17_spill] sm:$0xff] }
 0x8b8   :  { %6552 = vmatprep.subr.bf16.mxu1 %v10481_v10  ;;  %6616 = vmatprep.subr.bf16.mxu0 %v10482_v42  ;;  %v10490_v10 = vld [vmem:[#allocation18_spill] sm:$0xff]  ;;  %v10491_v42 = vld [vmem:[#allocation19_spill] sm:$0xff] }
 0x8bb   :  { %6554 = vmatpush1.bf16.msra.mxu1 %v10483_v59  ;;  %6618 = vmatpush1.bf16.msra.mxu0 %v10484_v14  ;;  %v10492_v59 = vld [vmem:[#allocation20_spill] sm:$0xff]  ;;  %v10493_v14 = vld [vmem:[#allocation21_spill] sm:$0xff] }
 0x8bc   :  { %6620 = vmatprep.subr.bf16.mxu1 %v10485_v12  ;;  %6684 = vmatprep.subr.bf16.mxu0 %v10486_v25  ;;  %v10494_v12 = vld [vmem:[#allocation22_spill] sm:$0xff]  ;;  %v10495_v25 = vld [vmem:[#allocation23_spill] sm:$0xff] }
 0x8be   :  { %2999 = vmatmul.mubr.f32.vlgmr.msra.gmra.mrb[30].mxu1 %v9156_v37  ;;  %3070 = vmatmul.mubr.f32.vlgmr.msra.gmra.mrb[32].mxu0 %v9156_v37  ;;  %v10497_v37 = vld [vmem:[#allocation25_spill] sm:$0xff] }
 0x8bf   :  { %6622 = vmatpush1.bf16.msra.mxu1 %v10487_v22  ;;  %6686 = vmatpush1.bf16.msra.mxu0 %v10488_v13  ;;  %v10498_v22 = vld [vmem:[#allocation26_spill] sm:$0xff]  ;;  %v10499_v13 = vld [vmem:[#allocation27_spill] sm:$0xff] }
 0x8c0   :  { %6624 = vmatprep.subr.bf16.mxu1 %v10489_v57  ;;  %6688 = vmatprep.subr.bf16.mxu0 %v10490_v10  ;;  %v10500_v57 = vld [vmem:[#allocation28_spill] sm:$0xff]  ;;  %v10501_v10 = vld [vmem:[#allocation29_spill] sm:$0xff] }
 0x8c3   :  { %6626 = vmatpush1.bf16.msra.mxu1 %v10491_v42  ;;  %6690 = vmatpush1.bf16.msra.mxu0 %v10492_v59  ;;  %v10502_v42 = vld [vmem:[#allocation30_spill] sm:$0xff]  ;;  %v10503_v59 = vld [vmem:[#allocation31_spill] sm:$0xff] }
 0x8c4   :  { %6628 = vmatprep.subr.bf16.mxu1 %v10493_v14  ;;  %6692 = vmatprep.subr.bf16.mxu0 %v10494_v12  ;;  %v10504_v14 = vld [vmem:[#allocation32_spill] sm:$0xff]  ;;  %v10505_v12 = vld [vmem:[#allocation33_spill] sm:$0xff] }
 0x8c7   :  { %6630 = vmatpush1.bf16.msra.mxu1 %v10495_v25  ;;  %6694 = vmatpush1.bf16.msra.mxu0 %v10496_v28  ;;  %v10506_v25 = vld [vmem:[#allocation34_spill] sm:$0xff]  ;;  %v10507_v28 = vld [vmem:[#allocation35_spill] sm:$0xff] }
 0x8c8   :  { %6632 = vmatprep.subr.bf16.mxu1 %v10497_v37  ;;  %6696 = vmatprep.subr.bf16.mxu0 %v10498_v22  ;;  %v10508_v37 = vld [vmem:[#allocation36_spill] sm:$0xff]  ;;  %v10509_v22 = vld [vmem:[#allocation37_spill] sm:$0xff] }
 0x8cb   :  { %6634 = vmatpush1.bf16.msra.mxu1 %v10499_v13  ;;  %6698 = vmatpush1.bf16.msra.mxu0 %v10500_v57  ;;  %v10510_v13 = vld [vmem:[#allocation38_spill] sm:$0xff]  ;;  %v10511_v57 = vld [vmem:[#allocation39_spill] sm:$0xff] }
 0x8cc   :  { %6636 = vmatprep.subr.bf16.mxu1 %v10501_v10  ;;  %6700 = vmatprep.subr.bf16.mxu0 %v10502_v42  ;;  %v10512_v10 = vld [vmem:[#allocation40_spill] sm:$0xff]  ;;  %v10513_v42 = vld [vmem:[#allocation41_spill] sm:$0xff] }
 0x8cf   :  { %6638 = vmatpush1.bf16.msra.mxu1 %v10503_v59  ;;  %6702 = vmatpush1.bf16.msra.mxu0 %v10504_v14  ;;  %v10514_v59 = vld [vmem:[#allocation42_spill] sm:$0xff]  ;;  %v10515_v14 = vld [vmem:[#allocation43_spill] sm:$0xff] }
 0x8d0   :  { %6640 = vmatprep.subr.bf16.mxu1 %v10505_v12  ;;  %6704 = vmatprep.subr.bf16.mxu0 %v10506_v25  ;;  %v10516_v12 = vld [vmem:[#allocation44_spill] sm:$0xff]  ;;  %v10517_v25 = vld [vmem:[#allocation45_spill] sm:$0xff] }
 0x8d3   :  { %6642 = vmatpush1.bf16.msra.mxu1 %v10507_v28  ;;  %6706 = vmatpush1.bf16.msra.mxu0 %v10508_v37  ;;  %v10518_v28 = vld [vmem:[#allocation46_spill] sm:$0xff]  ;;  %v10519_v37 = vld [vmem:[#allocation47_spill] sm:$0xff] }
 0x8d4   :  { %6644 = vmatprep.subr.bf16.mxu1 %v10509_v22  ;;  %6708 = vmatprep.subr.bf16.mxu0 %v10510_v13  ;;  %v10520_v22 = vld [vmem:[#allocation48_spill] sm:$0xff]  ;;  %v10521_v13 = vld [vmem:[#allocation49_spill] sm:$0xff] }
 0x8d7   :  { %6646 = vmatpush1.bf16.msra.mxu1 %v10511_v57  ;;  %6710 = vmatpush1.bf16.msra.mxu0 %v10512_v10  ;;  %v10522_v57 = vld [vmem:[#allocation50_spill] sm:$0xff]  ;;  %v10523_v10 = vld [vmem:[#allocation51_spill] sm:$0xff] }
 0x8d8   :  { %6648 = vmatprep.subr.bf16.mxu1 %v10513_v42  ;;  %6712 = vmatprep.subr.bf16.mxu0 %v10514_v59  ;;  %v10524_v42 = vld [vmem:[#allocation52_spill] sm:$0xff]  ;;  %v10525_v59 = vld [vmem:[#allocation53_spill] sm:$0xff] }
 0x8db   :  { %6650 = vmatpush1.bf16.msra.mxu1 %v10515_v14  ;;  %6714 = vmatpush1.bf16.msra.mxu0 %v10516_v12  ;;  %v10526_v14 = vld [vmem:[#allocation54_spill] sm:$0xff]  ;;  %v10527_v12 = vld [vmem:[#allocation55_spill] sm:$0xff] }
 0x8dc   :  { %6652 = vmatprep.subr.bf16.mxu1 %v10517_v25  ;;  %6716 = vmatprep.subr.bf16.mxu0 %v10518_v28  ;;  %v10528_v25 = vld [vmem:[#allocation56_spill] sm:$0xff]  ;;  %v10529_v28 = vld [vmem:[#allocation57_spill] sm:$0xff] }
 0x8df   :  { %6654 = vmatpush1.bf16.msra.mxu1 %v10519_v37  ;;  %6718 = vmatpush1.bf16.msra.mxu0 %v10520_v22  ;;  %v10530_v37 = vld [vmem:[#allocation58_spill] sm:$0xff]  ;;  %v10531_v22 = vld [vmem:[#allocation59_spill] sm:$0xff] }
 0x8e0   :  { %6656 = vmatprep.subr.bf16.mxu1 %v10521_v13  ;;  %6720 = vmatprep.subr.bf16.mxu0 %v10522_v57  ;;  %v10532_v13 = vld [vmem:[#allocation60_spill] sm:$0xff]  ;;  %v10533_v57 = vld [vmem:[#allocation61_spill] sm:$0xff] }
 0x8e3   :  { %6658 = vmatpush1.bf16.msra.mxu1 %v10523_v10  ;;  %6722 = vmatpush1.bf16.msra.mxu0 %v10524_v42  ;;  %v10534_v10 = vld [vmem:[#allocation62_spill] sm:$0xff]  ;;  %v10535_v42 = vld [vmem:[#allocation63_spill] sm:$0xff] }
 0x8e4   :  { %6660 = vmatprep.subr.bf16.mxu1 %v10525_v59  ;;  %6724 = vmatprep.subr.bf16.mxu0 %v10526_v14  ;;  %v10536_v59 = vld [vmem:[#allocation64_spill] sm:$0xff]  ;;  %v10537_v14 = vld [vmem:[#allocation65_spill] sm:$0xff] }
 0x8e7   :  { %6662 = vmatpush1.bf16.msra.mxu1 %v10527_v12  ;;  %6726 = vmatpush1.bf16.msra.mxu0 %v10528_v25  ;;  %v10538_v12 = vld [vmem:[#allocation66_spill] sm:$0xff]  ;;  %v10539_v25 = vld [vmem:[#allocation67_spill] sm:$0xff] }
 0x8e8   :  { %6664 = vmatprep.subr.bf16.mxu1 %v10529_v28  ;;  %6728 = vmatprep.subr.bf16.mxu0 %v10530_v37  ;;  %v10540_v28 = vld [vmem:[#allocation68_spill] sm:$0xff]  ;;  %v10541_v37 = vld [vmem:[#allocation69_spill] sm:$0xff] }
 0x8eb   :  { %6666 = vmatpush1.bf16.msra.mxu1 %v10531_v22  ;;  %6730 = vmatpush1.bf16.msra.mxu0 %v10532_v13  ;;  %v10542_v22 = vld [vmem:[#allocation70_spill] sm:$0xff]  ;;  %v10543_v13 = vld [vmem:[#allocation71_spill] sm:$0xff] }
 0x8ec   :  { %6668 = vmatprep.subr.bf16.mxu1 %v10533_v57  ;;  %6732 = vmatprep.subr.bf16.mxu0 %v10534_v10  ;;  %v10544_v57 = vld [vmem:[#allocation72_spill] sm:$0xff]  ;;  %v10545_v10 = vld [vmem:[#allocation73_spill] sm:$0xff] }
 0x8ef   :  { %6670 = vmatpush1.bf16.msra.mxu1 %v10535_v42  ;;  %6734 = vmatpush1.bf16.msra.mxu0 %v10536_v59  ;;  %v10546_v42 = vld [vmem:[#allocation74_spill] sm:$0xff]  ;;  %v10547_v59 = vld [vmem:[#allocation75_spill] sm:$0xff] }
 0x8f0   :  { %6672 = vmatprep.subr.bf16.mxu1 %v10537_v14  ;;  %6736 = vmatprep.subr.bf16.mxu0 %v10538_v12  ;;  %v10548_v14 = vld [vmem:[#allocation76_spill] sm:$0xff]  ;;  %v10549_v12 = vld [vmem:[#allocation77_spill] sm:$0xff] }
 0x8f3   :  { %6674 = vmatpush1.bf16.msra.mxu1 %v10539_v25  ;;  %6738 = vmatpush1.bf16.msra.mxu0 %v10540_v28  ;;  %v10550_v25 = vld [vmem:[#allocation78_spill] sm:$0xff] }
 0x8f4   :  { %6676 = vmatprep.subr.bf16.mxu1 %v10541_v37  ;;  %6740 = vmatprep.subr.bf16.mxu0 %v10542_v22 }
 0x8f7   :  { %6678 = vmatpush1.bf16.msra.mxu1 %v10543_v13  ;;  %6742 = vmatpush1.bf16.msra.mxu0 %v10544_v57 }
 0x8f8   :  { %6680 = vmatprep.subr.bf16.mxu1 %v10545_v10  ;;  %6744 = vmatprep.subr.bf16.mxu0 %v10546_v42 }
 0x8fb   :  { %6682 = vmatpush1.bf16.msra.mxu1 %v10547_v59  ;;  %6746 = vmatpush1.bf16.msra.mxu0 %v10548_v14  ;;  %v10553_v14 = vld [vmem:[#allocation148_spill] sm:$0xff] }
 0x8fc   :  { %6748 = vmatprep.subr.bf16.mxu1 %v10549_v12  ;;  %6812 = vmatprep.subr.bf16.mxu0 %v10550_v25  ;;  %v10554_v25 = vld [vmem:[#allocation146_spill] sm:$0xff] }
 0x951   :  { %v2858_v28 = vpop.f32.mrb[28].mxu1  ;;  %v2929_v37 = vpop.f32.mrb[30].mxu0 }
 0x952   :  { %v3080_v50 = vrot.slane %v2858_v28, 6  ;;  %v2860_v22 = vpop.f32.mrb[29].mxu1  ;;  %v2931_v19 = vpop.f32.mrb[31].mxu0  ;;  %v3082_v12 = vrot.slane %v2929_v37, 6 }
 0x953   :  { %v3081_v13 = vrot.slane %v2860_v22, 6  ;;  %v3083_v9 = vrot.slane %v2931_v19, 6  ;;  %v10555_v19 = vld [vmem:[#allocation82_spill] sm:$0xff] }
 0x954   :  { %v3088_v57 = vadd.f32 %v3080_v50, %v10551_v5  ;;  %v3090_v43 = vadd.f32 %v3082_v12, %v10554_v25 }
 0x955   :  { %v3089_v10 = vadd.f32 %v3081_v13, %v10552_v30  ;;  %v3091_v59 = vadd.f32 %v3083_v9, %v10553_v14 }
 0x956   :  { %v4780_v6 = vmul.f32 -1.442695, %v3088_v57 }
 0x957   :  { %v4781_v42 = vmul.f32 -1.442695, %v3089_v10  ;;  %v4782_v36 = vmul.f32 -1.442695, %v3091_v59 }
 0x958   :  { %7632 = vpow2.f32 %v4780_v6  ;;  %v3128_v6 = vrot.slane %v10555_v19, 6 }
 0x959   :  { %7634 = vpow2.f32 %v4781_v42 }
 0x95a   :  { %7636 = vpow2.f32 %v4782_v36 }
 0x95b   :  { %7638 = vtanh.f32 %v3090_v43 }
 0x962   :  { %v7633_v20 = vpop.eup %7632 }
 0x963   :  { %v7635_v28 = vpop.eup %7634  ;;  %v3111_v18 = vadd.f32 1.0, %v7633_v20 }
 0x964   :  { %v3117_v22 = vadd.f32 1.0, %v7635_v28  ;;  %v7637_v50 = vpop.eup %7636 }
 0x965   :  { %7640 = vrcp.f32 %v3111_v18  ;;  %v7639_v57 = vpop.eup %7638  ;;  %v3124_v9 = vadd.f32 1.0, %v7637_v50 }
 0x966   :  { %7642 = vrcp.f32 %v3117_v22 }
 0x967   :  { %7644 = vrcp.f32 %v3124_v9 }
 0x96f   :  { %v7641_v10 = vpop.eup %7640 }
 0x970   :  { %v7643_v42 = vpop.eup %7642  ;;  %v3131_v13 = vmul.f32 %v7641_v10, %v7639_v57 }
 0x971   :  { %v3130_v37 = vmul.f32 %v7643_v42, %v3128_v6  ;;  %v7645_v20 = vpop.eup %7644 }
 0x973   :  { %v9306_v59 = vadd.f32 %v3131_v13, %v3130_v37 }
 0x975   :  { %7646 = vtanh.f32 %v9306_v59 }
 0x97f   :  { %v7647_v36 = vpop.eup %7646 }
 0x980   :  { %v3134_v43 = vmul.f32 %v7647_v36, %v7645_v20 }
 0x991   :  { %v3000_v12 = vpop.f32.mrb[30].mxu1  ;;  %v3071_v18 = vpop.f32.mrb[32].mxu0 }
 0x992   :  { %v3096_v28 = vrot.slane %v3000_v12, 4  ;;  %v3002_v22 = vpop.f32.mrb[31].mxu1  ;;  %v3073_v25 = vpop.f32.mrb[33].mxu0  ;;  %v3098_v13 = vrot.slane %v3071_v18, 4 }
 0x993   :  { %v3097_v14 = vrot.slane %v3002_v22, 4  ;;  %v3099_v6 = vrot.slane %v3073_v25, 4  ;;  %v3155_v25 = vrot.slane %v9163_v11, 2 }
 0x994   :  { %v3104_v19 = vadd.f32 %v3096_v28, %v10459_v4  ;;  %v3106_v37 = vadd.f32 %v3098_v13, %v10462_v49 }
 0x995   :  { %v3105_v57 = vadd.f32 %v3097_v14, %v10460_v17  ;;  %v3107_v42 = vadd.f32 %v3099_v6, %v10461_v21 }
 0x996   :  { %v4783_v50 = vmul.f32 -1.442695, %v3104_v19 }
 0x997   :  { %v4784_v10 = vmul.f32 -1.442695, %v3105_v57  ;;  %v4785_v9 = vmul.f32 -1.442695, %v3107_v42 }
 0x998   :  { %7648 = vpow2.f32 %v4783_v50 }
 0x999   :  { %7650 = vpow2.f32 %v4784_v10 }
 0x99a   :  { %7652 = vpow2.f32 %v4785_v9 }
 0x99b   :  { %7654 = vtanh.f32 %v3106_v37 }
 0x9a2   :  { %v7649_v20 = vpop.eup %7648 }
 0x9a3   :  { %v7651_v36 = vpop.eup %7650  ;;  %v3138_v12 = vadd.f32 1.0, %v7649_v20 }
 0x9a4   :  { %v3144_v22 = vadd.f32 1.0, %v7651_v36  ;;  %v7653_v14 = vpop.eup %7652  ;;  %v9317_v36 = vrot.slane %v3134_v43, 2  ;;  %v10558_v43 = vld [vmem:[#allocation117_spill] sm:$0xff] }
 0x9a5   :  { %7656 = vrcp.f32 %v3138_v12  ;;  %v7655_v28 = vpop.eup %7654  ;;  %v3151_v10 = vadd.f32 1.0, %v7653_v14  ;;  %v10559_v12 = vld [vmem:[#allocation118_spill] sm:$0xff]  ;;  %v10561_v14 = vld [vmem:[#allocation120_spill] sm:$0xff] }
 0x9a6   :  { %7658 = vrcp.f32 %v3144_v22  ;;  %10556 = vst [vmem:[#allocation84_spill] sm:$0xff] %v9317_v36  ;;  %v10560_v22 = vld [vmem:[#allocation119_spill] sm:$0xff] }
 0x9a7   :  { %7660 = vrcp.f32 %v3151_v10  ;;  %v10567_v10 = vld [vmem:[#allocation126_spill] sm:$0xff] }
 0x9af   :  { %v7657_v19 = vpop.eup %7656 }
 0x9b0   :  { %v7659_v57 = vpop.eup %7658  ;;  %v3158_v50 = vmul.f32 %v7657_v19, %v7655_v28  ;;  %v10562_v28 = vld [vmem:[#allocation121_spill] sm:$0xff]  ;;  %v10563_v19 = vld [vmem:[#allocation122_spill] sm:$0xff] }
 0x9b1   :  { %v3157_v18 = vmul.f32 %v7659_v57, %v3155_v25  ;;  %v7661_v42 = vpop.eup %7660  ;;  %v10564_v25 = vld [vmem:[#allocation123_spill] sm:$0xff]  ;;  %v10565_v57 = vld [vmem:[#allocation124_spill] sm:$0xff] }
 0x9b3   :  { %v9314_v6 = vadd.f32 %v3158_v50, %v3157_v18  ;;  %v10566_v50 = vld [vmem:[#allocation125_spill] sm:$0xff]  ;;  %v10568_v18 = vld [vmem:[#allocation127_spill] sm:$0xff] }
 0x9b5   :  { %7662 = vtanh.f32 %v9314_v6 }
 0x9bf   :  { %v7663_v13 = vpop.eup %7662 }
 0x9c0   :  { %v3161_v9 = vmul.f32 %v7663_v13, %v7661_v42  ;;  %v10569_v42 = vld [vmem:[#allocation128_spill] sm:$0xff]  ;;  %v10570_v13 = vld [vmem:[#allocation129_spill] sm:$0xff] }
 0x9c2   :  { %v3163_v37 = vrot.slane %v3161_v9, 2  ;;  %v10571_v9 = vld [vmem:[#allocation130_spill] sm:$0xff] }
 0x9c4   :  { %v3166_v20 = vrot.slane %v3163_v37, 2  ;;  %v10572_v37 = vld [vmem:[#allocation131_spill] sm:$0xff] }
 0x9c6   :  { %3235 = vmatprep.mubr.f32.mxu1 %v3166_v20  ;;  %3306 = vmatprep.mubr.f32.mxu0 %v3166_v20  ;;  %v9320_v11 = vadd.f32 %v3166_v20, %v9167_v34  ;;  %v10557_v34 = vld [vmem:[#allocation116_spill] sm:$0xff] }
 0x9c7   :  { %3236 = vmatmul.mubr.f32.vlgmr.msra.gmra.mrb[32].mxu1 %v9317_v36  ;;  %3307 = vmatmul.mubr.f32.vlgmr.msra.gmra.mrb[34].mxu0 %v9317_v36 }
 0x9c8   :  { %6750 = vmatpush1.bf16.msra.mxu1 %v10079_v63  ;;  %6814 = vmatpush1.bf16.msra.mxu0 %v10080_v52 }
 0x9c9   :  { %3377 = vmatprep.mubr.f32.mxu1 %v3166_v20  ;;  %3448 = vmatprep.mubr.f32.mxu0 %v3166_v20  ;;  %v10573_v20 = vld [vmem:[#allocation132_spill] sm:$0xff] }
 0x9ca   :  { %6752 = vmatprep.subr.bf16.mxu1 %v10081_v53  ;;  %6816 = vmatprep.subr.bf16.mxu0 %v10082_v31 }
 0x9cc   :  { %6754 = vmatpush1.bf16.msra.mxu1 %v10083_v0  ;;  %6818 = vmatpush1.bf16.msra.mxu0 %v10084_v51 }
 0x9cd   :  { %6756 = vmatprep.subr.bf16.mxu1 %v10085_v38  ;;  %6820 = vmatprep.subr.bf16.mxu0 %v10173_v23 }
 0x9d0   :  { %6758 = vmatpush1.bf16.msra.mxu1 %v10174_v44  ;;  %6822 = vmatpush1.bf16.msra.mxu0 %v10175_v47 }
 0x9d1   :  { %6760 = vmatprep.subr.bf16.mxu1 %v10176_v56  ;;  %6824 = vmatprep.subr.bf16.mxu0 %v10177_v58 }
 0x9d4   :  { %6762 = vmatpush1.bf16.msra.mxu1 %v10267_v7  ;;  %6826 = vmatpush1.bf16.msra.mxu0 %v10268_v1 }
 0x9d5   :  { %6764 = vmatprep.subr.bf16.mxu1 %v10269_v46  ;;  %6828 = vmatprep.subr.bf16.mxu0 %v10270_v40 }
 0x9d8   :  { %6766 = vmatpush1.bf16.msra.mxu1 %v10271_v41  ;;  %6830 = vmatpush1.bf16.msra.mxu0 %v10272_v54 }
 0x9d9   :  { %6768 = vmatprep.subr.bf16.mxu1 %v10273_v61  ;;  %6832 = vmatprep.subr.bf16.mxu0 %v10274_v55 }
 0x9dc   :  { %6770 = vmatpush1.bf16.msra.mxu1 %v10275_v62  ;;  %6834 = vmatpush1.bf16.msra.mxu0 %v10276_v26 }
 0x9dd   :  { %6772 = vmatprep.subr.bf16.mxu1 %v10277_v2  ;;  %6836 = vmatprep.subr.bf16.mxu0 %v10278_v24 }
 0x9e0   :  { %6774 = vmatpush1.bf16.msra.mxu1 %v10279_v48  ;;  %6838 = vmatpush1.bf16.msra.mxu0 %v10280_v39 }
 0x9e1   :  { %6776 = vmatprep.subr.bf16.mxu1 %v10281_v45  ;;  %6840 = vmatprep.subr.bf16.mxu0 %v10282_v27 }
 0x9e4   :  { %6778 = vmatpush1.bf16.msra.mxu1 %v10194_v29  ;;  %6842 = vmatpush1.bf16.msra.mxu0 %v10195_v3 }
 0x9e5   :  { %6780 = vmatprep.subr.bf16.mxu1 %v10196_v16  ;;  %6844 = vmatprep.subr.bf16.mxu0 %v10197_v32 }
 0x9e8   :  { %6782 = vmatpush1.bf16.msra.mxu1 %v10198_v8  ;;  %6846 = vmatpush1.bf16.msra.mxu0 %v10199_v33 }
 0x9e9   :  { %6784 = vmatprep.subr.bf16.mxu1 %v10200_v60  ;;  %6848 = vmatprep.subr.bf16.mxu0 %v10201_v35 }
 0x9ec   :  { %6786 = vmatpush1.bf16.msra.mxu1 %v10361_v15  ;;  %6850 = vmatpush1.bf16.msra.mxu0 %v10557_v34 }
 0x9ed   :  { %6788 = vmatprep.subr.bf16.mxu1 %v10558_v43  ;;  %6852 = vmatprep.subr.bf16.mxu0 %v10559_v12 }
 0x9f0   :  { %6790 = vmatpush1.bf16.msra.mxu1 %v10560_v22  ;;  %6854 = vmatpush1.bf16.msra.mxu0 %v10561_v14 }
 0x9f1   :  { %6792 = vmatprep.subr.bf16.mxu1 %v10562_v28  ;;  %6856 = vmatprep.subr.bf16.mxu0 %v10563_v19  ;;  %v10574_v19 = vld [vmem:[#allocation133_spill] sm:$0xff] }
 0x9f4   :  { %6794 = vmatpush1.bf16.msra.mxu1 %v10564_v25  ;;  %6858 = vmatpush1.bf16.msra.mxu0 %v10565_v57  ;;  %v10575_v25 = vld [vmem:[#allocation134_spill] sm:$0xff]  ;;  %v10576_v57 = vld [vmem:[#allocation135_spill] sm:$0xff] }
 0x9f5   :  { %6796 = vmatprep.subr.bf16.mxu1 %v10566_v50  ;;  %6860 = vmatprep.subr.bf16.mxu0 %v10567_v10  ;;  %v10577_v50 = vld [vmem:[#allocation136_spill] sm:$0xff]  ;;  %v10578_v10 = vld [vmem:[#allocation137_spill] sm:$0xff] }
 0x9f8   :  { %6798 = vmatpush1.bf16.msra.mxu1 %v10568_v18  ;;  %6862 = vmatpush1.bf16.msra.mxu0 %v10569_v42  ;;  %v10579_v18 = vld [vmem:[#allocation138_spill] sm:$0xff]  ;;  %v10580_v42 = vld [vmem:[#allocation139_spill] sm:$0xff] }
 0x9f9   :  { %6800 = vmatprep.subr.bf16.mxu1 %v10570_v13  ;;  %6864 = vmatprep.subr.bf16.mxu0 %v10571_v9  ;;  %v10581_v13 = vld [vmem:[#allocation140_spill] sm:$0xff]  ;;  %v10582_v9 = vld [vmem:[#allocation13_spill] sm:$0xff] }
 0x9fc   :  { %6802 = vmatpush1.bf16.msra.mxu1 %v10572_v37  ;;  %6866 = vmatpush1.bf16.msra.mxu0 %v10573_v20  ;;  %v10583_v37 = vld [vmem:[#allocation14_spill] sm:$0xff] }
 0x9fd   :  { %6804 = vmatprep.subr.bf16.mxu1 %v10574_v19  ;;  %6868 = vmatprep.subr.bf16.mxu0 %v10575_v25  ;;  %v10584_v25 = vld [vmem:[#allocation15_spill] sm:$0xff]  ;;  %v10593_v19 = vld [vmem:[#allocation24_spill] sm:$0xff] }
 0xa00   :  { %6806 = vmatpush1.bf16.msra.mxu1 %v10576_v57  ;;  %6870 = vmatpush1.bf16.msra.mxu0 %v10577_v50  ;;  %v10585_v57 = vld [vmem:[#allocation16_spill] sm:$0xff]  ;;  %v10586_v50 = vld [vmem:[#allocation17_spill] sm:$0xff] }
 0xa01   :  { %6808 = vmatprep.subr.bf16.mxu1 %v10578_v10  ;;  %6872 = vmatprep.subr.bf16.mxu0 %v10579_v18  ;;  %v10587_v10 = vld [vmem:[#allocation18_spill] sm:$0xff]  ;;  %v10588_v18 = vld [vmem:[#allocation19_spill] sm:$0xff] }
 0xa04   :  { %6810 = vmatpush1.bf16.msra.mxu1 %v10580_v42  ;;  %6874 = vmatpush1.bf16.msra.mxu0 %v10581_v13  ;;  %v10589_v42 = vld [vmem:[#allocation20_spill] sm:$0xff]  ;;  %v10590_v13 = vld [vmem:[#allocation21_spill] sm:$0xff] }
 0xa05   :  { %6876 = vmatprep.subr.bf16.mxu1 %v10582_v9  ;;  %6940 = vmatprep.subr.bf16.mxu0 %v10583_v37  ;;  %v10591_v9 = vld [vmem:[#allocation22_spill] sm:$0xff]  ;;  %v10592_v37 = vld [vmem:[#allocation23_spill] sm:$0xff] }
 0xa07   :  { %3378 = vmatmul.mubr.f32.vlgmr.msra.gmra.mrb[34].mxu1 %v9317_v36  ;;  %3449 = vmatmul.mubr.f32.vlgmr.msra.gmra.mrb[36].mxu0 %v9317_v36  ;;  %v10594_v36 = vld [vmem:[#allocation25_spill] sm:$0xff] }
 0xa08   :  { %6878 = vmatpush1.bf16.msra.mxu1 %v10584_v25  ;;  %6942 = vmatpush1.bf16.msra.mxu0 %v10585_v57  ;;  %v10595_v25 = vld [vmem:[#allocation26_spill] sm:$0xff]  ;;  %v10596_v57 = vld [vmem:[#allocation27_spill] sm:$0xff] }
 0xa09   :  { %6880 = vmatprep.subr.bf16.mxu1 %v10586_v50  ;;  %6944 = vmatprep.subr.bf16.mxu0 %v10587_v10  ;;  %v10597_v50 = vld [vmem:[#allocation28_spill] sm:$0xff]  ;;  %v10598_v10 = vld [vmem:[#allocation29_spill] sm:$0xff] }
 0xa0c   :  { %6882 = vmatpush1.bf16.msra.mxu1 %v10588_v18  ;;  %6946 = vmatpush1.bf16.msra.mxu0 %v10589_v42  ;;  %v10599_v18 = vld [vmem:[#allocation30_spill] sm:$0xff]  ;;  %v10600_v42 = vld [vmem:[#allocation31_spill] sm:$0xff] }
 0xa0d   :  { %6884 = vmatprep.subr.bf16.mxu1 %v10590_v13  ;;  %6948 = vmatprep.subr.bf16.mxu0 %v10591_v9  ;;  %v10601_v13 = vld [vmem:[#allocation32_spill] sm:$0xff]  ;;  %v10602_v9 = vld [vmem:[#allocation33_spill] sm:$0xff] }
 0xa10   :  { %6886 = vmatpush1.bf16.msra.mxu1 %v10592_v37  ;;  %6950 = vmatpush1.bf16.msra.mxu0 %v10593_v19  ;;  %v10603_v37 = vld [vmem:[#allocation34_spill] sm:$0xff]  ;;  %v10604_v19 = vld [vmem:[#allocation35_spill] sm:$0xff] }
 0xa11   :  { %6888 = vmatprep.subr.bf16.mxu1 %v10594_v36  ;;  %6952 = vmatprep.subr.bf16.mxu0 %v10595_v25  ;;  %v10605_v36 = vld [vmem:[#allocation36_spill] sm:$0xff]  ;;  %v10606_v25 = vld [vmem:[#allocation37_spill] sm:$0xff] }
 0xa14   :  { %6890 = vmatpush1.bf16.msra.mxu1 %v10596_v57  ;;  %6954 = vmatpush1.bf16.msra.mxu0 %v10597_v50  ;;  %v10607_v57 = vld [vmem:[#allocation38_spill] sm:$0xff]  ;;  %v10608_v50 = vld [vmem:[#allocation39_spill] sm:$0xff] }
 0xa15   :  { %6892 = vmatprep.subr.bf16.mxu1 %v10598_v10  ;;  %6956 = vmatprep.subr.bf16.mxu0 %v10599_v18  ;;  %v10609_v10 = vld [vmem:[#allocation40_spill] sm:$0xff]  ;;  %v10610_v18 = vld [vmem:[#allocation41_spill] sm:$0xff] }
 0xa18   :  { %6894 = vmatpush1.bf16.msra.mxu1 %v10600_v42  ;;  %6958 = vmatpush1.bf16.msra.mxu0 %v10601_v13  ;;  %v10611_v42 = vld [vmem:[#allocation42_spill] sm:$0xff]  ;;  %v10612_v13 = vld [vmem:[#allocation43_spill] sm:$0xff] }
 0xa19   :  { %6896 = vmatprep.subr.bf16.mxu1 %v10602_v9  ;;  %6960 = vmatprep.subr.bf16.mxu0 %v10603_v37  ;;  %v10613_v9 = vld [vmem:[#allocation44_spill] sm:$0xff]  ;;  %v10614_v37 = vld [vmem:[#allocation45_spill] sm:$0xff] }
 0xa1c   :  { %6898 = vmatpush1.bf16.msra.mxu1 %v10604_v19  ;;  %6962 = vmatpush1.bf16.msra.mxu0 %v10605_v36  ;;  %v10615_v19 = vld [vmem:[#allocation46_spill] sm:$0xff]  ;;  %v10616_v36 = vld [vmem:[#allocation47_spill] sm:$0xff] }
 0xa1d   :  { %6900 = vmatprep.subr.bf16.mxu1 %v10606_v25  ;;  %6964 = vmatprep.subr.bf16.mxu0 %v10607_v57  ;;  %v10617_v25 = vld [vmem:[#allocation48_spill] sm:$0xff]  ;;  %v10618_v57 = vld [vmem:[#allocation49_spill] sm:$0xff] }
 0xa20   :  { %6902 = vmatpush1.bf16.msra.mxu1 %v10608_v50  ;;  %6966 = vmatpush1.bf16.msra.mxu0 %v10609_v10  ;;  %v10619_v50 = vld [vmem:[#allocation50_spill] sm:$0xff]  ;;  %v10620_v10 = vld [vmem:[#allocation51_spill] sm:$0xff] }
 0xa21   :  { %6904 = vmatprep.subr.bf16.mxu1 %v10610_v18  ;;  %6968 = vmatprep.subr.bf16.mxu0 %v10611_v42  ;;  %v10621_v18 = vld [vmem:[#allocation52_spill] sm:$0xff]  ;;  %v10622_v42 = vld [vmem:[#allocation53_spill] sm:$0xff] }
 0xa24   :  { %6906 = vmatpush1.bf16.msra.mxu1 %v10612_v13  ;;  %6970 = vmatpush1.bf16.msra.mxu0 %v10613_v9  ;;  %v10623_v13 = vld [vmem:[#allocation54_spill] sm:$0xff]  ;;  %v10624_v9 = vld [vmem:[#allocation55_spill] sm:$0xff] }
 0xa25   :  { %6908 = vmatprep.subr.bf16.mxu1 %v10614_v37  ;;  %6972 = vmatprep.subr.bf16.mxu0 %v10615_v19  ;;  %v10625_v37 = vld [vmem:[#allocation56_spill] sm:$0xff]  ;;  %v10626_v19 = vld [vmem:[#allocation57_spill] sm:$0xff] }
 0xa28   :  { %6910 = vmatpush1.bf16.msra.mxu1 %v10616_v36  ;;  %6974 = vmatpush1.bf16.msra.mxu0 %v10617_v25  ;;  %v10627_v36 = vld [vmem:[#allocation58_spill] sm:$0xff]  ;;  %v10628_v25 = vld [vmem:[#allocation59_spill] sm:$0xff] }
 0xa29   :  { %6912 = vmatprep.subr.bf16.mxu1 %v10618_v57  ;;  %6976 = vmatprep.subr.bf16.mxu0 %v10619_v50  ;;  %v10629_v57 = vld [vmem:[#allocation60_spill] sm:$0xff]  ;;  %v10630_v50 = vld [vmem:[#allocation61_spill] sm:$0xff] }
 0xa2c   :  { %6914 = vmatpush1.bf16.msra.mxu1 %v10620_v10  ;;  %6978 = vmatpush1.bf16.msra.mxu0 %v10621_v18  ;;  %v10631_v10 = vld [vmem:[#allocation62_spill] sm:$0xff]  ;;  %v10632_v18 = vld [vmem:[#allocation63_spill] sm:$0xff] }
 0xa2d   :  { %6916 = vmatprep.subr.bf16.mxu1 %v10622_v42  ;;  %6980 = vmatprep.subr.bf16.mxu0 %v10623_v13  ;;  %v10633_v42 = vld [vmem:[#allocation64_spill] sm:$0xff]  ;;  %v10634_v13 = vld [vmem:[#allocation65_spill] sm:$0xff] }
 0xa30   :  { %6918 = vmatpush1.bf16.msra.mxu1 %v10624_v9  ;;  %6982 = vmatpush1.bf16.msra.mxu0 %v10625_v37  ;;  %v10635_v9 = vld [vmem:[#allocation66_spill] sm:$0xff]  ;;  %v10636_v37 = vld [vmem:[#allocation67_spill] sm:$0xff] }
 0xa31   :  { %6920 = vmatprep.subr.bf16.mxu1 %v10626_v19  ;;  %6984 = vmatprep.subr.bf16.mxu0 %v10627_v36  ;;  %v10637_v19 = vld [vmem:[#allocation68_spill] sm:$0xff]  ;;  %v10638_v36 = vld [vmem:[#allocation69_spill] sm:$0xff] }
 0xa34   :  { %6922 = vmatpush1.bf16.msra.mxu1 %v10628_v25  ;;  %6986 = vmatpush1.bf16.msra.mxu0 %v10629_v57  ;;  %v10639_v25 = vld [vmem:[#allocation70_spill] sm:$0xff]  ;;  %v10640_v57 = vld [vmem:[#allocation71_spill] sm:$0xff] }
 0xa35   :  { %6924 = vmatprep.subr.bf16.mxu1 %v10630_v50  ;;  %6988 = vmatprep.subr.bf16.mxu0 %v10631_v10  ;;  %v10641_v50 = vld [vmem:[#allocation72_spill] sm:$0xff]  ;;  %v10642_v10 = vld [vmem:[#allocation73_spill] sm:$0xff] }
 0xa38   :  { %6926 = vmatpush1.bf16.msra.mxu1 %v10632_v18  ;;  %6990 = vmatpush1.bf16.msra.mxu0 %v10633_v42  ;;  %v10643_v18 = vld [vmem:[#allocation74_spill] sm:$0xff]  ;;  %v10644_v42 = vld [vmem:[#allocation75_spill] sm:$0xff] }
 0xa39   :  { %6928 = vmatprep.subr.bf16.mxu1 %v10634_v13  ;;  %6992 = vmatprep.subr.bf16.mxu0 %v10635_v9  ;;  %v10645_v13 = vld [vmem:[#allocation76_spill] sm:$0xff]  ;;  %v10646_v9 = vld [vmem:[#allocation77_spill] sm:$0xff] }
 0xa3c   :  { %6930 = vmatpush1.bf16.msra.mxu1 %v10636_v37  ;;  %6994 = vmatpush1.bf16.msra.mxu0 %v10637_v19  ;;  %v10647_v37 = vld [vmem:[#allocation78_spill] sm:$0xff] }
 0xa3d   :  { %6932 = vmatprep.subr.bf16.mxu1 %v10638_v36  ;;  %6996 = vmatprep.subr.bf16.mxu0 %v10639_v25 }
 0xa40   :  { %6934 = vmatpush1.bf16.msra.mxu1 %v10640_v57  ;;  %6998 = vmatpush1.bf16.msra.mxu0 %v10641_v50 }
 0xa41   :  { %6936 = vmatprep.subr.bf16.mxu1 %v10642_v10  ;;  %7000 = vmatprep.subr.bf16.mxu0 %v10643_v18 }
 0xa44   :  { %6938 = vmatpush1.bf16.msra.mxu1 %v10644_v42  ;;  %7002 = vmatpush1.bf16.msra.mxu0 %v10645_v13  ;;  %v10648_v42 = vld [vmem:[#allocation148_spill] sm:$0xff] }
 0xa45   :  { %7004 = vmatprep.subr.bf16.mxu1 %v10646_v9  ;;  %7068 = vmatprep.subr.bf16.mxu0 %v10647_v37  ;;  %v10649_v37 = vld [vmem:[#allocation146_spill] sm:$0xff] }
 0xa9a   :  { %v3237_v19 = vpop.f32.mrb[32].mxu1  ;;  %v3308_v36 = vpop.f32.mrb[34].mxu0 }
 0xa9b   :  { %v3459_v20 = vrot.slane %v3237_v19, 4  ;;  %v3239_v25 = vpop.f32.mrb[33].mxu1  ;;  %v3310_v28 = vpop.f32.mrb[35].mxu0  ;;  %v3461_v9 = vrot.slane %v3308_v36, 4 }
 0xa9c   :  { %v3460_v57 = vrot.slane %v3239_v25, 4  ;;  %v3462_v22 = vrot.slane %v3310_v28, 4 }
 0xa9d   :  { %v3467_v50 = vadd.f32 %v3459_v20, %v10551_v5  ;;  %v3469_v43 = vadd.f32 %v3461_v9, %v10649_v37 }
 0xa9e   :  { %v3468_v10 = vadd.f32 %v3460_v57, %v10552_v30  ;;  %v3470_v13 = vadd.f32 %v3462_v22, %v10648_v42 }
 0xa9f   :  { %v4786_v14 = vmul.f32 -1.442695, %v3467_v50 }
 0xaa0   :  { %v4787_v18 = vmul.f32 -1.442695, %v3468_v10  ;;  %v4788_v12 = vmul.f32 -1.442695, %v3470_v13 }
 0xaa1   :  { %7664 = vpow2.f32 %v4786_v14  ;;  %v3507_v14 = vrot.slane %v9306_v59, 6 }
 0xaa2   :  { %7666 = vpow2.f32 %v4787_v18 }
 0xaa3   :  { %7668 = vpow2.f32 %v4788_v12 }
 0xaa4   :  { %7670 = vtanh.f32 %v3469_v43 }
 0xaab   :  { %v7665_v34 = vpop.eup %7664 }
 0xaac   :  { %v7667_v19 = vpop.eup %7666  ;;  %v3490_v15 = vadd.f32 1.0, %v7665_v34 }
 0xaad   :  { %v3496_v25 = vadd.f32 1.0, %v7667_v19  ;;  %v7669_v20 = vpop.eup %7668 }
 0xaae   :  { %7672 = vrcp.f32 %v3490_v15  ;;  %v7671_v57 = vpop.eup %7670  ;;  %v3503_v22 = vadd.f32 1.0, %v7669_v20 }
 0xaaf   :  { %7674 = vrcp.f32 %v3496_v25 }
 0xab0   :  { %7676 = vrcp.f32 %v3503_v22 }
 0xab8   :  { %v7673_v50 = vpop.eup %7672 }
 0xab9   :  { %v7675_v28 = vpop.eup %7674  ;;  %v3510_v10 = vmul.f32 %v7673_v50, %v7671_v57 }
 0xaba   :  { %v3509_v36 = vmul.f32 %v7675_v28, %v3507_v14  ;;  %v7677_v34 = vpop.eup %7676 }
 0xabc   :  { %v9459_v18 = vadd.f32 %v3510_v10, %v3509_v36 }
 0xabe   :  { %7678 = vtanh.f32 %v9459_v18 }
 0xac8   :  { %v7679_v12 = vpop.eup %7678 }
 0xac9   :  { %v3513_v43 = vmul.f32 %v7679_v12, %v7677_v34 }
 0xada   :  { %v3379_v13 = vpop.f32.mrb[34].mxu1  ;;  %v3450_v15 = vpop.f32.mrb[36].mxu0 }
 0xadb   :  { %v3475_v9 = vrot.slane %v3379_v13, 6  ;;  %v3381_v19 = vpop.f32.mrb[35].mxu1  ;;  %v3452_v25 = vpop.f32.mrb[37].mxu0  ;;  %v3477_v10 = vrot.slane %v3450_v15, 6 }
 0xadc   :  { %v3476_v37 = vrot.slane %v3381_v19, 6  ;;  %v3478_v14 = vrot.slane %v3452_v25, 6  ;;  %v3534_v25 = vrot.slane %v9314_v6, 2 }
 0xadd   :  { %v3483_v59 = vadd.f32 %v3475_v9, %v10459_v4  ;;  %v3485_v36 = vadd.f32 %v3477_v10, %v10462_v49 }
 0xade   :  { %v3484_v57 = vadd.f32 %v3476_v37, %v10460_v17  ;;  %v3486_v28 = vadd.f32 %v3478_v14, %v10461_v21 }
 0xadf   :  { %v4789_v20 = vmul.f32 -1.442695, %v3483_v59 }
 0xae0   :  { %v4790_v50 = vmul.f32 -1.442695, %v3484_v57  ;;  %v4791_v22 = vmul.f32 -1.442695, %v3486_v28 }
 0xae1   :  { %7680 = vpow2.f32 %v4789_v20 }
 0xae2   :  { %7682 = vpow2.f32 %v4790_v50 }
 0xae3   :  { %7684 = vpow2.f32 %v4791_v22 }
 0xae4   :  { %7686 = vtanh.f32 %v3485_v36 }
 0xaeb   :  { %v7681_v34 = vpop.eup %7680 }
 0xaec   :  { %v7683_v12 = vpop.eup %7682  ;;  %v3517_v13 = vadd.f32 1.0, %v7681_v34 }
 0xaed   :  { %v3523_v19 = vadd.f32 1.0, %v7683_v12  ;;  %v7685_v37 = vpop.eup %7684  ;;  %v9470_v12 = vrot.slane %v3513_v43, 4  ;;  %v3928_v43 = vld [vmem:[#allocation7 + $0x48] sm:$0xff] }
 0xaee   :  { %7688 = vrcp.f32 %v3517_v13  ;;  %v7687_v9 = vpop.eup %7686  ;;  %v3530_v50 = vadd.f32 1.0, %v7685_v37  ;;  %v3930_v37 = vld [vmem:[#allocation7 + $0x58] sm:$0xff] }
 0xaef   :  { %7690 = vrcp.f32 %v3523_v19  ;;  %v3932_v19 = vld [vmem:[#allocation7 + $0x68] sm:$0xff] }
 0xaf0   :  { %7692 = vrcp.f32 %v3530_v50  ;;  %v3929_v50 = vld [vmem:[#allocation7 + $0x50] sm:$0xff] }
 0xaf8   :  { %v7689_v59 = vpop.eup %7688 }
 0xaf9   :  { %v7691_v57 = vpop.eup %7690  ;;  %v3537_v20 = vmul.f32 %v7689_v59, %v7687_v9  ;;  %v3934_v9 = vld [vmem:[#allocation7 + $0x78] sm:$0xff]  ;;  %v7135_v59 = vpack.c.bf16 %v3932_v19, %v3928_v43  ;;  %v3963_v19 = vld [vmem:[#allocation7 + $0x160] sm:$0xff] }
 0xafa   :  { %v3536_v15 = vmul.f32 %v7691_v57, %v3534_v25  ;;  %v7693_v28 = vpop.eup %7692  ;;  %v7199_v25 = vpack.c.bf16 %v3934_v9, %v3930_v37  ;;  %v3927_v57 = vld [vmem:[#allocation7 + $0x40] sm:$0xff]  ;;  %v3966_v43 = vld [vmem:[#allocation7 + $0x178] sm:$0xff] }
 0xafc   :  { %v9467_v14 = vadd.f32 %v3537_v20, %v3536_v15  ;;  %v3931_v20 = vld [vmem:[#allocation7 + $0x60] sm:$0xff] }
 0xafd   :  { %v7137_v15 = vpack.c.bf16 %v3931_v20, %v3927_v57  ;;  %v3968_v20 = vld [vmem:[#allocation7 + $0x188] sm:$0xff] }
 0xafe   :  { %7694 = vtanh.f32 %v9467_v14 }
 0xb08   :  { %v7695_v10 = vpop.eup %7694 }
 0xb09   :  { %v3540_v22 = vmul.f32 %v7695_v10, %v7693_v28  ;;  %v3933_v28 = vld [vmem:[#allocation7 + $0x70] sm:$0xff]  ;;  %v3936_v10 = vld [vmem:[#allocation7 + $0x88] sm:$0xff] }
 0xb0b   :  { %v3542_v36 = vrot.slane %v3540_v22, 6  ;;  %v3940_v22 = vld [vmem:[#allocation7 + $0xa8] sm:$0xff] }
 0xb0d   :  { %v3545_v34 = vrot.slane %v3542_v36, 4  ;;  %v7201_v36 = vpack.c.bf16 %v3933_v28, %v3929_v50  ;;  %v3972_v50 = vld [vmem:[#allocation7 + $0x1a8] sm:$0xff] }
 0xb0e   :  { %v7155_v28 = vpack.c.bf16 %v3972_v50, %v3968_v20  ;;  %v3999_v20 = vld [vmem:[#allocation7 + $0x280] sm:$0xff] }
 0xb0f   :  { %3614 = vmatprep.mubr.f32.mxu1 %v3545_v34  ;;  %3685 = vmatprep.mubr.f32.mxu0 %v3545_v34  ;;  %v9473_v6 = vadd.f32 %v3545_v34, %v9320_v11  ;;  %v3925_v11 = vld [vmem:[#allocation7 + $0x30] sm:$0xff]  ;;  %v4003_v50 = vld [vmem:[#allocation7 + $0x2a0] sm:$0xff] }
 0xb10   :  { %3615 = vmatmul.mubr.f32.vlgmr.msra.gmra.mrb[36].mxu1 %v9470_v12  ;;  %3686 = vmatmul.mubr.f32.vlgmr.msra.gmra.mrb[38].mxu0 %v9470_v12 }
 0xb11   :  { %7006 = vmatpush1.bf16.msra.mxu1 %v10079_v63  ;;  %7070 = vmatpush1.bf16.msra.mxu0 %v10080_v52  ;;  %v10650_v63 = vld [vmem:[#allocation115_spill] sm:$0xff]  ;;  %v10651_v52 = vld [vmem:[#allocation116_spill] sm:$0xff] }
 0xb12   :  { %3756 = vmatprep.mubr.f32.mxu1 %v3545_v34  ;;  %3827 = vmatprep.mubr.f32.mxu0 %v3545_v34  ;;  %v7139_v34 = vpack.c.bf16 %v3940_v22, %v3936_v10  ;;  %v3974_v10 = vld [vmem:[#allocation7 + $0x1b8] sm:$0xff]  ;;  %v3967_v22 = vld [vmem:[#allocation7 + $0x180] sm:$0xff] }
 0xb13   :  { %7008 = vmatprep.subr.bf16.mxu1 %v10081_v53  ;;  %7072 = vmatprep.subr.bf16.mxu0 %v10082_v31  ;;  %v10652_v53 = vld [vmem:[#allocation117_spill] sm:$0xff]  ;;  %v10653_v31 = vld [vmem:[#allocation118_spill] sm:$0xff] }
 0xb15   :  { %7010 = vmatpush1.bf16.msra.mxu1 %v10083_v0  ;;  %7074 = vmatpush1.bf16.msra.mxu0 %v10084_v51  ;;  %v10654_v0 = vld [vmem:[#allocation119_spill] sm:$0xff]  ;;  %v10655_v51 = vld [vmem:[#allocation120_spill] sm:$0xff] }
 0xb16   :  { %7012 = vmatprep.subr.bf16.mxu1 %v10085_v38  ;;  %7076 = vmatprep.subr.bf16.mxu0 %v10173_v23  ;;  %v10656_v38 = vld [vmem:[#allocation121_spill] sm:$0xff]  ;;  %v10657_v23 = vld [vmem:[#allocation122_spill] sm:$0xff] }
 0xb19   :  { %7014 = vmatpush1.bf16.msra.mxu1 %v10174_v44  ;;  %7078 = vmatpush1.bf16.msra.mxu0 %v10175_v47  ;;  %v10658_v44 = vld [vmem:[#allocation123_spill] sm:$0xff]  ;;  %v10659_v47 = vld [vmem:[#allocation124_spill] sm:$0xff] }
 0xb1a   :  { %7016 = vmatprep.subr.bf16.mxu1 %v10176_v56  ;;  %7080 = vmatprep.subr.bf16.mxu0 %v10177_v58  ;;  %v10660_v56 = vld [vmem:[#allocation125_spill] sm:$0xff]  ;;  %v10661_v58 = vld [vmem:[#allocation126_spill] sm:$0xff] }
 0xb1d   :  { %7018 = vmatpush1.bf16.msra.mxu1 %v10267_v7  ;;  %7082 = vmatpush1.bf16.msra.mxu0 %v10268_v1  ;;  %v10670_v7 = vld [vmem:[#allocation135_spill] sm:$0xff]  ;;  %v10671_v1 = vld [vmem:[#allocation136_spill] sm:$0xff] }
 0xb1e   :  { %7020 = vmatprep.subr.bf16.mxu1 %v10269_v46  ;;  %7084 = vmatprep.subr.bf16.mxu0 %v10270_v40  ;;  %v10672_v46 = vld [vmem:[#allocation137_spill] sm:$0xff]  ;;  %v10673_v40 = vld [vmem:[#allocation138_spill] sm:$0xff] }
 0xb21   :  { %7022 = vmatpush1.bf16.msra.mxu1 %v10271_v41  ;;  %7086 = vmatpush1.bf16.msra.mxu0 %v10272_v54  ;;  %v10674_v41 = vld [vmem:[#allocation139_spill] sm:$0xff]  ;;  %v10675_v54 = vld [vmem:[#allocation140_spill] sm:$0xff] }
 0xb22   :  { %7024 = vmatprep.subr.bf16.mxu1 %v10273_v61  ;;  %7088 = vmatprep.subr.bf16.mxu0 %v10274_v55  ;;  %v3920_v61 = vld [vmem:[#allocation7 + $0x8] sm:$0xff] }
 0xb23   :  { %v3924_v55 = vld [vmem:[#allocation7 + $0x28] sm:$0xff] }
 0xb25   :  { %7026 = vmatpush1.bf16.msra.mxu1 %v10275_v62  ;;  %7090 = vmatpush1.bf16.msra.mxu0 %v10276_v26  ;;  %v3922_v62 = vld [vmem:[#allocation7 + $0x18] sm:$0xff]  ;;  %v7131_v26 = vpack.c.bf16 %v3924_v55, %v3920_v61  ;;  %v3951_v61 = vld [vmem:[#allocation7 + $0x100] sm:$0xff] }
 0xb26   :  { %7028 = vmatprep.subr.bf16.mxu1 %v10277_v2  ;;  %7092 = vmatprep.subr.bf16.mxu0 %v10278_v24  ;;  %v3926_v2 = vld [vmem:[#allocation7 + $0x38] sm:$0xff]  ;;  %v3919_v24 = vld [vmem:[#allocation7] sm:$0xff] }
 0xb27   :  { %v3955_v55 = vld [vmem:[#allocation7 + $0x120] sm:$0xff] }
 0xb29   :  { %7030 = vmatpush1.bf16.msra.mxu1 %v10279_v48  ;;  %7094 = vmatpush1.bf16.msra.mxu0 %v10280_v39  ;;  %v3923_v48 = vld [vmem:[#allocation7 + $0x20] sm:$0xff]  ;;  %v7195_v39 = vpack.c.bf16 %v3926_v2, %v3922_v62  ;;  %v3953_v2 = vld [vmem:[#allocation7 + $0x110] sm:$0xff] }
 0xb2a   :  { %7032 = vmatprep.subr.bf16.mxu1 %v10281_v45  ;;  %7096 = vmatprep.subr.bf16.mxu0 %v10282_v27  ;;  %v7133_v45 = vpack.c.bf16 %v3923_v48, %v3919_v24  ;;  %v3921_v27 = vld [vmem:[#allocation7 + $0x10] sm:$0xff] }
 0xb2b   :  { %v7197_v13 = vpack.c.bf16 %v3925_v11, %v3921_v27  ;;  %v3957_v24 = vld [vmem:[#allocation7 + $0x130] sm:$0xff]  ;;  %v3962_v27 = vld [vmem:[#allocation7 + $0x158] sm:$0xff] }
 0xb2c   :  { %v7213_v48 = vpack.c.bf16 %v3957_v24, %v3953_v2  ;;  %v7215_v37 = vpack.c.bf16 %v3966_v43, %v3962_v27  ;;  %v3994_v2 = vld [vmem:[#allocation7 + $0x258] sm:$0xff]  ;;  %v3993_v43 = vld [vmem:[#allocation7 + $0x250] sm:$0xff] }
 0xb2d   :  { %7034 = vmatpush1.bf16.msra.mxu1 %v10194_v29  ;;  %7098 = vmatpush1.bf16.msra.mxu0 %v10195_v3  ;;  %v10664_v29 = vld [vmem:[#allocation129_spill] sm:$0xff]  ;;  %v10665_v3 = vld [vmem:[#allocation130_spill] sm:$0xff] }
 0xb2e   :  { %7036 = vmatprep.subr.bf16.mxu1 %v10196_v16  ;;  %7100 = vmatprep.subr.bf16.mxu0 %v10197_v32  ;;  %v10666_v16 = vld [vmem:[#allocation131_spill] sm:$0xff]  ;;  %v10667_v32 = vld [vmem:[#allocation132_spill] sm:$0xff] }
 0xb31   :  { %7038 = vmatpush1.bf16.msra.mxu1 %v10198_v8  ;;  %7102 = vmatpush1.bf16.msra.mxu0 %v10199_v33  ;;  %v10668_v8 = vld [vmem:[#allocation133_spill] sm:$0xff]  ;;  %v10669_v33 = vld [vmem:[#allocation134_spill] sm:$0xff] }
 0xb32   :  { %7040 = vmatprep.subr.bf16.mxu1 %v10200_v60  ;;  %7104 = vmatprep.subr.bf16.mxu0 %v10201_v35  ;;  %v10662_v60 = vld [vmem:[#allocation127_spill] sm:$0xff]  ;;  %v10663_v35 = vld [vmem:[#allocation128_spill] sm:$0xff] }
 0xb35   :  { %7042 = vmatpush1.bf16.msra.mxu1 %v10650_v63  ;;  %7106 = vmatpush1.bf16.msra.mxu0 %v10651_v52  ;;  %v3938_v63 = vld [vmem:[#allocation7 + $0x98] sm:$0xff] }
 0xb36   :  { %7044 = vmatprep.subr.bf16.mxu1 %v10652_v53  ;;  %7108 = vmatprep.subr.bf16.mxu0 %v10653_v31  ;;  %v3942_v52 = vld [vmem:[#allocation7 + $0xb8] sm:$0xff]  ;;  %v3935_v53 = vld [vmem:[#allocation7 + $0x80] sm:$0xff] }
 0xb37   :  { %v7203_v31 = vpack.c.bf16 %v3942_v52, %v3938_v63  ;;  %v3969_v52 = vld [vmem:[#allocation7 + $0x190] sm:$0xff] }
 0xb39   :  { %7046 = vmatpush1.bf16.msra.mxu1 %v10654_v0  ;;  %7110 = vmatpush1.bf16.msra.mxu0 %v10655_v51  ;;  %v3939_v0 = vld [vmem:[#allocation7 + $0xa0] sm:$0xff]  ;;  %v3937_v51 = vld [vmem:[#allocation7 + $0x90] sm:$0xff] }
 0xb3a   :  { %7048 = vmatprep.subr.bf16.mxu1 %v10656_v38  ;;  %7112 = vmatprep.subr.bf16.mxu0 %v10657_v23  ;;  %v3941_v38 = vld [vmem:[#allocation7 + $0xb0] sm:$0xff]  ;;  %v7141_v23 = vpack.c.bf16 %v3939_v0, %v3935_v53  ;;  %v3976_v0 = vld [vmem:[#allocation7 + $0x1c8] sm:$0xff] }
 0xb3b   :  { %v3973_v53 = vld [vmem:[#allocation7 + $0x1b0] sm:$0xff] }
 0xb3d   :  { %7050 = vmatpush1.bf16.msra.mxu1 %v10658_v44  ;;  %7114 = vmatpush1.bf16.msra.mxu0 %v10659_v47  ;;  %v7205_v44 = vpack.c.bf16 %v3941_v38, %v3937_v51  ;;  %v3944_v47 = vld [vmem:[#allocation7 + $0xc8] sm:$0xff]  ;;  %v3978_v38 = vld [vmem:[#allocation7 + $0x1d8] sm:$0xff] }
 0xb3e   :  { %7052 = vmatprep.subr.bf16.mxu1 %v10660_v56  ;;  %7116 = vmatprep.subr.bf16.mxu0 %v10661_v58  ;;  %v3948_v56 = vld [vmem:[#allocation7 + $0xe8] sm:$0xff]  ;;  %v3946_v58 = vld [vmem:[#allocation7 + $0xd8] sm:$0xff] }
 0xb3f   :  { %v3980_v51 = vld [vmem:[#allocation7 + $0x1e8] sm:$0xff] }
 0xb41   :  { %7054 = vmatpush1.bf16.msra.mxu1 %v10662_v60  ;;  %7118 = vmatpush1.bf16.msra.mxu0 %v10663_v35  ;;  %v7143_v60 = vpack.c.bf16 %v3948_v56, %v3944_v47  ;;  %v3950_v35 = vld [vmem:[#allocation7 + $0xf8] sm:$0xff]  ;;  %v3975_v47 = vld [vmem:[#allocation7 + $0x1c0] sm:$0xff] }
 0xb42   :  { %7056 = vmatprep.subr.bf16.mxu1 %v10664_v29  ;;  %7120 = vmatprep.subr.bf16.mxu0 %v10665_v3  ;;  %v7207_v29 = vpack.c.bf16 %v3950_v35, %v3946_v58  ;;  %v3943_v3 = vld [vmem:[#allocation7 + $0xc0] sm:$0xff]  ;;  %v3977_v35 = vld [vmem:[#allocation7 + $0x1d0] sm:$0xff] }
 0xb43   :  { %v3979_v56 = vld [vmem:[#allocation7 + $0x1e0] sm:$0xff] }
 0xb45   :  { %7058 = vmatpush1.bf16.msra.mxu1 %v10666_v16  ;;  %7122 = vmatpush1.bf16.msra.mxu0 %v10667_v32  ;;  %v3947_v16 = vld [vmem:[#allocation7 + $0xe0] sm:$0xff]  ;;  %v3945_v32 = vld [vmem:[#allocation7 + $0xd0] sm:$0xff] }
 0xb46   :  { %7060 = vmatprep.subr.bf16.mxu1 %v10668_v8  ;;  %7124 = vmatprep.subr.bf16.mxu0 %v10669_v33  ;;  %v7145_v8 = vpack.c.bf16 %v3947_v16, %v3943_v3  ;;  %v3949_v33 = vld [vmem:[#allocation7 + $0xf0] sm:$0xff]  ;;  %v3984_v16 = vld [vmem:[#allocation7 + $0x208] sm:$0xff] }
 0xb49   :  { %7062 = vmatpush1.bf16.msra.mxu1 %v10670_v7  ;;  %7126 = vmatpush1.bf16.msra.mxu0 %v10671_v1  ;;  %v7209_v7 = vpack.c.bf16 %v3949_v33, %v3945_v32  ;;  %v3952_v1 = vld [vmem:[#allocation7 + $0x108] sm:$0xff] }
 0xb4a   :  { %7064 = vmatprep.subr.bf16.mxu1 %v10672_v46  ;;  %7128 = vmatprep.subr.bf16.mxu0 %v10673_v40  ;;  %v3956_v46 = vld [vmem:[#allocation7 + $0x128] sm:$0xff]  ;;  %v3954_v40 = vld [vmem:[#allocation7 + $0x118] sm:$0xff] }
 0xb4b   :  { %v3988_v32 = vld [vmem:[#allocation7 + $0x228] sm:$0xff] }
 0xb4c   :  { %v7163_v33 = vpack.c.bf16 %v3988_v32, %v3984_v16  ;;  %v4015_v32 = vld [vmem:[#allocation7 + $0x300] sm:$0xff] }
 0xb4d   :  { %7066 = vmatpush1.bf16.msra.mxu1 %v10674_v41  ;;  %7130 = vmatpush1.bf16.msra.mxu0 %v10675_v54  ;;  %v7147_v41 = vpack.c.bf16 %v3956_v46, %v3952_v1  ;;  %v3958_v54 = vld [vmem:[#allocation7 + $0x138] sm:$0xff]  ;;  %v3983_v1 = vld [vmem:[#allocation7 + $0x200] sm:$0xff] }
 0xb4e   :  { %7132 = vmatprep.subr.bf16.mxu1 %v7131_v26  ;;  %7196 = vmatprep.subr.bf16.mxu0 %v7195_v39  ;;  %v7211_v62 = vpack.c.bf16 %v3958_v54, %v3954_v40  ;;  %v7149_v26 = vpack.c.bf16 %v3955_v55, %v3951_v61  ;;  %v3960_v39 = vld [vmem:[#allocation7 + $0x148] sm:$0xff]  ;;  %v3987_v46 = vld [vmem:[#allocation7 + $0x220] sm:$0xff]  ;;  %v3985_v54 = vld [vmem:[#allocation7 + $0x210] sm:$0xff] }
 0xb4f   :  { %v3989_v61 = vld [vmem:[#allocation7 + $0x230] sm:$0xff] }
 0xb50   :  { %3757 = vmatmul.mubr.f32.vlgmr.msra.gmra.mrb[38].mxu1 %v9470_v12  ;;  %3828 = vmatmul.mubr.f32.vlgmr.msra.gmra.mrb[40].mxu0 %v9470_v12  ;;  %v7229_v55 = vpack.c.bf16 %v3989_v61, %v3985_v54  ;;  %v4026_v61 = vld [vmem:[#allocation7 + $0x358] sm:$0xff] }
 0xb51   :  { %7134 = vmatpush1.bf16.msra.mxu1 %v7133_v45  ;;  %7198 = vmatpush1.bf16.msra.mxu0 %v7197_v13  ;;  %v3964_v45 = vld [vmem:[#allocation7 + $0x168] sm:$0xff]  ;;  %v3959_v13 = vld [vmem:[#allocation7 + $0x140] sm:$0xff] }
 0xb52   :  { %7136 = vmatprep.subr.bf16.mxu1 %v7135_v59  ;;  %7200 = vmatprep.subr.bf16.mxu0 %v7199_v25  ;;  %v7151_v11 = vpack.c.bf16 %v3964_v45, %v3960_v39  ;;  %v7153_v9 = vpack.c.bf16 %v3963_v19, %v3959_v13  ;;  %v3961_v59 = vld [vmem:[#allocation7 + $0x150] sm:$0xff]  ;;  %v3991_v39 = vld [vmem:[#allocation7 + $0x240] sm:$0xff] }
 0xb53   :  { %v3965_v25 = vld [vmem:[#allocation7 + $0x170] sm:$0xff]  ;;  %v3995_v45 = vld [vmem:[#allocation7 + $0x260] sm:$0xff] }
 0xb54   :  { %v7217_v57 = vpack.c.bf16 %v3965_v25, %v3961_v59  ;;  %v3997_v13 = vld [vmem:[#allocation7 + $0x270] sm:$0xff]  ;;  %v4002_v59 = vld [vmem:[#allocation7 + $0x298] sm:$0xff] }
 0xb55   :  { %7138 = vmatpush1.bf16.msra.mxu1 %v7137_v15  ;;  %7202 = vmatpush1.bf16.msra.mxu0 %v7201_v36  ;;  %v3970_v15 = vld [vmem:[#allocation7 + $0x198] sm:$0xff]  ;;  %v3971_v36 = vld [vmem:[#allocation7 + $0x1a0] sm:$0xff]  ;;  %v7233_v19 = vpack.c.bf16 %v3997_v13, %v3993_v43 }
 0xb56   :  { %7140 = vmatprep.subr.bf16.mxu1 %v7139_v34  ;;  %7204 = vmatprep.subr.bf16.mxu0 %v7203_v31  ;;  %v7219_v34 = vpack.c.bf16 %v3974_v10, %v3970_v15  ;;  %v7157_v63 = vpack.c.bf16 %v3971_v36, %v3967_v22  ;;  %v7221_v31 = vpack.c.bf16 %v3973_v53, %v3969_v52  ;;  %v4001_v10 = vld [vmem:[#allocation7 + $0x290] sm:$0xff]  ;;  %v4010_v52 = vld [vmem:[#allocation7 + $0x2d8] sm:$0xff] }
 0xb57   :  { %v4005_v22 = vld [vmem:[#allocation7 + $0x2b0] sm:$0xff] }
 0xb58   :  { %v7237_v36 = vpack.c.bf16 %v4005_v22, %v4001_v10 }
 0xb59   :  { %7142 = vmatpush1.bf16.msra.mxu1 %v7141_v23  ;;  %7206 = vmatpush1.bf16.msra.mxu0 %v7205_v44  ;;  %v7159_v23 = vpack.c.bf16 %v3980_v51, %v3976_v0  ;;  %v3982_v44 = vld [vmem:[#allocation7 + $0x1f8] sm:$0xff]  ;;  %v4007_v0 = vld [vmem:[#allocation7 + $0x2c0] sm:$0xff] }
 0xb5a   :  { %7144 = vmatprep.subr.bf16.mxu1 %v7143_v60  ;;  %7208 = vmatprep.subr.bf16.mxu0 %v7207_v29  ;;  %v7223_v58 = vpack.c.bf16 %v3982_v44, %v3978_v38  ;;  %v7161_v60 = vpack.c.bf16 %v3979_v56, %v3975_v47  ;;  %v3981_v29 = vld [vmem:[#allocation7 + $0x1f0] sm:$0xff]  ;;  %v4011_v51 = vld [vmem:[#allocation7 + $0x2e0] sm:$0xff]  ;;  %v4016_v56 = vld [vmem:[#allocation7 + $0x308] sm:$0xff] }
 0xb5b   :  { %v7225_v3 = vpack.c.bf16 %v3981_v29, %v3977_v35  ;;  %v4009_v44 = vld [vmem:[#allocation7 + $0x2d0] sm:$0xff]  ;;  %v4018_v35 = vld [vmem:[#allocation7 + $0x318] sm:$0xff] }
 0xb5c   :  { %v4013_v47 = vld [vmem:[#allocation7 + $0x2f0] sm:$0xff]  ;;  %v4022_v29 = vld [vmem:[#allocation7 + $0x338] sm:$0xff] }
 0xb5d   :  { %7146 = vmatpush1.bf16.msra.mxu1 %v7145_v8  ;;  %7210 = vmatpush1.bf16.msra.mxu0 %v7209_v7  ;;  %v3986_v8 = vld [vmem:[#allocation7 + $0x218] sm:$0xff]  ;;  %v7243_v16 = vpack.c.bf16 %v4022_v29, %v4018_v35 }
 0xb5e   :  { %7148 = vmatprep.subr.bf16.mxu1 %v7147_v41  ;;  %7212 = vmatprep.subr.bf16.mxu0 %v7211_v62  ;;  %v3990_v7 = vld [vmem:[#allocation7 + $0x238] sm:$0xff]  ;;  %v7165_v41 = vpack.c.bf16 %v3987_v46, %v3983_v1  ;;  %v3992_v62 = vld [vmem:[#allocation7 + $0x248] sm:$0xff]  ;;  %v4021_v1 = vld [vmem:[#allocation7 + $0x330] sm:$0xff] }
 0xb5f   :  { %v7227_v40 = vpack.c.bf16 %v3990_v7, %v3986_v8  ;;  %v4019_v8 = vld [vmem:[#allocation7 + $0x320] sm:$0xff]  ;;  %v4024_v46 = vld [vmem:[#allocation7 + $0x348] sm:$0xff] }
 0xb60   :  { %v7181_v7 = vpack.c.bf16 %v4019_v8, %v4015_v32 }
 0xb61   :  { %7150 = vmatpush1.bf16.msra.mxu1 %v7149_v26  ;;  %7214 = vmatpush1.bf16.msra.mxu0 %v7213_v48  ;;  %v3996_v26 = vld [vmem:[#allocation7 + $0x268] sm:$0xff]  ;;  %v3998_v48 = vld [vmem:[#allocation7 + $0x278] sm:$0xff] }
 0xb62   :  { %7152 = vmatprep.subr.bf16.mxu1 %v7151_v11  ;;  %7216 = vmatprep.subr.bf16.mxu0 %v7215_v37  ;;  %v7167_v24 = vpack.c.bf16 %v3996_v26, %v3992_v62  ;;  %v7231_v27 = vpack.c.bf16 %v3998_v48, %v3994_v2  ;;  %v7169_v11 = vpack.c.bf16 %v3995_v45, %v3991_v39  ;;  %v4000_v37 = vld [vmem:[#allocation7 + $0x288] sm:$0xff]  ;;  %v4023_v62 = vld [vmem:[#allocation7 + $0x340] sm:$0xff]  ;;  %v4029_v48 = vld [vmem:[#allocation7 + $0x370] sm:$0xff] }
 0xb63   :  { %v4027_v2 = vld [vmem:[#allocation7 + $0x360] sm:$0xff]  ;;  %v4032_v45 = vld [vmem:[#allocation7 + $0x388] sm:$0xff] }
 0xb64   :  { %v7185_v39 = vpack.c.bf16 %v4027_v2, %v4023_v62  ;;  %v4261_v62 = vld [vmem:[#allocation9 + $0x190] sm:$0xff] }
 0xb65   :  { %7154 = vmatpush1.bf16.msra.mxu1 %v7153_v9  ;;  %7218 = vmatpush1.bf16.msra.mxu0 %v7217_v57  ;;  %v4004_v9 = vld [vmem:[#allocation7 + $0x2a8] sm:$0xff]  ;;  %v4006_v57 = vld [vmem:[#allocation7 + $0x2b8] sm:$0xff] }
 0xb66   :  { %7156 = vmatprep.subr.bf16.mxu1 %v7155_v28  ;;  %7220 = vmatprep.subr.bf16.mxu0 %v7219_v34  ;;  %v7171_v25 = vpack.c.bf16 %v4004_v9, %v4000_v37  ;;  %v7235_v15 = vpack.c.bf16 %v4006_v57, %v4002_v59  ;;  %v7173_v28 = vpack.c.bf16 %v4003_v50, %v3999_v20  ;;  %v4008_v34 = vld [vmem:[#allocation7 + $0x2c8] sm:$0xff]  ;;  %v4031_v37 = vld [vmem:[#allocation7 + $0x380] sm:$0xff]  ;;  %v4037_v57 = vld [vmem:[#allocation7 + $0x3b0] sm:$0xff] }
 0xb67   :  { %v4035_v9 = vld [vmem:[#allocation7 + $0x3a0] sm:$0xff]  ;;  %v4040_v20 = vld [vmem:[#allocation7 + $0x3c8] sm:$0xff] }
 0xb68   :  { %v4044_v50 = vld [vmem:[#allocation7 + $0x3e8] sm:$0xff]  ;;  %v7189_v10 = vpack.c.bf16 %v4035_v9, %v4031_v37 }
 0xb69   :  { %7158 = vmatpush1.bf16.msra.mxu1 %v7157_v63  ;;  %7222 = vmatpush1.bf16.msra.mxu0 %v7221_v31  ;;  %v4012_v63 = vld [vmem:[#allocation7 + $0x2e8] sm:$0xff]  ;;  %v4014_v31 = vld [vmem:[#allocation7 + $0x2f8] sm:$0xff] }
 0xb6a   :  { %7160 = vmatprep.subr.bf16.mxu1 %v7159_v23  ;;  %7224 = vmatprep.subr.bf16.mxu0 %v7223_v58  ;;  %v7175_v53 = vpack.c.bf16 %v4012_v63, %v4008_v34  ;;  %v7239_v38 = vpack.c.bf16 %v4014_v31, %v4010_v52  ;;  %v7177_v23 = vpack.c.bf16 %v4011_v51, %v4007_v0  ;;  %v4039_v34 = vld [vmem:[#allocation7 + $0x3c0] sm:$0xff]  ;;  %v4045_v31 = vld [vmem:[#allocation7 + $0x3f0] sm:$0xff] }
 0xb6b   :  { %v7241_v58 = vpack.c.bf16 %v4013_v47, %v4009_v44  ;;  %v4043_v63 = vld [vmem:[#allocation7 + $0x3e0] sm:$0xff] }
 0xb6c   :  { %v7193_v0 = vpack.c.bf16 %v4043_v63, %v4039_v34 }
 0xb6d   :  { %7162 = vmatpush1.bf16.msra.mxu1 %v7161_v60  ;;  %7226 = vmatpush1.bf16.msra.mxu0 %v7225_v3  ;;  %v4020_v60 = vld [vmem:[#allocation7 + $0x328] sm:$0xff] }
 0xb6e   :  { %7164 = vmatprep.subr.bf16.mxu1 %v7163_v33  ;;  %7228 = vmatprep.subr.bf16.mxu0 %v7227_v40  ;;  %v7179_v3 = vpack.c.bf16 %v4020_v60, %v4016_v56  ;;  %v4017_v33 = vld [vmem:[#allocation7 + $0x310] sm:$0xff]  ;;  %v4028_v40 = vld [vmem:[#allocation7 + $0x368] sm:$0xff] }
 0xb6f   :  { %v7183_v54 = vpack.c.bf16 %v4028_v40, %v4024_v46  ;;  %v10676_v40 = vld [vmem:[#allocation146_spill] sm:$0xff] }
 0xb71   :  { %7166 = vmatpush1.bf16.msra.mxu1 %v7165_v41  ;;  %7230 = vmatpush1.bf16.msra.mxu0 %v7229_v55  ;;  %v7245_v41 = vpack.c.bf16 %v4021_v1, %v4017_v33  ;;  %v4030_v55 = vld [vmem:[#allocation7 + $0x378] sm:$0xff] }
 0xb72   :  { %7168 = vmatprep.subr.bf16.mxu1 %v7167_v24  ;;  %7232 = vmatprep.subr.bf16.mxu0 %v7231_v27  ;;  %v7247_v26 = vpack.c.bf16 %v4030_v55, %v4026_v61  ;;  %v4025_v24 = vld [vmem:[#allocation7 + $0x350] sm:$0xff]  ;;  %v4036_v27 = vld [vmem:[#allocation7 + $0x3a8] sm:$0xff] }
 0xb73   :  { %v7249_v43 = vpack.c.bf16 %v4029_v48, %v4025_v24  ;;  %v7187_v13 = vpack.c.bf16 %v4036_v27, %v4032_v45 }
 0xb75   :  { %7170 = vmatpush1.bf16.msra.mxu1 %v7169_v11  ;;  %7234 = vmatpush1.bf16.msra.mxu0 %v7233_v19  ;;  %v4034_v11 = vld [vmem:[#allocation7 + $0x398] sm:$0xff] }
 0xb76   :  { %7172 = vmatprep.subr.bf16.mxu1 %v7171_v25  ;;  %7236 = vmatprep.subr.bf16.mxu0 %v7235_v15  ;;  %v4038_v19 = vld [vmem:[#allocation7 + $0x3b8] sm:$0xff]  ;;  %v4033_v25 = vld [vmem:[#allocation7 + $0x390] sm:$0xff] }
 0xb77   :  { %v7251_v59 = vpack.c.bf16 %v4038_v19, %v4034_v11  ;;  %v4042_v15 = vld [vmem:[#allocation7 + $0x3d8] sm:$0xff]  ;;  %v7253_v22 = vpack.c.bf16 %v4037_v57, %v4033_v25 }
 0xb79   :  { %7174 = vmatpush1.bf16.msra.mxu1 %v7173_v28  ;;  %7238 = vmatpush1.bf16.msra.mxu0 %v7237_v36  ;;  %v4046_v28 = vld [vmem:[#allocation7 + $0x3f8] sm:$0xff]  ;;  %v7191_v36 = vpack.c.bf16 %v4044_v50, %v4040_v20 }
 0xb7a   :  { %7176 = vmatprep.subr.bf16.mxu1 %v7175_v53  ;;  %7240 = vmatprep.subr.bf16.mxu0 %v7239_v38  ;;  %v7255_v52 = vpack.c.bf16 %v4046_v28, %v4042_v15  ;;  %v4041_v53 = vld [vmem:[#allocation7 + $0x3d0] sm:$0xff]  ;;  %v4212_v38 = vld [vmem:[#allocation9 + $0x8] sm:$0xff] }
 0xb7b   :  { %v7257_v51 = vpack.c.bf16 %v4045_v31, %v4041_v53  ;;  %v3901_v31 = vrot.slane %v9467_v14, 2 }
 0xb7d   :  { %7178 = vmatpush1.bf16.msra.mxu1 %v7177_v23  ;;  %7242 = vmatpush1.bf16.msra.mxu0 %v7241_v58  ;;  %v4215_v23 = vld [vmem:[#allocation9 + $0x20] sm:$0xff] }
 0xb7e   :  { %7180 = vmatprep.subr.bf16.mxu1 %v7179_v3  ;;  %7244 = vmatprep.subr.bf16.mxu0 %v7243_v16  ;;  %v7259_v44 = vpack.c.bf16 %v4215_v23, %v4212_v38 }
 0xb81   :  { %7182 = vmatpush1.bf16.msra.mxu1 %v7181_v7  ;;  %7246 = vmatpush1.bf16.msra.mxu0 %v7245_v41 }
 0xb82   :  { %7184 = vmatprep.subr.bf16.mxu1 %v7183_v54  ;;  %7248 = vmatprep.subr.bf16.mxu0 %v7247_v26  ;;  %v4264_v26 = vld [vmem:[#allocation9 + $0x1a8] sm:$0xff] }
 0xb85   :  { %7186 = vmatpush1.bf16.msra.mxu1 %v7185_v39  ;;  %7250 = vmatpush1.bf16.msra.mxu0 %v7249_v43 }
 0xb86   :  { %7188 = vmatprep.subr.bf16.mxu1 %v7187_v13  ;;  %7252 = vmatprep.subr.bf16.mxu0 %v7251_v59 }
 0xb89   :  { %7190 = vmatpush1.bf16.msra.mxu1 %v7189_v10  ;;  %7254 = vmatpush1.bf16.msra.mxu0 %v7253_v22 }
 0xb8a   :  { %7192 = vmatprep.subr.bf16.mxu1 %v7191_v36  ;;  %7256 = vmatprep.subr.bf16.mxu0 %v7255_v52 }
 0xb8d   :  { %7194 = vmatpush1.bf16.msra.mxu1 %v7193_v0  ;;  %7258 = vmatpush1.bf16.msra.mxu0 %v7257_v51 }
 0xb8e   :  { %7260 = vmatprep.subr.bf16.mxu1 %v7259_v44  ;;  %v10678_v44 = vld [vmem:[#allocation79_spill] sm:$0xff] }
 0xbe3   :  { %v3616_v47 = vpop.f32.mrb[36].mxu1  ;;  %v3687_v56 = vpop.f32.mrb[38].mxu0 }
 0xbe4   :  { %v3838_v58 = vrot.slane %v3616_v47, 2  ;;  %v3618_v60 = vpop.f32.mrb[37].mxu1  ;;  %v3689_v35 = vpop.f32.mrb[39].mxu0  ;;  %v3840_v1 = vrot.slane %v3687_v56, 2  ;;  %v10679_v56 = vld [vmem:[#allocation80_spill] sm:$0xff] }
 0xbe5   :  { %v3839_v29 = vrot.slane %v3618_v60, 2  ;;  %v3841_v33 = vrot.slane %v3689_v35, 2  ;;  %v10680_v60 = vld [vmem:[#allocation81_spill] sm:$0xff] }
 0xbe6   :  { %v3846_v3 = vadd.f32 %v3838_v58, %v10551_v5  ;;  %v3848_v41 = vadd.f32 %v3840_v1, %v10676_v40  ;;  %v4214_v40 = vld [vmem:[#allocation9 + $0x18] sm:$0xff] }
 0xbe7   :  { %v3847_v16 = vadd.f32 %v3839_v29, %v10552_v30  ;;  %v3849_v7 = vadd.f32 %v3841_v33, %v10648_v42  ;;  %v7387_v30 = vpack.c.bf16 %v4264_v26, %v4261_v62  ;;  %v3874_v42 = vrot.slane %v9459_v18, 6  ;;  %v10681_v29 = vld [vmem:[#allocation83_spill] sm:$0xff] }
 0xbe8   :  { %v4792_v32 = vmul.f32 -1.442695, %v3846_v3  ;;  %v4221_v26 = vld [vmem:[#allocation9 + $0x50] sm:$0xff] }
 0xbe9   :  { %v4793_v8 = vmul.f32 -1.442695, %v3847_v16  ;;  %v4794_v46 = vmul.f32 -1.442695, %v3849_v7  ;;  %7388 = vmatprep.subr.bf16.mxu0 %v7387_v30  ;;  %v10682_v16 = vld [vmem:[#allocation84_spill] sm:$0xff] }
 0xbea   :  { %7696 = vpow2.f32 %v4792_v32  ;;  %v4270_v30 = vld [vmem:[#allocation9 + $0x1d8] sm:$0xff] }
 0xbeb   :  { %7698 = vpow2.f32 %v4793_v8 }
 0xbec   :  { %7700 = vpow2.f32 %v4794_v46  ;;  %v4211_v46 = vld [vmem:[#allocation9] sm:$0xff] }
 0xbed   :  { %7702 = vtanh.f32 %v3848_v41 }
 0xbf4   :  { %v7697_v54 = vpop.eup %7696 }
 0xbf5   :  { %v7699_v61 = vpop.eup %7698  ;;  %v3857_v55 = vadd.f32 1.0, %v7697_v54  ;;  %v4218_v54 = vld [vmem:[#allocation9 + $0x38] sm:$0xff] }
 0xbf6   :  { %v3863_v5 = vadd.f32 1.0, %v7699_v61  ;;  %v7701_v2 = vpop.eup %7700  ;;  %v4213_v61 = vld [vmem:[#allocation9 + $0x10] sm:$0xff] }
 0xbf7   :  { %7704 = vrcp.f32 %v3857_v55  ;;  %v7703_v24 = vpop.eup %7702  ;;  %v3870_v27 = vadd.f32 1.0, %v7701_v2  ;;  %v4216_v55 = vld [vmem:[#allocation9 + $0x28] sm:$0xff] }
 0xbf8   :  { %7706 = vrcp.f32 %v3863_v5  ;;  %v4267_v5 = vld [vmem:[#allocation9 + $0x1c0] sm:$0xff] }
 0xbf9   :  { %7708 = vrcp.f32 %v3870_v27  ;;  %v7263_v27 = vpack.c.bf16 %v4221_v26, %v4218_v54  ;;  %v4243_v54 = vld [vmem:[#allocation9 + $0x100] sm:$0xff]  ;;  %v4300_v26 = vld [vmem:[#allocation9 + $0x2c8] sm:$0xff] }
 0xc01   :  { %v7705_v48 = vpop.eup %7704 }
 0xc02   :  { %v7707_v39 = vpop.eup %7706  ;;  %v3877_v45 = vmul.f32 %v7705_v48, %v7703_v24  ;;  %v7261_v24 = vpack.c.bf16 %v4214_v40, %v4211_v46  ;;  %v4217_v48 = vld [vmem:[#allocation9 + $0x30] sm:$0xff]  ;;  %v4248_v40 = vld [vmem:[#allocation9 + $0x128] sm:$0xff] }
 0xc03   :  { %v3876_v11 = vmul.f32 %v7707_v39, %v3874_v42  ;;  %v7709_v13 = vpop.eup %7708  ;;  %v4220_v42 = vld [vmem:[#allocation9 + $0x48] sm:$0xff]  ;;  %v7389_v39 = vpack.c.bf16 %v4216_v55, %v4213_v61  ;;  %v4246_v61 = vld [vmem:[#allocation9 + $0x118] sm:$0xff]  ;;  %v4251_v55 = vld [vmem:[#allocation9 + $0x140] sm:$0xff] }
 0xc05   :  { %v3878_v43 = vadd.f32 %v3877_v45, %v3876_v11  ;;  %v7391_v11 = vpack.c.bf16 %v4270_v30, %v4267_v5  ;;  %v4247_v30 = vld [vmem:[#allocation9 + $0x120] sm:$0xff] }
 0xc07   :  { %7710 = vtanh.f32 %v3878_v43  ;;  %v4219_v43 = vld [vmem:[#allocation9 + $0x40] sm:$0xff] }
 0xc11   :  { %v7711_v19 = vpop.eup %7710 }
 0xc12   :  { %v3880_v37 = vmul.f32 %v7711_v19, %v7709_v13  ;;  %v4222_v13 = vld [vmem:[#allocation9 + $0x58] sm:$0xff]  ;;  %v4227_v19 = vld [vmem:[#allocation9 + $0x80] sm:$0xff] }
 0xc14   :  { %v3911_v8 = vrot.slane %v3880_v37, 6  ;;  %v4273_v37 = vld [vmem:[#allocation9 + $0x1f0] sm:$0xff] }
 0xc23   :  { %v3758_v9 = vpop.f32.mrb[38].mxu1  ;;  %v3829_v59 = vpop.f32.mrb[40].mxu0 }
 0xc24   :  { %v3850_v25 = vadd.f32 %v3758_v9, %v10459_v4  ;;  %v3760_v57 = vpop.f32.mrb[39].mxu1  ;;  %v3831_v20 = vpop.f32.mrb[41].mxu0  ;;  %v3852_v22 = vadd.f32 %v3829_v59, %v10462_v49  ;;  %v10677_v49 = vld [vmem:[#allocation154_spill] sm:$0xff]  ;;  %v4223_v59 = vld [vmem:[#allocation9 + $0x60] sm:$0xff] }
 0xc25   :  { %v3851_v50 = vadd.f32 %v3760_v57, %v10460_v17  ;;  %v3853_v28 = vadd.f32 %v3831_v20, %v10461_v21  ;;  %v1681_v47 = vadd.f32 %v10678_v44, %v10677_v49  ;;  %v4276_v9 = vld [vmem:[#allocation9 + $0x208] sm:$0xff]  ;;  %v7393_v57 = vpack.c.bf16 %v4222_v13, %v4219_v43  ;;  %v4235_v44 = vld [vmem:[#allocation9 + $0xc0] sm:$0xff] }
 0xc26   :  { %v4795_v15 = vmul.f32 -1.442695, %v3850_v25  ;;  %v4226_v25 = vld [vmem:[#allocation9 + $0x78] sm:$0xff] }
 0xc27   :  { %v4796_v18 = vmul.f32 -1.442695, %v3851_v50  ;;  %v4797_v10 = vmul.f32 -1.442695, %v3853_v28  ;;  %v2060_v58 = vadd.f32 %v10679_v56, %v1681_v47  ;;  %v4230_v50 = vld [vmem:[#allocation9 + $0x98] sm:$0xff]  ;;  %v4228_v28 = vld [vmem:[#allocation9 + $0x88] sm:$0xff] }
 0xc28   :  { %7712 = vpow2.f32 %v4795_v15  ;;  %v7395_v15 = vpack.c.bf16 %v4276_v9, %v4273_v37  ;;  %v4238_v47 = vld [vmem:[#allocation9 + $0xd8] sm:$0xff]  ;;  %v4256_v37 = vld [vmem:[#allocation9 + $0x168] sm:$0xff] }
 0xc29   :  { %7714 = vpow2.f32 %v4796_v18  ;;  %v2427_v35 = vadd.f32 %v10680_v60, %v2060_v58  ;;  %v4225_v18 = vld [vmem:[#allocation9 + $0x70] sm:$0xff]  ;;  %v4242_v60 = vld [vmem:[#allocation9 + $0xf8] sm:$0xff]  ;;  %v4260_v9 = vld [vmem:[#allocation9 + $0x188] sm:$0xff] }
 0xc2a   :  { %7716 = vpow2.f32 %v4797_v10  ;;  %v4233_v10 = vld [vmem:[#allocation9 + $0xb0] sm:$0xff] }
 0xc2b   :  { %7718 = vtanh.f32 %v3852_v22  ;;  %v2790_v3 = vadd.f32 %v10681_v29, %v2427_v35  ;;  %v4279_v22 = vld [vmem:[#allocation9 + $0x220] sm:$0xff]  ;;  %v4237_v29 = vld [vmem:[#allocation9 + $0xd0] sm:$0xff] }
 0xc2d   :  { %v3169_v32 = vadd.f32 %v10682_v16, %v2790_v3  ;;  %v4240_v3 = vld [vmem:[#allocation9 + $0xe8] sm:$0xff]  ;;  %v4245_v16 = vld [vmem:[#allocation9 + $0x110] sm:$0xff] }
 0xc2e   :  { %v7279_v46 = vpack.c.bf16 %v4245_v16, %v4242_v60  ;;  %v4290_v60 = vld [vmem:[#allocation9 + $0x278] sm:$0xff]  ;;  %v4289_v16 = vld [vmem:[#allocation9 + $0x270] sm:$0xff] }
 0xc2f   :  { %v3548_v7 = vadd.f32 %v9470_v12, %v3169_v32  ;;  %v4224_v12 = vld [vmem:[#allocation9 + $0x68] sm:$0xff]  ;;  %v4291_v32 = vld [vmem:[#allocation9 + $0x280] sm:$0xff] }
 0xc30   :  { %v7267_v20 = vpack.c.bf16 %v4227_v19, %v4224_v12  ;;  %v4257_v12 = vld [vmem:[#allocation9 + $0x170] sm:$0xff] }
 0xc31   :  { %v3915_v41 = vadd.f32 %v3911_v8, %v3548_v7  ;;  %v4294_v8 = vld [vmem:[#allocation9 + $0x298] sm:$0xff]  ;;  %v4244_v7 = vld [vmem:[#allocation9 + $0x108] sm:$0xff]  ;;  %v4253_v19 = vld [vmem:[#allocation9 + $0x150] sm:$0xff] }
 0xc32   :  { %v7713_v36 = vpop.eup %7712 }
 0xc33   :  { %v7715_v34 = vpop.eup %7714  ;;  %v3884_v63 = vadd.f32 1.0, %v7713_v36  ;;  %v3917_v45 = vmul.f32 0.125, %v3915_v41  ;;  %v4282_v36 = vld [vmem:[#allocation9 + $0x238] sm:$0xff]  ;;  %v7407_v41 = vpack.c.bf16 %v4294_v8, %v4291_v32  ;;  %v4292_v32 = vld [vmem:[#allocation9 + $0x288] sm:$0xff] }
 0xc34   :  { %v3890_v52 = vadd.f32 1.0, %v7715_v34  ;;  %v7717_v4 = vpop.eup %7716  ;;  %v7269_v34 = vpack.c.bf16 %v4226_v25, %v4223_v59  ;;  %v7289_v59 = vpack.c.bf16 %v4256_v37, %v4253_v19  ;;  %v4296_v8 = vld [vmem:[#allocation9 + $0x2a8] sm:$0xff]  ;;  %v10683_v19 = vld [vmem:[#allocation144_spill] sm:$0xff] }
 0xc35   :  { %7720 = vrcp.f32 %v3884_v63  ;;  %v7719_v53 = vpop.eup %7718  ;;  %v3897_v38 = vadd.f32 1.0, %v7717_v4  ;;  %v4229_v63 = vld [vmem:[#allocation9 + $0x90] sm:$0xff]  ;;  %v7397_v4 = vpack.c.bf16 %v4228_v28, %v4225_v18 }
 0xc36   :  { %7722 = vrcp.f32 %v3890_v52  ;;  %v4232_v52 = vld [vmem:[#allocation9 + $0xa8] sm:$0xff] }
 0xc37   :  { %7724 = vrcp.f32 %v3897_v38  ;;  %v4239_v38 = vld [vmem:[#allocation9 + $0xe0] sm:$0xff]  ;;  %v7273_v49 = vpack.c.bf16 %v4232_v52, %v4229_v63 }
 0xc3f   :  { %v7721_v17 = vpop.eup %7720 }
 0xc40   :  { %v7723_v0 = vpop.eup %7722  ;;  %v3904_v51 = vmul.f32 %v7721_v17, %v7719_v53  ;;  %v7271_v53 = vpack.c.bf16 %v4233_v10, %v4230_v50  ;;  %v4236_v17 = vld [vmem:[#allocation9 + $0xc8] sm:$0xff]  ;;  %v4266_v50 = vld [vmem:[#allocation9 + $0x1b8] sm:$0xff]  ;;  %v4265_v10 = vld [vmem:[#allocation9 + $0x1b0] sm:$0xff] }
 0xc41   :  { %v3903_v21 = vmul.f32 %v7723_v0, %v3901_v31  ;;  %v7725_v14 = vpop.eup %7724  ;;  %v7399_v31 = vpack.c.bf16 %v4282_v36, %v4279_v22  ;;  %v4231_v0 = vld [vmem:[#allocation9 + $0xa0] sm:$0xff]  ;;  %v7275_v58 = vpack.c.bf16 %v4239_v38, %v4236_v17  ;;  %v4268_v22 = vld [vmem:[#allocation9 + $0x1c8] sm:$0xff]  ;;  %v4278_v17 = vld [vmem:[#allocation9 + $0x218] sm:$0xff] }
 0xc42   :  { %v4272_v36 = vld [vmem:[#allocation9 + $0x1e8] sm:$0xff]  ;;  %v7297_v63 = vpack.c.bf16 %v4268_v22, %v4265_v10  ;;  %v4277_v38 = vld [vmem:[#allocation9 + $0x210] sm:$0xff]  ;;  %v10685_v10 = vld [vmem:[#allocation141_spill] sm:$0xff] }
 0xc43   :  { %v3905_v23 = vadd.f32 %v3904_v51, %v3903_v21  ;;  %v4234_v51 = vld [vmem:[#allocation9 + $0xb8] sm:$0xff]  ;;  %v4285_v21 = vld [vmem:[#allocation9 + $0x250] sm:$0xff]  ;;  %v10686_v22 = vsub.s32 3, %v10685_v10 }
 0xc44   :  { %v7401_v56 = vpack.c.bf16 %v4234_v51, %v4231_v0  ;;  %v4337_v10 = vld [vmem:[#allocation9 + $0x3f0] sm:$0xff] }
 0xc45   :  { %7726 = vtanh.f32 %v3905_v23  ;;  %v4288_v23 = vld [vmem:[#allocation9 + $0x268] sm:$0xff] }
 0xc46   :  { %v7403_v35 = vpack.c.bf16 %v4288_v23, %v4285_v21  ;;  %v4280_v21 = vld [vmem:[#allocation9 + $0x228] sm:$0xff] }
 0xc47   :  { %v4284_v23 = vld [vmem:[#allocation9 + $0x248] sm:$0xff] }
 0xc4f   :  { %v7727_v33 = vpop.eup %7726 }
 0xc50   :  { %v3907_v1 = vmul.f32 %v7727_v33, %v7725_v14  ;;  %v7277_v14 = vpack.c.bf16 %v4238_v47, %v4235_v44  ;;  %v4241_v33 = vld [vmem:[#allocation9 + $0xf0] sm:$0xff]  ;;  %v7305_v44 = vpack.c.bf16 %v4280_v21, %v4277_v38  ;;  %v4315_v21 = vld [vmem:[#allocation9 + $0x340] sm:$0xff] }
 0xc51   :  { %v7281_v5 = vpack.c.bf16 %v4244_v7, %v4241_v33  ;;  %v7313_v33 = vpack.c.bf16 %v4292_v32, %v4289_v16  ;;  %v4319_v16 = vld [vmem:[#allocation9 + $0x360] sm:$0xff]  ;;  %v4322_v32 = vld [vmem:[#allocation9 + $0x378] sm:$0xff] }
 0xc52   :  { %v3916_v62 = vadd.f32 %v3907_v1, %v9473_v6  ;;  %v7265_v6 = vpack.c.bf16 %v4220_v42, %v4217_v48  ;;  %v7405_v1 = vpack.c.bf16 %v4240_v3, %v4237_v29  ;;  %v4250_v48 = vld [vmem:[#allocation9 + $0x138] sm:$0xff] }
 0xc54   :  { %v3918_v2 = vmul.f32 0.125, %v3916_v62  ;;  %v4297_v62 = vld [vmem:[#allocation9 + $0x2b0] sm:$0xff] }
 0xc55   :  { %v7411_v42 = vpack.c.bf16 %v4300_v26, %v4297_v62  ;;  %v4306_v62 = vld [vmem:[#allocation9 + $0x2f8] sm:$0xff]  ;;  %v4301_v26 = vld [vmem:[#allocation9 + $0x2d0] sm:$0xff] }
 0xc56   :  { %4133 = vmatprep.mubr.f32.mxu1 %v3918_v2  ;;  %4204 = vmatprep.mubr.f32.mxu0 %v3918_v2  ;;  %v7409_v2 = vpack.c.bf16 %v4246_v61, %v4243_v54  ;;  %v4305_v54 = vld [vmem:[#allocation9 + $0x2f0] sm:$0xff]  ;;  %v4303_v61 = vld [vmem:[#allocation9 + $0x2e0] sm:$0xff] }
 0xc57   :  { %4134 = vmatmul.mubr.f32.vlgmr.msra.gmra.mrb[40].mxu1 %v3917_v45  ;;  %4205 = vmatmul.mubr.f32.vlgmr.msra.gmra.mrb[42].mxu0 %v3917_v45  ;;  %v4252_v45 = vld [vmem:[#allocation9 + $0x148] sm:$0xff] }
 0xc58   :  { %7262 = vmatpush1.bf16.msra.mxu1 %v7261_v24  ;;  %7390 = vmatpush3.bf16.msra.mxu0 %v7389_v39  ;;  %v7283_v24 = vpack.c.bf16 %v4251_v55, %v4248_v40  ;;  %v4249_v39 = vld [vmem:[#allocation9 + $0x130] sm:$0xff] }
 0xc59   :  { %7264 = vmatprep.subr.bf16.mxu1 %v7263_v27  ;;  %7392 = vmatprep.subr.bf16.mxu0 %v7391_v11  ;;  %v4254_v27 = vld [vmem:[#allocation9 + $0x158] sm:$0xff]  ;;  %v7285_v11 = vpack.c.bf16 %v4250_v48, %v4247_v30  ;;  %v7413_v43 = vpack.c.bf16 %v4252_v45, %v4249_v39  ;;  %v7415_v30 = vpack.c.bf16 %v4306_v62, %v4303_v61  ;;  %v4308_v39 = vld [vmem:[#allocation9 + $0x308] sm:$0xff]  ;;  %v4311_v45 = vld [vmem:[#allocation9 + $0x320] sm:$0xff] }
 0xc5a   :  { %v7287_v13 = vpack.c.bf16 %v4257_v12, %v4254_v27  ;;  %v4258_v48 = vld [vmem:[#allocation9 + $0x178] sm:$0xff]  ;;  %v4357_v27 = vld [vmem:[#allocation9 + $0x490] sm:$0xff]  ;;  %v7323_v12 = vpack.c.bf16 %v4311_v45, %v4308_v39  ;;  %v4328_v62 = vld [vmem:[#allocation9 + $0x3a8] sm:$0xff] }
 0xc5b   :  { %v4384_v39 = vld [vmem:[#allocation9 + $0x568] sm:$0xff] }
 0xc5c   :  { %7266 = vmatpush1.bf16.msra.mxu1 %v7265_v6  ;;  %7394 = vmatpush3.bf16.msra.mxu0 %v7393_v57  ;;  %v4263_v6 = vld [vmem:[#allocation9 + $0x1a0] sm:$0xff] }
 0xc5d   :  { %7268 = vmatprep.subr.bf16.mxu1 %v7267_v20  ;;  %7396 = vmatprep.subr.bf16.mxu0 %v7395_v15  ;;  %v7291_v25 = vpack.c.bf16 %v4263_v6, %v4260_v9  ;;  %v4259_v57 = vld [vmem:[#allocation9 + $0x180] sm:$0xff]  ;;  %v4262_v20 = vld [vmem:[#allocation9 + $0x198] sm:$0xff]  ;;  %v4269_v15 = vld [vmem:[#allocation9 + $0x1d0] sm:$0xff] }
 0xc5e   :  { %v7293_v18 = vpack.c.bf16 %v4262_v20, %v4259_v57  ;;  %v7295_v28 = vpack.c.bf16 %v4269_v15, %v4266_v50  ;;  %v4307_v9 = vld [vmem:[#allocation9 + $0x300] sm:$0xff]  ;;  %v10684_v6 = vld [vmem:[#allocation142_spill] sm:$0xff]  ;;  %v4309_v57 = vld [vmem:[#allocation9 + $0x310] sm:$0xff] }
 0xc5f   :  { %v4312_v20 = vld [vmem:[#allocation9 + $0x328] sm:$0xff] }
 0xc60   :  { %7270 = vmatpush1.bf16.msra.mxu1 %v7269_v34  ;;  %7398 = vmatpush3.bf16.msra.mxu0 %v7397_v4  ;;  %v4275_v34 = vld [vmem:[#allocation9 + $0x200] sm:$0xff] }
 0xc61   :  { %7272 = vmatprep.subr.bf16.mxu1 %v7271_v53  ;;  %7400 = vmatprep.subr.bf16.mxu0 %v7399_v31  ;;  %v7299_v52 = vpack.c.bf16 %v4275_v34, %v4272_v36  ;;  %v4271_v4 = vld [vmem:[#allocation9 + $0x1e0] sm:$0xff]  ;;  %v4274_v53 = vld [vmem:[#allocation9 + $0x1f8] sm:$0xff]  ;;  %v4281_v31 = vld [vmem:[#allocation9 + $0x230] sm:$0xff] }
 0xc62   :  { %v7301_v0 = vpack.c.bf16 %v4274_v53, %v4271_v4  ;;  %v7303_v51 = vpack.c.bf16 %v4281_v31, %v4278_v17  ;;  %v4366_v4 = vld [vmem:[#allocation9 + $0x4d8] sm:$0xff]  ;;  %v7421_v31 = vpack.c.bf16 %v4312_v20, %v4309_v57  ;;  %v4341_v57 = vld [vmem:[#allocation9 + $0x410] sm:$0xff]  ;;  %v4387_v20 = vld [vmem:[#allocation9 + $0x580] sm:$0xff] }
 0xc64   :  { %7274 = vmatpush1.bf16.msra.mxu1 %v7273_v49  ;;  %7402 = vmatpush3.bf16.msra.mxu0 %v7401_v56  ;;  %v4287_v49 = vld [vmem:[#allocation9 + $0x260] sm:$0xff] }
 0xc65   :  { %7276 = vmatprep.subr.bf16.mxu1 %v7275_v58  ;;  %7404 = vmatprep.subr.bf16.mxu0 %v7403_v35  ;;  %v7307_v47 = vpack.c.bf16 %v4287_v49, %v4284_v23  ;;  %v4283_v56 = vld [vmem:[#allocation9 + $0x240] sm:$0xff]  ;;  %v4286_v58 = vld [vmem:[#allocation9 + $0x258] sm:$0xff]  ;;  %v4293_v35 = vld [vmem:[#allocation9 + $0x290] sm:$0xff] }
 0xc66   :  { %v7309_v29 = vpack.c.bf16 %v4286_v58, %v4283_v56  ;;  %v7311_v3 = vpack.c.bf16 %v4293_v35, %v4290_v60  ;;  %v4318_v23 = vld [vmem:[#allocation9 + $0x358] sm:$0xff]  ;;  %v4320_v49 = vld [vmem:[#allocation9 + $0x368] sm:$0xff]  ;;  %v4323_v56 = vld [vmem:[#allocation9 + $0x380] sm:$0xff] }
 0xc67   :  { %v4369_v58 = vld [vmem:[#allocation9 + $0x4f0] sm:$0xff]  ;;  %v4372_v60 = vld [vmem:[#allocation9 + $0x508] sm:$0xff] }
 0xc68   :  { %7278 = vmatpush1.bf16.msra.mxu1 %v7277_v14  ;;  %7406 = vmatpush3.bf16.msra.mxu0 %v7405_v1  ;;  %v4299_v14 = vld [vmem:[#allocation9 + $0x2c0] sm:$0xff] }
 0xc69   :  { %7280 = vmatprep.subr.bf16.mxu1 %v7279_v46  ;;  %7408 = vmatprep.subr.bf16.mxu0 %v7407_v41  ;;  %v7315_v7 = vpack.c.bf16 %v4299_v14, %v4296_v8  ;;  %v4295_v1 = vld [vmem:[#allocation9 + $0x2a0] sm:$0xff]  ;;  %v4298_v46 = vld [vmem:[#allocation9 + $0x2b8] sm:$0xff]  ;;  %v7331_v8 = vpack.c.bf16 %v4323_v56, %v4320_v49  ;;  %v7427_v14 = vpack.c.bf16 %v4372_v60, %v4369_v58  ;;  %v4353_v58 = vld [vmem:[#allocation9 + $0x470] sm:$0xff] }
 0xc6a   :  { %v7317_v40 = vpack.c.bf16 %v4298_v46, %v4295_v1  ;;  %v4302_v41 = vld [vmem:[#allocation9 + $0x2d8] sm:$0xff]  ;;  %v4329_v46 = vld [vmem:[#allocation9 + $0x3b0] sm:$0xff]  ;;  %v4399_v60 = vld [vmem:[#allocation9 + $0x5e0] sm:$0xff] }
 0xc6b   :  { %v7319_v55 = vpack.c.bf16 %v4305_v54, %v4302_v41  ;;  %v4326_v1 = vld [vmem:[#allocation9 + $0x398] sm:$0xff]  ;;  %v7333_v54 = vpack.c.bf16 %v4322_v32, %v4319_v16  ;;  %v4349_v16 = vld [vmem:[#allocation9 + $0x450] sm:$0xff] }
 0xc6c   :  { %7282 = vmatpush1.bf16.msra.mxu1 %v7281_v5  ;;  %7410 = vmatpush3.bf16.msra.mxu0 %v7409_v2  ;;  %v4304_v5 = vld [vmem:[#allocation9 + $0x2e8] sm:$0xff]  ;;  %v4378_v41 = vld [vmem:[#allocation9 + $0x538] sm:$0xff] }
 0xc6d   :  { %7284 = vmatprep.subr.bf16.mxu1 %v7283_v24  ;;  %7412 = vmatprep.subr.bf16.mxu0 %v7411_v42  ;;  %v7321_v2 = vpack.c.bf16 %v4304_v5, %v4301_v26  ;;  %v4255_v24 = vld [vmem:[#allocation9 + $0x160] sm:$0xff]  ;;  %v7335_v26 = vpack.c.bf16 %v4329_v46, %v4326_v1  ;;  %v4350_v56 = vld [vmem:[#allocation9 + $0x458] sm:$0xff]  ;;  %v4356_v1 = vld [vmem:[#allocation9 + $0x488] sm:$0xff] }
 0xc6e   :  { %v7417_v42 = vpack.c.bf16 %v4258_v48, %v4255_v24  ;;  %v4332_v24 = vld [vmem:[#allocation9 + $0x3c8] sm:$0xff]  ;;  %v4335_v48 = vld [vmem:[#allocation9 + $0x3e0] sm:$0xff]  ;;  %v7351_v32 = vpack.c.bf16 %v4353_v58, %v4350_v56  ;;  %v4397_v56 = vld [vmem:[#allocation9 + $0x5d0] sm:$0xff] }
 0xc6f   :  { %v4359_v46 = vld [vmem:[#allocation9 + $0x4a0] sm:$0xff]  ;;  %v4400_v58 = vld [vmem:[#allocation9 + $0x5e8] sm:$0xff] }
 0xc70   :  { %7286 = vmatpush1.bf16.msra.mxu1 %v7285_v11  ;;  %7414 = vmatpush3.bf16.msra.mxu0 %v7413_v43  ;;  %v4360_v11 = vld [vmem:[#allocation9 + $0x4a8] sm:$0xff] }
 0xc71   :  { %7288 = vmatprep.subr.bf16.mxu1 %v7287_v13  ;;  %7416 = vmatprep.subr.bf16.mxu0 %v7415_v30  ;;  %v7419_v43 = vpack.c.bf16 %v4360_v11, %v4357_v27  ;;  %v9562_v13 = vld [vmem:[%s9600_s6] sm:$0xf]  ;;  %v4334_v11 = vld [vmem:[#allocation9 + $0x3d8] sm:$0xff] }
 0xc72   :  { %v4056_v37 = vrot.slane %v9562_v13, %v10683_v19  ;;  %v4064_v36 = vrot.slane %v9562_v13, %v10686_v22  ;;  %v4327_v30 = vld [vmem:[#allocation9 + $0x3a0] sm:$0xff]  ;;  %v4340_v22 = vld [vmem:[#allocation9 + $0x408] sm:$0xff] }
 0xc74   :  { %7290 = vmatpush1.bf16.msra.mxu1 %v7289_v59  ;;  %7418 = vmatpush3.bf16.msra.mxu0 %v7417_v42  ;;  %v4052_v59 = vrot.slane %v9562_v13, %v10684_v6  ;;  %v4381_v42 = vld [vmem:[#allocation9 + $0x550] sm:$0xff] }
 0xc75   :  { %7292 = vmatprep.subr.bf16.mxu1 %v7291_v25  ;;  %7420 = vmatprep.subr.bf16.mxu0 %v7419_v43  ;;  %v4310_v25 = vld [vmem:[#allocation9 + $0x318] sm:$0xff]  ;;  %v7339_v43 = vpack.c.bf16 %v4335_v48, %v4332_v24 }
 0xc76   :  { %v7325_v17 = vpack.c.bf16 %v4310_v25, %v4307_v9  ;;  %v4333_v9 = vld [vmem:[#allocation9 + $0x3d0] sm:$0xff]  ;;  %v4338_v25 = vld [vmem:[#allocation9 + $0x3f8] sm:$0xff] }
 0xc78   :  { %7294 = vmatpush1.bf16.msra.mxu1 %v7293_v18  ;;  %v4314_v18 = vld [vmem:[#allocation9 + $0x338] sm:$0xff] }
 0xc79   :  { %7296 = vmatprep.subr.bf16.mxu1 %v7295_v28 }
 0xc7c   :  { %7298 = vmatpush1.bf16.msra.mxu1 %v7297_v63  ;;  %v4317_v63 = vld [vmem:[#allocation9 + $0x350] sm:$0xff] }
 0xc7d   :  { %7300 = vmatprep.subr.bf16.mxu1 %v7299_v52  ;;  %v4363_v52 = vld [vmem:[#allocation9 + $0x4c0] sm:$0xff] }
 0xc80   :  { %7302 = vmatpush1.bf16.msra.mxu1 %v7301_v0  ;;  %v4313_v0 = vld [vmem:[#allocation9 + $0x330] sm:$0xff] }
 0xc81   :  { %7304 = vmatprep.subr.bf16.mxu1 %v7303_v51  ;;  %v4316_v51 = vld [vmem:[#allocation9 + $0x348] sm:$0xff] }
 0xc84   :  { %7306 = vmatpush1.bf16.msra.mxu1 %v7305_v44  ;;  %v7327_v44 = vpack.c.bf16 %v4317_v63, %v4314_v18  ;;  %v4339_v63 = vld [vmem:[#allocation9 + $0x400] sm:$0xff] }
 0xc85   :  { %7308 = vmatprep.subr.bf16.mxu1 %v7307_v47  ;;  %v7423_v47 = vpack.c.bf16 %v4366_v4, %v4363_v52  ;;  %v4342_v52 = vld [vmem:[#allocation9 + $0x418] sm:$0xff]  ;;  %v4344_v4 = vld [vmem:[#allocation9 + $0x428] sm:$0xff] }
 0xc88   :  { %7310 = vmatpush1.bf16.msra.mxu1 %v7309_v29  ;;  %v7329_v29 = vpack.c.bf16 %v4316_v51, %v4313_v0  ;;  %v7345_v0 = vpack.c.bf16 %v4340_v22, %v4337_v10  ;;  %v7441_v51 = vpack.c.bf16 %v4342_v52, %v4339_v63  ;;  %v4379_v10 = vld [vmem:[#allocation9 + $0x540] sm:$0xff]  ;;  %v4382_v22 = vld [vmem:[#allocation9 + $0x558] sm:$0xff] }
 0xc89   :  { %7312 = vmatprep.subr.bf16.mxu1 %v7311_v3  ;;  %v7425_v3 = vpack.c.bf16 %v4318_v23, %v4315_v21  ;;  %v4346_v21 = vld [vmem:[#allocation9 + $0x438] sm:$0xff]  ;;  %v7373_v63 = vpack.c.bf16 %v4382_v22, %v4379_v10 }
 0xc8c   :  { %7314 = vmatpush1.bf16.msra.mxu1 %v7313_v33  ;;  %v4321_v33 = vld [vmem:[#allocation9 + $0x370] sm:$0xff] }
 0xc8d   :  { %7316 = vmatprep.subr.bf16.mxu1 %v7315_v7  ;;  %v4324_v7 = vld [vmem:[#allocation9 + $0x388] sm:$0xff] }
 0xc8e   :  { %v7429_v61 = vpack.c.bf16 %v4324_v7, %v4321_v33  ;;  %v4351_v33 = vld [vmem:[#allocation9 + $0x460] sm:$0xff]  ;;  %v4354_v7 = vld [vmem:[#allocation9 + $0x478] sm:$0xff] }
 0xc90   :  { %7318 = vmatpush1.bf16.msra.mxu1 %v7317_v40  ;;  %v4375_v40 = vld [vmem:[#allocation9 + $0x520] sm:$0xff] }
 0xc91   :  { %7320 = vmatprep.subr.bf16.mxu1 %v7319_v55  ;;  %v4325_v55 = vld [vmem:[#allocation9 + $0x390] sm:$0xff]  ;;  %v7431_v5 = vpack.c.bf16 %v4378_v41, %v4375_v40  ;;  %v7449_v41 = vpack.c.bf16 %v4354_v7, %v4351_v33 }
 0xc92   :  { %v7337_v45 = vpack.c.bf16 %v4328_v62, %v4325_v55  ;;  %v7355_v55 = vpack.c.bf16 %v4359_v46, %v4356_v1  ;;  %v4355_v62 = vld [vmem:[#allocation9 + $0x480] sm:$0xff] }
 0xc94   :  { %7322 = vmatpush1.bf16.msra.mxu1 %v7321_v2  ;;  %v4330_v2 = vld [vmem:[#allocation9 + $0x3b8] sm:$0xff] }
 0xc95   :  { %7324 = vmatprep.subr.bf16.mxu1 %v7323_v12  ;;  %v7433_v27 = vpack.c.bf16 %v4330_v2, %v4327_v30  ;;  %v4331_v12 = vld [vmem:[#allocation9 + $0x3c0] sm:$0xff]  ;;  %v4365_v30 = vld [vmem:[#allocation9 + $0x4d0] sm:$0xff] }
 0xc96   :  { %v7341_v18 = vpack.c.bf16 %v4334_v11, %v4331_v12  ;;  %v4367_v11 = vld [vmem:[#allocation9 + $0x4e0] sm:$0xff] }
 0xd2a   :  { %v4135_v50 = vpop.f32.mrb[40].mxu1  ;;  %v9568_v15 = vpop.f32.mrb[42].mxu0 }
 0xd2b   :  { %v4137_v28 = vpop.f32.mrb[41].mxu1  ;;  %v4208_v34 = vpop.f32.mrb[43].mxu0  ;;  %v4136_v38 = vadd.f32 %v4135_v50, %v4052_v59  ;;  %v4336_v59 = vld [vmem:[#allocation9 + $0x3e8] sm:$0xff]  ;;  %v4390_v50 = vld [vmem:[#allocation9 + $0x598] sm:$0xff] }
 0xd2c   :  { %v4138_v53 = vadd.f32 %v4137_v28, %v4056_v37  ;;  %v4209_v35 = vadd.f32 %v4208_v34, %v4064_v36  ;;  %v7435_v37 = vpack.c.bf16 %v4384_v39, %v4381_v42  ;;  %v7437_v28 = vpack.c.bf16 %v4336_v59, %v4333_v9  ;;  %v4361_v42 = vld [vmem:[#allocation9 + $0x4b0] sm:$0xff]  ;;  %v4364_v39 = vld [vmem:[#allocation9 + $0x4c8] sm:$0xff] }
 0xd2d   :  { %v7343_v36 = vpack.c.bf16 %v4341_v57, %v4338_v25  ;;  %v7439_v34 = vpack.c.bf16 %v4390_v50, %v4387_v20  ;;  %v4377_v9 = vld [vmem:[#allocation9 + $0x530] sm:$0xff]  ;;  %v4376_v57 = vld [vmem:[#allocation9 + $0x528] sm:$0xff]  ;;  %v4383_v50 = vld [vmem:[#allocation9 + $0x560] sm:$0xff] }
 0xd2e   :  { %4484 = vmatprep.mubr.f32.mxu1 %v4138_v53  ;;  %4626 = vmatprep.mubr.f32.mxu0 %v4138_v53  ;;  %v4347_v53 = vld [vmem:[#allocation9 + $0x440] sm:$0xff]  ;;  %v4380_v20 = vld [vmem:[#allocation9 + $0x548] sm:$0xff] }
 0xd2f   :  { %4485 = vmatmul.mubr.f32.vlgmr.msra.gmra.mrb[42].mxu1 %v4136_v38  ;;  %4627 = vmatmul.mubr.f32.vlgmr.msra.gmra.mrb[44].mxu0 %v4136_v38  ;;  %v4343_v38 = vld [vmem:[#allocation9 + $0x420] sm:$0xff]  ;;  %v7347_v23 = vpack.c.bf16 %v4347_v53, %v4344_v4  ;;  %v4385_v4 = vld [vmem:[#allocation9 + $0x570] sm:$0xff]  ;;  %v4388_v53 = vld [vmem:[#allocation9 + $0x588] sm:$0xff] }
 0xd30   :  { %7326 = vmatpush1.bf16.msra.mxu1 %v7325_v17  ;;  %7422 = vmatpush3.bf16.msra.mxu0 %v7421_v31  ;;  %v4393_v17 = vld [vmem:[#allocation9 + $0x5b0] sm:$0xff]  ;;  %v4396_v31 = vld [vmem:[#allocation9 + $0x5c8] sm:$0xff] }
 0xd31   :  { %4555 = vmatprep.mubr.f32.mxu1 %v4209_v35  ;;  %4696 = vmatprep.mubr.f32.mxu0 %v4209_v35  ;;  %v7443_v49 = vpack.c.bf16 %v4396_v31, %v4393_v17  ;;  %v4402_v35 = vld [vmem:[#allocation9 + $0x5f8] sm:$0xff]  ;;  %v4392_v17 = vld [vmem:[#allocation9 + $0x5a8] sm:$0xff]  ;;  %v4395_v31 = vld [vmem:[#allocation9 + $0x5c0] sm:$0xff] }
 0xd32   :  { %7328 = vmatprep.subr.bf16.mxu1 %v7327_v44  ;;  %7424 = vmatprep.subr.bf16.mxu0 %v7423_v47  ;;  %v4345_v44 = vld [vmem:[#allocation9 + $0x430] sm:$0xff]  ;;  %v4348_v47 = vld [vmem:[#allocation9 + $0x448] sm:$0xff] }
 0xd34   :  { %7330 = vmatpush1.bf16.msra.mxu1 %v7329_v29  ;;  %7426 = vmatpush3.bf16.msra.mxu0 %v7425_v3  ;;  %v7349_v29 = vpack.c.bf16 %v4346_v21, %v4343_v38  ;;  %v7445_v3 = vpack.c.bf16 %v4348_v47, %v4345_v44  ;;  %v4391_v38 = vld [vmem:[#allocation9 + $0x5a0] sm:$0xff]  ;;  %v4394_v21 = vld [vmem:[#allocation9 + $0x5b8] sm:$0xff] }
 0xd35   :  { %7332 = vmatprep.subr.bf16.mxu1 %v7331_v8  ;;  %7428 = vmatprep.subr.bf16.mxu0 %v7427_v14  ;;  %v7447_v8 = vpack.c.bf16 %v4402_v35, %v4399_v60  ;;  %v4352_v14 = vld [vmem:[#allocation9 + $0x468] sm:$0xff]  ;;  %v7381_v44 = vpack.c.bf16 %v4394_v21, %v4391_v38  ;;  %v7385_v60 = vpack.c.bf16 %v4400_v58, %v4397_v56 }
 0xd36   :  { %v7353_v40 = vpack.c.bf16 %v4352_v14, %v4349_v16  ;;  %v4403_v16 = vld [vmem:[%s9602_s8] sm:$0x7] }
 0xd37   :  { %v4408_v46 = vrot.slane %v4403_v16, %v10684_v6 }
 0xd38   :  { %7334 = vmatpush1.bf16.msra.mxu1 %v7333_v54  ;;  %7430 = vmatpush3.bf16.msra.mxu0 %v7429_v61  ;;  %v10687_v54 = vld [vmem:[#allocation143_spill] sm:$0xff] }
 0xd39   :  { %7336 = vmatprep.subr.bf16.mxu1 %v7335_v26  ;;  %7432 = vmatprep.subr.bf16.mxu0 %v7431_v5  ;;  %v4060_v61 = vrot.slane %v9562_v13, %v10687_v54  ;;  %v4358_v26 = vld [vmem:[#allocation9 + $0x498] sm:$0xff]  ;;  %v7361_v13 = vpack.c.bf16 %v4364_v39, %v4361_v42 }
 0xd3a   :  { %v4362_v5 = vld [vmem:[#allocation9 + $0x4b8] sm:$0xff]  ;;  %v7357_v2 = vpack.c.bf16 %v4358_v26, %v4355_v62 }
 0xd3b   :  { %v4207_v24 = vadd.f32 %v9568_v15, %v4060_v61  ;;  %v7359_v48 = vpack.c.bf16 %v4365_v30, %v4362_v5  ;;  %v4373_v15 = vld [vmem:[#allocation9 + $0x510] sm:$0xff] }
 0xd3c   :  { %7338 = vmatpush1.bf16.msra.mxu1 %v7337_v45  ;;  %7434 = vmatpush3.bf16.msra.mxu0 %v7433_v27  ;;  %v4368_v45 = vld [vmem:[#allocation9 + $0x4e8] sm:$0xff]  ;;  %v4371_v27 = vld [vmem:[#allocation9 + $0x500] sm:$0xff] }
 0xd3d   :  { %7340 = vmatprep.subr.bf16.mxu1 %v7339_v43  ;;  %7436 = vmatprep.subr.bf16.mxu0 %v7435_v37  ;;  %v7363_v12 = vpack.c.bf16 %v4371_v27, %v4368_v45  ;;  %v4370_v43 = vld [vmem:[#allocation9 + $0x4f8] sm:$0xff] }
 0xd3e   :  { %v4374_v37 = vld [vmem:[#allocation9 + $0x518] sm:$0xff]  ;;  %v7365_v59 = vpack.c.bf16 %v4370_v43, %v4367_v11 }
 0xd3f   :  { %v7367_v25 = vpack.c.bf16 %v4377_v9, %v4374_v37 }
 0xd40   :  { %7342 = vmatpush1.bf16.msra.mxu1 %v7341_v18  ;;  %7438 = vmatpush3.bf16.msra.mxu0 %v7437_v28  ;;  %v7369_v18 = vpack.c.bf16 %v4376_v57, %v4373_v15  ;;  %v7371_v28 = vpack.c.bf16 %v4383_v50, %v4380_v20 }
 0xd41   :  { %7344 = vmatprep.subr.bf16.mxu1 %v7343_v36  ;;  %7440 = vmatprep.subr.bf16.mxu0 %v7439_v34  ;;  %v4386_v36 = vld [vmem:[#allocation9 + $0x578] sm:$0xff]  ;;  %v4389_v34 = vld [vmem:[#allocation9 + $0x590] sm:$0xff] }
 0xd42   :  { %v7375_v52 = vpack.c.bf16 %v4389_v34, %v4386_v36 }
 0xd44   :  { %7346 = vmatpush1.bf16.msra.mxu1 %v7345_v0  ;;  %7442 = vmatpush3.bf16.msra.mxu0 %v7441_v51  ;;  %v7377_v0 = vpack.c.bf16 %v4388_v53, %v4385_v4  ;;  %v7379_v51 = vpack.c.bf16 %v4395_v31, %v4392_v17 }
 0xd45   :  { %7348 = vmatprep.subr.bf16.mxu1 %v7347_v23  ;;  %7444 = vmatprep.subr.bf16.mxu0 %v7443_v49  ;;  %v4398_v23 = vld [vmem:[#allocation9 + $0x5d8] sm:$0xff]  ;;  %v4401_v49 = vld [vmem:[#allocation9 + $0x5f0] sm:$0xff] }
 0xd46   :  { %v7383_v47 = vpack.c.bf16 %v4401_v49, %v4398_v23 }
 0xd48   :  { %7350 = vmatpush1.bf16.msra.mxu1 %v7349_v29  ;;  %7446 = vmatpush3.bf16.msra.mxu0 %v7445_v3 }
 0xd49   :  { %7352 = vmatprep.subr.bf16.mxu1 %v7351_v32  ;;  %7448 = vmatprep.subr.bf16.mxu0 %v7447_v8  ;;  %v4416_v32 = vrot.slane %v4403_v16, %v10687_v54 }
 0xd4c   :  { %7354 = vmatpush1.bf16.msra.mxu1 %v7353_v40  ;;  %7450 = vmatpush3.bf16.msra.mxu0 %v7449_v41  ;;  %v4702_v40 = vld [vmem:[%s9603_s9] sm:$0x7]  ;;  %v4412_v41 = vrot.slane %v4403_v16, %v10683_v19 }
 0xd4d   :  { %7356 = vmatprep.subr.bf16.mxu1 %v7355_v55  ;;  %v4707_v61 = vrot.slane %v4702_v40, %v10684_v6  ;;  %v4711_v62 = vrot.slane %v4702_v40, %v10683_v19  ;;  %v4715_v26 = vrot.slane %v4702_v40, %v10687_v54  ;;  %v4799_v6 = vld [vmem:[%s9604_s10] ss:$0 sm:$0xff] }
 0xd4f   :  { %4697 = vmatmul.mubr.f32.vlgmr.msra.gmra.mrb[46].mxu0 %v4207_v24 }
 0xd50   :  { %7358 = vmatpush1.bf16.msra.mxu1 %v7357_v2 }
 0xd51   :  { %7360 = vmatprep.subr.bf16.mxu1 %v7359_v48 }
 0xd54   :  { %7362 = vmatpush1.bf16.msra.mxu1 %v7361_v13 }
 0xd55   :  { %7364 = vmatprep.subr.bf16.mxu1 %v7363_v12 }
 0xd58   :  { %7366 = vmatpush1.bf16.msra.mxu1 %v7365_v59 }
 0xd59   :  { %7368 = vmatprep.subr.bf16.mxu1 %v7367_v25 }
 0xd5c   :  { %7370 = vmatpush1.bf16.msra.mxu1 %v7369_v18 }
 0xd5d   :  { %7372 = vmatprep.subr.bf16.mxu1 %v7371_v28 }
 0xd60   :  { %7374 = vmatpush1.bf16.msra.mxu1 %v7373_v63 }
 0xd61   :  { %7376 = vmatprep.subr.bf16.mxu1 %v7375_v52 }
 0xd64   :  { %7378 = vmatpush1.bf16.msra.mxu1 %v7377_v0 }
 0xd65   :  { %7380 = vmatprep.subr.bf16.mxu1 %v7379_v51 }
 0xd68   :  { %7382 = vmatpush1.bf16.msra.mxu1 %v7381_v44 }
 0xd69   :  { %7384 = vmatprep.subr.bf16.mxu1 %v7383_v47 }
 0xd6c   :  { %7386 = vmatpush1.bf16.msra.mxu1 %v7385_v60 }
 0xd6f   :  { %4556 = vmatmul.mubr.f32.vlgmr.msra.gmra.mrb[42].mxu1 %v4207_v24 }
 0xe02   :  { %v4850_v35 = vpop.f32.mrb[44].mxu0 }
 0xe03   :  { %v4851_v29 = vpop.f32.mrb[45].mxu0 }
 0xe04   :  { %v4852_v3 = vadd.f32 %v4851_v29, %v4850_v35 }
 0xe06   :  { %v4629_v33 = vadd.f32 %v4852_v3, %v4416_v32 }
 0xe22   :  { %v4885_v8 = vpop.f32.mrb[46].mxu0 }
 0xe23   :  { %v4886_v14 = vpop.f32.mrb[47].mxu0 }
 0xe24   :  { %v4887_v7 = vadd.f32 %v4886_v14, %v4885_v8 }
 0xe26   :  { %v4699_v1 = vadd.f32 %v4887_v7, %v4629_v33 }
 0xe28   :  { %v4721_v42 = vmul.f32 %v4715_v26, %v4699_v1 }
 0xe2a   :  { %v4726_v13 = vsel %vm4722_vm2, %v4721_v42, 0.0 }
 0xe42   :  { %v4557_v55 = vpop.f32.mrb[42].mxu1 }
 0xe43   :  { %v7451_v5 = vadd.f32 %v4557_v55, %v4408_v46  ;;  %v4559_v30 = vpop.f32.mrb[43].mxu1 }
 0xe44   :  { %v7452_v2 = vadd.f32 %v4559_v30, %v4412_v41 }
 0xe45   :  { %v4719_v24 = vmul.f32 %v7451_v5, %v4707_v61 }
 0xe46   :  { %v4720_v48 = vmul.f32 %v7452_v2, %v4711_v62 }
 0xe47   :  { %v4723_v39 = vsel %vm4722_vm2, %v4719_v24, 0.0 }
 0xe48   :  { %v4724_v45 = vsel %vm4722_vm2, %v4720_v48, 0.0 }
 0xe49   :  { %v4725_v27 = vadd.f32 %v4724_v45, %v4723_v39 }
 0xe4b   :  { %v4727_v12 = vadd.f32 %v4726_v13, %v4725_v27 }
 0xe4d   :  { %4728 = vadd.xlane.f32.xlu1 %v4727_v12 }
 0xeda   :  { %v4729_v19 = vpop.xlane.xlu1 %4728 }
 0xedb   :  { %v4737_v11 = vadd.f32 %v4799_v6, %v4729_v19 }
 0xedd   :  { %4738 = vst [vmem:[%s9605_s11] sm:$0x3] %v4737_v11 }
 0xede   :  { %4743 = vsyncpa [#allocation3], 1 }
 0xedf   :  { %4744 = vsyncpa [#allocation5], 1 }
 0xee0   :  { %4745 = vsyncpa [#allocation8], 1 }

</bundles_post_ra>
